<compile_context>
chip_gen: v5e
topology: v5e:2x2
jax: 0.10.0
libtpu: 0.0.40
codegen_flags: <defaults>
</compile_context>

<pallas_src>
import math
import numpy as np
import jax
import jax.numpy as jnp
from jax import lax
from jax.experimental import pallas as pl
from jax.experimental.pallas import tpu as pltpu


# ---------------------------------------------------------------------------
# Kernel 1: rigid transform (affine_grid + bilinear grid_sample, zeros pad),
# tiled over blocks of T output rows.  Gather-free tent-weight formulation:
#     out[i,j] = sum_{p,q} tri(iy[i,j]-p) * img[p,q] * tri(ix[i,j]-q)
# The q-contraction is a bf16 MXU matmul; the p-contraction is a lane reduce.
# ---------------------------------------------------------------------------
def _warp_kernel(params_ref, img_ref, out_ref):
    T, N = out_ref.shape
    blk = pl.program_id(0)

    cos_a = params_ref[0]
    sin_a = params_ref[1]
    tx = params_ref[2]
    ty = params_ref[3]

    # output pixel coordinates for this row block (align_corners=False)
    jj = lax.broadcasted_iota(jnp.int32, (T, N), 1).astype(jnp.float32)
    ii = (lax.broadcasted_iota(jnp.int32, (T, N), 0) + blk * T).astype(jnp.float32)
    x_n = (2.0 * jj + 1.0) / N - 1.0
    y_n = (2.0 * ii + 1.0) / N - 1.0
    gx = cos_a * x_n - sin_a * y_n + tx          # theta row 0
    gy = sin_a * x_n + cos_a * y_n + ty          # theta row 1
    ix = (gx + 1.0) * (N * 0.5) - 0.5            # source column coordinate
    iy = (gy + 1.0) * (N * 0.5) - 0.5            # source row coordinate

    # one (1,1,N) iota broadcast instead of an (T,N,N) int32 iota
    q = lax.broadcasted_iota(jnp.int32, (1, 1, N), 2).astype(jnp.float32)

    # --- stage 1: contract source columns on the MXU (bf16 in, f32 acc) ---
    # tent weights in f32 (coordinate precision), cast to bf16 for the MXU
    wx = jnp.maximum(0.0, 1.0 - jnp.abs(ix[:, :, None] - q)).astype(jnp.bfloat16)
    img_bf = img_ref[...].astype(jnp.bfloat16)
    # t[(i,j), p] = sum_q wx[i,j,q] * img[p,q]
    t = lax.dot_general(
        wx.reshape(T * N, N), img_bf,
        dimension_numbers=(((1,), (1,)), ((), ())),
        preferred_element_type=jnp.float32,
    ).reshape(T, N, N)

    # --- stage 2: contract source rows (wx is dead here -> 2 live tensors) ---
    wy = jnp.maximum(0.0, 1.0 - jnp.abs(iy[:, :, None] - q))
    out_ref[...] = jnp.sum(wy * t, axis=-1)


# ---------------------------------------------------------------------------
# Kernel 2: fft2 -> (shift-folded) filter -> ifft2 real part, via exact DFT
# matrix multiplications.  Y = F X F, real(ifft2(Z)) = real(conj(F) Z conj(F))
# with the 1/N^2 scale folded into the filter on the host.
# ---------------------------------------------------------------------------
def _spectral_kernel(warped_ref, fr_ref, fi_ref, hf_ref, out_ref):
    warped = warped_ref[...]
    fr = fr_ref[...]                  # cos(2*pi*k*m/N)
    fi = fi_ref[...]                  # -sin(2*pi*k*m/N)
    hf = hf_ref[...]                  # ifftshift(filter) / N^2

    dot = lambda a, b: jnp.dot(a, b, preferred_element_type=jnp.float32)

    # A = warped @ F  (real x complex: 2 matmuls)
    ar = dot(warped, fr)
    ai = dot(warped, fi)

    # Y = F @ A  (Karatsuba: 3 matmuls)
    m1 = dot(fr, ar)
    m2 = dot(fi, ai)
    m3 = dot(fr + fi, ar + ai)
    yr = m1 - m2
    yi = m3 - m1 - m2

    # apply shift-folded, pre-scaled real filter
    zr = yr * hf
    zi = yi * hf

    # B = Z @ conj(F), conj(F) = fr - i*fi  (Karatsuba: 3 matmuls)
    k1 = dot(zr, fr)
    k2 = dot(zi, fi)
    k3 = dot(zr + zi, fr - fi)
    br = k1 + k2
    bi = k3 - k1 + k2

    # real( conj(F) @ B )  (2 matmuls); 1/N^2 already folded into hf
    out_ref[...] = dot(fr, br) + dot(fi, bi)


# ---------------------------------------------------------------------------
# Host-side constant construction
# ---------------------------------------------------------------------------
def _make_sinc_gaussian_filter(n, slice_thickness_ratio=0.5, fwhm=1.0):
    x = np.linspace(-1.0, 1.0, n, dtype=np.float64)
    xx, yy = np.meshgrid(x, x, indexing="ij")
    radius = np.sqrt(xx ** 2 + yy ** 2)
    arg = radius / slice_thickness_ratio
    sinc_f = np.where(radius == 0, np.ones_like(radius),
                      np.sin(arg) / np.where(arg == 0, 1.0, arg))
    gauss = np.exp(-0.5 * (radius / fwhm) ** 2)
    return jnp.asarray(sinc_f * gauss, dtype=jnp.float32)


def _make_dft_matrices(n):
    idx = np.arange(n)
    m = np.mod(np.outer(idx, idx), n).astype(np.float64)
    phase = 2.0 * np.pi * m / n
    fr = jnp.asarray(np.cos(phase), dtype=jnp.float32)
    fi = jnp.asarray(-np.sin(phase), dtype=jnp.float32)
    return fr, fi


def _pick_row_tile(n):
    for t in (32, 16, 8):
        if n % t == 0:
            return t
    return n


class DegradationNetworkPallas:
    def __init__(self, image_size, slice_thickness_ratio=0.5, fwhm=1.0, row_tile=None):
        self.image_size = image_size
        self.low_pass_filter = _make_sinc_gaussian_filter(
            image_size, slice_thickness_ratio, fwhm)
        # fold the fftshift/ifftshift pair AND the 1/N^2 ifft scale into the filter
        self.hf_scaled = (jnp.fft.ifftshift(self.low_pass_filter)
                          / float(image_size * image_size)).astype(jnp.float32)
        self.fr, self.fi = _make_dft_matrices(image_size)
        self.row_tile = _pick_row_tile(image_size) if row_tile is None else row_tile

    def __call__(self, x, angle, translation):
        n = self.image_size
        t = self.row_tile
        angle_rad = angle * (math.pi / 180.0)
        params = jnp.array(
            [math.cos(angle_rad), math.sin(angle_rad),
             float(translation[0]), float(translation[1])], dtype=jnp.float32)
        img2d = x[0]  # (1, H, W) -> (H, W)

        # ---- stage 1: rigid transform, row-block tiled & core-parallel ----
        warped = pl.pallas_call(
            _warp_kernel,
            out_shape=jax.ShapeDtypeStruct((n, n), jnp.float32),
            grid=(n // t,),
            in_specs=[
                pl.BlockSpec(memory_space=pltpu.MemorySpace.SMEM),   # scalars
                pl.BlockSpec((n, n), lambda i: (0, 0)),              # full image
            ],
            out_specs=pl.BlockSpec((t, n), lambda i: (i, 0)),
            compiler_params=pltpu.CompilerParams(
                dimension_semantics=("parallel",),
                vmem_limit_bytes=32 * 1024 * 1024,
            ),
        )(params, img2d)

        # ---- stage 2: spectral filtering, single program (O(N^3) only) ----
        out2d = pl.pallas_call(
            _spectral_kernel,
            out_shape=jax.ShapeDtypeStruct((n, n), jnp.float32),
            in_specs=[pl.BlockSpec(memory_space=pltpu.MemorySpace.VMEM)] * 4,
            out_specs=pl.BlockSpec(memory_space=pltpu.MemorySpace.VMEM),
        )(warped, self.fr, self.fi, self.hf_scaled)

        return out2d[None]  # back to (1, H, W)


def _reference(x, angle, translation, filt):
    """Pure-JAX reference (same math, jnp.fft for the spectral part)."""
    n = x.shape[-1]
    img = x[0]
    angle_rad = angle * (math.pi / 180.0)
    cos_a, sin_a = math.cos(angle_rad), math.sin(angle_rad)
    tx, ty = float(translation[0]), float(translation[1])
    coords = (2.0 * jnp.arange(n, dtype=jnp.float32) + 1.0) / n - 1.0
    x_n = coords[None, :]
    y_n = coords[:, None]
    gx = cos_a * x_n - sin_a * y_n + tx
    gy = sin_a * x_n + cos_a * y_n + ty
    ix = (gx + 1.0) * n / 2.0 - 0.5
    iy = (gy + 1.0) * n / 2.0 - 0.5
    q = jnp.arange(n, dtype=jnp.float32)
    wx = jnp.maximum(0.0, 1.0 - jnp.abs(ix[..., None] - q))
    wy = jnp.maximum(0.0, 1.0 - jnp.abs(iy[..., None] - q))
    warped = jnp.einsum("ijp,pq,ijq->ij", wy, img, wx,
                        precision=jax.lax.Precision.HIGHEST)
    freq = jnp.fft.fftshift(jnp.fft.fft2(warped))
    filtered = freq * filt
    out = jnp.real(jnp.fft.ifft2(jnp.fft.ifftshift(filtered)))
    return out[None].astype(jnp.float32)


if __name__ == "__main__":
    img_size = 64          # small stand-in for the module's 256
    angle = 30
    translation = (0.1, 0.1)

    key = jax.random.PRNGKey(0)
    input_image = jax.random.uniform(key, (1, img_size, img_size), dtype=jnp.float32)

    net = DegradationNetworkPallas(image_size=img_size)
    degraded = net(input_image, angle, translation)
    degraded = jax.block_until_ready(degraded)

    ref = jax.block_until_ready(
        _reference(input_image, angle, translation, net.low_pass_filter))
    np.testing.assert_allclose(np.asarray(degraded), np.asarray(ref),
                               rtol=2e-2, atol=2e-2)

    print("KERNEL_OK")
</pallas_src>

<mosaic_0001>
module attributes {stable_mosaic.version = 11 : i64} {
  func.func @_warp_kernel(%arg0: i32, %arg1: memref<4xf32, #tpu.memory_space<smem>>, %arg2: memref<64x64xf32, #tpu.memory_space<vmem>>, %arg3: memref<32x64xf32, #tpu.memory_space<vmem>>) attributes {dimension_semantics = [#tpu.dimension_semantics<parallel>], iteration_bounds = array<i64: 2>, scalar_prefetch = 0 : i64, scratch_operands = 0 : i64, tpu.core_type = #tpu.core_type<tc>, window_params = [{transform_indices = @transform_0, window_bounds = array<i64: 4>}, {pipeline_mode = #tpu.pipeline_mode<synchronous>, transform_indices = @transform_1, window_bounds = array<i64: 64, 64>}, {transform_indices = @transform_2, window_bounds = array<i64: 32, 64>}]} {
    %c0 = arith.constant 0 : index
    %0 = memref.load %arg1[%c0] : memref<4xf32, #tpu.memory_space<smem>>
    %c1 = arith.constant 1 : index
    %1 = memref.load %arg1[%c1] : memref<4xf32, #tpu.memory_space<smem>>
    %c2 = arith.constant 2 : index
    %2 = memref.load %arg1[%c2] : memref<4xf32, #tpu.memory_space<smem>>
    %c3 = arith.constant 3 : index
    %3 = memref.load %arg1[%c3] : memref<4xf32, #tpu.memory_space<smem>>
    %4 = tpu.iota {dimensions = array<i32: 1>} : vector<32x64xi32>
    %5 = arith.sitofp %4 : vector<32x64xi32> to vector<32x64xf32>
    %6 = tpu.iota {dimensions = array<i32: 0>} : vector<32x64xi32>
    %c32_i32 = arith.constant 32 : i32
    %7 = arith.muli %arg0, %c32_i32 : i32
    %8 = vector.broadcast %7 : i32 to vector<32x64xi32>
    %9 = arith.addi %6, %8 : vector<32x64xi32>
    %10 = arith.sitofp %9 : vector<32x64xi32> to vector<32x64xf32>
    %cst = arith.constant 2.000000e+00 : f32
    %11 = vector.broadcast %cst : f32 to vector<32x64xf32>
    %12 = arith.mulf %11, %5 : vector<32x64xf32>
    %cst_0 = arith.constant 1.000000e+00 : f32
    %13 = vector.broadcast %cst_0 : f32 to vector<32x64xf32>
    %14 = arith.addf %12, %13 : vector<32x64xf32>
    %cst_1 = arith.constant 6.400000e+01 : f32
    %15 = vector.broadcast %cst_1 : f32 to vector<32x64xf32>
    %16 = arith.divf %14, %15 : vector<32x64xf32>
    %cst_2 = arith.constant 1.000000e+00 : f32
    %17 = vector.broadcast %cst_2 : f32 to vector<32x64xf32>
    %18 = arith.subf %16, %17 : vector<32x64xf32>
    %cst_3 = arith.constant 2.000000e+00 : f32
    %19 = vector.broadcast %cst_3 : f32 to vector<32x64xf32>
    %20 = arith.mulf %19, %10 : vector<32x64xf32>
    %cst_4 = arith.constant 1.000000e+00 : f32
    %21 = vector.broadcast %cst_4 : f32 to vector<32x64xf32>
    %22 = arith.addf %20, %21 : vector<32x64xf32>
    %cst_5 = arith.constant 6.400000e+01 : f32
    %23 = vector.broadcast %cst_5 : f32 to vector<32x64xf32>
    %24 = arith.divf %22, %23 : vector<32x64xf32>
    %cst_6 = arith.constant 1.000000e+00 : f32
    %25 = vector.broadcast %cst_6 : f32 to vector<32x64xf32>
    %26 = arith.subf %24, %25 : vector<32x64xf32>
    %27 = vector.broadcast %0 : f32 to vector<32x64xf32>
    %28 = arith.mulf %27, %18 : vector<32x64xf32>
    %29 = vector.broadcast %1 : f32 to vector<32x64xf32>
    %30 = arith.mulf %29, %26 : vector<32x64xf32>
    %31 = arith.subf %28, %30 : vector<32x64xf32>
    %32 = vector.broadcast %2 : f32 to vector<32x64xf32>
    %33 = arith.addf %31, %32 : vector<32x64xf32>
    %34 = vector.broadcast %1 : f32 to vector<32x64xf32>
    %35 = arith.mulf %34, %18 : vector<32x64xf32>
    %36 = vector.broadcast %0 : f32 to vector<32x64xf32>
    %37 = arith.mulf %36, %26 : vector<32x64xf32>
    %38 = arith.addf %35, %37 : vector<32x64xf32>
    %39 = vector.broadcast %3 : f32 to vector<32x64xf32>
    %40 = arith.addf %38, %39 : vector<32x64xf32>
    %cst_7 = arith.constant 1.000000e+00 : f32
    %41 = vector.broadcast %cst_7 : f32 to vector<32x64xf32>
    %42 = arith.addf %33, %41 : vector<32x64xf32>
    %cst_8 = arith.constant 3.200000e+01 : f32
    %43 = vector.broadcast %cst_8 : f32 to vector<32x64xf32>
    %44 = arith.mulf %42, %43 : vector<32x64xf32>
    %cst_9 = arith.constant 5.000000e-01 : f32
    %45 = vector.broadcast %cst_9 : f32 to vector<32x64xf32>
    %46 = arith.subf %44, %45 : vector<32x64xf32>
    %cst_10 = arith.constant 1.000000e+00 : f32
    %47 = vector.broadcast %cst_10 : f32 to vector<32x64xf32>
    %48 = arith.addf %40, %47 : vector<32x64xf32>
    %cst_11 = arith.constant 3.200000e+01 : f32
    %49 = vector.broadcast %cst_11 : f32 to vector<32x64xf32>
    %50 = arith.mulf %48, %49 : vector<32x64xf32>
    %cst_12 = arith.constant 5.000000e-01 : f32
    %51 = vector.broadcast %cst_12 : f32 to vector<32x64xf32>
    %52 = arith.subf %50, %51 : vector<32x64xf32>
    %53 = tpu.iota {dimensions = array<i32: 2>} : vector<1x1x64xi32>
    %54 = arith.sitofp %53 : vector<1x1x64xi32> to vector<1x1x64xf32>
    %55 = vector.shape_cast %46 : vector<32x64xf32> to vector<32x64x1xf32>
    %56 = vector.broadcast %55 : vector<32x64x1xf32> to vector<32x64x64xf32>
    %57 = vector.broadcast %54 : vector<1x1x64xf32> to vector<32x64x64xf32>
    %58 = arith.subf %56, %57 : vector<32x64x64xf32>
    %59 = math.absf %58 : vector<32x64x64xf32>
    %cst_13 = arith.constant 1.000000e+00 : f32
    %60 = vector.broadcast %cst_13 : f32 to vector<32x64x64xf32>
    %61 = arith.subf %60, %59 : vector<32x64x64xf32>
    %cst_14 = arith.constant 0.000000e+00 : f32
    %62 = vector.broadcast %cst_14 : f32 to vector<32x64x64xf32>
    %63 = arith.maximumf %62, %61 : vector<32x64x64xf32>
    %64 = arith.truncf %63 : vector<32x64x64xf32> to vector<32x64x64xbf16>
    %c0_15 = arith.constant 0 : index
    %c0_16 = arith.constant 0 : index
    %65 = vector.load %arg2[%c0_15, %c0_16] : memref<64x64xf32, #tpu.memory_space<vmem>>, vector<64x64xf32>
    %66 = arith.truncf %65 : vector<64x64xf32> to vector<64x64xbf16>
    %67 = vector.shape_cast %64 : vector<32x64x64xbf16> to vector<2048x64xbf16>
    %cst_17 = arith.constant dense<0.000000e+00> : vector<2048x64xf32>
    %68 = tpu.matmul %67, %66, %cst_17 {dimension_numbers = #tpu.dot_dimension_numbers<[1], [1], [0], [0], [0, 0, 1, 0], [], []>} : vector<2048x64xbf16>, vector<64x64xbf16>, vector<2048x64xf32> -> vector<2048x64xf32>
    %69 = vector.shape_cast %68 : vector<2048x64xf32> to vector<32x64x64xf32>
    %70 = vector.shape_cast %52 : vector<32x64xf32> to vector<32x64x1xf32>
    %71 = vector.broadcast %70 : vector<32x64x1xf32> to vector<32x64x64xf32>
    %72 = vector.broadcast %54 : vector<1x1x64xf32> to vector<32x64x64xf32>
    %73 = arith.subf %71, %72 : vector<32x64x64xf32>
    %74 = math.absf %73 : vector<32x64x64xf32>
    %cst_18 = arith.constant 1.000000e+00 : f32
    %75 = vector.broadcast %cst_18 : f32 to vector<32x64x64xf32>
    %76 = arith.subf %75, %74 : vector<32x64x64xf32>
    %cst_19 = arith.constant 0.000000e+00 : f32
    %77 = vector.broadcast %cst_19 : f32 to vector<32x64x64xf32>
    %78 = arith.maximumf %77, %76 : vector<32x64x64xf32>
    %79 = arith.mulf %78, %69 : vector<32x64x64xf32>
    %cst_20 = arith.constant dense<0.000000e+00> : vector<32x64xf32>
    %80 = vector.multi_reduction <add>, %79, %cst_20 [2] : vector<32x64x64xf32> to vector<32x64xf32>
    %c0_21 = arith.constant 0 : index
    %c0_22 = arith.constant 0 : index
    %81 = vector.load %arg3[%c0_21, %c0_22] : memref<32x64xf32, #tpu.memory_space<vmem>>, vector<32x64xf32>
    tpu.vector_store %arg3[%c0_21, %c0_22], %80 {strides = array<i32>} : memref<32x64xf32, #tpu.memory_space<vmem>>, vector<32x64xf32>,
    return
  }
  func.func @transform_0(%arg0: i32) -> i32 {
    %c0_i32 = arith.constant 0 : i32
    %c0_i32_0 = arith.constant 0 : i32
    return %c0_i32 : i32
  }
  func.func @transform_1(%arg0: i32) -> (i32, i32) {
    %c0_i32 = arith.constant 0 : i32
    %c0_i32_0 = arith.constant 0 : i32
    %c0_i32_1 = arith.constant 0 : i32
    return %c0_i32, %c0_i32_0 : i32, i32
  }
  func.func @transform_2(%arg0: i32) -> (i32, i32) {
    %c0_i32 = arith.constant 0 : i32
    %c0_i32_0 = arith.constant 0 : i32
    return %arg0, %c0_i32 : i32, i32
  }
}

</mosaic_0001>

<bundles_post_ra>
// kernel: tpu_custom_call.1
= control target key start
LH: loop header
LB: loop body
LE: loop exit
PB: predicated region body
PF: predicated region fallthrough
CT: control target
= control target key end

     0   :  { %7 = vsyncpa [#allocation5], 0  ;;  %s15219_s0 = inlined_call_operand.hbm [shape: f32[4], index: 0, kind: input, shape index: {}]   ;;  %s15220_s1 = inlined_call_operand.hbm [shape: f32[64,64], index: 1, kind: input, shape index: {}]   ;;  %s15221_s2 = inlined_call_operand.hbm [shape: f32[64,64], index: 2, kind: output, shape index: {}]  }
   0x1   :  { %8 = vsyncpa [#allocation3], 0 }
   0x2   :  { %9 = vsyncpa [#allocation4], 0 }
   0x3   :  { %11 = vsyncpa [#allocation4 + $0x1], 0  ;;  %s10098_s9 = smov 0   ;;  %s10100_s10 = smov 0  }
   0x4   :  { %s10102_s11 = smov 0   ;;  %s10104_s12 = smov 0  }
   0x5 LB: > { %s10119_s13 = sadd.s32 4294967295, %s10074_s12   ;;  %s9303_s14 = sadd.s32 4294967294, %s10074_s12   ;;  %s10074_s12 = sphi %s10104_s12, %s16513_s12   ;;  %s10070_s11 = sphi %s10102_s11, %s16512_s11   ;;  %s10066_s10 = sphi %s10100_s10, %s16511_s10   ;;  %s10062_s9 = sphi %s10098_s9, %s16510_s9  }
   0x6   : > { %s10123_s15 = sadd.s32 1, %s10074_s12   ;;  %s66_s16 = sadd.s32 1, %s10070_s11 }
   0x7   : > { %s63_s17 = ssub.s32 %s10074_s12, %s10123_s15  ;;  %p76_p0 = scmp.ne.s32.totalorder %s10070_s11, %s10066_s10 }
   0x8   : > { %p64_p1 = scmp.eq.s32.totalorder %s63_s17, 0  ;;  %p77_p2 = scmp.eq.s32.totalorder %s10119_s13, 1 }
   0x9   : > { %p82_p3 = scmp.ne.s32.totalorder %s10066_s10, %s10062_s9  ;;  %p83_p4 = scmp.eq.s32.totalorder %s9303_s14, 1 }
   0xa   : > { %s10134_s18 = scalar_select %p64_p1, %s10070_s11, %s66_s16  }
   0xb   : > { %p10136_p5 = por %p77_p2, %p76_p0  ;;  %p10140_p6 = por %p83_p4, %p82_p3 }
   0xc   : > { %p9304_p7 = scmp.ge.s32.totalorder %s10074_s12, 1  ;;  %p90_p8 = scmp.lt.s32.totalorder %s10074_s12, 3 }
   0xd   : > { %p9495_p9 = scmp.eq.s32.totalorder %s10119_s13, 0  ;;  %s102_s24 = sshll.u32 %s15219_s0, 4  ;;  %s103_s24 = int_to_ptr.hbm [resolvable:$true] %s102_s24 }
   0xe   : > { %p10147_p10 = pnand %p9304_p7, %p90_p8  ;;  %s111_s27 = sshll.u32 %s15220_s1, 4  ;;  %s112_s27 = int_to_ptr.hbm [resolvable:$true] %s111_s27 }
   0xf   : > { %s10076_s28 = smov [#allocation6]   ;;  %s10077_s30 = smov [#allocation2]  }
  0x10   : > { %p9484_p11 = pneg %p10147_p10  ;;  %s113_s29 = sshll.u32 %s10076_s28, 4  ;;  %s114_s29 = int_to_ptr.vmem [resolvable:$true] %s113_s29 }
  0x11   : > { %s10078_s3 = smov 128   ;;  %s10079_s4 = smov 8  }
  0x12   : > { %p9485_p12 = pnand %p9495_p9, %p9484_p11  ;;  %129 = sbr.rel (%p10147_p10) target bundleno = 4165 (0x1045), region = 28 }
  0x14   : > { %9487 = dma.hbm_to_smem (!%p9485_p12), %s103_s24, 16, %s10077_s30, [#allocation5]  }
  0x15   : > { %9490 = dma.hbm_to_vmem [thread:$0]  (!%p9485_p12), %s112_s27, 1024, %s114_s29, [#allocation3], %s10078_s3, %s10078_s3, %s10079_s4  }
  0x17   : > { %10049 = dma.done.wait (%p9495_p9), [#allocation5], 16  }
  0x18   : > { %10051 = vsyncadd (%p9495_p9), [#allocation5], 4294967280 }
  0x19   : > { %10053 = dma.done.wait (%p9495_p9), [#allocation3], 1024  }
  0x1a   : > { %10055 = vsyncadd (%p9495_p9), [#allocation3], 4294966272 }
  0x1b   : > { %141 = sfence }
  0x1c   : > { %v159_v0 = vlaneseq  ;;  %s9314_s5 = sshll.u32 %s10119_s13, 5  ;;  %v10080_v1 = vmov 64.0   ;;  %s155_s6 = sld [smem:[#allocation2]]  ;;  %vm3758_vm1 = vcmask 523264   ;;  %vm8679_vm2 = vcmask 130112  }
  0x1d   : > { %9957 = vrcp.f32 %v10080_v1  ;;  %v168_v4 = vstv %s9314_s5  ;;  %s9311_s7 = sld [smem:[#allocation2 + $0x1]]  ;;  %vm8683_vm3 = vcmask 195712   ;;  %vm8687_vm4 = vcmask 261312   ;;  %s150_s16 = sand.u32 1, %s10066_s10  }
  0x1e   : > { %v10172_v2 = vshrl.u32 %v159_v0, 7  ;;  %v10174_v3 = vand.u32 127, %v159_v0  ;;  %s9312_s8 = sld [smem:[#allocation2 + $0x2]]  ;;  %vm8691_vm5 = vcmask 326912   ;;  %vm8695_vm6 = vcmask 392512   ;;  %s9310_s17 = sshll.u32 %s150_s16, 5 }
  0x1f   : > { %s9313_s14 = sld [smem:[#allocation2 + $0x3]]  ;;  %vm8699_vm7 = vcmask 458112   ;;  %vm8703_vm8 = vcmask 523712   ;;  %vm9170_vm9 = vcmask 1041409   ;;  %vm9172_vm10 = vcmask 1042434   ;;  %s14070_s21 = scalar_lea.vmem [#allocation7], %s9310_s17 }
  0x20   : > { %15351 = vst [vmem:[#allocation11_spill] sm:$0xff] %v10174_v3  ;;  %v10179_v5 = vadd.s32 32, %v10172_v2  ;;  %v10182_v6 = vadd.s32 16, %v10172_v2  ;;  %v10185_v7 = vadd.s32 8, %v10172_v2  ;;  %v10188_v8 = vcvt.s32.f32 %v10174_v3  ;;  %s9225_s24 = scalar_lea.hbm %s15221_s2, %s9314_s5  ;;  %s9226_s13 = sshll.u32 %s14070_s21, 4  ;;  %s9227_s13 = int_to_ptr.vmem [resolvable:$true] %s9226_s13 }
  0x21   : > { %v169_v9 = vadd.s32 %v168_v4, %v10172_v2  ;;  %v10203_v38 = vadd.s32 24, %v10172_v2  ;;  %v10216_v57 = vadd.s32 40, %v10172_v2  ;;  %vm9174_vm11 = vcmask 1043459   ;;  %s9228_s25 = sshll.u32 %s9225_s24, 4  ;;  %s9214_s26 = scalar_lea.sflag [#allocation4], %s150_s16  ;;  %s9229_s25 = int_to_ptr.hbm [resolvable:$true] %s9228_s25 }
  0x22   : > { %9542 = vset.pattern.permute.xlu2 %v10179_v5  ;;  %9540 = vset.pattern.permute.xlu1 %v10182_v6  ;;  %v170_v10 = vadd.s32 %v168_v4, %v10185_v7  ;;  %v177_v14 = vmul.f32 2.0, %v10188_v8  ;;  %v171_v25 = vadd.s32 %v168_v4, %v10182_v6  ;;  %v10197_v29 = vstv %s155_s6  ;;  %s10018_s27 = sshra.s32 %s9229_s25, 4  ;;  %s10024_s3 = scalar_lea.hbm %s15221_s2, 64  ;;  %s10019_s27 = int_to_ptr.hbm [resolvable:$true] %s10018_s27 }
  0x23   : > { %v9958_v11 = vpop.eup %9957  ;;  %9539 = vset.pattern.permute.xlu0 %v10185_v7  ;;  %v173_v12 = vcvt.s32.f32 %v169_v9  ;;  %v206_v30 = vstv %s9311_s7  ;;  %v172_v42 = vadd.s32 %v168_v4, %v10203_v38  ;;  %vm9176_vm12 = vcmask 1044484   ;;  %s10020_s28 = scalar_lea.hbm %s10019_s27, 32  ;;  %p10025_p2 = scmp.lt.s32.totalorder %s10019_s27, %s15221_s2 }
  0x24   : > { %v180_v13 = vmul.f32 64.0, %v9958_v11  ;;  %v174_v16 = vcvt.s32.f32 %v170_v10  ;;  %v178_v20 = vadd.f32 1.0, %v177_v14  ;;  %vm184_vm0 = vweird.f32 %v9958_v11  ;;  %p10021_p13 = scmp.ne.s32.totalorder %s10019_s27, %s10020_s28  ;;  %p10026_p3 = scmp.lt.s32.totalorder %s10024_s3, %s10020_s28 }
  0x25   : > { %v188_v15 = vmul.f32 2.0, %v173_v12  ;;  %v175_v34 = vcvt.s32.f32 %v171_v25  ;;  %v215_v37 = vstv %s9312_s8  ;;  %v176_v47 = vcvt.s32.f32 %v172_v42 }
  0x26   : > { %v181_v17 = vsub.f32 1.0, %v180_v13  ;;  %v189_v18 = vmul.f32 2.0, %v174_v16  ;;  %v10236_v12 = vadd.s32 56, %v10172_v2  ;;  %v10239_v13 = vadd.s32 48, %v10172_v2  ;;  %p10022_p0 = pnand %p10021_p13, %p10136_p5  ;;  %p10027_p4 = por %p10026_p3, %p10025_p2 }
  0x27   : > { %v192_v21 = vadd.f32 1.0, %v188_v15  ;;  %v190_v41 = vmul.f32 2.0, %v175_v34  ;;  %v191_v52 = vmul.f32 2.0, %v176_v47  ;;  %v229_v25 = vstv %s9313_s14 }
  0x28   : > { %v182_v19 = vmul.f32 %v9958_v11, %v181_v17  ;;  %v193_v22 = vadd.f32 1.0, %v189_v18  ;;  %vm9178_vm13 = vcmask 1045509   ;;  %vm9180_vm14 = vcmask 1046534   ;;  %p10023_p1 = pneg %p10022_p0 }
  0x29   : > { %v194_v46 = vadd.f32 1.0, %v190_v41  ;;  %v195_v56 = vadd.f32 1.0, %v191_v52  ;;  %vm9182_vm15 = vcmask 1047559  }
  0x2a   : > { %v183_v23 = vadd.f32 %v9958_v11, %v182_v19  ;;  %p10028_p7 = pnand %p10027_p4, %p10023_p1 }
  0x2c   : > { %v185_v24 = vsel %vm184_vm0, %v9958_v11, %v183_v23 }
  0x2d   : > { %v186_v26 = vmul.f32 %v185_v24, %v178_v20  ;;  %v196_v27 = vmul.f32 %v192_v21, %v185_v24  ;;  %v197_v28 = vmul.f32 %v193_v22, %v185_v24  ;;  %v198_v51 = vmul.f32 %v194_v46, %v185_v24 }
  0x2e   : > { %v199_v61 = vmul.f32 %v195_v56, %v185_v24 }
  0x2f   : > { %v9315_v31 = vadd.f32 -1.0, %v186_v26  ;;  %v9316_v32 = vadd.f32 -1.0, %v196_v27  ;;  %v10199_v33 = vadd.f32 -1.0, %v197_v28  ;;  %v9318_v55 = vadd.f32 -1.0, %v198_v51 }
  0x30   : > { %v10226_v0 = vadd.f32 -1.0, %v199_v61 }
  0x31   : > { %v205_v35 = vmul.f32 %v9315_v31, %v10197_v29  ;;  %v207_v36 = vmul.f32 %v9316_v32, %v206_v30  ;;  %v208_v40 = vmul.f32 %v10199_v33, %v206_v30  ;;  %v209_v60 = vmul.f32 %v9318_v55, %v206_v30 }
  0x32   : > { %v210_v9 = vmul.f32 %v10226_v0, %v206_v30  ;;  %v220_v21 = vmul.f32 %v9315_v31, %v206_v30  ;;  %v221_v22 = vmul.f32 %v9316_v32, %v10197_v29  ;;  %v222_v34 = vmul.f32 %v10199_v33, %v10197_v29 }
  0x33   : > { %v211_v39 = vsub.f32 %v205_v35, %v207_v36  ;;  %v212_v45 = vsub.f32 %v205_v35, %v208_v40  ;;  %v213_v63 = vsub.f32 %v205_v35, %v209_v60  ;;  %v223_v40 = vmul.f32 %v9318_v55, %v10197_v29 }
  0x34   : > { %v214_v11 = vsub.f32 %v205_v35, %v210_v9  ;;  %v225_v24 = vadd.f32 %v221_v22, %v220_v21  ;;  %v226_v36 = vadd.f32 %v222_v34, %v220_v21 }
  0x35   : > { %v216_v43 = vadd.f32 %v215_v37, %v211_v39  ;;  %v217_v50 = vadd.f32 %v215_v37, %v212_v45  ;;  %v218_v4 = vadd.f32 %v215_v37, %v213_v63  ;;  %v227_v41 = vadd.f32 %v223_v40, %v220_v21 }
  0x36   : > { %v219_v16 = vadd.f32 %v215_v37, %v214_v11  ;;  %v230_v27 = vadd.f32 %v229_v25, %v225_v24  ;;  %v231_v39 = vadd.f32 %v229_v25, %v226_v36 }
  0x37   : > { %v234_v44 = vadd.f32 1.0, %v216_v43  ;;  %v235_v54 = vadd.f32 1.0, %v217_v50  ;;  %v236_v10 = vadd.f32 1.0, %v218_v4  ;;  %v224_v50 = vmul.f32 %v10226_v0, %v10197_v29 }
  0x38   : > { %v237_v18 = vadd.f32 1.0, %v219_v16  ;;  %v246_v28 = vadd.f32 1.0, %v230_v27  ;;  %v247_v33 = vadd.f32 1.0, %v231_v39 }
  0x39   : > { %v238_v48 = vmul.f32 32.0, %v234_v44  ;;  %v239_v59 = vmul.f32 32.0, %v235_v54  ;;  %v240_v15 = vmul.f32 32.0, %v236_v10  ;;  %v232_v44 = vadd.f32 %v229_v25, %v227_v41 }
  0x3a   : > { %v241_v20 = vmul.f32 32.0, %v237_v18  ;;  %v250_v32 = vmul.f32 32.0, %v246_v28  ;;  %v251_v43 = vmul.f32 32.0, %v247_v33  ;;  %v228_v52 = vadd.f32 %v224_v50, %v220_v21 }
  0x3b   : > { %v10207_v49 = vadd.f32 -0.5, %v238_v48  ;;  %v10224_v62 = vadd.f32 -0.5, %v239_v59  ;;  %v10247_v17 = vadd.f32 -0.5, %v240_v15  ;;  %v248_v46 = vadd.f32 1.0, %v232_v44 }
  0x3c   : > { %v10256_v23 = vadd.f32 -0.5, %v241_v20  ;;  %v10275_v35 = vadd.f32 -0.5, %v250_v32  ;;  %v10290_v45 = vadd.f32 -0.5, %v251_v43  ;;  %v233_v55 = vadd.f32 %v229_v25, %v228_v52 }
  0x3d   : > { %v10210_v53 = vperm.slane %v10207_v49, 0  ;;  %v10219_v58 = vperm.slane %v10207_v49, 4  ;;  %v10229_v1 = vperm.slane %v10224_v62, 1  ;;  %v10242_v14 = vperm.slane %v10224_v62, 6 }
  0x3e   : > { %v10250_v19 = vperm.slane %v10247_v17, 3  ;;  %v10259_v26 = vperm.slane %v10256_v23, 0  ;;  %v10265_v30 = vperm.slane %v10207_v49, 1  ;;  %v10268_v31 = vperm.slane %v10256_v23, 5 }
  0x3f   : > { %287 = vperm.xlu2 %9542, %v10210_v53   ;;  %275 = vperm.xlu1 %9540, %v10210_v53   ;;  %15352 = vst [vmem:[#allocation12_spill] sm:$0xff] %v10242_v14  ;;  %v10278_v37 = vperm.slane %v10275_v35, 2  ;;  %v10285_v42 = vperm.slane %v10275_v35, 7  ;;  %v10293_v47 = vperm.slane %v10290_v45, 4  ;;  %v252_v48 = vmul.f32 32.0, %v248_v46 }
  0x40   : > { %269 = vperm.xlu0 %9539, %v10210_v53   ;;  %15353 = vst [vmem:[#allocation13_spill] sm:$0xff] %v10250_v19  ;;  %v249_v29 = vadd.f32 1.0, %v233_v55  ;;  %v10317_v61 = vperm.slane %v10207_v49, 2  ;;  %v10349_v11 = vperm.slane %v10207_v49, 3  ;;  %v503_v27 = vperm.slane %v10207_v49, 5 }
  0x41   : > { %15354 = vst [vmem:[#allocation14_spill] sm:$0xff] %v10259_v26  ;;  %v10300_v51 = vadd.f32 -0.5, %v252_v48  ;;  %v10400_v32 = vperm.slane %v10224_v62, 2  ;;  %v10408_v36 = vperm.slane %v10224_v62, 7  ;;  %v10416_v40 = vperm.slane %v10247_v17, 4 }
  0x42   : > { %15355 = vst [vmem:[#allocation15_spill] sm:$0xff] %v10268_v31  ;;  %v253_v59 = vmul.f32 32.0, %v249_v29  ;;  %v10423_v41 = vperm.slane %v10256_v23, 1  ;;  %v10431_v44 = vperm.slane %v10256_v23, 6  ;;  %v10437_v46 = vperm.slane %v10275_v35, 3 }
  0x43   : > { %15356 = vst [vmem:[#allocation16_spill] sm:$0xff] %v10278_v37  ;;  %v10303_v54 = vperm.slane %v10300_v51, 1  ;;  %v10309_v56 = vperm.slane %v10300_v51, 6  ;;  %v10445_v50 = vperm.slane %v10290_v45, 0  ;;  %v10451_v55 = vperm.slane %v10290_v45, 5 }
  0x44   : > { %15357 = vst [vmem:[#allocation17_spill] sm:$0xff] %v10285_v42  ;;  %v10314_v60 = vadd.f32 -0.5, %v253_v59  ;;  %v10459_v59 = vperm.slane %v10300_v51, 2 }
  0x45   : > { %15358 = vst [vmem:[#allocation18_spill] sm:$0xff] %v10293_v47 }
  0x46   : > { %15359 = vst [vmem:[#allocation19_spill] sm:$0xff] %v10303_v54  ;;  %v10320_v63 = vperm.slane %v10314_v60, 3 }
  0x47   : > { %9543 = vset.pattern.permute.xlu2 %v10216_v57  ;;  %9541 = vset.pattern.permute.xlu1 %v10203_v38  ;;  %15360 = vst [vmem:[#allocation20_spill] sm:$0xff] %v10309_v56 }
  0x48   : > { %465 = vperm.xlu0 %9539, %v10219_v58   ;;  %15361 = vst [vmem:[#allocation21_spill] sm:$0xff] %v10314_v60 }
  0x49   : > { %15362 = vst [vmem:[#allocation22_spill] sm:$0xff] %v10320_v63 }
  0x4a   : > { %15366 = vst [vmem:[#allocation26_spill] sm:$0xff] %v10349_v11 }
  0x4b   : > { %15377 = vst [vmem:[#allocation37_spill] sm:$0xff] %v10408_v36 }
  0x4c   : > { %15379 = vst [vmem:[#allocation39_spill] sm:$0xff] %v10416_v40 }
  0x4d   : > { %15381 = vst [vmem:[#allocation41_spill] sm:$0xff] %v10423_v41 }
  0x4e   : > { %15383 = vst [vmem:[#allocation43_spill] sm:$0xff] %v10431_v44 }
  0x4f   : > { %293 = vperm.xlu2 %9543, %v10210_v53   ;;  %281 = vperm.xlu1 %9541, %v10210_v53   ;;  %15385 = vst [vmem:[#allocation45_spill] sm:$0xff] %v10437_v46 }
  0x50   : > { %710 = vperm.xlu0 %9539, %v10229_v1   ;;  %15387 = vst [vmem:[#allocation47_spill] sm:$0xff] %v10445_v50 }
  0x51   : > { %15389 = vst [vmem:[#allocation49_spill] sm:$0xff] %v10451_v55 }
  0x52   : > { %15391 = vst [vmem:[#allocation51_spill] sm:$0xff] %v10459_v59 }
  0x57   : > { %9545 = vset.pattern.permute.xlu2 %v10236_v12  ;;  %9544 = vset.pattern.permute.xlu1 %v10239_v13 }
  0x58   : > { %955 = vperm.xlu0 %9539, %v10242_v14  }
  0x5f   : > { %305 = vperm.xlu2 %9545, %v10210_v53   ;;  %299 = vperm.xlu1 %9544, %v10210_v53  }
  0x60   : > { %1200 = vperm.xlu0 %9539, %v10250_v19  }
  0x67   : > { %9547 = vset.pattern.permute.xlu2 %v10182_v6  ;;  %9546 = vset.pattern.permute.xlu1 %v10185_v7 }
  0x68   : > { %1445 = vperm.xlu0 %9539, %v10259_v26  }
  0x6f   : > { %324 = vperm.xlu2 %9547, %v10265_v30   ;;  %318 = vperm.xlu1 %9546, %v10265_v30  }
  0x70   : > { %1690 = vperm.xlu0 %9539, %v10268_v31  }
  0x77   : > { %9549 = vset.pattern.permute.xlu2 %v10179_v5  ;;  %9548 = vset.pattern.permute.xlu1 %v10203_v38 }
  0x78   : > { %4913 = vperm.xlu0 %9539, %v10278_v37  }
  0x7f   : > { %336 = vperm.xlu2 %9549, %v10265_v30   ;;  %330 = vperm.xlu1 %9548, %v10265_v30  }
  0x80   : > { %5158 = vperm.xlu0 %9539, %v10285_v42  }
  0x87   : > { %9551 = vset.pattern.permute.xlu2 %v10236_v12  ;;  %9550 = vset.pattern.permute.xlu1 %v10239_v13 }
  0x88   : > { %5403 = vperm.xlu0 %9539, %v10293_v47  }
  0x8f   : > { %354 = vperm.xlu2 %9551, %v10265_v30   ;;  %348 = vperm.xlu1 %9550, %v10265_v30  }
  0x90   : > { %5648 = vperm.xlu0 %9539, %v10303_v54  }
  0x97   : > { %9553 = vset.pattern.permute.xlu2 %v10185_v7  ;;  %9552 = vset.pattern.permute.xlu1 %v10172_v2 }
  0x98   : > { %5893 = vperm.xlu0 %9539, %v10309_v56  }
  0x99   : > { %v10470_v3 = vpop.permute.xlu2 %287 }
  0x9f   : > { %367 = vperm.xlu2 %9553, %v10317_v61   ;;  %361 = vperm.xlu1 %9552, %v10317_v61  }
  0xa0   : > { %6138 = vperm.xlu0 %9539, %v10320_v63  }
  0xa7   : > { %9555 = vset.pattern.permute.xlu2 %v10179_v5  ;;  %9554 = vset.pattern.permute.xlu1 %v10203_v38 }
  0xa8   : > { %9918 = vset.pattern.permute.xlu0 %v10239_v13 }
  0xaf   : > { %385 = vperm.xlu2 %9555, %v10317_v61   ;;  %379 = vperm.xlu1 %9554, %v10317_v61  }
  0xb0   : > { %495 = vperm.xlu0 %9918, %v10219_v58  }
  0xb2   : > { %v10331_v0 = vpop.permute.xlu0 %269 }
  0xb7   : > { %9557 = vset.pattern.permute.xlu2 %v10239_v13  ;;  %9556 = vset.pattern.permute.xlu1 %v10216_v57 }
  0xb8   : > { %740 = vperm.xlu0 %9918, %v10229_v1  }
  0xba   : > { %v10336_v4 = vpop.permute.xlu0 %465 }
  0xbb   : > { %15363 = vst [vmem:[#allocation23_spill] sm:$0xff] %v10336_v4 }
  0xbf   : > { %397 = vperm.xlu2 %9557, %v10317_v61   ;;  %391 = vperm.xlu1 %9556, %v10317_v61  }
  0xc0   : > { %985 = vperm.xlu0 %9918, %v10242_v14  }
  0xc2   : > { %v10341_v9 = vpop.permute.xlu0 %710 }
  0xc3   : > { %15364 = vst [vmem:[#allocation24_spill] sm:$0xff] %v10341_v9  ;;  %v10612_v9 = vperm.slane %v10290_v45, 6 }
  0xc5   : > { %15418 = vst [vmem:[#allocation78_spill] sm:$0xff] %v10612_v9 }
  0xc7   : > { %9559 = vset.pattern.permute.xlu2 %v10185_v7  ;;  %9558 = vset.pattern.permute.xlu1 %v10172_v2 }
  0xc8   : > { %1230 = vperm.xlu0 %9918, %v10250_v19   ;;  %v3110_v19 = vld [vmem:[#allocation6 + $0x20] sm:$0xff] }
  0xca   : > { %v10346_v10 = vpop.permute.xlu0 %955 }
  0xcb   : > { %15365 = vst [vmem:[#allocation25_spill] sm:$0xff] %v10346_v10 }
  0xcf   : > { %416 = vperm.xlu2 %9559, %v10349_v11   ;;  %410 = vperm.xlu1 %9558, %v10349_v11  }
  0xd0   : > { %1475 = vperm.xlu0 %9918, %v10259_v26   ;;  %v10583_v26 = vperm.slane %v10275_v35, 4 }
  0xd2   : > { %v10354_v15 = vpop.permute.xlu0 %1200  ;;  %15410 = vst [vmem:[#allocation70_spill] sm:$0xff] %v10583_v26 }
  0xd3   : > { %15367 = vst [vmem:[#allocation27_spill] sm:$0xff] %v10354_v15 }
  0xd7   : > { %9561 = vset.pattern.permute.xlu2 %v10203_v38  ;;  %9560 = vset.pattern.permute.xlu1 %v10182_v6 }
  0xd8   : > { %1720 = vperm.xlu0 %9918, %v10268_v31   ;;  %v10559_v31 = vperm.slane %v10256_v23, 2 }
  0xda   : > { %v10359_v16 = vpop.permute.xlu0 %1445  ;;  %15404 = vst [vmem:[#allocation64_spill] sm:$0xff] %v10559_v31 }
  0xdb   : > { %15368 = vst [vmem:[#allocation28_spill] sm:$0xff] %v10359_v16 }
  0xdf   : > { %428 = vperm.xlu2 %9561, %v10349_v11   ;;  %422 = vperm.xlu1 %9560, %v10349_v11  }
  0xe0   : > { %4943 = vperm.xlu0 %9918, %v10278_v37  }
  0xe2   : > { %v10364_v18 = vpop.permute.xlu0 %1690 }
  0xe3   : > { %15369 = vst [vmem:[#allocation29_spill] sm:$0xff] %v10364_v18 }
  0xe7   : > { %9563 = vset.pattern.permute.xlu2 %v10239_v13  ;;  %9562 = vset.pattern.permute.xlu1 %v10216_v57 }
  0xe8   : > { %5188 = vperm.xlu0 %9918, %v10285_v42   ;;  %v10535_v42 = vperm.slane %v10247_v17, 0 }
  0xea   : > { %v10369_v20 = vpop.permute.xlu0 %4913 }
  0xeb   : > { %15370 = vst [vmem:[#allocation30_spill] sm:$0xff] %v10369_v20 }
  0xef   : > { %446 = vperm.xlu2 %9563, %v10349_v11   ;;  %440 = vperm.xlu1 %9562, %v10349_v11  }
  0xf0   : > { %5433 = vperm.xlu0 %9918, %v10293_v47  }
  0xf2   : > { %v10374_v21 = vpop.permute.xlu0 %5158 }
  0xf3   : > { %15371 = vst [vmem:[#allocation31_spill] sm:$0xff] %v10374_v21 }
  0xf7   : > { %9565 = vset.pattern.permute.xlu2 %v10172_v2  ;;  %9564 = vset.pattern.permute.xlu1 %v10236_v12 }
  0xf8   : > { %5678 = vperm.xlu0 %9918, %v10303_v54   ;;  %v10520_v54 = vperm.slane %v10224_v62, 3 }
  0xfa   : > { %v10379_v22 = vpop.permute.xlu0 %5403 }
  0xfb   : > { %15372 = vst [vmem:[#allocation32_spill] sm:$0xff] %v10379_v22  ;;  %v10473_v22 = vperm.slane %v10207_v49, 6 }
  0xff   : > { %459 = vperm.xlu2 %9565, %v10219_v58   ;;  %452 = vperm.xlu1 %9564, %v10349_v11  }
 0x100   : > { %5923 = vperm.xlu0 %9918, %v10309_v56  }
 0x102   : > { %v10384_v24 = vpop.permute.xlu0 %5648 }
 0x103   : > { %15373 = vst [vmem:[#allocation33_spill] sm:$0xff] %v10384_v24 }
 0x107   : > { %9567 = vset.pattern.permute.xlu2 %v10203_v38  ;;  %9566 = vset.pattern.permute.xlu1 %v10182_v6 }
 0x108   : > { %6168 = vperm.xlu0 %9918, %v10320_v63   ;;  %v10490_v63 = vpop.permute.xlu1 %275 }
 0x10a   : > { %v10389_v25 = vpop.permute.xlu0 %5893 }
 0x10b   : > { %15374 = vst [vmem:[#allocation34_spill] sm:$0xff] %v10389_v25  ;;  %v10465_v25 = vperm.slane %v10300_v51, 7 }
 0x10d   : > { %15393 = vst [vmem:[#allocation53_spill] sm:$0xff] %v10465_v25 }
 0x10f   : > { %477 = vperm.xlu2 %9567, %v10219_v58   ;;  %471 = vperm.xlu1 %9566, %v10219_v58  }
 0x110   : > { %9923 = vset.pattern.permute.xlu0 %v10203_v38 }
 0x112   : > { %v10397_v28 = vpop.permute.xlu0 %6138 }
 0x113   : > { %15375 = vst [vmem:[#allocation35_spill] sm:$0xff] %v10397_v28 }
 0x117   : > { %9569 = vset.pattern.permute.xlu2 %v10216_v57  ;;  %9568 = vset.pattern.permute.xlu1 %v10179_v5 }
 0x118   : > { %526 = vperm.xlu0 %9923, %v503_v27  }
 0x11f   : > { %489 = vperm.xlu2 %9569, %v10219_v58   ;;  %483 = vperm.xlu1 %9568, %v10219_v58  }
 0x120   : > { %771 = vperm.xlu0 %9923, %v10400_v32  }
 0x122   : > { %v10405_v34 = vpop.permute.xlu0 %495 }
 0x123   : > { %15376 = vst [vmem:[#allocation36_spill] sm:$0xff] %v10405_v34 }
 0x127   : > { %9571 = vset.pattern.permute.xlu2 %v10172_v2  ;;  %9570 = vset.pattern.permute.xlu1 %v10236_v12 }
 0x128   : > { %1016 = vperm.xlu0 %9923, %v10408_v36  }
 0x12a   : > { %v10413_v39 = vpop.permute.xlu0 %740 }
 0x12b   : > { %15378 = vst [vmem:[#allocation38_spill] sm:$0xff] %v10413_v39 }
 0x12f   : > { %508 = vperm.xlu2 %9571, %v503_v27   ;;  %501 = vperm.xlu1 %9570, %v10219_v58  }
 0x130   : > { %1261 = vperm.xlu0 %9923, %v10416_v40  }
 0x132   : > { %v10420_v33 = vpop.permute.xlu0 %985 }
 0x133   : > { %15380 = vst [vmem:[#allocation40_spill] sm:$0xff] %v10420_v33  ;;  %v10571_v33 = vperm.slane %v10256_v23, 7 }
 0x135   : > { %15407 = vst [vmem:[#allocation67_spill] sm:$0xff] %v10571_v33 }
 0x137   : > { %9573 = vset.pattern.permute.xlu2 %v10182_v6  ;;  %9572 = vset.pattern.permute.xlu1 %v10185_v7 }
 0x138   : > { %1506 = vperm.xlu0 %9923, %v10423_v41  }
 0x13a   : > { %v10428_v43 = vpop.permute.xlu0 %1230 }
 0x13b   : > { %15382 = vst [vmem:[#allocation42_spill] sm:$0xff] %v10428_v43  ;;  %v3113_v43 = vld [vmem:[#allocation6 + $0x38] sm:$0xff] }
 0x13f   : > { %520 = vperm.xlu2 %9573, %v503_v27   ;;  %514 = vperm.xlu1 %9572, %v503_v27  }
 0x140   : > { %1751 = vperm.xlu0 %9923, %v10431_v44  }
 0x142   : > { %v10434_v58 = vpop.permute.xlu0 %1475 }
 0x143   : > { %15384 = vst [vmem:[#allocation44_spill] sm:$0xff] %v10434_v58 }
 0x147   : > { %9575 = vset.pattern.permute.xlu2 %v10216_v57  ;;  %9574 = vset.pattern.permute.xlu1 %v10179_v5 }
 0x148   : > { %4974 = vperm.xlu0 %9923, %v10437_v46  }
 0x14a   : > { %v10442_v48 = vpop.permute.xlu0 %1720 }
 0x14b   : > { %15386 = vst [vmem:[#allocation46_spill] sm:$0xff] %v10442_v48  ;;  %v10547_v48 = vperm.slane %v10247_v17, 5 }
 0x14d   : > { %15402 = vst [vmem:[#allocation62_spill] sm:$0xff] %v10547_v48 }
 0x14f   : > { %538 = vperm.xlu2 %9575, %v503_v27   ;;  %532 = vperm.xlu1 %9574, %v503_v27  }
 0x150   : > { %5219 = vperm.xlu0 %9923, %v10445_v50   ;;  %v10532_v50 = vperm.slane %v10207_v49, 7 }
 0x152   : > { %v10448_v52 = vpop.permute.xlu0 %4943 }
 0x153   : > { %15388 = vst [vmem:[#allocation48_spill] sm:$0xff] %v10448_v52 }
 0x157   : > { %9577 = vset.pattern.permute.xlu2 %v10236_v12  ;;  %9576 = vset.pattern.permute.xlu1 %v10239_v13 }
 0x158   : > { %5464 = vperm.xlu0 %9923, %v10451_v55  }
 0x15a   : > { %v10456_v29 = vpop.permute.xlu0 %5188 }
 0x15b   : > { %15390 = vst [vmem:[#allocation50_spill] sm:$0xff] %v10456_v29 }
 0x15f   : > { %550 = vperm.xlu2 %9577, %v503_v27   ;;  %544 = vperm.xlu1 %9576, %v503_v27   ;;  %v10476_v27 = vperm.slane %v10314_v60, 4 }
 0x160   : > { %5709 = vperm.xlu0 %9923, %v10459_v59  }
 0x161   : > { %15394 = vst [vmem:[#allocation54_spill] sm:$0xff] %v10476_v27 }
 0x162   : > { %v10462_v28 = vpop.permute.xlu0 %5433 }
 0x163   : > { %15392 = vst [vmem:[#allocation52_spill] sm:$0xff] %v10462_v28  ;;  %v10483_v28 = vpop.permute.xlu2 %293 }
 0x167   : > { %9579 = vset.pattern.permute.xlu2 %v10182_v6  ;;  %9578 = vset.pattern.permute.xlu1 %v10185_v7 }
 0x168   : > { %5954 = vperm.xlu0 %9923, %v10465_v25  }
 0x16a   : > { %v10478_v21 = vpop.permute.xlu0 %5678 }
 0x16b   : > { %15395 = vst [vmem:[#allocation55_spill] sm:$0xff] %v10478_v21  ;;  %v10492_v25 = vpop.permute.xlu2 %305 }
 0x16f   : > { %569 = vperm.xlu2 %9579, %v10473_v22   ;;  %563 = vperm.xlu1 %9578, %v10473_v22  }
 0x170   : > { %6199 = vperm.xlu0 %9923, %v10476_v27   ;;  %v10499_v27 = vpop.permute.xlu1 %281 }
 0x172   : > { %v10485_v52 = vpop.permute.xlu0 %5923 }
 0x173   : > { %15396 = vst [vmem:[#allocation56_spill] sm:$0xff] %v10485_v52  ;;  %v10501_v52 = vpop.permute.xlu2 %324 }
 0x177   : > { %9581 = vset.pattern.permute.xlu2 %v10179_v5  ;;  %9580 = vset.pattern.permute.xlu1 %v10203_v38 }
 0x178   : > { %9928 = vset.pattern.permute.xlu0 %v10172_v2  ;;  %v10506_v56 = vpop.permute.xlu1 %299 }
 0x17a   : > { %v10497_v21 = vpop.permute.xlu0 %6168 }
 0x17b   : > { %15397 = vst [vmem:[#allocation57_spill] sm:$0xff] %v10497_v21  ;;  %v10510_v59 = vpop.permute.xlu2 %336 }
 0x17f   : > { %581 = vperm.xlu2 %9581, %v10473_v22   ;;  %575 = vperm.xlu1 %9580, %v10473_v22  }
 0x180   : > { %263 = vperm.xlu0 %9928, %v10210_v53   ;;  %v10515_v53 = vpop.permute.xlu1 %318 }
 0x183   : > { %v10522_v55 = vpop.permute.xlu2 %354 }
 0x187   : > { %9583 = vset.pattern.permute.xlu2 %v10236_v12  ;;  %9582 = vset.pattern.permute.xlu1 %v10239_v13 }
 0x188   : > { %312 = vperm.xlu0 %9928, %v10265_v30   ;;  %v10527_v47 = vpop.permute.xlu1 %330 }
 0x18a   : > { %v10508_v24 = vpop.permute.xlu0 %526 }
 0x18b   : > { %15398 = vst [vmem:[#allocation58_spill] sm:$0xff] %v10508_v24  ;;  %v10537_v20 = vpop.permute.xlu2 %367  ;;  %v10596_v24 = vperm.slane %v10290_v45, 1 }
 0x18d   : > { %15414 = vst [vmem:[#allocation74_spill] sm:$0xff] %v10596_v24 }
 0x18f   : > { %599 = vperm.xlu2 %9583, %v10473_v22   ;;  %593 = vperm.xlu1 %9582, %v10473_v22  }
 0x190   : > { %557 = vperm.xlu0 %9928, %v10473_v22   ;;  %v10542_v46 = vpop.permute.xlu1 %348 }
 0x192   : > { %v10517_v21 = vpop.permute.xlu0 %771 }
 0x193   : > { %15399 = vst [vmem:[#allocation59_spill] sm:$0xff] %v10517_v21  ;;  %v10549_v49 = vpop.permute.xlu2 %385 }
 0x197   : > { %9585 = vset.pattern.permute.xlu2 %v10185_v7  ;;  %9584 = vset.pattern.permute.xlu1 %v10172_v2 }
 0x198   : > { %802 = vperm.xlu0 %9928, %v10520_v54   ;;  %v10554_v18 = vpop.permute.xlu1 %361 }
 0x19a   : > { %v10529_v29 = vpop.permute.xlu0 %1016 }
 0x19b   : > { %15400 = vst [vmem:[#allocation60_spill] sm:$0xff] %v10529_v29  ;;  %v10561_v58 = vpop.permute.xlu2 %397 }
 0x19c   : > { %15405 = vst [vmem:[#allocation65_spill] sm:$0xff] %v10561_v58 }
 0x19f   : > { %612 = vperm.xlu2 %9585, %v10532_v50   ;;  %606 = vperm.xlu1 %9584, %v10532_v50  }
 0x1a0   : > { %1047 = vperm.xlu0 %9928, %v10535_v42   ;;  %v10566_v29 = vpop.permute.xlu1 %379 }
 0x1a2   : > { %v10544_v37 = vpop.permute.xlu0 %1261 }
 0x1a3   : > { %15401 = vst [vmem:[#allocation61_spill] sm:$0xff] %v10544_v37  ;;  %v10573_v41 = vpop.permute.xlu2 %416 }
 0x1a4   : > { %15408 = vst [vmem:[#allocation68_spill] sm:$0xff] %v10573_v41  ;;  %v3107_v41 = vld [vmem:[#allocation6 + $0x8] sm:$0xff] }
 0x1a7   : > { %9587 = vset.pattern.permute.xlu2 %v10179_v5  ;;  %9586 = vset.pattern.permute.xlu1 %v10203_v38 }
 0x1a8   : > { %1292 = vperm.xlu0 %9928, %v10547_v48  }
 0x1aa   : > { %v10556_v44 = vpop.permute.xlu0 %1506 }
 0x1ab   : > { %15403 = vst [vmem:[#allocation63_spill] sm:$0xff] %v10556_v44  ;;  %v10578_v44 = vpop.permute.xlu1 %391  ;;  %v10585_v37 = vpop.permute.xlu2 %428 }
 0x1ac   : > { %15411 = vst [vmem:[#allocation71_spill] sm:$0xff] %v10585_v37 }
 0x1af   : > { %630 = vperm.xlu2 %9587, %v10532_v50   ;;  %624 = vperm.xlu1 %9586, %v10532_v50  }
 0x1b0   : > { %1537 = vperm.xlu0 %9928, %v10559_v31  }
 0x1b2   : > { %v10568_v16 = vpop.permute.xlu0 %1751 }
 0x1b3   : > { %15406 = vst [vmem:[#allocation66_spill] sm:$0xff] %v10568_v16  ;;  %v3112_v16 = vld [vmem:[#allocation6 + $0x30] sm:$0xff]  ;;  %v10590_v40 = vpop.permute.xlu1 %410  ;;  %v10598_v39 = vpop.permute.xlu2 %446 }
 0x1b4   : > { %v3117_v15 = vpack.c.bf16 %v3113_v43, %v3112_v16  ;;  %15412 = vst [vmem:[#allocation72_spill] sm:$0xff] %v10590_v40  ;;  %v3111_v16 = vld [vmem:[#allocation6 + $0x28] sm:$0xff] }
 0x1b5   : > { %15415 = vst [vmem:[#allocation75_spill] sm:$0xff] %v10598_v39  ;;  %v3116_v43 = vpack.c.bf16 %v3111_v16, %v3110_v19  ;;  %v3108_v19 = vld [vmem:[#allocation6 + $0x10] sm:$0xff]  ;;  %v3109_v16 = vld [vmem:[#allocation6 + $0x18] sm:$0xff] }
 0x1b6   : > { %v4153_v21 = vsel %vm3758_vm1, %v3117_v15, 0 }
 0x1b7   : > { %9589 = vset.pattern.permute.xlu2 %v10239_v13  ;;  %9588 = vset.pattern.permute.xlu1 %v10216_v57 }
 0x1b8   : > { %1782 = vperm.xlu0 %9928, %v10571_v33   ;;  %4159 = vmatpush.bf16.xpose.msra.mxu0 %v4153_v21 }
 0x1b9   : > { %9462 = vmatpush.bf16.xpose.msra.mxu1 %v4153_v21  ;;  %9463 = vmatpush.bf16.xpose.msra.mxu2 %v4153_v21 }
 0x1ba   : > { %v10580_v10 = vpop.permute.xlu0 %4974  ;;  %9464 = vmatpush.bf16.xpose.msra.mxu3 %v4153_v21  ;;  %v10609_v21 = vperm.slane %v10224_v62, 0 }
 0x1bb   : > { %15409 = vst [vmem:[#allocation69_spill] sm:$0xff] %v10580_v10  ;;  %v10603_v15 = vpop.permute.xlu1 %422  ;;  %v10614_v4 = vpop.permute.xlu2 %459 }
 0x1bc   : > { %15416 = vst [vmem:[#allocation76_spill] sm:$0xff] %v10603_v15  ;;  %v3106_v15 = vld [vmem:[#allocation6] sm:$0xff] }
 0x1bd   : > { %15419 = vst [vmem:[#allocation79_spill] sm:$0xff] %v10614_v4 }
 0x1bf   : > { %642 = vperm.xlu2 %9589, %v10532_v50   ;;  %636 = vperm.xlu1 %9588, %v10532_v50  }
 0x1c0   : > { %5005 = vperm.xlu0 %9928, %v10583_v26  }
 0x1c2   : > { %v10593_v10 = vpop.permute.xlu0 %5219 }
 0x1c3   : > { %15413 = vst [vmem:[#allocation73_spill] sm:$0xff] %v10593_v10  ;;  %v4150_v10 = vsel %vm3758_vm1, %v3116_v43, 0  ;;  %v3115_v43 = vpack.c.bf16 %v3109_v16, %v3108_v19  ;;  %v10627_v37 = vpop.permute.xlu2 %477  ;;  %v3114_v19 = vpack.c.bf16 %v3107_v41, %v3106_v15  ;;  %v10648_v15 = vperm.slane %v10314_v60, 5 }
 0x1c4   : > { %4160 = vmatpush.bf16.xpose.msra.mxu0 %v4150_v10  ;;  %9465 = vmatpush.bf16.xpose.msra.mxu1 %v4150_v10  ;;  %15423 = vst [vmem:[#allocation83_spill] sm:$0xff] %v10627_v37 }
 0x1c5   : > { %9466 = vmatpush.bf16.xpose.msra.mxu2 %v4150_v10  ;;  %9467 = vmatpush.bf16.xpose.msra.mxu3 %v4150_v10  ;;  %v4147_v39 = vsel %vm3758_vm1, %v3115_v43, 0  ;;  %v10623_v10 = vperm.slane %v10300_v51, 3  ;;  %v10636_v43 = vperm.slane %v10314_v60, 0  ;;  %15429 = vst [vmem:[#allocation89_spill] sm:$0xff] %v10648_v15 }
 0x1c7   : > { %9591 = vset.pattern.permute.xlu2 %v10185_v7  ;;  %9590 = vset.pattern.permute.xlu1 %v10172_v2  ;;  %15421 = vst [vmem:[#allocation81_spill] sm:$0xff] %v10623_v10 }
 0x1c8   : > { %5250 = vperm.xlu0 %9928, %v10596_v24   ;;  %15425 = vst [vmem:[#allocation85_spill] sm:$0xff] %v10636_v43 }
 0x1ca   : > { %v10606_v34 = vpop.permute.xlu0 %5464 }
 0x1cb   : > { %15417 = vst [vmem:[#allocation77_spill] sm:$0xff] %v10606_v34  ;;  %v10619_v34 = vpop.permute.xlu1 %440 }
 0x1cc   : > { %15420 = vst [vmem:[#allocation80_spill] sm:$0xff] %v10619_v34  ;;  %4161 = vmatpush.bf16.xpose.msra.mxu0 %v4147_v39  ;;  %9468 = vmatpush.bf16.xpose.msra.mxu1 %v4147_v39 }
 0x1cd   : > { %9469 = vmatpush.bf16.xpose.msra.mxu2 %v4147_v39  ;;  %9470 = vmatpush.bf16.xpose.msra.mxu3 %v4147_v39  ;;  %v4144_v39 = vsel %vm3758_vm1, %v3114_v19, 0 }
 0x1cf   : > { %661 = vperm.xlu2 %9591, %v10609_v21   ;;  %655 = vperm.xlu1 %9590, %v10609_v21  }
 0x1d0   : > { %5495 = vperm.xlu0 %9928, %v10612_v9  }
 0x1d2   : > { %v10625_v4 = vpop.permute.xlu0 %5709 }
 0x1d3   : > { %15422 = vst [vmem:[#allocation82_spill] sm:$0xff] %v10625_v4  ;;  %v10632_v16 = vpop.permute.xlu1 %452  ;;  %v10638_v4 = vpop.permute.xlu2 %489 }
 0x1d4   : > { %15424 = vst [vmem:[#allocation84_spill] sm:$0xff] %v10632_v16  ;;  %4162 = vmatpush.bf16.xpose.msra.mxu0 %v4144_v39  ;;  %9471 = vmatpush.bf16.xpose.msra.mxu1 %v4144_v39 }
 0x1d5   : > { %9472 = vmatpush.bf16.xpose.msra.mxu2 %v4144_v39  ;;  %9473 = vmatpush.bf16.xpose.msra.mxu3 %v4144_v39  ;;  %15426 = vst [vmem:[#allocation86_spill] sm:$0xff] %v10638_v4  ;;  %v1827_v39 = vsub.f32 %v10331_v0, %v10188_v8 }
 0x1d7   : > { %9593 = vset.pattern.permute.xlu2 %v10203_v38  ;;  %9592 = vset.pattern.permute.xlu1 %v10182_v6  ;;  %v2083_v16 = vand.u32 2147483647, %v1827_v39  ;;  %v1829_v39 = vsub.f32 %v10499_v27, %v10188_v8 }
 0x1d8   : > { %5740 = vperm.xlu0 %9928, %v10623_v10  }
 0x1d9   : > { %v2339_v34 = vsub.f32 1.0, %v2083_v16 }
 0x1da   : > { %v10640_v37 = vpop.permute.xlu0 %5954 }
 0x1db   : > { %15427 = vst [vmem:[#allocation87_spill] sm:$0xff] %v10640_v37  ;;  %v10645_v41 = vpop.permute.xlu1 %471  ;;  %v10650_v19 = vpop.permute.xlu2 %508  ;;  %v2595_v40 = vmax.f32 %v2339_v34, 0.0 }
 0x1dc   : > { %15428 = vst [vmem:[#allocation88_spill] sm:$0xff] %v10645_v41 }
 0x1dd   : > { %15430 = vst [vmem:[#allocation90_spill] sm:$0xff] %v10650_v19 }
 0x1df   : > { %673 = vperm.xlu2 %9593, %v10609_v21   ;;  %667 = vperm.xlu1 %9592, %v10609_v21  }
 0x1e0   : > { %5985 = vperm.xlu0 %9928, %v10636_v43  }
 0x1e2   : > { %v10657_v37 = vpop.permute.xlu0 %6199 }
 0x1e3   : > { %15431 = vst [vmem:[#allocation91_spill] sm:$0xff] %v10657_v37  ;;  %v10659_v4 = vpop.permute.xlu1 %483  ;;  %v10661_v41 = vpop.permute.xlu2 %520 }
 0x1e4   : > { %15432 = vst [vmem:[#allocation92_spill] sm:$0xff] %v10659_v4 }
 0x1e5   : > { %15433 = vst [vmem:[#allocation93_spill] sm:$0xff] %v10661_v41  ;;  %v2851_v41 = vpack.c.bf16 %v2595_v40, %v2595_v40 }
 0x1e7   : > { %9595 = vset.pattern.permute.xlu2 %v10239_v13  ;;  %9594 = vset.pattern.permute.xlu1 %v10216_v57 }
 0x1e8   : > { %6230 = vperm.xlu0 %9928, %v10648_v15  }
 0x1eb   : > { %v10666_v0 = vpop.permute.xlu1 %501  ;;  %v10669_v58 = vpop.permute.xlu2 %538 }
 0x1ec   : > { %15434 = vst [vmem:[#allocation94_spill] sm:$0xff] %v10666_v0  ;;  %v1828_v0 = vsub.f32 %v10490_v63, %v10188_v8 }
 0x1ed   : > { %15435 = vst [vmem:[#allocation95_spill] sm:$0xff] %v10669_v58  ;;  %v3375_v58 = vunpack.c.l.b16 %v2851_v41 }
 0x1ee   : > { %v2084_v27 = vand.u32 2147483647, %v1828_v0 }
 0x1ef   : > { %691 = vperm.xlu2 %9595, %v10609_v21   ;;  %685 = vperm.xlu1 %9594, %v10609_v21  }
 0x1f0   : > { %9933 = vset.pattern.permute.xlu0 %v10216_v57  ;;  %v2340_v63 = vsub.f32 1.0, %v2084_v27 }
 0x1f2   : > { %v264_v19 = vpop.permute.xlu0 %263  ;;  %v2596_v0 = vmax.f32 %v2340_v63, 0.0 }
 0x1f3   : > { %v1826_v11 = vsub.f32 %v264_v19, %v10188_v8  ;;  %v10678_v34 = vpop.permute.xlu1 %514  ;;  %v10682_v40 = vpop.permute.xlu2 %550 }
 0x1f4   : > { %15436 = vst [vmem:[#allocation96_spill] sm:$0xff] %v10678_v34 }
 0x1f5   : > { %v2082_v37 = vand.u32 2147483647, %v1826_v11  ;;  %v2085_v11 = vand.u32 2147483647, %v1829_v39 }
 0x1f7   : > { %v2338_v16 = vsub.f32 1.0, %v2082_v37  ;;  %9597 = vset.pattern.permute.xlu2 %v10172_v2  ;;  %9596 = vset.pattern.permute.xlu1 %v10236_v12  ;;  %v2341_v14 = vsub.f32 1.0, %v2085_v11 }
 0x1f8   : > { %342 = vperm.xlu0 %9933, %v10265_v30  }
 0x1f9   : > { %v2594_v19 = vmax.f32 %v2338_v16, 0.0  ;;  %v2597_v41 = vmax.f32 %v2341_v14, 0.0 }
 0x1fa   : > { %v10680_v4 = vpop.permute.xlu0 %312 }
 0x1fb   : > { %v2850_v36 = vpack.c.bf16 %v2594_v19, %v2594_v19  ;;  %v10687_v34 = vpop.permute.xlu1 %532  ;;  %v10692_v16 = vpop.permute.xlu2 %569  ;;  %v2853_v19 = vpack.c.bf16 %v2597_v41, %v2597_v41 }
 0x1fc   : > { %15437 = vst [vmem:[#allocation97_spill] sm:$0xff] %v10692_v16 }
 0x1fd   : > { %v3374_v37 = vunpack.c.l.b16 %v2850_v36  ;;  %v1831_v36 = vsub.f32 %v10483_v28, %v10188_v8 }
 0x1ff   : > { %704 = vperm.xlu2 %9597, %v10229_v1   ;;  %697 = vperm.xlu1 %9596, %v10609_v21   ;;  %v3630_v30 = vpack.c.b16 %v3375_v58, %v3374_v37  ;;  %v2852_v58 = vpack.c.bf16 %v2596_v0, %v2596_v0  ;;  %v2087_v27 = vand.u32 2147483647, %v1831_v36  ;;  %v3377_v37 = vunpack.c.l.b16 %v2853_v19 }
 0x200   : > { %587 = vperm.xlu0 %9933, %v10473_v22   ;;  %v1830_v22 = vsub.f32 %v10470_v3, %v10188_v8 }
 0x201   : > { %9328 = vmatmul.msk.bf16.vlgmr.msra.gmra.mxu0 %vm3758_vm1, %v3630_v30  ;;  %v3376_v63 = vunpack.c.l.b16 %v2852_v58  ;;  %v2343_v41 = vsub.f32 1.0, %v2087_v27  ;;  %v1832_v27 = vsub.f32 %v10506_v56, %v10188_v8 }
 0x202   : > { %v10690_v39 = vpop.permute.xlu0 %557  ;;  %v2086_v30 = vand.u32 2147483647, %v1830_v22 }
 0x203   : > { %v10701_v11 = vpop.permute.xlu1 %544  ;;  %v10705_v28 = vpop.permute.xlu2 %581  ;;  %v3631_v16 = vpack.c.b16 %v3377_v37, %v3376_v63  ;;  %v2599_v36 = vmax.f32 %v2343_v41, 0.0 }
 0x204   : > { %15439 = vst [vmem:[#allocation99_spill] sm:$0xff] %v10705_v28  ;;  %v2342_v3 = vsub.f32 1.0, %v2086_v30 }
 0x205   : > { %v2855_v58 = vpack.c.bf16 %v2599_v36, %v2599_v36 }
 0x206   : > { %v2598_v19 = vmax.f32 %v2342_v3, 0.0  ;;  %v2088_v3 = vand.u32 2147483647, %v1832_v27 }
 0x207   : > { %9599 = vset.pattern.permute.xlu2 %v10203_v38  ;;  %9598 = vset.pattern.permute.xlu1 %v10182_v6  ;;  %v3379_v41 = vunpack.c.l.b16 %v2855_v58 }
 0x208   : > { %832 = vperm.xlu0 %9933, %v10520_v54   ;;  %v2854_v37 = vpack.c.bf16 %v2598_v19, %v2598_v19  ;;  %v2344_v56 = vsub.f32 1.0, %v2088_v3  ;;  %v1834_v3 = vsub.f32 %v10680_v4, %v10188_v8 }
 0x20a   : > { %v10703_v14 = vpop.permute.xlu0 %802  ;;  %v3378_v36 = vunpack.c.l.b16 %v2854_v37  ;;  %v2600_v58 = vmax.f32 %v2344_v56, 0.0 }
 0x20b   : > { %15438 = vst [vmem:[#allocation98_spill] sm:$0xff] %v10703_v14  ;;  %v10710_v0 = vpop.permute.xlu1 %563  ;;  %v10715_v22 = vpop.permute.xlu2 %599 }
 0x20c   : > { %15440 = vst [vmem:[#allocation100_spill] sm:$0xff] %v10715_v22 }
 0x20f   : > { %722 = vperm.xlu2 %9599, %v10229_v1   ;;  %716 = vperm.xlu1 %9598, %v10229_v1  }
 0x210   : > { %1077 = vperm.xlu0 %9933, %v10535_v42  }
 0x211   : > { %9329 = vmatmul.msk.bf16.gmra.mxu0 %vm3758_vm1, %v3631_v16  ;;  %v1833_v16 = vsub.f32 %v10492_v25, %v10188_v8 }
 0x212   : > { %v10713_v14 = vpop.permute.xlu0 %1047 }
 0x213   : > { %v10724_v30 = vpop.permute.xlu1 %575  ;;  %v2089_v22 = vand.u32 2147483647, %v1833_v16  ;;  %v10728_v28 = vpop.permute.xlu2 %612  ;;  %v2856_v16 = vpack.c.bf16 %v2600_v58, %v2600_v58 }
 0x214   : > { %15442 = vst [vmem:[#allocation102_spill] sm:$0xff] %v10728_v28 }
 0x215   : > { %v2345_v19 = vsub.f32 1.0, %v2089_v22  ;;  %v3380_v56 = vunpack.c.l.b16 %v2856_v16 }
 0x217   : > { %9601 = vset.pattern.permute.xlu2 %v10216_v57  ;;  %9600 = vset.pattern.permute.xlu1 %v10179_v5  ;;  %v2601_v27 = vmax.f32 %v2345_v19, 0.0  ;;  %v2090_v19 = vand.u32 2147483647, %v1834_v3 }
 0x218   : > { %1322 = vperm.xlu0 %9933, %v10547_v48   ;;  %v3632_v48 = vpack.c.b16 %v3379_v41, %v3378_v36 }
 0x219   : > { %v2857_v22 = vpack.c.bf16 %v2601_v27, %v2601_v27  ;;  %v2346_v4 = vsub.f32 1.0, %v2090_v19 }
 0x21a   : > { %v10726_v63 = vpop.permute.xlu0 %1292 }
 0x21b   : > { %15441 = vst [vmem:[#allocation101_spill] sm:$0xff] %v10726_v63  ;;  %v10733_v25 = vpop.permute.xlu1 %593  ;;  %v10738_v37 = vpop.permute.xlu2 %630  ;;  %v3381_v58 = vunpack.c.l.b16 %v2857_v22  ;;  %v2602_v16 = vmax.f32 %v2346_v4, 0.0 }
 0x21c   : > { %15443 = vst [vmem:[#allocation103_spill] sm:$0xff] %v10733_v25 }
 0x21d   : > { %15445 = vst [vmem:[#allocation105_spill] sm:$0xff] %v10738_v37  ;;  %v2858_v19 = vpack.c.bf16 %v2602_v16, %v2602_v16 }
 0x21f   : > { %734 = vperm.xlu2 %9601, %v10229_v1   ;;  %728 = vperm.xlu1 %9600, %v10229_v1  }
 0x220   : > { %1567 = vperm.xlu0 %9933, %v10559_v31  }
 0x221   : > { %9330 = vmatmul.msk.bf16.gmra.mxu0 %vm3758_vm1, %v3632_v48  ;;  %v1835_v48 = vsub.f32 %v10515_v53, %v10188_v8 }
 0x222   : > { %v10736_v63 = vpop.permute.xlu0 %1537 }
 0x223   : > { %15444 = vst [vmem:[#allocation104_spill] sm:$0xff] %v10736_v63  ;;  %v10747_v41 = vpop.permute.xlu1 %606  ;;  %v2091_v63 = vand.u32 2147483647, %v1835_v48  ;;  %v10751_v31 = vpop.permute.xlu2 %642  ;;  %v1837_v48 = vsub.f32 %v10527_v47, %v10188_v8 }
 0x224   : > { %15446 = vst [vmem:[#allocation106_spill] sm:$0xff] %v10747_v41 }
 0x225   : > { %15448 = vst [vmem:[#allocation108_spill] sm:$0xff] %v10751_v31  ;;  %v2347_v27 = vsub.f32 1.0, %v2091_v63  ;;  %v2093_v4 = vand.u32 2147483647, %v1837_v48 }
 0x227   : > { %9603 = vset.pattern.permute.xlu2 %v10172_v2  ;;  %9602 = vset.pattern.permute.xlu1 %v10236_v12  ;;  %v2603_v3 = vmax.f32 %v2347_v27, 0.0  ;;  %v3382_v27 = vunpack.c.l.b16 %v2858_v19 }
 0x228   : > { %1812 = vperm.xlu0 %9933, %v10571_v33   ;;  %v3633_v33 = vpack.c.b16 %v3381_v58, %v3380_v56 }
 0x229   : > { %v2859_v63 = vpack.c.bf16 %v2603_v3, %v2603_v3 }
 0x22a   : > { %v10749_v36 = vpop.permute.xlu0 %1782 }
 0x22b   : > { %15447 = vst [vmem:[#allocation107_spill] sm:$0xff] %v10749_v36  ;;  %v10756_v53 = vpop.permute.xlu1 %624  ;;  %v662_v22 = vpop.permute.xlu2 %661 }
 0x22c   : > { %15449 = vst [vmem:[#allocation109_spill] sm:$0xff] %v10756_v53 }
 0x22f   : > { %753 = vperm.xlu2 %9603, %v10400_v32   ;;  %746 = vperm.xlu1 %9602, %v10229_v1   ;;  %v1891_v1 = vsub.f32 %v662_v22, %v10188_v8 }
 0x230   : > { %5035 = vperm.xlu0 %9933, %v10583_v26   ;;  %v2349_v26 = vsub.f32 1.0, %v2093_v4 }
 0x231   : > { %9331 = vmatmul.msk.bf16.gmra.mxu0 %vm3758_vm1, %v3633_v33  ;;  %v1836_v33 = vsub.f32 %v10501_v52, %v10188_v8  ;;  %v2147_v47 = vand.u32 2147483647, %v1891_v1 }
 0x232   : > { %v10759_v36 = vpop.permute.xlu0 %5005  ;;  %v2605_v19 = vmax.f32 %v2349_v26, 0.0 }
 0x233   : > { %15450 = vst [vmem:[#allocation110_spill] sm:$0xff] %v10759_v36  ;;  %v10769_v56 = vpop.permute.xlu1 %636  ;;  %v2092_v16 = vand.u32 2147483647, %v1836_v33  ;;  %v3383_v36 = vunpack.c.l.b16 %v2859_v63 }
 0x234   : > { %15451 = vst [vmem:[#allocation111_spill] sm:$0xff] %v10769_v56  ;;  %v2861_v37 = vpack.c.bf16 %v2605_v19, %v2605_v19 }
 0x235   : > { %v3634_v22 = vpack.c.b16 %v3383_v36, %v3382_v27  ;;  %v2348_v52 = vsub.f32 1.0, %v2092_v16 }
 0x237   : > { %9605 = vset.pattern.permute.xlu2 %v10182_v6  ;;  %9604 = vset.pattern.permute.xlu1 %v10185_v7  ;;  %v2604_v63 = vmax.f32 %v2348_v52, 0.0 }
 0x238   : > { %5280 = vperm.xlu0 %9933, %v10596_v24   ;;  %v2403_v24 = vsub.f32 1.0, %v2147_v47 }
 0x239   : > { %v674_v4 = vpop.permute.xlu2 %673  ;;  %v2860_v16 = vpack.c.bf16 %v2604_v63, %v2604_v63 }
 0x23a   : > { %v10771_v58 = vpop.permute.xlu0 %5250  ;;  %v2659_v1 = vmax.f32 %v2403_v24, 0.0  ;;  %v1893_v27 = vsub.f32 %v674_v4, %v10188_v8 }
 0x23b   : > { %15452 = vst [vmem:[#allocation112_spill] sm:$0xff] %v10771_v58 }
 0x23c   : > { %v2915_v36 = vpack.c.bf16 %v2659_v1, %v2659_v1  ;;  %v2149_v24 = vand.u32 2147483647, %v1893_v27 }
 0x23e   : > { %v3439_v26 = vunpack.c.l.b16 %v2915_v36 }
 0x23f   : > { %765 = vperm.xlu2 %9605, %v10400_v32   ;;  %759 = vperm.xlu1 %9604, %v10400_v32  }
 0x240   : > { %5525 = vperm.xlu0 %9933, %v10612_v9  }
 0x241   : > { %9332 = vmatmul.msk.bf16.gmra.mxu0 %vm3758_vm1, %v3634_v22  ;;  %v656_v3 = vpop.permute.xlu1 %655 }
 0x242   : > { %v1890_v58 = vsub.f32 %v656_v3, %v10188_v8  ;;  %v10778_v48 = vpop.permute.xlu0 %5495  ;;  %v3385_v3 = vunpack.c.l.b16 %v2861_v37 }
 0x243   : > { %15453 = vst [vmem:[#allocation113_spill] sm:$0xff] %v10778_v48  ;;  %v2405_v48 = vsub.f32 1.0, %v2149_v24 }
 0x244   : > { %v2146_v33 = vand.u32 2147483647, %v1890_v58 }
 0x245   : > { %v2661_v63 = vmax.f32 %v2405_v48, 0.0 }
 0x246   : > { %v2402_v31 = vsub.f32 1.0, %v2146_v33  ;;  %v3384_v33 = vunpack.c.l.b16 %v2860_v16 }
 0x247   : > { %9607 = vset.pattern.permute.xlu2 %v10216_v57  ;;  %9606 = vset.pattern.permute.xlu1 %v10179_v5 }
 0x248   : > { %v2658_v47 = vmax.f32 %v2402_v31, 0.0  ;;  %5770 = vperm.xlu0 %9933, %v10623_v10   ;;  %v3635_v1 = vpack.c.b16 %v3385_v3, %v3384_v33 }
 0x24a   : > { %v2914_v22 = vpack.c.bf16 %v2658_v47, %v2658_v47  ;;  %v10784_v52 = vpop.permute.xlu0 %5740  ;;  %v2917_v47 = vpack.c.bf16 %v2661_v63, %v2661_v63  ;;  %v1840_v63 = vsub.f32 %v10542_v46, %v10188_v8 }
 0x24b   : > { %15454 = vst [vmem:[#allocation114_spill] sm:$0xff] %v10784_v52  ;;  %v1847_v52 = vsub.f32 %v10578_v44, %v10188_v8 }
 0x24c   : > { %v3438_v58 = vunpack.c.l.b16 %v2914_v22  ;;  %v3441_v3 = vunpack.c.l.b16 %v2917_v47 }
 0x24e   : > { %v3662_v19 = vpack.c.b16 %v3439_v26, %v3438_v58  ;;  %v1838_v58 = vsub.f32 %v10510_v59, %v10188_v8 }
 0x24f   : > { %783 = vperm.xlu2 %9607, %v10400_v32   ;;  %777 = vperm.xlu1 %9606, %v10400_v32  }
 0x250   : > { %6015 = vperm.xlu0 %9933, %v10636_v43   ;;  %9360 = vmatmul.msk.bf16.vlgmr.msra.gmra.mxu1 %vm3758_vm1, %v3662_v19  ;;  %v2094_v33 = vand.u32 2147483647, %v1838_v58 }
 0x251   : > { %9333 = vmatmul.msk.bf16.gmra.mxu0 %vm3758_vm1, %v3635_v1  ;;  %v668_v31 = vpop.permute.xlu1 %667 }
 0x252   : > { %v1892_v37 = vsub.f32 %v668_v31, %v10188_v8  ;;  %v10792_v27 = vpop.permute.xlu0 %5985  ;;  %v2350_v19 = vsub.f32 1.0, %v2094_v33 }
 0x253   : > { %15455 = vst [vmem:[#allocation115_spill] sm:$0xff] %v10792_v27 }
 0x254   : > { %v2148_v4 = vand.u32 2147483647, %v1892_v37  ;;  %v2606_v31 = vmax.f32 %v2350_v19, 0.0 }
 0x256   : > { %v2404_v36 = vsub.f32 1.0, %v2148_v4  ;;  %v2862_v59 = vpack.c.bf16 %v2606_v31, %v2606_v31  ;;  %v10828_v31 = vperm.slane %v10247_v17, 1 }
 0x257   : > { %9609 = vset.pattern.permute.xlu2 %v10236_v12  ;;  %9608 = vset.pattern.permute.xlu1 %v10239_v13 }
 0x258   : > { %v2660_v16 = vmax.f32 %v2404_v36, 0.0  ;;  %6260 = vperm.xlu0 %9933, %v10648_v15   ;;  %v1841_v36 = vsub.f32 %v10522_v55, %v10188_v8  ;;  %v3386_v46 = vunpack.c.l.b16 %v2862_v59 }
 0x25a   : > { %v2916_v22 = vpack.c.bf16 %v2660_v16, %v2660_v16  ;;  %v10801_v48 = vpop.permute.xlu0 %6230 }
 0x25b   : > { %15456 = vst [vmem:[#allocation116_spill] sm:$0xff] %v10801_v48  ;;  %v10912_v48 = vperm.slane %v10224_v62, 5 }
 0x25c   : > { %v3440_v26 = vunpack.c.l.b16 %v2916_v22  ;;  %v2096_v22 = vand.u32 2147483647, %v1840_v63 }
 0x25e   : > { %v3663_v24 = vpack.c.b16 %v3441_v3, %v3440_v26  ;;  %v10819_v26 = vperm.slane %v10224_v62, 4  ;;  %v2352_v33 = vsub.f32 1.0, %v2096_v22 }
 0x25f   : > { %795 = vperm.xlu2 %9609, %v10400_v32   ;;  %789 = vperm.xlu1 %9608, %v10400_v32  }
 0x260   : > { %9938 = vset.pattern.permute.xlu0 %v10182_v6  ;;  %9361 = vmatmul.msk.bf16.gmra.mxu1 %vm3758_vm1, %v3663_v24  ;;  %v2097_v24 = vand.u32 2147483647, %v1841_v36  ;;  %v1843_v36 = vsub.f32 %v10537_v20, %v10188_v8 }
 0x262   : > { %v2353_v55 = vsub.f32 1.0, %v2097_v24 }
 0x267   : > { %9611 = vset.pattern.permute.xlu2 %v10182_v6  ;;  %9610 = vset.pattern.permute.xlu1 %v10185_v7 }
 0x268   : > { %373 = vperm.xlu0 %9938, %v10317_v61  }
 0x26a   : > { %v343_v1 = vpop.permute.xlu0 %342 }
 0x26b   : > { %v1839_v32 = vsub.f32 %v343_v1, %v10188_v8 }
 0x26d   : > { %v2095_v37 = vand.u32 2147483647, %v1839_v32  ;;  %v2608_v32 = vmax.f32 %v2352_v33, 0.0 }
 0x26f   : > { %v2351_v4 = vsub.f32 1.0, %v2095_v37  ;;  %814 = vperm.xlu2 %9611, %v10520_v54   ;;  %808 = vperm.xlu1 %9610, %v10520_v54   ;;  %v2609_v37 = vmax.f32 %v2353_v55, 0.0  ;;  %v2864_v63 = vpack.c.bf16 %v2608_v32, %v2608_v32  ;;  %v10849_v32 = vperm.slane %v10256_v23, 3 }
 0x270   : > { %618 = vperm.xlu0 %9938, %v10532_v50  }
 0x271   : > { %v2607_v47 = vmax.f32 %v2351_v4, 0.0  ;;  %v1842_v4 = vsub.f32 %v10554_v18, %v10188_v8  ;;  %v2865_v59 = vpack.c.bf16 %v2609_v37, %v2609_v37  ;;  %v3388_v22 = vunpack.c.l.b16 %v2864_v63  ;;  %15459 = vst [vmem:[#allocation119_spill] sm:$0xff] %v10849_v32 }
 0x272   : > { %v10816_v16 = vpop.permute.xlu0 %587 }
 0x273   : > { %v2863_v3 = vpack.c.bf16 %v2607_v47, %v2607_v47  ;;  %v3389_v24 = vunpack.c.l.b16 %v2865_v59 }
 0x275   : > { %v3387_v58 = vunpack.c.l.b16 %v2863_v3  ;;  %v2098_v3 = vand.u32 2147483647, %v1842_v4  ;;  %v3637_v33 = vpack.c.b16 %v3389_v24, %v3388_v22  ;;  %v10857_v22 = vperm.slane %v10275_v35, 0 }
 0x277   : > { %9613 = vset.pattern.permute.xlu2 %v10179_v5  ;;  %9612 = vset.pattern.permute.xlu1 %v10203_v38  ;;  %v3636_v19 = vpack.c.b16 %v3387_v58, %v3386_v46  ;;  %v10840_v46 = vperm.slane %v10247_v17, 6  ;;  %v2099_v58 = vand.u32 2147483647, %v1843_v36  ;;  %v2354_v18 = vsub.f32 1.0, %v2098_v3  ;;  %15461 = vst [vmem:[#allocation121_spill] sm:$0xff] %v10857_v22 }
 0x278   : > { %863 = vperm.xlu0 %9938, %v10819_v26  }
 0x279   : > { %9334 = vmatmul.msk.bf16.gmra.mxu0 %vm3758_vm1, %v3636_v19  ;;  %15457 = vst [vmem:[#allocation117_spill] sm:$0xff] %v10840_v46  ;;  %v2355_v19 = vsub.f32 1.0, %v2099_v58  ;;  %v2610_v55 = vmax.f32 %v2354_v18, 0.0  ;;  %v10866_v58 = vperm.slane %v10275_v35, 5 }
 0x27a   : > { %v10825_v1 = vpop.permute.xlu0 %832 }
 0x27b   : > { %v2611_v37 = vmax.f32 %v2355_v19, 0.0  ;;  %v2866_v63 = vpack.c.bf16 %v2610_v55, %v2610_v55  ;;  %15463 = vst [vmem:[#allocation123_spill] sm:$0xff] %v10866_v58  ;;  %v10882_v55 = vperm.slane %v10290_v45, 7 }
 0x27d   : > { %v2867_v4 = vpack.c.bf16 %v2611_v37, %v2611_v37  ;;  %v3390_v36 = vunpack.c.l.b16 %v2866_v63  ;;  %15467 = vst [vmem:[#allocation127_spill] sm:$0xff] %v10882_v55  ;;  %v10890_v63 = vperm.slane %v10300_v51, 4 }
 0x27f   : > { %826 = vperm.xlu2 %9613, %v10520_v54   ;;  %820 = vperm.xlu1 %9612, %v10520_v54   ;;  %v3391_v3 = vunpack.c.l.b16 %v2867_v4  ;;  %15469 = vst [vmem:[#allocation129_spill] sm:$0xff] %v10890_v63  ;;  %v10896_v4 = vperm.slane %v10314_v60, 1 }
 0x280   : > { %1108 = vperm.xlu0 %9938, %v10828_v31  }
 0x281   : > { %v3638_v24 = vpack.c.b16 %v3391_v3, %v3390_v36  ;;  %15470 = vst [vmem:[#allocation130_spill] sm:$0xff] %v10896_v4  ;;  %v10904_v3 = vperm.slane %v10314_v60, 6 }
 0x282   : > { %v10837_v47 = vpop.permute.xlu0 %1077 }
 0x283   : > { %15472 = vst [vmem:[#allocation132_spill] sm:$0xff] %v10904_v3 }
 0x287   : > { %9615 = vset.pattern.permute.xlu2 %v10236_v12  ;;  %9614 = vset.pattern.permute.xlu1 %v10239_v13 }
 0x288   : > { %1353 = vperm.xlu0 %9938, %v10840_v46  }
 0x289   : > { %9335 = vmatmul.msk.bf16.gmra.mxu0 %vm3758_vm1, %v3637_v33  ;;  %v10874_v33 = vperm.slane %v10290_v45, 2 }
 0x28a   : > { %v10846_v20 = vpop.permute.xlu0 %1322 }
 0x28b   : > { %15458 = vst [vmem:[#allocation118_spill] sm:$0xff] %v10846_v20 }
 0x28c   : > { %15465 = vst [vmem:[#allocation125_spill] sm:$0xff] %v10874_v33 }
 0x28f   : > { %844 = vperm.xlu2 %9615, %v10520_v54   ;;  %838 = vperm.xlu1 %9614, %v10520_v54  }
 0x290   : > { %1598 = vperm.xlu0 %9938, %v10849_v32  }
 0x292   : > { %v10854_v59 = vpop.permute.xlu0 %1567 }
 0x293   : > { %15460 = vst [vmem:[#allocation120_spill] sm:$0xff] %v10854_v59 }
 0x297   : > { %9617 = vset.pattern.permute.xlu2 %v10185_v7  ;;  %9616 = vset.pattern.permute.xlu1 %v10172_v2 }
 0x298   : > { %4821 = vperm.xlu0 %9938, %v10857_v22  }
 0x299   : > { %9336 = vmatmul.msk.bf16.gmra.mxu0 %vm3758_vm1, %v3638_v24 }
 0x29a   : > { %v10863_v54 = vpop.permute.xlu0 %1812 }
 0x29b   : > { %15462 = vst [vmem:[#allocation122_spill] sm:$0xff] %v10863_v54 }
 0x29f   : > { %857 = vperm.xlu2 %9617, %v10819_v26   ;;  %851 = vperm.xlu1 %9616, %v10819_v26  }
 0x2a0   : > { %5066 = vperm.xlu0 %9938, %v10866_v58  }
 0x2a2   : > { %v10871_v18 = vpop.permute.xlu0 %5035 }
 0x2a3   : > { %15464 = vst [vmem:[#allocation124_spill] sm:$0xff] %v10871_v18 }
 0x2a7   : > { %9619 = vset.pattern.permute.xlu2 %v10179_v5  ;;  %9618 = vset.pattern.permute.xlu1 %v10203_v38 }
 0x2a8   : > { %5311 = vperm.xlu0 %9938, %v10874_v33  }
 0x2aa   : > { %v10879_v19 = vpop.permute.xlu0 %5280 }
 0x2ab   : > { %15466 = vst [vmem:[#allocation126_spill] sm:$0xff] %v10879_v19 }
 0x2af   : > { %875 = vperm.xlu2 %9619, %v10819_v26   ;;  %869 = vperm.xlu1 %9618, %v10819_v26  }
 0x2b0   : > { %5556 = vperm.xlu0 %9938, %v10882_v55  }
 0x2b2   : > { %v10887_v37 = vpop.permute.xlu0 %5525 }
 0x2b3   : > { %15468 = vst [vmem:[#allocation128_spill] sm:$0xff] %v10887_v37 }
 0x2b7   : > { %9621 = vset.pattern.permute.xlu2 %v10239_v13  ;;  %9620 = vset.pattern.permute.xlu1 %v10216_v57 }
 0x2b8   : > { %5801 = vperm.xlu0 %9938, %v10890_v63  }
 0x2ba   : > { %v10898_v36 = vpop.permute.xlu0 %5770 }
 0x2bb   : > { %15471 = vst [vmem:[#allocation131_spill] sm:$0xff] %v10898_v36  ;;  %v1845_v36 = vsub.f32 %v10566_v29, %v10188_v8  ;;  %v1846_v29 = vsub.f32 %v10549_v49, %v10188_v8 }
 0x2bd   : > { %v2101_v37 = vand.u32 2147483647, %v1845_v36 }
 0x2bf   : > { %887 = vperm.xlu2 %9621, %v10819_v26   ;;  %881 = vperm.xlu1 %9620, %v10819_v26   ;;  %v2357_v62 = vsub.f32 1.0, %v2101_v37 }
 0x2c0   : > { %6046 = vperm.xlu0 %9938, %v10896_v4  }
 0x2c2   : > { %v10906_v24 = vpop.permute.xlu0 %6015 }
 0x2c3   : > { %15473 = vst [vmem:[#allocation133_spill] sm:$0xff] %v10906_v24  ;;  %v2613_v24 = vmax.f32 %v2357_v62, 0.0 }
 0x2c7   : > { %9623 = vset.pattern.permute.xlu2 %v10185_v7  ;;  %9622 = vset.pattern.permute.xlu1 %v10172_v2 }
 0x2c8   : > { %6291 = vperm.xlu0 %9938, %v10904_v3  }
 0x2ca   : > { %v10917_v27 = vpop.permute.xlu0 %6260 }
 0x2cb   : > { %15474 = vst [vmem:[#allocation134_spill] sm:$0xff] %v10917_v27 }
 0x2cf   : > { %906 = vperm.xlu2 %9623, %v10912_v48   ;;  %900 = vperm.xlu1 %9622, %v10912_v48  }
 0x2d0   : > { %9943 = vset.pattern.permute.xlu0 %v10236_v12 }
 0x2d7   : > { %9625 = vset.pattern.permute.xlu2 %v10203_v38  ;;  %9624 = vset.pattern.permute.xlu1 %v10182_v6 }
 0x2d8   : > { %403 = vperm.xlu0 %9943, %v10317_v61   ;;  %v2869_v61 = vpack.c.bf16 %v2613_v24, %v2613_v24 }
 0x2da   : > { %v374_v18 = vpop.permute.xlu0 %373  ;;  %v3393_v10 = vunpack.c.l.b16 %v2869_v61 }
 0x2db   : > { %v1844_v15 = vsub.f32 %v374_v18, %v10188_v8  ;;  %v2103_v18 = vand.u32 2147483647, %v1847_v52 }
 0x2dd   : > { %v2100_v43 = vand.u32 2147483647, %v1844_v15  ;;  %v2102_v15 = vand.u32 2147483647, %v1846_v29  ;;  %v2359_v44 = vsub.f32 1.0, %v2103_v18  ;;  %v15478_v18 = vld [vmem:[#allocation12_spill] sm:$0xff] }
 0x2df   : > { %v2356_v27 = vsub.f32 1.0, %v2100_v43  ;;  %918 = vperm.xlu2 %9625, %v10912_v48   ;;  %912 = vperm.xlu1 %9624, %v10912_v48  }
 0x2e0   : > { %648 = vperm.xlu0 %9943, %v10532_v50   ;;  %v2358_v50 = vsub.f32 1.0, %v2102_v15 }
 0x2e1   : > { %v2612_v37 = vmax.f32 %v2356_v27, 0.0  ;;  %v2615_v27 = vmax.f32 %v2359_v44, 0.0 }
 0x2e2   : > { %v10932_v36 = vpop.permute.xlu0 %618  ;;  %v2614_v24 = vmax.f32 %v2358_v50, 0.0  ;;  %v10974_v50 = vpop.permute.xlu1 %685 }
 0x2e3   : > { %15475 = vst [vmem:[#allocation135_spill] sm:$0xff] %v10932_v36  ;;  %v2868_v62 = vpack.c.bf16 %v2612_v37, %v2612_v37  ;;  %v2871_v52 = vpack.c.bf16 %v2615_v27, %v2615_v27 }
 0x2e4   : > { %v2870_v29 = vpack.c.bf16 %v2614_v24, %v2614_v24  ;;  %v10978_v24 = vpop.permute.xlu2 %691 }
 0x2e5   : > { %v3392_v9 = vunpack.c.l.b16 %v2868_v62 }
 0x2e7   : > { %9627 = vset.pattern.permute.xlu2 %v10239_v13  ;;  %9626 = vset.pattern.permute.xlu1 %v10216_v57  ;;  %v3639_v43 = vpack.c.b16 %v3393_v10, %v3392_v9  ;;  %v3395_v9 = vunpack.c.l.b16 %v2871_v52  ;;  %v3394_v10 = vunpack.c.l.b16 %v2870_v29 }
 0x2e8   : > { %893 = vperm.xlu0 %9943, %v10819_v26  }
 0x2e9   : > { %9337 = vmatmul.msk.bf16.gmra.mxu0 %vm3758_vm1, %v3639_v43  ;;  %v3640_v26 = vpack.c.b16 %v3395_v9, %v3394_v10  ;;  %v15485_v10 = vld [vmem:[#allocation37_spill] sm:$0xff] }
 0x2ea   : > { %v10938_v49 = vpop.permute.xlu0 %863  ;;  %v10983_v52 = vpop.permute.xlu1 %697 }
 0x2eb   : > { %15476 = vst [vmem:[#allocation136_spill] sm:$0xff] %v10938_v49 }
 0x2ec   : > { %v10987_v9 = vpop.permute.xlu2 %704 }
 0x2ef   : > { %936 = vperm.xlu2 %9627, %v10912_v48   ;;  %930 = vperm.xlu1 %9626, %v10912_v48  }
 0x2f0   : > { %1138 = vperm.xlu0 %9943, %v10828_v31  }
 0x2f2   : > { %v10943_v61 = vpop.permute.xlu0 %1108 }
 0x2f7   : > { %9629 = vset.pattern.permute.xlu2 %v10172_v2  ;;  %9628 = vset.pattern.permute.xlu1 %v10236_v12 }
 0x2f8   : > { %1383 = vperm.xlu0 %9943, %v10840_v46  }
 0x2f9   : > { %9338 = vmatmul.msk.bf16.gmra.mxu0 %vm3758_vm1, %v3640_v26  ;;  %v10992_v26 = vpop.permute.xlu1 %716 }
 0x2fa   : > { %v10949_v37 = vpop.permute.xlu0 %1353 }
 0x2fb   : > { %15477 = vst [vmem:[#allocation137_spill] sm:$0xff] %v10949_v37 }
 0x2ff   : > { %949 = vperm.xlu2 %9629, %v15478_v18   ;;  %942 = vperm.xlu1 %9628, %v10912_v48  }
 0x300   : > { %1628 = vperm.xlu0 %9943, %v10849_v32  }
 0x302   : > { %v10954_v62 = vpop.permute.xlu0 %1598 }
 0x303   : > { %15479 = vst [vmem:[#allocation12_spill] sm:$0xff] %v10954_v62 }
 0x307   : > { %9631 = vset.pattern.permute.xlu2 %v10203_v38  ;;  %9630 = vset.pattern.permute.xlu1 %v10182_v6 }
 0x308   : > { %4851 = vperm.xlu0 %9943, %v10857_v22  }
 0x30a   : > { %v10959_v15 = vpop.permute.xlu0 %4821 }
 0x30b   : > { %15480 = vst [vmem:[#allocation138_spill] sm:$0xff] %v10959_v15 }
 0x30f   : > { %967 = vperm.xlu2 %9631, %v15478_v18   ;;  %961 = vperm.xlu1 %9630, %v15478_v18  }
 0x310   : > { %5096 = vperm.xlu0 %9943, %v10866_v58  }
 0x312   : > { %v10964_v44 = vpop.permute.xlu0 %5066 }
 0x313   : > { %15481 = vst [vmem:[#allocation139_spill] sm:$0xff] %v10964_v44 }
 0x317   : > { %9633 = vset.pattern.permute.xlu2 %v10216_v57  ;;  %9632 = vset.pattern.permute.xlu1 %v10179_v5 }
 0x318   : > { %5341 = vperm.xlu0 %9943, %v10874_v33  }
 0x31a   : > { %v10969_v43 = vpop.permute.xlu0 %5311 }
 0x31b   : > { %15482 = vst [vmem:[#allocation140_spill] sm:$0xff] %v10969_v43  ;;  %v10994_v43 = vpop.permute.xlu2 %722 }
 0x31f   : > { %979 = vperm.xlu2 %9633, %v15478_v18   ;;  %973 = vperm.xlu1 %9632, %v15478_v18  }
 0x320   : > { %5586 = vperm.xlu0 %9943, %v10882_v55  }
 0x322   : > { %v10976_v27 = vpop.permute.xlu0 %5556 }
 0x323   : > { %15483 = vst [vmem:[#allocation141_spill] sm:$0xff] %v10976_v27  ;;  %v11003_v15 = vpop.permute.xlu2 %734 }
 0x327   : > { %9635 = vset.pattern.permute.xlu2 %v10172_v2  ;;  %9634 = vset.pattern.permute.xlu1 %v10236_v12 }
 0x328   : > { %5831 = vperm.xlu0 %9943, %v10890_v63  }
 0x32a   : > { %v10985_v29 = vpop.permute.xlu0 %5801 }
 0x32b   : > { %15484 = vst [vmem:[#allocation142_spill] sm:$0xff] %v10985_v29  ;;  %v11001_v29 = vpop.permute.xlu1 %728  ;;  %v11014_v55 = vpop.permute.xlu2 %753 }
 0x32f   : > { %998 = vperm.xlu2 %9635, %v15485_v10   ;;  %991 = vperm.xlu1 %9634, %v15478_v18  }
 0x330   : > { %6076 = vperm.xlu0 %9943, %v10896_v4  }
 0x332   : > { %v10996_v44 = vpop.permute.xlu0 %6046 }
 0x333   : > { %15486 = vst [vmem:[#allocation37_spill] sm:$0xff] %v10996_v44  ;;  %v15488_v44 = vld [vmem:[#allocation65_spill] sm:$0xff]  ;;  %v11012_v63 = vpop.permute.xlu1 %746  ;;  %v11022_v22 = vpop.permute.xlu2 %765 }
 0x334   : > { %v1848_v4 = vsub.f32 %v15488_v44, %v10188_v8 }
 0x336   : > { %v2104_v27 = vand.u32 2147483647, %v1848_v4  ;;  %v15490_v4 = vld [vmem:[#allocation72_spill] sm:$0xff] }
 0x337   : > { %9637 = vset.pattern.permute.xlu2 %v10182_v6  ;;  %9636 = vset.pattern.permute.xlu1 %v10185_v7  ;;  %v1850_v62 = vsub.f32 %v15490_v4, %v10188_v8 }
 0x338   : > { %6321 = vperm.xlu0 %9943, %v10904_v3   ;;  %v15489_v3 = vld [vmem:[#allocation26_spill] sm:$0xff]  ;;  %v2360_v19 = vsub.f32 1.0, %v2104_v27  ;;  %v15491_v27 = vld [vmem:[#allocation68_spill] sm:$0xff] }
 0x339   : > { %v1851_v59 = vsub.f32 %v15491_v27, %v10188_v8 }
 0x33a   : > { %v11008_v18 = vpop.permute.xlu0 %6291  ;;  %v2616_v54 = vmax.f32 %v2360_v19, 0.0 }
 0x33b   : > { %15487 = vst [vmem:[#allocation143_spill] sm:$0xff] %v11008_v18  ;;  %v11019_v33 = vpop.permute.xlu1 %759  ;;  %v2107_v4 = vand.u32 2147483647, %v1851_v59 }
 0x33f   : > { %1010 = vperm.xlu2 %9637, %v15485_v10   ;;  %1004 = vperm.xlu1 %9636, %v15485_v10  }
 0x340   : > { %9948 = vset.pattern.permute.xlu0 %v10179_v5 }
 0x343   : > { %v11031_v32 = vpop.permute.xlu1 %777 }
 0x347   : > { %9639 = vset.pattern.permute.xlu2 %v10216_v57  ;;  %9638 = vset.pattern.permute.xlu1 %v10179_v5 }
 0x348   : > { %434 = vperm.xlu0 %9948, %v15489_v3   ;;  %v2872_v3 = vpack.c.bf16 %v2616_v54, %v2616_v54  ;;  %v2363_v54 = vsub.f32 1.0, %v2107_v4  ;;  %v15496_v4 = vld [vmem:[#allocation71_spill] sm:$0xff] }
 0x34a   : > { %v404_v58 = vpop.permute.xlu0 %403  ;;  %v3396_v20 = vunpack.c.l.b16 %v2872_v3  ;;  %v2619_v3 = vmax.f32 %v2363_v54, 0.0 }
 0x34b   : > { %v1849_v18 = vsub.f32 %v404_v58, %v10188_v8  ;;  %v11040_v27 = vpop.permute.xlu1 %789 }
 0x34d   : > { %v2105_v44 = vand.u32 2147483647, %v1849_v18  ;;  %v2106_v18 = vand.u32 2147483647, %v1850_v62 }
 0x34f   : > { %v2361_v60 = vsub.f32 1.0, %v2105_v44  ;;  %1028 = vperm.xlu2 %9639, %v15485_v10   ;;  %1022 = vperm.xlu1 %9638, %v15485_v10   ;;  %v11035_v44 = vpop.permute.xlu2 %783  ;;  %v2362_v49 = vsub.f32 1.0, %v2106_v18 }
 0x350   : > { %679 = vperm.xlu0 %9948, %v10609_v21  }
 0x351   : > { %v2617_v58 = vmax.f32 %v2361_v60, 0.0  ;;  %v11043_v60 = vpop.f32.mrf.mxu0  ;;  %v2618_v59 = vmax.f32 %v2362_v49, 0.0  ;;  %v1853_v49 = vsub.f32 %v15496_v4, %v10188_v8 }
 0x352   : > { %v11033_v19 = vpop.permute.xlu0 %648  ;;  %15493 = vst [vmem:[#allocation26_spill] sm:$0xff] %v11043_v60 }
 0x353   : > { %15492 = vst [vmem:[#allocation65_spill] sm:$0xff] %v11033_v19  ;;  %v2873_v37 = vpack.c.bf16 %v2617_v58, %v2617_v58  ;;  %v2874_v18 = vpack.c.bf16 %v2618_v59, %v2618_v59  ;;  %v2109_v53 = vand.u32 2147483647, %v1853_v49 }
 0x355   : > { %v3397_v56 = vunpack.c.l.b16 %v2873_v37  ;;  %v11048_v37 = vperm.slane %v10247_v17, 2  ;;  %v3398_v54 = vunpack.c.l.b16 %v2874_v18  ;;  %v2365_v4 = vsub.f32 1.0, %v2109_v53 }
 0x357   : > { %9641 = vset.pattern.permute.xlu2 %v10236_v12  ;;  %9640 = vset.pattern.permute.xlu1 %v10239_v13  ;;  %v3641_v21 = vpack.c.b16 %v3397_v56, %v3396_v20  ;;  %v11050_v58 = vpop.permute.xlu2 %795  ;;  %v15495_v56 = vld [vmem:[#allocation76_spill] sm:$0xff]  ;;  %v2875_v20 = vpack.c.bf16 %v2619_v3, %v2619_v3  ;;  %v2621_v49 = vmax.f32 %v2365_v4, 0.0 }
 0x358   : > { %924 = vperm.xlu0 %9948, %v10912_v48   ;;  %v1852_v48 = vsub.f32 %v15495_v56, %v10188_v8  ;;  %v11066_v56 = vperm.slane %v10247_v17, 7 }
 0x359   : > { %9339 = vmatmul.msk.bf16.gmra.mxu0 %vm3758_vm1, %v3641_v21  ;;  %v11059_v21 = vpop.permute.xlu1 %808  ;;  %v11063_v59 = vpop.f32.mrf.mxu0  ;;  %v3399_v19 = vunpack.c.l.b16 %v2875_v20  ;;  %v11079_v20 = vperm.slane %v10256_v23, 4  ;;  %v2877_v53 = vpack.c.bf16 %v2621_v49, %v2621_v49  ;;  %v11093_v23 = vperm.slane %v10275_v35, 1 }
 0x35a   : > { %v11045_v62 = vpop.permute.xlu0 %893  ;;  %15497 = vst [vmem:[#allocation68_spill] sm:$0xff] %v11063_v59 }
 0x35b   : > { %15494 = vst [vmem:[#allocation72_spill] sm:$0xff] %v11045_v62  ;;  %v2108_v62 = vand.u32 2147483647, %v1852_v48  ;;  %v3642_v46 = vpack.c.b16 %v3399_v19, %v3398_v54  ;;  %v3401_v4 = vunpack.c.l.b16 %v2877_v53 }
 0x35c   : > { %15498 = vst [vmem:[#allocation76_spill] sm:$0xff] %v11066_v56 }
 0x35d   : > { %v2364_v3 = vsub.f32 1.0, %v2108_v62  ;;  %15500 = vst [vmem:[#allocation144_spill] sm:$0xff] %v11079_v20 }
 0x35e   : > { %15505 = vst [vmem:[#allocation149_spill] sm:$0xff] %v11093_v23 }
 0x35f   : > { %1040 = vperm.xlu2 %9641, %v15485_v10   ;;  %1034 = vperm.xlu1 %9640, %v15485_v10   ;;  %v11068_v10 = vpop.permute.xlu2 %814  ;;  %v2620_v17 = vmax.f32 %v2364_v3, 0.0 }
 0x360   : > { %1169 = vperm.xlu0 %9948, %v11048_v37  }
 0x361   : > { %v11073_v18 = vpop.permute.xlu1 %820  ;;  %v11083_v62 = vpop.f32.mrf.mxu0  ;;  %v2876_v54 = vpack.c.bf16 %v2620_v17, %v2620_v17 }
 0x362   : > { %v11061_v60 = vpop.permute.xlu0 %1138  ;;  %15502 = vst [vmem:[#allocation146_spill] sm:$0xff] %v11083_v62 }
 0x363   : > { %v3400_v3 = vunpack.c.l.b16 %v2876_v54 }
 0x365   : > { %v3643_v62 = vpack.c.b16 %v3401_v4, %v3400_v3 }
 0x367   : > { %9643 = vset.pattern.permute.xlu2 %v10182_v6  ;;  %9642 = vset.pattern.permute.xlu1 %v10185_v7  ;;  %v11081_v19 = vpop.permute.xlu2 %826 }
 0x368   : > { %1414 = vperm.xlu0 %9948, %v11066_v56   ;;  %15501 = vst [vmem:[#allocation145_spill] sm:$0xff] %v11081_v19 }
 0x369   : > { %9340 = vmatmul.msk.bf16.gmra.mxu0 %vm3758_vm1, %v3642_v46  ;;  %v11088_v46 = vpop.permute.xlu1 %838  ;;  %v11099_v17 = vpop.f32.mrf.mxu0 }
 0x36a   : > { %v11076_v48 = vpop.permute.xlu0 %1383  ;;  %15503 = vst [vmem:[#allocation147_spill] sm:$0xff] %v11088_v46 }
 0x36b   : > { %15499 = vst [vmem:[#allocation71_spill] sm:$0xff] %v11076_v48 }
 0x36c   : > { %15507 = vst [vmem:[#allocation151_spill] sm:$0xff] %v11099_v17 }
 0x36f   : > { %1059 = vperm.xlu2 %9643, %v10535_v42   ;;  %1053 = vperm.xlu1 %9642, %v10535_v42   ;;  %v11095_v48 = vpop.permute.xlu2 %844 }
 0x370   : > { %1659 = vperm.xlu0 %9948, %v11079_v20   ;;  %15506 = vst [vmem:[#allocation150_spill] sm:$0xff] %v11095_v48 }
 0x371   : > { %v11102_v49 = vpop.permute.xlu1 %851  ;;  %v11113_v3 = vpop.f32.mrf.mxu0 }
 0x372   : > { %v11090_v59 = vpop.permute.xlu0 %1628  ;;  %15508 = vst [vmem:[#allocation152_spill] sm:$0xff] %v11102_v49 }
 0x373   : > { %15504 = vst [vmem:[#allocation148_spill] sm:$0xff] %v11090_v59 }
 0x374   : > { %15512 = vst [vmem:[#allocation156_spill] sm:$0xff] %v11113_v3 }
 0x377   : > { %9645 = vset.pattern.permute.xlu2 %v10179_v5  ;;  %9644 = vset.pattern.permute.xlu1 %v10203_v38  ;;  %v11107_v59 = vpop.permute.xlu2 %857 }
 0x378   : > { %4882 = vperm.xlu0 %9948, %v11093_v23   ;;  %15510 = vst [vmem:[#allocation154_spill] sm:$0xff] %v11107_v59 }
 0x379   : > { %9341 = vmatmul.msk.bf16.gmra.mxu0 %vm3758_vm1, %v3643_v62  ;;  %v11111_v53 = vpop.permute.xlu1 %869  ;;  %v11125_v23 = vpop.f32.mrf.mxu0 }
 0x37a   : > { %v11105_v54 = vpop.permute.xlu0 %4851  ;;  %15511 = vst [vmem:[#allocation155_spill] sm:$0xff] %v11111_v53 }
 0x37b   : > { %15509 = vst [vmem:[#allocation153_spill] sm:$0xff] %v11105_v54 }
 0x37c   : > { %15517 = vst [vmem:[#allocation161_spill] sm:$0xff] %v11125_v23 }
 0x37f   : > { %1071 = vperm.xlu2 %9645, %v10535_v42   ;;  %1065 = vperm.xlu1 %9644, %v10535_v42   ;;  %v11117_v17 = vpop.permute.xlu2 %875 }
 0x380   : > { %15514 = vst [vmem:[#allocation158_spill] sm:$0xff] %v11117_v17 }
 0x381   : > { %v11121_v62 = vpop.permute.xlu1 %881  ;;  %v11137_v17 = vpop.f32.mrf.mxu0 }
 0x382   : > { %v11115_v4 = vpop.permute.xlu0 %5096  ;;  %15515 = vst [vmem:[#allocation159_spill] sm:$0xff] %v11121_v62 }
 0x383   : > { %15513 = vst [vmem:[#allocation157_spill] sm:$0xff] %v11115_v4 }
 0x384   : > { %15522 = vst [vmem:[#allocation166_spill] sm:$0xff] %v11137_v17 }
 0x387   : > { %9647 = vset.pattern.permute.xlu2 %v10236_v12  ;;  %9646 = vset.pattern.permute.xlu1 %v10239_v13  ;;  %v11127_v20 = vpop.permute.xlu2 %887 }
 0x388   : > { %15518 = vst [vmem:[#allocation162_spill] sm:$0xff] %v11127_v20 }
 0x389   : > { %v11131_v3 = vpop.permute.xlu1 %900 }
 0x38a   : > { %v11123_v54 = vpop.permute.xlu0 %5341  ;;  %15519 = vst [vmem:[#allocation163_spill] sm:$0xff] %v11131_v3 }
 0x38b   : > { %15516 = vst [vmem:[#allocation160_spill] sm:$0xff] %v11123_v54 }
 0x38f   : > { %1089 = vperm.xlu2 %9647, %v10535_v42   ;;  %1083 = vperm.xlu1 %9646, %v10535_v42   ;;  %v11135_v56 = vpop.permute.xlu2 %906  ;;  %v11149_v42 = vpop.f32.mrf.mxu0 }
 0x390   : > { %15521 = vst [vmem:[#allocation165_spill] sm:$0xff] %v11135_v56 }
 0x391   : > { %v11141_v54 = vpop.permute.xlu1 %912  ;;  %15526 = vst [vmem:[#allocation170_spill] sm:$0xff] %v11149_v42 }
 0x392   : > { %v11133_v4 = vpop.permute.xlu0 %5586  ;;  %15523 = vst [vmem:[#allocation167_spill] sm:$0xff] %v11141_v54 }
 0x393   : > { %15520 = vst [vmem:[#allocation164_spill] sm:$0xff] %v11133_v4 }
 0x397   : > { %9649 = vset.pattern.permute.xlu2 %v10185_v7  ;;  %9648 = vset.pattern.permute.xlu1 %v10172_v2  ;;  %v11145_v20 = vpop.permute.xlu2 %918 }
 0x398   : > { %15525 = vst [vmem:[#allocation169_spill] sm:$0xff] %v11145_v20 }
 0x399   : > { %v11151_v4 = vpop.permute.xlu1 %930 }
 0x39a   : > { %v11143_v23 = vpop.permute.xlu0 %5831  ;;  %15527 = vst [vmem:[#allocation171_spill] sm:$0xff] %v11151_v4 }
 0x39b   : > { %15524 = vst [vmem:[#allocation168_spill] sm:$0xff] %v11143_v23  ;;  %v11161_v23 = vpop.f32.mrf.mxu0 }
 0x39c   : > { %15531 = vst [vmem:[#allocation175_spill] sm:$0xff] %v11161_v23 }
 0x39f   : > { %1102 = vperm.xlu2 %9649, %v10828_v31   ;;  %1096 = vperm.xlu1 %9648, %v10828_v31   ;;  %v11153_v56 = vpop.permute.xlu2 %936 }
 0x3a0   : > { %15528 = vst [vmem:[#allocation172_spill] sm:$0xff] %v11153_v56  ;;  %v15534_v56 = vld [vmem:[#allocation80_spill] sm:$0xff] }
 0x3a1   : > { %v11159_v54 = vpop.permute.xlu1 %942  ;;  %v1855_v4 = vsub.f32 %v15534_v56, %v10188_v8 }
 0x3a2   : > { %v11155_v17 = vpop.permute.xlu0 %6076  ;;  %15530 = vst [vmem:[#allocation174_spill] sm:$0xff] %v11159_v54 }
 0x3a3   : > { %15529 = vst [vmem:[#allocation173_spill] sm:$0xff] %v11155_v17  ;;  %v11173_v3 = vpop.f32.mrf.mxu0  ;;  %v2111_v62 = vand.u32 2147483647, %v1855_v4 }
 0x3a4   : > { %15536 = vst [vmem:[#allocation178_spill] sm:$0xff] %v11173_v3 }
 0x3a5   : > { %v2367_v23 = vsub.f32 1.0, %v2111_v62 }
 0x3a7   : > { %9651 = vset.pattern.permute.xlu2 %v10179_v5  ;;  %9650 = vset.pattern.permute.xlu1 %v10203_v38  ;;  %v11163_v20 = vpop.permute.xlu2 %949  ;;  %v2623_v36 = vmax.f32 %v2367_v23, 0.0 }
 0x3a8   : > { %15532 = vst [vmem:[#allocation176_spill] sm:$0xff] %v11163_v20  ;;  %v1895_v20 = vsub.f32 %v10974_v50, %v10188_v8  ;;  %v15542_v50 = vld [vmem:[#allocation75_spill] sm:$0xff] }
 0x3a9   : > { %v11171_v17 = vpop.permute.xlu1 %961  ;;  %v1856_v62 = vsub.f32 %v15542_v50, %v10188_v8 }
 0x3aa   : > { %v11167_v42 = vpop.permute.xlu0 %6321  ;;  %15535 = vst [vmem:[#allocation80_spill] sm:$0xff] %v11171_v17  ;;  %v2151_v17 = vand.u32 2147483647, %v1895_v20 }
 0x3ab   : > { %15533 = vst [vmem:[#allocation177_spill] sm:$0xff] %v11167_v42  ;;  %v11186_v3 = vpop.f32.mrf.mxu0  ;;  %v2112_v48 = vand.u32 2147483647, %v1856_v62 }
 0x3ac   : > { %15540 = vst [vmem:[#allocation182_spill] sm:$0xff] %v11186_v3 }
 0x3af   : > { %1120 = vperm.xlu2 %9651, %v10828_v31   ;;  %1114 = vperm.xlu1 %9650, %v10828_v31   ;;  %v11175_v53 = vpop.permute.xlu2 %967 }
 0x3b0   : > { %15537 = vst [vmem:[#allocation179_spill] sm:$0xff] %v11175_v53  ;;  %v15541_v53 = vld [vmem:[#allocation84_spill] sm:$0xff] }
 0x3b1   : > { %v11181_v54 = vpop.permute.xlu1 %973  ;;  %v1857_v49 = vsub.f32 %v15541_v53, %v10188_v8 }
 0x3b2   : > { %15538 = vst [vmem:[#allocation180_spill] sm:$0xff] %v11181_v54  ;;  %v2879_v54 = vpack.c.bf16 %v2623_v36, %v2623_v36  ;;  %v1897_v36 = vsub.f32 %v10983_v52, %v10188_v8 }
 0x3b4   : > { %v3403_v53 = vunpack.c.l.b16 %v2879_v54  ;;  %v2153_v52 = vand.u32 2147483647, %v1897_v36 }
 0x3b7   : > { %9653 = vset.pattern.permute.xlu2 %v10239_v13  ;;  %9652 = vset.pattern.permute.xlu1 %v10216_v57  ;;  %v11184_v59 = vpop.permute.xlu2 %979 }
 0x3b8   : > { %15539 = vst [vmem:[#allocation181_spill] sm:$0xff] %v11184_v59 }
 0x3b9   : > { %v11194_v23 = vpop.permute.xlu1 %991 }
 0x3ba   : > { %v435_v42 = vpop.permute.xlu0 %434  ;;  %15543 = vst [vmem:[#allocation84_spill] sm:$0xff] %v11194_v23 }
 0x3bb   : > { %v1854_v56 = vsub.f32 %v435_v42, %v10188_v8  ;;  %v2407_v42 = vsub.f32 1.0, %v2151_v17 }
 0x3bd   : > { %v2110_v4 = vand.u32 2147483647, %v1854_v56  ;;  %v2113_v56 = vand.u32 2147483647, %v1857_v49  ;;  %v1896_v49 = vsub.f32 %v10978_v24, %v10188_v8  ;;  %v15549_v24 = vld [vmem:[#allocation79_spill] sm:$0xff] }
 0x3bf   : > { %v2366_v28 = vsub.f32 1.0, %v2110_v4  ;;  %1132 = vperm.xlu2 %9653, %v10828_v31   ;;  %1126 = vperm.xlu1 %9652, %v10828_v31   ;;  %v2663_v4 = vmax.f32 %v2407_v42, 0.0  ;;  %v11197_v46 = vpop.permute.xlu2 %998  ;;  %v2369_v19 = vsub.f32 1.0, %v2113_v56 }
 0x3c0   : > { %15544 = vst [vmem:[#allocation75_spill] sm:$0xff] %v11197_v46 }
 0x3c1   : > { %v2622_v20 = vmax.f32 %v2366_v28, 0.0  ;;  %v11203_v28 = vpop.f32.mrf.mxu0  ;;  %v2919_v54 = vpack.c.bf16 %v2663_v4, %v2663_v4  ;;  %v11207_v62 = vpop.permute.xlu1 %1004  ;;  %v1858_v4 = vsub.f32 %v15549_v24, %v10188_v8 }
 0x3c2   : > { %v680_v59 = vpop.permute.xlu0 %679  ;;  %15545 = vst [vmem:[#allocation183_spill] sm:$0xff] %v11203_v28 }
 0x3c3   : > { %v2878_v41 = vpack.c.bf16 %v2622_v20, %v2622_v20  ;;  %v1894_v3 = vsub.f32 %v680_v59, %v10188_v8  ;;  %v2368_v59 = vsub.f32 1.0, %v2112_v48  ;;  %15546 = vst [vmem:[#allocation184_spill] sm:$0xff] %v11207_v62  ;;  %v2152_v20 = vand.u32 2147483647, %v1896_v49  ;;  %v15548_v48 = vld [vmem:[#allocation23_spill] sm:$0xff] }
 0x3c4   : > { %v3443_v56 = vunpack.c.l.b16 %v2919_v54  ;;  %v1859_v28 = vsub.f32 %v15548_v48, %v10188_v8  ;;  %v2409_v62 = vsub.f32 1.0, %v2153_v52  ;;  %v2114_v54 = vand.u32 2147483647, %v1858_v4 }
 0x3c5   : > { %v3402_v25 = vunpack.c.l.b16 %v2878_v41  ;;  %v2150_v31 = vand.u32 2147483647, %v1894_v3  ;;  %v2625_v3 = vmax.f32 %v2369_v19, 0.0  ;;  %v2624_v42 = vmax.f32 %v2368_v59, 0.0 }
 0x3c6   : > { %v2115_v49 = vand.u32 2147483647, %v1859_v28 }
 0x3c7   : > { %v3644_v17 = vpack.c.b16 %v3403_v53, %v3402_v25  ;;  %v2406_v50 = vsub.f32 1.0, %v2150_v31  ;;  %9655 = vset.pattern.permute.xlu2 %v10185_v7  ;;  %9654 = vset.pattern.permute.xlu1 %v10172_v2  ;;  %v11210_v53 = vpop.permute.xlu2 %1010  ;;  %v2881_v46 = vpack.c.bf16 %v2625_v3, %v2625_v3 }
 0x3c8   : > { %15547 = vst [vmem:[#allocation185_spill] sm:$0xff] %v11210_v53  ;;  %v2371_v24 = vsub.f32 1.0, %v2115_v49  ;;  %v15553_v53 = vld [vmem:[#allocation24_spill] sm:$0xff] }
 0x3c9   : > { %v2662_v41 = vmax.f32 %v2406_v50, 0.0  ;;  %9342 = vmatmul.msk.bf16.gmra.mxu0 %vm3758_vm1, %v3644_v17  ;;  %v11218_v36 = vpop.f32.mrf.mxu0  ;;  %v2880_v17 = vpack.c.bf16 %v2624_v42, %v2624_v42  ;;  %v2408_v50 = vsub.f32 1.0, %v2152_v20  ;;  %v11220_v59 = vpop.permute.xlu1 %1022  ;;  %v1954_v42 = vsub.f32 %v10713_v14, %v10188_v8 }
 0x3ca   : > { %15550 = vst [vmem:[#allocation23_spill] sm:$0xff] %v11218_v36  ;;  %v2370_v20 = vsub.f32 1.0, %v2114_v54  ;;  %v2627_v4 = vmax.f32 %v2371_v24, 0.0 }
 0x3cb   : > { %v2918_v25 = vpack.c.bf16 %v2662_v41, %v2662_v41  ;;  %15551 = vst [vmem:[#allocation79_spill] sm:$0xff] %v11220_v59  ;;  %v3405_v41 = vunpack.c.l.b16 %v2881_v46  ;;  %v3404_v48 = vunpack.c.l.b16 %v2880_v17  ;;  %v2664_v3 = vmax.f32 %v2408_v50, 0.0 }
 0x3cc   : > { %v2210_v17 = vand.u32 2147483647, %v1954_v42  ;;  %v2626_v14 = vmax.f32 %v2370_v20, 0.0 }
 0x3cd   : > { %v3442_v31 = vunpack.c.l.b16 %v2918_v25  ;;  %v2665_v25 = vmax.f32 %v2409_v62, 0.0  ;;  %v2920_v46 = vpack.c.bf16 %v2664_v3, %v2664_v3  ;;  %v15557_v3 = vld [vmem:[#allocation88_spill] sm:$0xff] }
 0x3ce   : > { %v2466_v36 = vsub.f32 1.0, %v2210_v17 }
 0x3cf   : > { %1151 = vperm.xlu2 %9655, %v11048_v37   ;;  %1145 = vperm.xlu1 %9654, %v11048_v37   ;;  %v3664_v19 = vpack.c.b16 %v3443_v56, %v3442_v31  ;;  %v11223_v52 = vpop.permute.xlu2 %1028  ;;  %v1899_v56 = vsub.f32 %v15553_v53, %v10188_v8  ;;  %v3645_v31 = vpack.c.b16 %v3405_v41, %v3404_v48  ;;  %v3444_v41 = vunpack.c.l.b16 %v2920_v46 }
 0x3d0   : > { %15552 = vst [vmem:[#allocation186_spill] sm:$0xff] %v11223_v52  ;;  %v2921_v28 = vpack.c.bf16 %v2665_v25, %v2665_v25  ;;  %v2883_v25 = vpack.c.bf16 %v2627_v4, %v2627_v4  ;;  %v2882_v52 = vpack.c.bf16 %v2626_v14, %v2626_v14 }
 0x3d1   : > { %9362 = vmatmul.msk.bf16.gmra.mxu1 %vm3758_vm1, %v3664_v19  ;;  %v1898_v19 = vsub.f32 %v10987_v9, %v10188_v8  ;;  %v11233_v62 = vpop.permute.xlu1 %1034  ;;  %v2155_v53 = vand.u32 2147483647, %v1899_v56  ;;  %v11236_v50 = vpop.f32.mrf.mxu0  ;;  %v15558_v56 = vld [vmem:[#allocation83_spill] sm:$0xff] }
 0x3d2   : > { %15554 = vst [vmem:[#allocation24_spill] sm:$0xff] %v11233_v62  ;;  %v3445_v54 = vunpack.c.l.b16 %v2921_v28  ;;  %v1860_v62 = vsub.f32 %v15557_v3, %v10188_v8  ;;  %v1861_v42 = vsub.f32 %v15558_v56, %v10188_v8  ;;  %v3407_v46 = vunpack.c.l.b16 %v2883_v25 }
 0x3d3   : > { %15555 = vst [vmem:[#allocation187_spill] sm:$0xff] %v11236_v50  ;;  %v2154_v49 = vand.u32 2147483647, %v1898_v19  ;;  %v2411_v48 = vsub.f32 1.0, %v2155_v53  ;;  %v2722_v19 = vmax.f32 %v2466_v36, 0.0  ;;  %v3406_v4 = vunpack.c.l.b16 %v2882_v52 }
 0x3d4   : > { %v3665_v24 = vpack.c.b16 %v3445_v54, %v3444_v41  ;;  %v2116_v53 = vand.u32 2147483647, %v1860_v62  ;;  %v2117_v3 = vand.u32 2147483647, %v1861_v42  ;;  %v1900_v36 = vsub.f32 %v10992_v26, %v10188_v8 }
 0x3d5   : > { %v2410_v59 = vsub.f32 1.0, %v2154_v49  ;;  %v2978_v41 = vpack.c.bf16 %v2722_v19, %v2722_v19  ;;  %v3646_v56 = vpack.c.b16 %v3407_v46, %v3406_v4  ;;  %v11256_v62 = vperm.slane %v10275_v35, 6 }
 0x3d6   : > { %v2372_v23 = vsub.f32 1.0, %v2116_v53  ;;  %v2373_v25 = vsub.f32 1.0, %v2117_v3 }
 0x3d7   : > { %9657 = vset.pattern.permute.xlu2 %v10203_v38  ;;  %9656 = vset.pattern.permute.xlu1 %v10182_v6  ;;  %v11238_v9 = vpop.permute.xlu2 %1040  ;;  %v2666_v17 = vmax.f32 %v2410_v59, 0.0  ;;  %v3502_v42 = vunpack.c.l.b16 %v2978_v41  ;;  %v11270_v41 = vperm.slane %v10290_v45, 3 }
 0x3d8   : > { %15556 = vst [vmem:[#allocation188_spill] sm:$0xff] %v11238_v9  ;;  %5127 = vperm.xlu0 %9948, %v11256_v62  }
 0x3d9   : > { %9343 = vmatmul.msk.bf16.gmra.mxu0 %vm3758_vm1, %v3645_v31  ;;  %v2667_v31 = vmax.f32 %v2411_v48, 0.0  ;;  %v11248_v14 = vpop.f32.mrf.mxu0  ;;  %v1901_v48 = vsub.f32 %v10994_v43, %v10188_v8  ;;  %v15560_v43 = vld [vmem:[#allocation92_spill] sm:$0xff] }
 0x3db   : > { %v2923_v54 = vpack.c.bf16 %v2667_v31, %v2667_v31  ;;  %v2628_v31 = vmax.f32 %v2372_v23, 0.0  ;;  %v2157_v4 = vand.u32 2147483647, %v1901_v48 }
 0x3dd   : > { %v3447_v26 = vunpack.c.l.b16 %v2923_v54 }
 0x3df   : > { %1163 = vperm.xlu2 %9657, %v11048_v37   ;;  %1157 = vperm.xlu1 %9656, %v11048_v37   ;;  %v1060_v50 = vpop.permute.xlu2 %1059 }
 0x3e0   : > { %v1956_v59 = vsub.f32 %v1060_v50, %v10188_v8  ;;  %5372 = vperm.xlu0 %9948, %v11270_v41  }
 0x3e1   : > { %9363 = vmatmul.msk.bf16.gmra.mxu1 %vm3758_vm1, %v3665_v24  ;;  %v1054_v20 = vpop.permute.xlu1 %1053  ;;  %v2922_v24 = vpack.c.bf16 %v2666_v17, %v2666_v17  ;;  %v11262_v35 = vpop.f32.mrf.mxu0  ;;  %v2884_v17 = vpack.c.bf16 %v2628_v31, %v2628_v31 }
 0x3e2   : > { %v1955_v28 = vsub.f32 %v1054_v20, %v10188_v8  ;;  %v2212_v46 = vand.u32 2147483647, %v1956_v59  ;;  %15559 = vst [vmem:[#allocation88_spill] sm:$0xff] %v11262_v35  ;;  %v2413_v59 = vsub.f32 1.0, %v2157_v4 }
 0x3e3   : > { %v3446_v19 = vunpack.c.l.b16 %v2922_v24  ;;  %v15561_v24 = vld [vmem:[#allocation86_spill] sm:$0xff]  ;;  %v3408_v48 = vunpack.c.l.b16 %v2884_v17  ;;  %v1902_v17 = vsub.f32 %v11001_v29, %v10188_v8 }
 0x3e4   : > { %v2211_v49 = vand.u32 2147483647, %v1955_v28  ;;  %v2156_v28 = vand.u32 2147483647, %v1900_v36  ;;  %v2468_v23 = vsub.f32 1.0, %v2212_v46  ;;  %v1863_v36 = vsub.f32 %v15561_v24, %v10188_v8 }
 0x3e5   : > { %v3666_v54 = vpack.c.b16 %v3447_v26, %v3446_v19  ;;  %v2669_v46 = vmax.f32 %v2413_v59, 0.0 }
 0x3e6   : > { %v2467_v9 = vsub.f32 1.0, %v2211_v49  ;;  %v1862_v49 = vsub.f32 %v15560_v43, %v10188_v8  ;;  %v2412_v3 = vsub.f32 1.0, %v2156_v28  ;;  %v2724_v31 = vmax.f32 %v2468_v23, 0.0 }
 0x3e7   : > { %9659 = vset.pattern.permute.xlu2 %v10239_v13  ;;  %9658 = vset.pattern.permute.xlu1 %v10216_v57  ;;  %v1072_v26 = vpop.permute.xlu2 %1071  ;;  %v2119_v28 = vand.u32 2147483647, %v1863_v36  ;;  %v2925_v24 = vpack.c.bf16 %v2669_v46, %v2669_v46  ;;  %v1903_v36 = vsub.f32 %v11003_v15, %v10188_v8 }
 0x3e8   : > { %v2723_v52 = vmax.f32 %v2467_v9, 0.0  ;;  %v2629_v9 = vmax.f32 %v2373_v25, 0.0 }
 0x3e9   : > { %9344 = vmatmul.msk.bf16.gmra.mxu0 %vm3758_vm1, %v3646_v56  ;;  %v2159_v46 = vand.u32 2147483647, %v1903_v36 }
 0x3ea   : > { %v2979_v20 = vpack.c.bf16 %v2723_v52, %v2723_v52  ;;  %v2885_v56 = vpack.c.bf16 %v2629_v9, %v2629_v9  ;;  %v1958_v9 = vsub.f32 %v1072_v26, %v10188_v8 }
 0x3ec   : > { %v3503_v50 = vunpack.c.l.b16 %v2979_v20  ;;  %v2668_v20 = vmax.f32 %v2412_v3, 0.0  ;;  %v3409_v45 = vunpack.c.l.b16 %v2885_v56  ;;  %v2980_v3 = vpack.c.bf16 %v2724_v31, %v2724_v31  ;;  %v15564_v31 = vld [vmem:[#allocation36_spill] sm:$0xff] }
 0x3ed   : > { %v11287_v56 = vperm.slane %v10300_v51, 0  ;;  %v2214_v29 = vand.u32 2147483647, %v1958_v9 }
 0x3ee   : > { %v3694_v53 = vpack.c.b16 %v3503_v50, %v3502_v42  ;;  %v2118_v42 = vand.u32 2147483647, %v1862_v49  ;;  %v1959_v50 = vsub.f32 %v10837_v47, %v10188_v8  ;;  %v11284_v49 = vpop.f32.mrf.mxu0  ;;  %v2375_v47 = vsub.f32 1.0, %v2119_v28 }
 0x3ef   : > { %1181 = vperm.xlu2 %9659, %v11048_v37   ;;  %1175 = vperm.xlu1 %9658, %v11048_v37   ;;  %15562 = vst [vmem:[#allocation83_spill] sm:$0xff] %v11284_v49  ;;  %v3449_v28 = vunpack.c.l.b16 %v2925_v24  ;;  %v2470_v15 = vsub.f32 1.0, %v2214_v29  ;;  %v15566_v49 = vld [vmem:[#allocation13_spill] sm:$0xff] }
 0x3f0   : > { %9392 = vmatmul.msk.bf16.vlgmr.msra.gmra.mxu2 %vm3758_vm1, %v3694_v53  ;;  %v3647_v53 = vpack.c.b16 %v3409_v45, %v3408_v48  ;;  %v2374_v43 = vsub.f32 1.0, %v2118_v42  ;;  %15563 = vst [vmem:[#allocation92_spill] sm:$0xff] %v11287_v56  ;;  %v2215_v59 = vand.u32 2147483647, %v1959_v50  ;;  %5617 = vperm.xlu0 %9948, %v11287_v56   ;;  %v2158_v42 = vand.u32 2147483647, %v1902_v17 }
 0x3f1   : > { %9364 = vmatmul.msk.bf16.gmra.mxu1 %vm3758_vm1, %v3666_v54  ;;  %v1066_v52 = vpop.permute.xlu1 %1065  ;;  %v2924_v54 = vpack.c.bf16 %v2668_v20, %v2668_v20  ;;  %v3504_v20 = vunpack.c.l.b16 %v2980_v3  ;;  %v2631_v45 = vmax.f32 %v2375_v47, 0.0  ;;  %v15565_v50 = vld [vmem:[#allocation94_spill] sm:$0xff]  ;;  %v2415_v3 = vsub.f32 1.0, %v2159_v46 }
 0x3f2   : > { %v1957_v25 = vsub.f32 %v1066_v52, %v10188_v8  ;;  %v1865_v9 = vsub.f32 %v15565_v50, %v10188_v8  ;;  %v2726_v36 = vmax.f32 %v2470_v15, 0.0  ;;  %v1905_v15 = vsub.f32 %v11012_v63, %v10188_v8 }
 0x3f3   : > { %v3448_v48 = vunpack.c.l.b16 %v2924_v54  ;;  %v2887_v17 = vpack.c.bf16 %v2631_v45, %v2631_v45 }
 0x3f4   : > { %v2213_v19 = vand.u32 2147483647, %v1957_v25  ;;  %v2630_v25 = vmax.f32 %v2374_v43, 0.0  ;;  %v2121_v29 = vand.u32 2147483647, %v1865_v9 }
 0x3f5   : > { %v3667_v43 = vpack.c.b16 %v3449_v28, %v3448_v48  ;;  %v15567_v48 = vld [vmem:[#allocation38_spill] sm:$0xff] }
 0x3f6   : > { %v2469_v4 = vsub.f32 1.0, %v2213_v19  ;;  %v1864_v19 = vsub.f32 %v15564_v31, %v10188_v8  ;;  %v11301_v24 = vpop.f32.mrf.mxu0  ;;  %v2377_v46 = vsub.f32 1.0, %v2121_v29 }
 0x3f7   : > { %9661 = vset.pattern.permute.xlu2 %v10172_v2  ;;  %9660 = vset.pattern.permute.xlu1 %v10236_v12 }
 0x3f8   : > { %v2725_v23 = vmax.f32 %v2469_v4, 0.0  ;;  %v2471_v4 = vsub.f32 1.0, %v2215_v59  ;;  %v2120_v54 = vand.u32 2147483647, %v1864_v19  ;;  %v2982_v19 = vpack.c.bf16 %v2726_v36, %v2726_v36 }
 0x3f9   : > { %9345 = vmatmul.msk.bf16.gmra.mxu0 %vm3758_vm1, %v3647_v53  ;;  %v2886_v53 = vpack.c.bf16 %v2630_v25, %v2630_v25 }
 0x3fa   : > { %v2981_v52 = vpack.c.bf16 %v2725_v23, %v2725_v23  ;;  %v2414_v23 = vsub.f32 1.0, %v2158_v42  ;;  %v2727_v47 = vmax.f32 %v2471_v4, 0.0  ;;  %v2376_v42 = vsub.f32 1.0, %v2120_v54 }
 0x3fb   : > { %v3410_v59 = vunpack.c.l.b16 %v2886_v53 }
 0x3fc   : > { %v3505_v26 = vunpack.c.l.b16 %v2981_v52  ;;  %v2670_v52 = vmax.f32 %v2414_v23, 0.0  ;;  %v2983_v31 = vpack.c.bf16 %v2727_v47, %v2727_v47  ;;  %v2632_v50 = vmax.f32 %v2376_v42, 0.0  ;;  %v15569_v42 = vld [vmem:[#allocation96_spill] sm:$0xff] }
 0x3fd   : > { %v2633_v47 = vmax.f32 %v2377_v46, 0.0 }
 0x3fe   : > { %v3695_v35 = vpack.c.b16 %v3505_v26, %v3504_v20  ;;  %v3411_v20 = vunpack.c.l.b16 %v2887_v17  ;;  %v2671_v26 = vmax.f32 %v2415_v3, 0.0  ;;  %v2926_v4 = vpack.c.bf16 %v2670_v52, %v2670_v52  ;;  %v11312_v54 = vpop.f32.mrf.mxu0 }
 0x3ff   : > { %1194 = vperm.xlu2 %9661, %v15566_v49   ;;  %1187 = vperm.xlu1 %9660, %v11048_v37   ;;  %v1090_v37 = vpop.permute.xlu2 %1089  ;;  %15568 = vst [vmem:[#allocation86_spill] sm:$0xff] %v11312_v54  ;;  %v3506_v17 = vunpack.c.l.b16 %v2982_v19  ;;  %v2888_v52 = vpack.c.bf16 %v2632_v50, %v2632_v50  ;;  %v15570_v19 = vld [vmem:[#allocation90_spill] sm:$0xff] }
 0x400   : > { %9393 = vmatmul.msk.bf16.gmra.mxu2 %vm3758_vm1, %v3695_v35  ;;  %v1904_v35 = vsub.f32 %v15567_v48, %v10188_v8  ;;  %v3648_v28 = vpack.c.b16 %v3411_v20, %v3410_v59  ;;  %v1961_v53 = vsub.f32 %v1090_v37, %v10188_v8  ;;  %v2927_v9 = vpack.c.bf16 %v2671_v26, %v2671_v26 }
 0x401   : > { %9365 = vmatmul.msk.bf16.gmra.mxu1 %vm3758_vm1, %v3667_v43  ;;  %v1084_v25 = vpop.permute.xlu1 %1083  ;;  %v3507_v43 = vunpack.c.l.b16 %v2983_v31  ;;  %v3450_v36 = vunpack.c.l.b16 %v2926_v4  ;;  %v2161_v59 = vand.u32 2147483647, %v1905_v15  ;;  %v2889_v37 = vpack.c.bf16 %v2633_v47, %v2633_v47 }
 0x402   : > { %v1960_v45 = vsub.f32 %v1084_v25, %v10188_v8  ;;  %v2160_v23 = vand.u32 2147483647, %v1904_v35  ;;  %v2217_v63 = vand.u32 2147483647, %v1961_v53  ;;  %v3451_v29 = vunpack.c.l.b16 %v2927_v9 }
 0x403   : > { %v3696_v48 = vpack.c.b16 %v3507_v43, %v3506_v17  ;;  %v1867_v26 = vsub.f32 %v15569_v42, %v10188_v8  ;;  %v3412_v15 = vunpack.c.l.b16 %v2888_v52  ;;  %v3413_v53 = vunpack.c.l.b16 %v2889_v37 }
 0x404   : > { %v2216_v3 = vand.u32 2147483647, %v1960_v45  ;;  %v2416_v25 = vsub.f32 1.0, %v2160_v23  ;;  %v3668_v35 = vpack.c.b16 %v3451_v29, %v3450_v36  ;;  %v2473_v31 = vsub.f32 1.0, %v2217_v63 }
 0x405   : > { %v1866_v45 = vsub.f32 %v15570_v19, %v10188_v8  ;;  %v2123_v50 = vand.u32 2147483647, %v1867_v26  ;;  %v3649_v29 = vpack.c.b16 %v3413_v53, %v3412_v15  ;;  %v1906_v26 = vsub.f32 %v11014_v55, %v10188_v8  ;;  %v15572_v53 = vld [vmem:[#allocation58_spill] sm:$0xff]  ;;  %v15573_v55 = vld [vmem:[#allocation93_spill] sm:$0xff] }
 0x406   : > { %v2472_v20 = vsub.f32 1.0, %v2216_v3  ;;  %v2672_v46 = vmax.f32 %v2416_v25, 0.0  ;;  %v11322_v43 = vpop.f32.mrf.mxu0  ;;  %v2729_v17 = vmax.f32 %v2473_v31, 0.0  ;;  %v1907_v25 = vsub.f32 %v11019_v33, %v10188_v8 }
 0x407   : > { %9663 = vset.pattern.permute.xlu2 %v10203_v38  ;;  %9662 = vset.pattern.permute.xlu1 %v10182_v6  ;;  %15571 = vst [vmem:[#allocation36_spill] sm:$0xff] %v11322_v43  ;;  %v2122_v3 = vand.u32 2147483647, %v1866_v45  ;;  %v1103_v47 = vpop.permute.xlu2 %1102 }
 0x408   : > { %v2728_v4 = vmax.f32 %v2472_v20, 0.0  ;;  %v2928_v36 = vpack.c.bf16 %v2672_v46, %v2672_v46  ;;  %v2985_v52 = vpack.c.bf16 %v2729_v17, %v2729_v17  ;;  %v1963_v20 = vsub.f32 %v1103_v47, %v10188_v8 }
 0x409   : > { %9346 = vmatmul.msk.bf16.gmra.mxu0 %vm3758_vm1, %v3648_v28  ;;  %v2417_v28 = vsub.f32 1.0, %v2161_v59  ;;  %v2378_v37 = vsub.f32 1.0, %v2122_v3  ;;  %v2163_v46 = vand.u32 2147483647, %v1907_v25  ;;  %v1868_v47 = vsub.f32 %v15573_v55, %v10188_v8  ;;  %v11352_v55 = vpop.f32.mrf.mxu1 }
 0x40a   : > { %v2984_v59 = vpack.c.bf16 %v2728_v4, %v2728_v4  ;;  %v3452_v31 = vunpack.c.l.b16 %v2928_v36  ;;  %v3509_v33 = vunpack.c.l.b16 %v2985_v52  ;;  %v2219_v4 = vand.u32 2147483647, %v1963_v20  ;;  %15575 = vst [vmem:[#allocation94_spill] sm:$0xff] %v11352_v55 }
 0x40b   : > { %v2673_v9 = vmax.f32 %v2417_v28, 0.0  ;;  %v2634_v15 = vmax.f32 %v2378_v37, 0.0  ;;  %v2124_v20 = vand.u32 2147483647, %v1868_v47 }
 0x40c   : > { %v3508_v28 = vunpack.c.l.b16 %v2984_v59 }
 0x40d   : > { %v2929_v42 = vpack.c.bf16 %v2673_v9, %v2673_v9  ;;  %v2162_v9 = vand.u32 2147483647, %v1906_v26 }
 0x40e   : > { %v3697_v3 = vpack.c.b16 %v3509_v33, %v3508_v28 }
 0x40f   : > { %1212 = vperm.xlu2 %9663, %v15566_v49   ;;  %1206 = vperm.xlu1 %9662, %v15566_v49   ;;  %v3453_v45 = vunpack.c.l.b16 %v2929_v42  ;;  %v2418_v25 = vsub.f32 1.0, %v2162_v9 }
 0x410   : > { %9394 = vmatmul.msk.bf16.gmra.mxu2 %vm3758_vm1, %v3696_v48  ;;  %v2379_v48 = vsub.f32 1.0, %v2123_v50  ;;  %v1869_v50 = vsub.f32 %v15572_v53, %v10188_v8  ;;  %v15574_v53 = vld [vmem:[#allocation59_spill] sm:$0xff] }
 0x411   : > { %9366 = vmatmul.msk.bf16.gmra.mxu1 %vm3758_vm1, %v3668_v35  ;;  %v1097_v23 = vpop.permute.xlu1 %1096  ;;  %v3669_v36 = vpack.c.b16 %v3453_v45, %v3452_v31  ;;  %v2674_v33 = vmax.f32 %v2418_v25, 0.0  ;;  %v1909_v31 = vsub.f32 %v15574_v53, %v10188_v8  ;;  %v1964_v45 = vsub.f32 %v10943_v61, %v10188_v8 }
 0x412   : > { %v1962_v63 = vsub.f32 %v1097_v23, %v10188_v8  ;;  %v2635_v19 = vmax.f32 %v2379_v48, 0.0  ;;  %v11335_v23 = vpop.f32.mrf.mxu0  ;;  %v2890_v48 = vpack.c.bf16 %v2634_v15, %v2634_v15  ;;  %v2125_v42 = vand.u32 2147483647, %v1869_v50 }
 0x413   : > { %v2380_v50 = vsub.f32 1.0, %v2124_v20  ;;  %v2930_v61 = vpack.c.bf16 %v2674_v33, %v2674_v33  ;;  %v15577_v33 = vld [vmem:[#allocation39_spill] sm:$0xff] }
 0x414   : > { %v2218_v35 = vand.u32 2147483647, %v1962_v63  ;;  %v2891_v59 = vpack.c.bf16 %v2635_v19, %v2635_v19  ;;  %v2419_v63 = vsub.f32 1.0, %v2163_v46  ;;  %v3414_v19 = vunpack.c.l.b16 %v2890_v48 }
 0x415   : > { %v2381_v46 = vsub.f32 1.0, %v2125_v42  ;;  %v2636_v25 = vmax.f32 %v2380_v50, 0.0 }
 0x416   : > { %v2474_v17 = vsub.f32 1.0, %v2218_v35  ;;  %v3415_v37 = vunpack.c.l.b16 %v2891_v59  ;;  %v2675_v26 = vmax.f32 %v2419_v63, 0.0 }
 0x417   : > { %9665 = vset.pattern.permute.xlu2 %v10216_v57  ;;  %9664 = vset.pattern.permute.xlu1 %v10179_v5  ;;  %v2637_v63 = vmax.f32 %v2381_v46, 0.0 }
 0x418   : > { %v2730_v52 = vmax.f32 %v2474_v17, 0.0  ;;  %v3650_v9 = vpack.c.b16 %v3415_v37, %v3414_v19  ;;  %v1908_v17 = vsub.f32 %v11022_v22, %v10188_v8 }
 0x419   : > { %9347 = vmatmul.msk.bf16.gmra.mxu0 %vm3758_vm1, %v3649_v29  ;;  %v2475_v29 = vsub.f32 1.0, %v2219_v4  ;;  %v2893_v37 = vpack.c.bf16 %v2637_v63, %v2637_v63 }
 0x41a   : > { %v2986_v4 = vpack.c.bf16 %v2730_v52, %v2730_v52  ;;  %v11354_v47 = vpop.f32.mrf.mxu0  ;;  %v2164_v22 = vand.u32 2147483647, %v1908_v17 }
 0x41b   : > { %v2731_v35 = vmax.f32 %v2475_v29, 0.0  ;;  %15576 = vst [vmem:[#allocation13_spill] sm:$0xff] %v11354_v47  ;;  %v2220_v29 = vand.u32 2147483647, %v1964_v45  ;;  %v2892_v47 = vpack.c.bf16 %v2636_v25, %v2636_v25 }
 0x41c   : > { %v3510_v48 = vunpack.c.l.b16 %v2986_v4  ;;  %v2420_v46 = vsub.f32 1.0, %v2164_v22  ;;  %v15579_v4 = vld [vmem:[#allocation95_spill] sm:$0xff] }
 0x41d   : > { %v2987_v59 = vpack.c.bf16 %v2731_v35, %v2731_v35  ;;  %v2476_v19 = vsub.f32 1.0, %v2220_v29  ;;  %v1870_v35 = vsub.f32 %v10687_v34, %v10188_v8  ;;  %v1121_v29 = vpop.permute.xlu2 %1120 }
 0x41f   : > { %1224 = vperm.xlu2 %9665, %v15566_v49   ;;  %1218 = vperm.xlu1 %9664, %v15566_v49   ;;  %v3511_v20 = vunpack.c.l.b16 %v2987_v59  ;;  %v2732_v17 = vmax.f32 %v2476_v19, 0.0  ;;  %v3416_v59 = vunpack.c.l.b16 %v2892_v47  ;;  %v2126_v63 = vand.u32 2147483647, %v1870_v35 }
 0x420   : > { %9395 = vmatmul.msk.bf16.gmra.mxu2 %vm3758_vm1, %v3697_v3  ;;  %v2931_v3 = vpack.c.bf16 %v2675_v26, %v2675_v26  ;;  %v3454_v26 = vunpack.c.l.b16 %v2930_v61  ;;  %v2676_v61 = vmax.f32 %v2420_v46, 0.0  ;;  %v1966_v47 = vsub.f32 %v1121_v29, %v10188_v8 }
 0x421   : > { %9367 = vmatmul.msk.bf16.gmra.mxu1 %vm3758_vm1, %v3669_v36  ;;  %v1115_v28 = vpop.permute.xlu1 %1114  ;;  %v2165_v36 = vand.u32 2147483647, %v1909_v31  ;;  %v3698_v55 = vpack.c.b16 %v3511_v20, %v3510_v48 }
 0x422   : > { %v1965_v15 = vsub.f32 %v1115_v28, %v10188_v8  ;;  %v3455_v52 = vunpack.c.l.b16 %v2931_v3  ;;  %v11361_v45 = vpop.f32.mrf.mxu0  ;;  %v3417_v3 = vunpack.c.l.b16 %v2893_v37  ;;  %v2932_v20 = vpack.c.bf16 %v2676_v61, %v2676_v61 }
 0x423   : > { %v2421_v28 = vsub.f32 1.0, %v2165_v36  ;;  %15578 = vst [vmem:[#allocation38_spill] sm:$0xff] %v11361_v45  ;;  %v1873_v61 = vsub.f32 %v10682_v40, %v10188_v8  ;;  %v15659_v45 = vld [vmem:[#allocation14_spill] sm:$0xff] }
 0x424   : > { %v2221_v42 = vand.u32 2147483647, %v1965_v15  ;;  %v3670_v31 = vpack.c.b16 %v3455_v52, %v3454_v26  ;;  %v1871_v15 = vsub.f32 %v15579_v4, %v10188_v8  ;;  %v3651_v22 = vpack.c.b16 %v3417_v3, %v3416_v59 }
 0x425   : > { %v2677_v50 = vmax.f32 %v2421_v28, 0.0  ;;  %v2382_v52 = vsub.f32 1.0, %v2126_v63  ;;  %v1910_v26 = vsub.f32 %v11031_v32, %v10188_v8  ;;  %v1911_v28 = vsub.f32 %v11035_v44, %v10188_v8  ;;  %v1133_v40 = vpop.permute.xlu2 %1132 }
 0x426   : > { %v2477_v53 = vsub.f32 1.0, %v2221_v42  ;;  %v2127_v36 = vand.u32 2147483647, %v1871_v15  ;;  %v2988_v42 = vpack.c.bf16 %v2732_v17, %v2732_v17  ;;  %v3456_v32 = vunpack.c.l.b16 %v2932_v20 }
 0x427   : > { %9667 = vset.pattern.permute.xlu2 %v10172_v2  ;;  %9666 = vset.pattern.permute.xlu1 %v10236_v12  ;;  %v2933_v48 = vpack.c.bf16 %v2677_v50, %v2677_v50  ;;  %v2638_v4 = vmax.f32 %v2382_v52, 0.0  ;;  %v2166_v15 = vand.u32 2147483647, %v1910_v26  ;;  %v2222_v17 = vand.u32 2147483647, %v1966_v47 }
 0x428   : > { %v2733_v34 = vmax.f32 %v2477_v53, 0.0  ;;  %v2383_v37 = vsub.f32 1.0, %v2127_v36  ;;  %v3512_v19 = vunpack.c.l.b16 %v2988_v42  ;;  %v1872_v3 = vsub.f32 %v10701_v11, %v10188_v8 }
 0x429   : > { %9348 = vmatmul.msk.bf16.gmra.mxu0 %vm3758_vm1, %v3650_v9  ;;  %v11367_v9 = vpop.f32.mrf.mxu1  ;;  %v2167_v59 = vand.u32 2147483647, %v1911_v28  ;;  %v2422_v36 = vsub.f32 1.0, %v2166_v15 }
 0x42a   : > { %v11378_v53 = vpop.f32.mrf.mxu0 }
 0x42b   : > { %v2678_v20 = vmax.f32 %v2422_v36, 0.0 }
 0x42f   : > { %1243 = vperm.xlu2 %9667, %v15577_v33   ;;  %1236 = vperm.xlu1 %9666, %v15566_v49  }
 0x430   : > { %9396 = vmatmul.msk.bf16.gmra.mxu2 %vm3758_vm1, %v3698_v55  ;;  %v2989_v55 = vpack.c.bf16 %v2733_v34, %v2733_v34  ;;  %v2639_v34 = vmax.f32 %v2383_v37, 0.0 }
 0x431   : > { %9368 = vmatmul.msk.bf16.gmra.mxu1 %vm3758_vm1, %v3670_v31  ;;  %v1127_v49 = vpop.permute.xlu1 %1126  ;;  %v3457_v31 = vunpack.c.l.b16 %v2933_v48  ;;  %v11380_v50 = vpop.f32.mrf.mxu1  ;;  %v2478_v48 = vsub.f32 1.0, %v2222_v17  ;;  %v2934_v17 = vpack.c.bf16 %v2678_v20, %v2678_v20 }
 0x432   : > { %v1967_v25 = vsub.f32 %v1127_v49, %v10188_v8  ;;  %v3513_v35 = vunpack.c.l.b16 %v2989_v55  ;;  %15580 = vst [vmem:[#allocation96_spill] sm:$0xff] %v11380_v50  ;;  %v2894_v49 = vpack.c.bf16 %v2638_v4, %v2638_v4  ;;  %v2895_v42 = vpack.c.bf16 %v2639_v34, %v2639_v34  ;;  %v11390_v26 = vpop.f32.mrf.mxu0 }
 0x433   : > { %v3671_v29 = vpack.c.b16 %v3457_v31, %v3456_v32  ;;  %v2128_v55 = vand.u32 2147483647, %v1872_v3  ;;  %15581 = vst [vmem:[#allocation90_spill] sm:$0xff] %v11390_v26  ;;  %v2734_v47 = vmax.f32 %v2478_v48, 0.0  ;;  %v1968_v31 = vsub.f32 %v1133_v40, %v10188_v8 }
 0x434   : > { %v2223_v46 = vand.u32 2147483647, %v1967_v25  ;;  %v3699_v63 = vpack.c.b16 %v3513_v35, %v3512_v19  ;;  %v2423_v25 = vsub.f32 1.0, %v2167_v59  ;;  %v3418_v52 = vunpack.c.l.b16 %v2894_v49 }
 0x435   : > { %v3419_v37 = vunpack.c.l.b16 %v2895_v42  ;;  %v2384_v28 = vsub.f32 1.0, %v2128_v55  ;;  %v1912_v34 = vsub.f32 %v11040_v27, %v10188_v8  ;;  %v2990_v3 = vpack.c.bf16 %v2734_v47, %v2734_v47 }
 0x436   : > { %v2479_v44 = vsub.f32 1.0, %v2223_v46  ;;  %v2679_v19 = vmax.f32 %v2423_v25, 0.0  ;;  %v1969_v46 = vsub.f32 %v11061_v60, %v10188_v8 }
 0x437   : > { %9669 = vset.pattern.permute.xlu2 %v10182_v6  ;;  %9668 = vset.pattern.permute.xlu1 %v10185_v7  ;;  %v3652_v15 = vpack.c.b16 %v3419_v37, %v3418_v52  ;;  %v2640_v59 = vmax.f32 %v2384_v28, 0.0  ;;  %v2168_v48 = vand.u32 2147483647, %v1912_v34  ;;  %v3514_v42 = vunpack.c.l.b16 %v2990_v3 }
 0x438   : > { %v2735_v11 = vmax.f32 %v2479_v44, 0.0  ;;  %v2935_v44 = vpack.c.bf16 %v2679_v19, %v2679_v19  ;;  %v2225_v60 = vand.u32 2147483647, %v1969_v46  ;;  %v1875_v19 = vsub.f32 %v10710_v0, %v10188_v8 }
 0x439   : > { %9349 = vmatmul.msk.bf16.gmra.mxu0 %vm3758_vm1, %v3651_v22  ;;  %v2129_v22 = vand.u32 2147483647, %v1873_v61  ;;  %v11392_v35 = vpop.f32.mrf.mxu1  ;;  %v2224_v61 = vand.u32 2147483647, %v1968_v31  ;;  %v2896_v27 = vpack.c.bf16 %v2640_v59, %v2640_v59  ;;  %v2424_v37 = vsub.f32 1.0, %v2168_v48 }
 0x43a   : > { %15582 = vst [vmem:[#allocation58_spill] sm:$0xff] %v11392_v35  ;;  %v2991_v4 = vpack.c.bf16 %v2735_v11, %v2735_v11  ;;  %v3459_v55 = vunpack.c.l.b16 %v2935_v44  ;;  %v1874_v11 = vsub.f32 %v10690_v39, %v10188_v8  ;;  %v11406_v52 = vpop.f32.mrf.mxu0  ;;  %v2131_v3 = vand.u32 2147483647, %v1875_v19 }
 0x43b   : > { %v2385_v32 = vsub.f32 1.0, %v2129_v22  ;;  %v2481_v22 = vsub.f32 1.0, %v2225_v60  ;;  %15583 = vst [vmem:[#allocation93_spill] sm:$0xff] %v11406_v52  ;;  %v2480_v20 = vsub.f32 1.0, %v2224_v61  ;;  %v3420_v39 = vunpack.c.l.b16 %v2896_v27 }
 0x43c   : > { %v3515_v49 = vunpack.c.l.b16 %v2991_v4  ;;  %v2130_v31 = vand.u32 2147483647, %v1874_v11  ;;  %v1915_v27 = vsub.f32 %v11059_v21, %v10188_v8 }
 0x43d   : > { %v2641_v36 = vmax.f32 %v2385_v32, 0.0  ;;  %v2737_v4 = vmax.f32 %v2481_v22, 0.0  ;;  %v2736_v32 = vmax.f32 %v2480_v20, 0.0 }
 0x43e   : > { %v3700_v40 = vpack.c.b16 %v3515_v49, %v3514_v42  ;;  %v2386_v60 = vsub.f32 1.0, %v2130_v31  ;;  %v1877_v31 = vsub.f32 %v10724_v30, %v10188_v8 }
 0x43f   : > { %1255 = vperm.xlu2 %9669, %v15577_v33   ;;  %1249 = vperm.xlu1 %9668, %v15577_v33   ;;  %v2897_v47 = vpack.c.bf16 %v2641_v36, %v2641_v36  ;;  %v2993_v61 = vpack.c.bf16 %v2737_v4, %v2737_v4  ;;  %v2992_v49 = vpack.c.bf16 %v2736_v32, %v2736_v32 }
 0x440   : > { %9397 = vmatmul.msk.bf16.gmra.mxu2 %vm3758_vm1, %v3699_v63  ;;  %v1913_v63 = vsub.f32 %v11050_v58, %v10188_v8  ;;  %v2642_v20 = vmax.f32 %v2386_v60, 0.0  ;;  %v2133_v30 = vand.u32 2147483647, %v1877_v31  ;;  %v1917_v31 = vsub.f32 %v11073_v18, %v10188_v8 }
 0x441   : > { %9369 = vmatmul.msk.bf16.gmra.mxu1 %vm3758_vm1, %v3671_v29  ;;  %v3458_v29 = vunpack.c.l.b16 %v2934_v17  ;;  %v2680_v17 = vmax.f32 %v2424_v37, 0.0  ;;  %v1146_v34 = vpop.permute.xlu1 %1145 }
 0x442   : > { %v2169_v25 = vand.u32 2147483647, %v1913_v63  ;;  %v1152_v63 = vpop.permute.xlu2 %1151  ;;  %v1970_v0 = vsub.f32 %v1146_v34, %v10188_v8  ;;  %v2898_v32 = vpack.c.bf16 %v2642_v20, %v2642_v20 }
 0x443   : > { %v3672_v28 = vpack.c.b16 %v3459_v55, %v3458_v29  ;;  %v15585_v29 = vld [vmem:[#allocation98_spill] sm:$0xff]  ;;  %v2936_v42 = vpack.c.bf16 %v2680_v17, %v2680_v17  ;;  %v2387_v55 = vsub.f32 1.0, %v2131_v3  ;;  %v1971_v11 = vsub.f32 %v1152_v63, %v10188_v8  ;;  %v15587_v3 = vld [vmem:[#allocation97_spill] sm:$0xff] }
 0x444   : > { %v2425_v46 = vsub.f32 1.0, %v2169_v25  ;;  %v1914_v48 = vsub.f32 %v15585_v29, %v10188_v8  ;;  %v11425_v25 = vpop.f32.mrf.mxu0  ;;  %v2226_v37 = vand.u32 2147483647, %v1970_v0  ;;  %v3422_v0 = vunpack.c.l.b16 %v2898_v32 }
 0x445   : > { %v3460_v19 = vunpack.c.l.b16 %v2936_v42  ;;  %v2643_v21 = vmax.f32 %v2387_v55, 0.0 }
 0x446   : > { %v2681_v44 = vmax.f32 %v2425_v46, 0.0  ;;  %v2227_v46 = vand.u32 2147483647, %v1971_v11 }
 0x447   : > { %9671 = vset.pattern.permute.xlu2 %v10216_v57  ;;  %9670 = vset.pattern.permute.xlu1 %v10179_v5 }
 0x448   : > { %v2937_v22 = vpack.c.bf16 %v2681_v44, %v2681_v44 }
 0x449   : > { %9350 = vmatmul.msk.bf16.gmra.mxu0 %vm3758_vm1, %v3652_v15  ;;  %v3421_v15 = vunpack.c.l.b16 %v2897_v47  ;;  %v3516_v47 = vunpack.c.l.b16 %v2992_v49  ;;  %v2483_v49 = vsub.f32 1.0, %v2227_v46 }
 0x44a   : > { %v3461_v4 = vunpack.c.l.b16 %v2937_v22 }
 0x44b   : > { %v3653_v59 = vpack.c.b16 %v3421_v15, %v3420_v39  ;;  %v2171_v39 = vand.u32 2147483647, %v1915_v27  ;;  %v2482_v15 = vsub.f32 1.0, %v2226_v37  ;;  %v2739_v20 = vmax.f32 %v2483_v49, 0.0  ;;  %v11454_v49 = vpop.permute.xlu0 %924 }
 0x44c   : > { %v3673_v60 = vpack.c.b16 %v3461_v4, %v3460_v19  ;;  %v11439_v29 = vpop.f32.mrf.mxu0 }
 0x44d   : > { %v2427_v63 = vsub.f32 1.0, %v2171_v39  ;;  %15588 = vst [vmem:[#allocation95_spill] sm:$0xff] %v11439_v29  ;;  %v2995_v4 = vpack.c.bf16 %v2739_v20, %v2739_v20 }
 0x44e   : > { %v11408_v58 = vpop.f32.mrf.mxu1 }
 0x44f   : > { %1273 = vperm.xlu2 %9671, %v15577_v33   ;;  %1267 = vperm.xlu1 %9670, %v15577_v33   ;;  %v2683_v55 = vmax.f32 %v2427_v63, 0.0 }
 0x450   : > { %9398 = vmatmul.msk.bf16.gmra.mxu2 %vm3758_vm1, %v3700_v40  ;;  %v3517_v40 = vunpack.c.l.b16 %v2993_v61  ;;  %v2899_v61 = vpack.c.bf16 %v2643_v21, %v2643_v21 }
 0x451   : > { %9370 = vmatmul.msk.bf16.gmra.mxu1 %vm3758_vm1, %v3672_v28  ;;  %v2170_v28 = vand.u32 2147483647, %v1914_v48  ;;  %v2738_v48 = vmax.f32 %v2482_v15, 0.0  ;;  %v1158_v11 = vpop.permute.xlu1 %1157  ;;  %v2939_v46 = vpack.c.bf16 %v2683_v55, %v2683_v55 }
 0x452   : > { %v3701_v34 = vpack.c.b16 %v3517_v40, %v3516_v47  ;;  %v3423_v22 = vunpack.c.l.b16 %v2899_v61  ;;  %v2389_v40 = vsub.f32 1.0, %v2133_v30  ;;  %v2173_v61 = vand.u32 2147483647, %v1917_v31 }
 0x453   : > { %v2426_v44 = vsub.f32 1.0, %v2170_v28  ;;  %v2994_v37 = vpack.c.bf16 %v2738_v48, %v2738_v48  ;;  %v1972_v28 = vsub.f32 %v1158_v11, %v10188_v8  ;;  %v3463_v18 = vunpack.c.l.b16 %v2939_v46 }
 0x454   : > { %v3654_v47 = vpack.c.b16 %v3423_v22, %v3422_v0  ;;  %v2645_v15 = vmax.f32 %v2389_v40, 0.0  ;;  %v3519_v30 = vunpack.c.l.b16 %v2995_v4  ;;  %v2429_v40 = vsub.f32 1.0, %v2173_v61 }
 0x455   : > { %v2682_v27 = vmax.f32 %v2426_v44, 0.0  ;;  %v2228_v44 = vand.u32 2147483647, %v1972_v28 }
 0x456   : > { %v11417_v36 = vpop.f32.mrf.mxu1  ;;  %v2901_v48 = vpack.c.bf16 %v2645_v15, %v2645_v15  ;;  %v2685_v4 = vmax.f32 %v2429_v40, 0.0 }
 0x457   : > { %15584 = vst [vmem:[#allocation59_spill] sm:$0xff] %v11417_v36  ;;  %9673 = vset.pattern.permute.xlu2 %v10236_v12  ;;  %9672 = vset.pattern.permute.xlu1 %v10239_v13  ;;  %v2938_v21 = vpack.c.bf16 %v2682_v27, %v2682_v27  ;;  %v1879_v27 = vsub.f32 %v10816_v16, %v10188_v8 }
 0x459   : > { %9351 = vmatmul.msk.bf16.gmra.mxu0 %vm3758_vm1, %v3653_v59  ;;  %v1876_v59 = vsub.f32 %v15587_v3, %v10188_v8  ;;  %v3518_v3 = vunpack.c.l.b16 %v2994_v37  ;;  %v2135_v16 = vand.u32 2147483647, %v1879_v27  ;;  %v1919_v27 = vsub.f32 %v10825_v1, %v10188_v8 }
 0x45b   : > { %v2132_v42 = vand.u32 2147483647, %v1876_v59  ;;  %v11452_v59 = vpop.f32.mrf.mxu0  ;;  %v3702_v11 = vpack.c.b16 %v3519_v30, %v3518_v3  ;;  %v2391_v61 = vsub.f32 1.0, %v2135_v16  ;;  %v2175_v16 = vand.u32 2147483647, %v1919_v27 }
 0x45c   : > { %15589 = vst [vmem:[#allocation98_spill] sm:$0xff] %v11452_v59 }
 0x45d   : > { %v2388_v39 = vsub.f32 1.0, %v2132_v42 }
 0x45e   : > { %v11431_v17 = vpop.f32.mrf.mxu1 }
 0x45f   : > { %15586 = vst [vmem:[#allocation39_spill] sm:$0xff] %v11431_v17  ;;  %1285 = vperm.xlu2 %9673, %v15577_v33   ;;  %1279 = vperm.xlu1 %9672, %v15577_v33   ;;  %v1164_v33 = vpop.permute.xlu2 %1163  ;;  %v2644_v63 = vmax.f32 %v2388_v39, 0.0  ;;  %v3425_v39 = vunpack.c.l.b16 %v2901_v48 }
 0x460   : > { %9399 = vmatmul.msk.bf16.gmra.mxu2 %vm3758_vm1, %v3701_v34  ;;  %v1973_v32 = vsub.f32 %v1164_v33, %v10188_v8  ;;  %v1916_v34 = vsub.f32 %v11068_v10, %v10188_v8  ;;  %v2484_v10 = vsub.f32 1.0, %v2228_v44  ;;  %v15591_v33 = vld [vmem:[#allocation62_spill] sm:$0xff] }
 0x461   : > { %9371 = vmatmul.msk.bf16.gmra.mxu1 %vm3758_vm1, %v3673_v60  ;;  %v3462_v60 = vunpack.c.l.b16 %v2938_v21  ;;  %v2900_v22 = vpack.c.bf16 %v2644_v63, %v2644_v63 }
 0x462   : > { %v2229_v0 = vand.u32 2147483647, %v1973_v32  ;;  %v2172_v42 = vand.u32 2147483647, %v1916_v34  ;;  %v2740_v46 = vmax.f32 %v2484_v10, 0.0  ;;  %v1176_v32 = vpop.permute.xlu1 %1175  ;;  %v15595_v10 = vld [vmem:[#allocation145_spill] sm:$0xff] }
 0x463   : > { %v3674_v20 = vpack.c.b16 %v3463_v18, %v3462_v60  ;;  %v3424_v31 = vunpack.c.l.b16 %v2900_v22  ;;  %v11468_v44 = vpop.f32.mrf.mxu0  ;;  %v1170_v18 = vpop.permute.xlu0 %1169  ;;  %v1975_v48 = vsub.f32 %v1176_v32, %v10188_v8  ;;  %v2941_v22 = vpack.c.bf16 %v2685_v4, %v2685_v4 }
 0x464   : > { %v2485_v28 = vsub.f32 1.0, %v2229_v0  ;;  %v2428_v21 = vsub.f32 1.0, %v2172_v42  ;;  %v1974_v30 = vsub.f32 %v1170_v18, %v10188_v8  ;;  %v2996_v0 = vpack.c.bf16 %v2740_v46, %v2740_v46 }
 0x465   : > { %v3655_v63 = vpack.c.b16 %v3425_v39, %v3424_v31  ;;  %v3465_v1 = vunpack.c.l.b16 %v2941_v22 }
 0x466   : > { %v11442_v19 = vpop.f32.mrf.mxu1  ;;  %v2741_v3 = vmax.f32 %v2485_v28, 0.0  ;;  %v2684_v60 = vmax.f32 %v2428_v21, 0.0  ;;  %v2230_v28 = vand.u32 2147483647, %v1974_v30  ;;  %v3520_v39 = vunpack.c.l.b16 %v2996_v0 }
 0x467   : > { %9675 = vset.pattern.permute.xlu2 %v10182_v6  ;;  %9674 = vset.pattern.permute.xlu1 %v10185_v7  ;;  %v2231_v21 = vand.u32 2147483647, %v1975_v48 }
 0x468   : > { %v2997_v40 = vpack.c.bf16 %v2741_v3, %v2741_v3 }
 0x469   : > { %9352 = vmatmul.msk.bf16.gmra.mxu0 %vm3758_vm1, %v3654_v47  ;;  %v15592_v47 = vld [vmem:[#allocation99_spill] sm:$0xff] }
 0x46a   : > { %v1878_v37 = vsub.f32 %v15592_v47, %v10188_v8  ;;  %v2940_v47 = vpack.c.bf16 %v2684_v60, %v2684_v60  ;;  %v3521_v4 = vunpack.c.l.b16 %v2997_v40 }
 0x46c   : > { %v2134_v34 = vand.u32 2147483647, %v1878_v37  ;;  %v2647_v37 = vmax.f32 %v2391_v61, 0.0  ;;  %v3464_v18 = vunpack.c.l.b16 %v2940_v47  ;;  %v3703_v3 = vpack.c.b16 %v3521_v4, %v3520_v39  ;;  %v1182_v4 = vpop.permute.xlu2 %1181 }
 0x46d   : > { %v2431_v61 = vsub.f32 1.0, %v2175_v16 }
 0x46e   : > { %v11458_v55 = vpop.f32.mrf.mxu1  ;;  %v3675_v0 = vpack.c.b16 %v3465_v1, %v3464_v18 }
 0x46f   : > { %15590 = vst [vmem:[#allocation97_spill] sm:$0xff] %v11458_v55  ;;  %1304 = vperm.xlu2 %9675, %v15591_v33   ;;  %1298 = vperm.xlu1 %9674, %v15591_v33   ;;  %v2486_v55 = vsub.f32 1.0, %v2230_v28  ;;  %v2687_v28 = vmax.f32 %v2431_v61, 0.0 }
 0x470   : > { %9400 = vmatmul.msk.bf16.gmra.mxu2 %vm3758_vm1, %v3702_v11  ;;  %v1918_v11 = vsub.f32 %v15595_v10, %v10188_v8  ;;  %v2903_v10 = vpack.c.bf16 %v2647_v37, %v2647_v37 }
 0x471   : > { %9372 = vmatmul.msk.bf16.gmra.mxu1 %vm3758_vm1, %v3674_v20  ;;  %v2390_v20 = vsub.f32 1.0, %v2134_v34  ;;  %v2487_v34 = vsub.f32 1.0, %v2231_v21  ;;  %v2742_v40 = vmax.f32 %v2486_v55, 0.0  ;;  %v1188_v21 = vpop.permute.xlu1 %1187  ;;  %v15601_v55 = vld [vmem:[#allocation147_spill] sm:$0xff] }
 0x472   : > { %v2174_v46 = vand.u32 2147483647, %v1918_v11  ;;  %v15599_v11 = vld [vmem:[#allocation100_spill] sm:$0xff] }
 0x473   : > { %v11466_v15 = vpop.f32.mrf.mxu2  ;;  %v2646_v32 = vmax.f32 %v2390_v20, 0.0  ;;  %v1881_v22 = vsub.f32 %v15599_v11, %v10188_v8  ;;  %v3427_v20 = vunpack.c.l.b16 %v2903_v10  ;;  %v2743_v47 = vmax.f32 %v2487_v34, 0.0 }
 0x474   : > { %15593 = vst [vmem:[#allocation62_spill] sm:$0xff] %v11466_v15  ;;  %v2430_v30 = vsub.f32 1.0, %v2174_v46  ;;  %v2998_v18 = vpack.c.bf16 %v2742_v40, %v2742_v40  ;;  %v1920_v10 = vsub.f32 %v15601_v55, %v10188_v8  ;;  %v1976_v34 = vsub.f32 %v1182_v4, %v10188_v8 }
 0x475   : > { %v2902_v27 = vpack.c.bf16 %v2646_v32, %v2646_v32  ;;  %v2137_v1 = vand.u32 2147483647, %v1881_v22 }
 0x476   : > { %v11472_v42 = vpop.f32.mrf.mxu1  ;;  %v2686_v39 = vmax.f32 %v2430_v30, 0.0  ;;  %v15603_v30 = vld [vmem:[#allocation150_spill] sm:$0xff]  ;;  %v2232_v4 = vand.u32 2147483647, %v1976_v34 }
 0x477   : > { %15594 = vst [vmem:[#allocation99_spill] sm:$0xff] %v11472_v42  ;;  %9677 = vset.pattern.permute.xlu2 %v10179_v5  ;;  %9676 = vset.pattern.permute.xlu1 %v10203_v38  ;;  %v11483_v42 = vpop.f32.mrf.mxu0  ;;  %v3426_v46 = vunpack.c.l.b16 %v2902_v27  ;;  %v2393_v61 = vsub.f32 1.0, %v2137_v1  ;;  %v1921_v27 = vsub.f32 %v15603_v30, %v10188_v8  ;;  %v15606_v1 = vld [vmem:[#allocation106_spill] sm:$0xff] }
 0x478   : > { %15597 = vst [vmem:[#allocation189_spill] sm:$0xff] %v11483_v42  ;;  %v1882_v36 = vsub.f32 %v15606_v1, %v10188_v8 }
 0x479   : > { %9353 = vmatmul.msk.bf16.gmra.mxu0 %vm3758_vm1, %v3655_v63  ;;  %v15598_v63 = vld [vmem:[#allocation103_spill] sm:$0xff]  ;;  %v3656_v32 = vpack.c.b16 %v3427_v20, %v3426_v46  ;;  %v3522_v20 = vunpack.c.l.b16 %v2998_v18  ;;  %v2649_v55 = vmax.f32 %v2393_v61, 0.0 }
 0x47a   : > { %v1880_v60 = vsub.f32 %v15598_v63, %v10188_v8  ;;  %v1977_v63 = vsub.f32 %v1188_v21, %v10188_v8  ;;  %v2176_v21 = vand.u32 2147483647, %v1920_v10  ;;  %v1195_v10 = vpop.permute.xlu2 %1194 }
 0x47b   : > { %v11481_v31 = vpop.f32.mrf.mxu2 }
 0x47c   : > { %15596 = vst [vmem:[#allocation145_spill] sm:$0xff] %v11481_v31  ;;  %v2136_v37 = vand.u32 2147483647, %v1880_v60  ;;  %v2943_v31 = vpack.c.bf16 %v2687_v28, %v2687_v28 }
 0x47e   : > { %v11487_v48 = vpop.f32.mrf.mxu1  ;;  %v2392_v11 = vsub.f32 1.0, %v2136_v37  ;;  %v3467_v28 = vunpack.c.l.b16 %v2943_v31  ;;  %v15607_v31 = vld [vmem:[#allocation102_spill] sm:$0xff] }
 0x47f   : > { %1316 = vperm.xlu2 %9677, %v15591_v33   ;;  %1310 = vperm.xlu1 %9676, %v15591_v33   ;;  %v11503_v60 = vpop.f32.mrf.mxu0  ;;  %v1883_v18 = vsub.f32 %v15607_v31, %v10188_v8 }
 0x480   : > { %9401 = vmatmul.msk.bf16.gmra.mxu2 %vm3758_vm1, %v3703_v3  ;;  %v2999_v3 = vpack.c.bf16 %v2743_v47, %v2743_v47  ;;  %15602 = vst [vmem:[#allocation100_spill] sm:$0xff] %v11503_v60  ;;  %v2233_v47 = vand.u32 2147483647, %v1977_v63  ;;  %v2648_v37 = vmax.f32 %v2392_v11, 0.0  ;;  %v2905_v63 = vpack.c.bf16 %v2649_v55, %v2649_v55 }
 0x481   : > { %9373 = vmatmul.msk.bf16.gmra.mxu1 %vm3758_vm1, %v3675_v0  ;;  %v2942_v0 = vpack.c.bf16 %v2686_v39, %v2686_v39 }
 0x482   : > { %v3523_v40 = vunpack.c.l.b16 %v2999_v3  ;;  %v2489_v30 = vsub.f32 1.0, %v2233_v47  ;;  %v2488_v3 = vsub.f32 1.0, %v2232_v4  ;;  %v2139_v47 = vand.u32 2147483647, %v1883_v18 }
 0x483   : > { %v11495_v16 = vpop.f32.mrf.mxu2  ;;  %v3466_v39 = vunpack.c.l.b16 %v2942_v0  ;;  %v2138_v0 = vand.u32 2147483647, %v1882_v36 }
 0x484   : > { %15600 = vst [vmem:[#allocation103_spill] sm:$0xff] %v11495_v16  ;;  %v2177_v16 = vand.u32 2147483647, %v1921_v27  ;;  %v3704_v17 = vpack.c.b16 %v3523_v40, %v3522_v20  ;;  %v2745_v61 = vmax.f32 %v2489_v30, 0.0  ;;  %v2395_v30 = vsub.f32 1.0, %v2139_v47 }
 0x485   : > { %v3676_v50 = vpack.c.b16 %v3467_v28, %v3466_v39  ;;  %v15610_v28 = vld [vmem:[#allocation27_spill] sm:$0xff]  ;;  %v3429_v39 = vunpack.c.l.b16 %v2905_v63 }
 0x486   : > { %v11507_v22 = vpop.f32.mrf.mxu1  ;;  %v2433_v11 = vsub.f32 1.0, %v2177_v16  ;;  %v3001_v36 = vpack.c.bf16 %v2745_v61, %v2745_v61 }
 0x487   : > { %9679 = vset.pattern.permute.xlu2 %v10236_v12  ;;  %9678 = vset.pattern.permute.xlu1 %v10239_v13  ;;  %15604 = vst [vmem:[#allocation147_spill] sm:$0xff] %v11507_v22  ;;  %v2904_v22 = vpack.c.bf16 %v2648_v37, %v2648_v37  ;;  %v11520_v34 = vpop.f32.mrf.mxu0  ;;  %v2744_v37 = vmax.f32 %v2488_v3, 0.0  ;;  %v15612_v3 = vld [vmem:[#allocation154_spill] sm:$0xff] }
 0x488   : > { %v2689_v16 = vmax.f32 %v2433_v11, 0.0  ;;  %v1923_v63 = vsub.f32 %v15612_v3, %v10188_v8  ;;  %v15615_v3 = vld [vmem:[#allocation135_spill] sm:$0xff] }
 0x489   : > { %9354 = vmatmul.msk.bf16.gmra.mxu0 %vm3758_vm1, %v3656_v32  ;;  %v2432_v32 = vsub.f32 1.0, %v2176_v21  ;;  %v3428_v27 = vunpack.c.l.b16 %v2904_v22  ;;  %v2394_v21 = vsub.f32 1.0, %v2138_v0  ;;  %v15611_v22 = vld [vmem:[#allocation152_spill] sm:$0xff] }
 0x48a   : > { %v1922_v1 = vsub.f32 %v15611_v22, %v10188_v8  ;;  %v2945_v18 = vpack.c.bf16 %v2689_v16, %v2689_v16 }
 0x48b   : > { %v11510_v46 = vpop.f32.mrf.mxu2  ;;  %v2688_v20 = vmax.f32 %v2432_v32, 0.0  ;;  %v3657_v4 = vpack.c.b16 %v3429_v39, %v3428_v27  ;;  %v3000_v32 = vpack.c.bf16 %v2744_v37, %v2744_v37  ;;  %v2650_v11 = vmax.f32 %v2394_v21, 0.0 }
 0x48c   : > { %15605 = vst [vmem:[#allocation150_spill] sm:$0xff] %v11510_v46  ;;  %v2178_v27 = vand.u32 2147483647, %v1922_v1  ;;  %v3469_v37 = vunpack.c.l.b16 %v2945_v18  ;;  %v15616_v1 = vld [vmem:[#allocation117_spill] sm:$0xff] }
 0x48d   : > { %v2944_v55 = vpack.c.bf16 %v2688_v20, %v2688_v20  ;;  %v3524_v39 = vunpack.c.l.b16 %v3000_v32  ;;  %v15617_v32 = vld [vmem:[#allocation109_spill] sm:$0xff] }
 0x48e   : > { %v11522_v40 = vpop.f32.mrf.mxu1 }
 0x48f   : > { %1334 = vperm.xlu2 %9679, %v15591_v33   ;;  %1328 = vperm.xlu1 %9678, %v15591_v33   ;;  %15608 = vst [vmem:[#allocation106_spill] sm:$0xff] %v11522_v40  ;;  %v3468_v61 = vunpack.c.l.b16 %v2944_v55  ;;  %v11538_v22 = vpop.f32.mrf.mxu0  ;;  %v2434_v55 = vsub.f32 1.0, %v2178_v27  ;;  %v1213_v40 = vpop.permute.xlu2 %1212 }
 0x490   : > { %9402 = vmatmul.msk.bf16.gmra.mxu2 %vm3758_vm1, %v3704_v17  ;;  %v1979_v17 = vsub.f32 %v15610_v28, %v10188_v8  ;;  %v2651_v28 = vmax.f32 %v2395_v30, 0.0  ;;  %15614 = vst [vmem:[#allocation152_spill] sm:$0xff] %v11538_v22 }
 0x491   : > { %9374 = vmatmul.msk.bf16.gmra.mxu1 %vm3758_vm1, %v3676_v50  ;;  %v1978_v50 = vsub.f32 %v1195_v10, %v10188_v8  ;;  %v3525_v10 = vunpack.c.l.b16 %v3001_v36  ;;  %v3677_v36 = vpack.c.b16 %v3469_v37, %v3468_v61  ;;  %v1207_v61 = vpop.permute.xlu1 %1206 }
 0x492   : > { %v2235_v31 = vand.u32 2147483647, %v1979_v17  ;;  %v2179_v17 = vand.u32 2147483647, %v1923_v63  ;;  %v2907_v30 = vpack.c.bf16 %v2651_v28, %v2651_v28 }
 0x493   : > { %v11524_v33 = vpop.f32.mrf.mxu2  ;;  %v2234_v0 = vand.u32 2147483647, %v1978_v50  ;;  %v3705_v50 = vpack.c.b16 %v3525_v10, %v3524_v39  ;;  %v2690_v10 = vmax.f32 %v2434_v55, 0.0 }
 0x494   : > { %15609 = vst [vmem:[#allocation102_spill] sm:$0xff] %v11524_v33  ;;  %v2491_v47 = vsub.f32 1.0, %v2235_v31  ;;  %v2906_v33 = vpack.c.bf16 %v2650_v11, %v2650_v11  ;;  %v1885_v31 = vsub.f32 %v15617_v32, %v10188_v8  ;;  %v2435_v63 = vsub.f32 1.0, %v2179_v17 }
 0x495   : > { %v2490_v21 = vsub.f32 1.0, %v2234_v0  ;;  %v3431_v39 = vunpack.c.l.b16 %v2907_v30 }
 0x496   : > { %v11540_v16 = vpop.f32.mrf.mxu1  ;;  %v2747_v18 = vmax.f32 %v2491_v47, 0.0  ;;  %v3430_v11 = vunpack.c.l.b16 %v2906_v33  ;;  %v2141_v37 = vand.u32 2147483647, %v1885_v31  ;;  %v2691_v28 = vmax.f32 %v2435_v63, 0.0  ;;  %v15620_v33 = vld [vmem:[#allocation136_spill] sm:$0xff] }
 0x497   : > { %9681 = vset.pattern.permute.xlu2 %v10185_v7  ;;  %9680 = vset.pattern.permute.xlu1 %v10172_v2  ;;  %v2746_v0 = vmax.f32 %v2490_v21, 0.0  ;;  %v1980_v47 = vsub.f32 %v1207_v61, %v10188_v8  ;;  %v1924_v17 = vsub.f32 %v15620_v33, %v10188_v8  ;;  %v15621_v21 = vld [vmem:[#allocation155_spill] sm:$0xff]  ;;  %v1981_v31 = vsub.f32 %v1213_v40, %v10188_v8 }
 0x498   : > { %v3658_v35 = vpack.c.b16 %v3431_v39, %v3430_v11  ;;  %v2397_v30 = vsub.f32 1.0, %v2141_v37  ;;  %v15624_v40 = vld [vmem:[#allocation111_spill] sm:$0xff] }
 0x499   : > { %9355 = vmatmul.msk.bf16.gmra.mxu0 %vm3758_vm1, %v3657_v4  ;;  %v1884_v4 = vsub.f32 %v15615_v3, %v10188_v8  ;;  %v3002_v22 = vpack.c.bf16 %v2746_v0, %v2746_v0  ;;  %v2236_v0 = vand.u32 2147483647, %v1980_v47 }
 0x49b   : > { %v11536_v20 = vpop.f32.mrf.mxu2  ;;  %v2140_v3 = vand.u32 2147483647, %v1884_v4  ;;  %v2946_v4 = vpack.c.bf16 %v2690_v10, %v2690_v10  ;;  %v2180_v10 = vand.u32 2147483647, %v1924_v17  ;;  %v2492_v37 = vsub.f32 1.0, %v2236_v0  ;;  %v15625_v17 = vld [vmem:[#allocation105_spill] sm:$0xff] }
 0x49c   : > { %15613 = vst [vmem:[#allocation27_spill] sm:$0xff] %v11536_v20  ;;  %v3003_v20 = vpack.c.bf16 %v2747_v18, %v2747_v18  ;;  %v2947_v18 = vpack.c.bf16 %v2691_v28, %v2691_v28  ;;  %v1887_v28 = vsub.f32 %v15624_v40, %v10188_v8 }
 0x49d   : > { %v2396_v32 = vsub.f32 1.0, %v2140_v3  ;;  %v3526_v3 = vunpack.c.l.b16 %v3002_v22  ;;  %v3470_v61 = vunpack.c.l.b16 %v2946_v4  ;;  %v2436_v59 = vsub.f32 1.0, %v2180_v10 }
 0x49e   : > { %v11559_v55 = vpop.f32.mrf.mxu1  ;;  %v3527_v63 = vunpack.c.l.b16 %v3003_v20  ;;  %v1886_v4 = vsub.f32 %v15625_v17, %v10188_v8 }
 0x49f   : > { %1347 = vperm.xlu2 %9681, %v15616_v1   ;;  %1341 = vperm.xlu1 %9680, %v15616_v1   ;;  %15622 = vst [vmem:[#allocation117_spill] sm:$0xff] %v11559_v55  ;;  %v2652_v11 = vmax.f32 %v2396_v32, 0.0  ;;  %v2237_v55 = vand.u32 2147483647, %v1981_v31  ;;  %v2143_v31 = vand.u32 2147483647, %v1887_v28 }
 0x4a0   : > { %9403 = vmatmul.msk.bf16.gmra.mxu2 %vm3758_vm1, %v3705_v50  ;;  %v11552_v50 = vpop.f32.mrf.mxu0  ;;  %v3706_v60 = vpack.c.b16 %v3527_v63, %v3526_v3  ;;  %v2142_v10 = vand.u32 2147483647, %v1886_v4 }
 0x4a1   : > { %9375 = vmatmul.msk.bf16.gmra.mxu1 %vm3758_vm1, %v3677_v36  ;;  %15619 = vst [vmem:[#allocation135_spill] sm:$0xff] %v11552_v50  ;;  %v1925_v36 = vsub.f32 %v15621_v21, %v10188_v8  ;;  %v2653_v21 = vmax.f32 %v2397_v30, 0.0  ;;  %v3471_v50 = vunpack.c.l.b16 %v2947_v18  ;;  %v2908_v42 = vpack.c.bf16 %v2652_v11, %v2652_v11  ;;  %v1219_v11 = vpop.permute.xlu1 %1218 }
 0x4a2   : > { %v2493_v32 = vsub.f32 1.0, %v2237_v55  ;;  %v2692_v18 = vmax.f32 %v2436_v59, 0.0  ;;  %v2399_v40 = vsub.f32 1.0, %v2143_v31 }
 0x4a3   : > { %v11550_v27 = vpop.f32.mrf.mxu2  ;;  %v2181_v39 = vand.u32 2147483647, %v1925_v36  ;;  %v2909_v22 = vpack.c.bf16 %v2653_v21, %v2653_v21  ;;  %v3432_v30 = vunpack.c.l.b16 %v2908_v42  ;;  %v1982_v21 = vsub.f32 %v1219_v11, %v10188_v8  ;;  %v15628_v42 = vld [vmem:[#allocation159_spill] sm:$0xff] }
 0x4a4   : > { %15618 = vst [vmem:[#allocation154_spill] sm:$0xff] %v11550_v27  ;;  %v2749_v0 = vmax.f32 %v2493_v32, 0.0  ;;  %v2948_v17 = vpack.c.bf16 %v2692_v18, %v2692_v18 }
 0x4a5   : > { %v2437_v20 = vsub.f32 1.0, %v2181_v39  ;;  %v3433_v55 = vunpack.c.l.b16 %v2909_v22 }
 0x4a6   : > { %v11576_v36 = vpop.f32.mrf.mxu1  ;;  %v3005_v59 = vpack.c.bf16 %v2749_v0, %v2749_v0  ;;  %v3472_v31 = vunpack.c.l.b16 %v2948_v17  ;;  %v15633_v17 = vld [vmem:[#allocation108_spill] sm:$0xff] }
 0x4a7   : > { %9683 = vset.pattern.permute.xlu2 %v10179_v5  ;;  %9682 = vset.pattern.permute.xlu1 %v10203_v38  ;;  %15626 = vst [vmem:[#allocation136_spill] sm:$0xff] %v11576_v36  ;;  %v2693_v63 = vmax.f32 %v2437_v20, 0.0  ;;  %v15629_v20 = vld [vmem:[#allocation158_spill] sm:$0xff] }
 0x4a8   : > { %v11571_v47 = vpop.f32.mrf.mxu0  ;;  %v1926_v22 = vsub.f32 %v15629_v20, %v10188_v8  ;;  %v3529_v0 = vunpack.c.l.b16 %v3005_v59 }
 0x4a9   : > { %9356 = vmatmul.msk.bf16.gmra.mxu0 %vm3758_vm1, %v3658_v35  ;;  %v3678_v35 = vpack.c.b16 %v3471_v50, %v3470_v61  ;;  %v2748_v50 = vmax.f32 %v2492_v37, 0.0  ;;  %v1225_v61 = vpop.permute.xlu2 %1224  ;;  %v1927_v37 = vsub.f32 %v15628_v42, %v10188_v8 }
 0x4aa   : > { %v1983_v28 = vsub.f32 %v1225_v61, %v10188_v8  ;;  %v2182_v42 = vand.u32 2147483647, %v1926_v22 }
 0x4ab   : > { %v11565_v33 = vpop.f32.mrf.mxu2  ;;  %v3004_v39 = vpack.c.bf16 %v2748_v50, %v2748_v50  ;;  %v2655_v50 = vmax.f32 %v2399_v40, 0.0 }
 0x4ac   : > { %15623 = vst [vmem:[#allocation109_spill] sm:$0xff] %v11565_v33  ;;  %v2949_v33 = vpack.c.bf16 %v2693_v63, %v2693_v63  ;;  %v2183_v63 = vand.u32 2147483647, %v1927_v37  ;;  %v2239_v61 = vand.u32 2147483647, %v1983_v28  ;;  %v1888_v37 = vsub.f32 %v15633_v17, %v10188_v8 }
 0x4ad   : > { %v3528_v32 = vunpack.c.l.b16 %v3004_v39  ;;  %v2911_v36 = vpack.c.bf16 %v2655_v50, %v2655_v50  ;;  %v2438_v59 = vsub.f32 1.0, %v2182_v42 }
 0x4ae   : > { %v3473_v18 = vunpack.c.l.b16 %v2949_v33  ;;  %v11592_v11 = vpop.f32.mrf.mxu1  ;;  %v2439_v39 = vsub.f32 1.0, %v2183_v63  ;;  %v2495_v33 = vsub.f32 1.0, %v2239_v61 }
 0x4af   : > { %1365 = vperm.xlu2 %9683, %v15616_v1   ;;  %1359 = vperm.xlu1 %9682, %v15616_v1  }
 0x4b0   : > { %9404 = vmatmul.msk.bf16.gmra.mxu2 %vm3758_vm1, %v3706_v60  ;;  %v3659_v60 = vpack.c.b16 %v3433_v55, %v3432_v30  ;;  %v11590_v4 = vpop.f32.mrf.mxu0  ;;  %v2238_v30 = vand.u32 2147483647, %v1982_v21  ;;  %v2695_v22 = vmax.f32 %v2439_v39, 0.0  ;;  %v2751_v50 = vmax.f32 %v2495_v33, 0.0  ;;  %v15638_v39 = vld [vmem:[#allocation72_spill] sm:$0xff] }
 0x4b1   : > { %9376 = vmatmul.msk.bf16.gmra.mxu1 %vm3758_vm1, %v3678_v35  ;;  %v2398_v35 = vsub.f32 1.0, %v2142_v10  ;;  %15630 = vst [vmem:[#allocation111_spill] sm:$0xff] %v11590_v4  ;;  %v15632_v4 = vld [vmem:[#allocation65_spill] sm:$0xff] }
 0x4b2   : > { %v2494_v20 = vsub.f32 1.0, %v2238_v30  ;;  %v1889_v21 = vsub.f32 %v15632_v4, %v10188_v8  ;;  %v1237_v30 = vpop.permute.xlu1 %1236  ;;  %v3007_v33 = vpack.c.bf16 %v2751_v50, %v2751_v50 }
 0x4b3   : > { %v11579_v3 = vpop.f32.mrf.mxu2  ;;  %v2654_v10 = vmax.f32 %v2398_v35, 0.0  ;;  %v3435_v35 = vunpack.c.l.b16 %v2911_v36  ;;  %v1985_v42 = vsub.f32 %v1237_v30, %v10188_v8 }
 0x4b4   : > { %15627 = vst [vmem:[#allocation155_spill] sm:$0xff] %v11579_v3  ;;  %v3707_v3 = vpack.c.b16 %v3529_v0, %v3528_v32  ;;  %v2750_v28 = vmax.f32 %v2494_v20, 0.0  ;;  %v2145_v32 = vand.u32 2147483647, %v1889_v21  ;;  %v15637_v0 = vld [vmem:[#allocation42_spill] sm:$0xff]  ;;  %v2951_v20 = vpack.c.bf16 %v2695_v22, %v2695_v22 }
 0x4b5   : > { %v2910_v40 = vpack.c.bf16 %v2654_v10, %v2654_v10  ;;  %v1984_v61 = vsub.f32 %v15637_v0, %v10188_v8  ;;  %v1929_v21 = vsub.f32 %v15638_v39, %v10188_v8  ;;  %v3531_v39 = vunpack.c.l.b16 %v3007_v33 }
 0x4b6   : > { %v3006_v10 = vpack.c.bf16 %v2750_v28, %v2750_v28  ;;  %v3475_v22 = vunpack.c.l.b16 %v2951_v20 }
 0x4b7   : > { %9685 = vset.pattern.permute.xlu2 %v10239_v13  ;;  %9684 = vset.pattern.permute.xlu1 %v10216_v57  ;;  %v2240_v28 = vand.u32 2147483647, %v1984_v61 }
 0x4b8   : > { %v11606_v63 = vpop.f32.mrf.mxu0  ;;  %v3530_v30 = vunpack.c.l.b16 %v3006_v10  ;;  %v15642_v10 = vld [vmem:[#allocation76_spill] sm:$0xff] }
 0x4b9   : > { %9357 = vmatmul.msk.bf16.gmra.mxu0 %vm3758_vm1, %v3659_v60  ;;  %v3679_v60 = vpack.c.b16 %v3473_v18, %v3472_v31  ;;  %v3434_v31 = vunpack.c.l.b16 %v2910_v40  ;;  %v2694_v18 = vmax.f32 %v2438_v59, 0.0  ;;  %15635 = vst [vmem:[#allocation158_spill] sm:$0xff] %v11606_v63  ;;  %v2496_v50 = vsub.f32 1.0, %v2240_v28  ;;  %v1244_v28 = vpop.permute.xlu2 %1243 }
 0x4ba   : > { %v1250_v33 = vpop.permute.xlu1 %1249 }
 0x4bb   : > { %v11594_v55 = vpop.f32.mrf.mxu2  ;;  %v3660_v36 = vpack.c.b16 %v3435_v35, %v3434_v31  ;;  %v2950_v17 = vpack.c.bf16 %v2694_v18, %v2694_v18  ;;  %v2241_v35 = vand.u32 2147483647, %v1985_v42  ;;  %v2185_v31 = vand.u32 2147483647, %v1929_v21 }
 0x4bc   : > { %15631 = vst [vmem:[#allocation105_spill] sm:$0xff] %v11594_v55  ;;  %v2752_v20 = vmax.f32 %v2496_v50, 0.0 }
 0x4bd   : > { %v2497_v18 = vsub.f32 1.0, %v2241_v35 }
 0x4bf   : > { %1377 = vperm.xlu2 %9685, %v15616_v1   ;;  %1371 = vperm.xlu1 %9684, %v15616_v1   ;;  %v2144_v1 = vand.u32 2147483647, %v1888_v37  ;;  %v15639_v37 = vld [vmem:[#allocation162_spill] sm:$0xff] }
 0x4c0   : > { %9405 = vmatmul.msk.bf16.gmra.mxu2 %vm3758_vm1, %v3707_v3  ;;  %v11608_v3 = vpop.f32.mrf.mxu1  ;;  %v1928_v59 = vsub.f32 %v15639_v37, %v10188_v8  ;;  %v2441_v37 = vsub.f32 1.0, %v2185_v31  ;;  %v11622_v52 = vpop.f32.mrf.mxu0 }
 0x4c1   : > { %9377 = vmatmul.msk.bf16.gmra.mxu1 %vm3758_vm1, %v3679_v60  ;;  %15636 = vst [vmem:[#allocation65_spill] sm:$0xff] %v11608_v3  ;;  %v2401_v60 = vsub.f32 1.0, %v2145_v32  ;;  %v2400_v40 = vsub.f32 1.0, %v2144_v1  ;;  %v3474_v3 = vunpack.c.l.b16 %v2950_v17  ;;  %v3708_v1 = vpack.c.b16 %v3531_v39, %v3530_v30  ;;  %v15645_v39 = vld [vmem:[#allocation165_spill] sm:$0xff] }
 0x4c2   : > { %v2184_v63 = vand.u32 2147483647, %v1928_v59  ;;  %v3008_v30 = vpack.c.bf16 %v2752_v20, %v2752_v20  ;;  %v1931_v50 = vsub.f32 %v15645_v39, %v10188_v8 }
 0x4c3   : > { %v11604_v4 = vpop.f32.mrf.mxu2  ;;  %v2657_v32 = vmax.f32 %v2401_v60, 0.0  ;;  %v3680_v29 = vpack.c.b16 %v3475_v22, %v3474_v3  ;;  %v2753_v60 = vmax.f32 %v2497_v18, 0.0  ;;  %v2697_v3 = vmax.f32 %v2441_v37, 0.0 }
 0x4c4   : > { %15634 = vst [vmem:[#allocation159_spill] sm:$0xff] %v11604_v4  ;;  %v2656_v4 = vmax.f32 %v2400_v40, 0.0  ;;  %v1987_v22 = vsub.f32 %v1250_v33, %v10188_v8  ;;  %v3532_v37 = vunpack.c.l.b16 %v3008_v30 }
 0x4c5   : > { %v2913_v26 = vpack.c.bf16 %v2657_v32, %v2657_v32  ;;  %v3009_v35 = vpack.c.bf16 %v2753_v60, %v2753_v60  ;;  %v15644_v32 = vld [vmem:[#allocation163_spill] sm:$0xff]  ;;  %v2953_v31 = vpack.c.bf16 %v2697_v3, %v2697_v3 }
 0x4c6   : > { %v2912_v42 = vpack.c.bf16 %v2656_v4, %v2656_v4  ;;  %v1930_v4 = vsub.f32 %v15644_v32, %v10188_v8 }
 0x4c7   : > { %9687 = vset.pattern.permute.xlu2 %v10185_v7  ;;  %9686 = vset.pattern.permute.xlu1 %v10172_v2  ;;  %v3437_v21 = vunpack.c.l.b16 %v2913_v26  ;;  %v1986_v26 = vsub.f32 %v1244_v28, %v10188_v8  ;;  %v3477_v60 = vunpack.c.l.b16 %v2953_v31 }
 0x4c8   : > { %v11624_v61 = vpop.f32.mrf.mxu1  ;;  %v3436_v17 = vunpack.c.l.b16 %v2912_v42  ;;  %v3533_v42 = vunpack.c.l.b16 %v3009_v35  ;;  %v2186_v20 = vand.u32 2147483647, %v1930_v4  ;;  %v1256_v4 = vpop.permute.xlu2 %1255 }
 0x4c9   : > { %9358 = vmatmul.msk.bf16.gmra.mxu0 %vm3758_vm1, %v3660_v36  ;;  %15641 = vst [vmem:[#allocation42_spill] sm:$0xff] %v11624_v61  ;;  %v2440_v36 = vsub.f32 1.0, %v2184_v63 }
 0x4ca   : > { %v3661_v63 = vpack.c.b16 %v3437_v21, %v3436_v17  ;;  %v2242_v21 = vand.u32 2147483647, %v1986_v26  ;;  %v2187_v17 = vand.u32 2147483647, %v1931_v50  ;;  %v2442_v32 = vsub.f32 1.0, %v2186_v20 }
 0x4cb   : > { %v11620_v0 = vpop.f32.mrf.mxu2  ;;  %v2696_v59 = vmax.f32 %v2440_v36, 0.0  ;;  %v2243_v36 = vand.u32 2147483647, %v1987_v22 }
 0x4cc   : > { %15640 = vst [vmem:[#allocation108_spill] sm:$0xff] %v11620_v0  ;;  %v2498_v0 = vsub.f32 1.0, %v2242_v21  ;;  %v2443_v30 = vsub.f32 1.0, %v2187_v17  ;;  %v2698_v22 = vmax.f32 %v2442_v32, 0.0 }
 0x4cd   : > { %v2499_v28 = vsub.f32 1.0, %v2243_v36 }
 0x4ce   : > { %v2754_v31 = vmax.f32 %v2498_v0, 0.0  ;;  %v2699_v26 = vmax.f32 %v2443_v30, 0.0  ;;  %v2954_v20 = vpack.c.bf16 %v2698_v22, %v2698_v22  ;;  %v15653_v0 = vld [vmem:[#allocation169_spill] sm:$0xff] }
 0x4cf   : > { %1396 = vperm.xlu2 %9687, %v15642_v10   ;;  %1390 = vperm.xlu1 %9686, %v15642_v10   ;;  %v2755_v35 = vmax.f32 %v2499_v28, 0.0 }
 0x4d0   : > { %9406 = vmatmul.msk.bf16.gmra.mxu2 %vm3758_vm1, %v3708_v1  ;;  %v11640_v1 = vpop.f32.mrf.mxu0  ;;  %v11642_v18 = vpop.f32.mrf.mxu1  ;;  %v2955_v17 = vpack.c.bf16 %v2699_v26, %v2699_v26  ;;  %v3478_v30 = vunpack.c.l.b16 %v2954_v20 }
 0x4d1   : > { %9378 = vmatmul.msk.bf16.gmra.mxu1 %vm3758_vm1, %v3680_v29  ;;  %v2952_v29 = vpack.c.bf16 %v2696_v59, %v2696_v59  ;;  %15646 = vst [vmem:[#allocation162_spill] sm:$0xff] %v11640_v1  ;;  %v3709_v59 = vpack.c.b16 %v3533_v42, %v3532_v37  ;;  %v1988_v37 = vsub.f32 %v1256_v4, %v10188_v8  ;;  %v1268_v20 = vpop.permute.xlu1 %1267 }
 0x4d2   : > { %15647 = vst [vmem:[#allocation76_spill] sm:$0xff] %v11642_v18  ;;  %v3011_v42 = vpack.c.bf16 %v2755_v35, %v2755_v35 }
 0x4d3   : > { %v11630_v40 = vpop.f32.mrf.mxu2  ;;  %v3476_v33 = vunpack.c.l.b16 %v2952_v29  ;;  %v15650_v29 = vld [vmem:[#allocation61_spill] sm:$0xff]  ;;  %v2244_v32 = vand.u32 2147483647, %v1988_v37 }
 0x4d4   : > { %15643 = vst [vmem:[#allocation72_spill] sm:$0xff] %v11630_v40  ;;  %v1989_v50 = vsub.f32 %v15650_v29, %v10188_v8  ;;  %v3479_v29 = vunpack.c.l.b16 %v2955_v17 }
 0x4d5   : > { %v3681_v39 = vpack.c.b16 %v3477_v60, %v3476_v33  ;;  %v15652_v60 = vld [vmem:[#allocation167_spill] sm:$0xff]  ;;  %v3010_v33 = vpack.c.bf16 %v2754_v31, %v2754_v31 }
 0x4d6   : > { %v1932_v21 = vsub.f32 %v15652_v60, %v10188_v8  ;;  %v2245_v28 = vand.u32 2147483647, %v1989_v50  ;;  %v3682_v61 = vpack.c.b16 %v3479_v29, %v3478_v30 }
 0x4d7   : > { %9689 = vset.pattern.permute.xlu2 %v10203_v38  ;;  %9688 = vset.pattern.permute.xlu1 %v10182_v6  ;;  %v3534_v4 = vunpack.c.l.b16 %v3010_v33  ;;  %v1274_v33 = vpop.permute.xlu2 %1273 }
 0x4d8   : > { %v2188_v35 = vand.u32 2147483647, %v1932_v21  ;;  %v2501_v60 = vsub.f32 1.0, %v2245_v28 }
 0x4d9   : > { %9359 = vmatmul.msk.bf16.gmra.mxu0 %vm3758_vm1, %v3661_v63  ;;  %v11651_v63 = vpop.f32.mrf.mxu1 }
 0x4da   : > { %15649 = vst [vmem:[#allocation165_spill] sm:$0xff] %v11651_v63  ;;  %v2444_v1 = vsub.f32 1.0, %v2188_v35  ;;  %v2757_v50 = vmax.f32 %v2501_v60, 0.0 }
 0x4db   : > { %v11645_v3 = vpop.f32.mrf.mxu2 }
 0x4dc   : > { %15648 = vst [vmem:[#allocation163_spill] sm:$0xff] %v11645_v3  ;;  %v3013_v17 = vpack.c.bf16 %v2757_v50, %v2757_v50 }
 0x4de   : > { %v3537_v30 = vunpack.c.l.b16 %v3013_v17 }
 0x4df   : > { %1408 = vperm.xlu2 %9689, %v15642_v10   ;;  %1402 = vperm.xlu1 %9688, %v15642_v10  }
 0x4e0   : > { %9407 = vmatmul.msk.bf16.gmra.mxu2 %vm3758_vm1, %v3709_v59  ;;  %v1933_v59 = vsub.f32 %v15653_v0, %v10188_v8 }
 0x4e1   : > { %9379 = vmatmul.msk.bf16.gmra.mxu1 %vm3758_vm1, %v3681_v39  ;;  %v3535_v39 = vunpack.c.l.b16 %v3011_v42  ;;  %v11664_v3 = vpop.f32.mrf.mxu1  ;;  %v2700_v42 = vmax.f32 %v2444_v1, 0.0 }
 0x4e2   : > { %v2189_v22 = vand.u32 2147483647, %v1933_v59  ;;  %15654 = vst [vmem:[#allocation167_spill] sm:$0xff] %v11664_v3  ;;  %v1990_v59 = vsub.f32 %v1268_v20, %v10188_v8 }
 0x4e3   : > { %v11656_v36 = vpop.f32.mrf.mxu2  ;;  %v3710_v63 = vpack.c.b16 %v3535_v39, %v3534_v4  ;;  %v2956_v28 = vpack.c.bf16 %v2700_v42, %v2700_v42 }
 0x4e4   : > { %15651 = vst [vmem:[#allocation61_spill] sm:$0xff] %v11656_v36  ;;  %v2500_v36 = vsub.f32 1.0, %v2244_v32  ;;  %v2445_v26 = vsub.f32 1.0, %v2189_v22  ;;  %v1934_v32 = vsub.f32 %v11454_v49, %v10188_v8  ;;  %v2246_v4 = vand.u32 2147483647, %v1990_v59 }
 0x4e5   : > { %v3480_v22 = vunpack.c.l.b16 %v2956_v28  ;;  %v1280_v28 = vpop.permute.xlu1 %1279 }
 0x4e6   : > { %v2756_v37 = vmax.f32 %v2500_v36, 0.0  ;;  %v2701_v21 = vmax.f32 %v2445_v26, 0.0  ;;  %v2190_v60 = vand.u32 2147483647, %v1934_v32  ;;  %v2502_v42 = vsub.f32 1.0, %v2246_v4 }
 0x4e7   : > { %9691 = vset.pattern.permute.xlu2 %v10239_v13  ;;  %9690 = vset.pattern.permute.xlu1 %v10216_v57 }
 0x4e8   : > { %v3012_v0 = vpack.c.bf16 %v2756_v37, %v2756_v37  ;;  %v2957_v1 = vpack.c.bf16 %v2701_v21, %v2701_v21  ;;  %v2446_v3 = vsub.f32 1.0, %v2190_v60  ;;  %v15663_v60 = vld [vmem:[#allocation172_spill] sm:$0xff] }
 0x4e9   : > { %v11675_v39 = vpop.f32.mrf.mxu1 }
 0x4ea   : > { %15656 = vst [vmem:[#allocation190_spill] sm:$0xff] %v11675_v39  ;;  %v3536_v35 = vunpack.c.l.b16 %v3012_v0  ;;  %v3481_v26 = vunpack.c.l.b16 %v2957_v1  ;;  %v2758_v0 = vmax.f32 %v2502_v42, 0.0  ;;  %v2702_v59 = vmax.f32 %v2446_v3, 0.0 }
 0x4eb   : > { %v11668_v31 = vpop.f32.mrf.mxu2 }
 0x4ec   : > { %15655 = vst [vmem:[#allocation169_spill] sm:$0xff] %v11668_v31  ;;  %v3711_v37 = vpack.c.b16 %v3537_v30, %v3536_v35  ;;  %v3683_v20 = vpack.c.b16 %v3481_v26, %v3480_v22  ;;  %v1992_v30 = vsub.f32 %v1280_v28, %v10188_v8  ;;  %v2958_v4 = vpack.c.bf16 %v2702_v59, %v2702_v59 }
 0x4ef   : > { %1426 = vperm.xlu2 %9691, %v15642_v10   ;;  %1420 = vperm.xlu1 %9690, %v15642_v10  }
 0x4f0   : > { %9408 = vmatmul.msk.bf16.gmra.mxu2 %vm3758_vm1, %v3710_v63  ;;  %v15657_v63 = vld [vmem:[#allocation171_spill] sm:$0xff] }
 0x4f1   : > { %9380 = vmatmul.msk.bf16.gmra.mxu1 %vm3758_vm1, %v3682_v61  ;;  %v1991_v61 = vsub.f32 %v1274_v33, %v10188_v8  ;;  %v1935_v36 = vsub.f32 %v15657_v63, %v10188_v8  ;;  %v11687_v17 = vpop.f32.mrf.mxu1  ;;  %v1286_v63 = vpop.permute.xlu2 %1285 }
 0x4f2   : > { %15660 = vst [vmem:[#allocation14_spill] sm:$0xff] %v11687_v17  ;;  %v1993_v3 = vsub.f32 %v1286_v63, %v10188_v8 }
 0x4f3   : > { %v11682_v29 = vpop.f32.mrf.mxu2  ;;  %v2247_v49 = vand.u32 2147483647, %v1991_v61  ;;  %v2191_v50 = vand.u32 2147483647, %v1935_v36  ;;  %v3014_v36 = vpack.c.bf16 %v2758_v0, %v2758_v0 }
 0x4f4   : > { %15658 = vst [vmem:[#allocation171_spill] sm:$0xff] %v11682_v29  ;;  %v2249_v0 = vand.u32 2147483647, %v1993_v3 }
 0x4f5   : > { %v2503_v21 = vsub.f32 1.0, %v2247_v49  ;;  %v2447_v33 = vsub.f32 1.0, %v2191_v50  ;;  %v1936_v49 = vsub.f32 %v15663_v60, %v10188_v8  ;;  %v3538_v50 = vunpack.c.l.b16 %v3014_v36 }
 0x4f7   : > { %9693 = vset.pattern.permute.xlu2 %v10172_v2  ;;  %9692 = vset.pattern.permute.xlu1 %v10236_v12  ;;  %v2759_v32 = vmax.f32 %v2503_v21, 0.0  ;;  %v2703_v1 = vmax.f32 %v2447_v33, 0.0  ;;  %v2192_v59 = vand.u32 2147483647, %v1936_v49  ;;  %v15667_v49 = vld [vmem:[#allocation101_spill] sm:$0xff] }
 0x4f9   : > { %v3015_v22 = vpack.c.bf16 %v2759_v32, %v2759_v32  ;;  %v2959_v26 = vpack.c.bf16 %v2703_v1, %v2703_v1  ;;  %v11700_v21 = vpop.f32.mrf.mxu1  ;;  %v11704_v17 = vpop.permute.xlu2 %1304  ;;  %v2505_v1 = vsub.f32 1.0, %v2249_v0  ;;  %v2448_v36 = vsub.f32 1.0, %v2192_v59 }
 0x4fb   : > { %v11690_v61 = vpop.f32.mrf.mxu2  ;;  %v3539_v33 = vunpack.c.l.b16 %v3015_v22  ;;  %v3483_v28 = vunpack.c.l.b16 %v2959_v26  ;;  %v2761_v22 = vmax.f32 %v2505_v1, 0.0  ;;  %v2704_v3 = vmax.f32 %v2448_v36, 0.0 }
 0x4fc   : > { %15661 = vst [vmem:[#allocation191_spill] sm:$0xff] %v11690_v61  ;;  %v1994_v26 = vsub.f32 %v15667_v49, %v10188_v8 }
 0x4ff   : > { %1439 = vperm.xlu2 %9693, %v15659_v45   ;;  %1432 = vperm.xlu1 %9692, %v15642_v10   ;;  %v15662_v10 = vld [vmem:[#allocation174_spill] sm:$0xff] }
 0x500   : > { %9409 = vmatmul.msk.bf16.gmra.mxu2 %vm3758_vm1, %v3711_v37  ;;  %v1937_v35 = vsub.f32 %v15662_v10, %v10188_v8  ;;  %v2248_v37 = vand.u32 2147483647, %v1992_v30  ;;  %15664 = vst [vmem:[#allocation174_spill] sm:$0xff] %v11700_v21  ;;  %v3712_v10 = vpack.c.b16 %v3539_v33, %v3538_v50  ;;  %v15669_v33 = vld [vmem:[#allocation176_spill] sm:$0xff] }
 0x501   : > { %9381 = vmatmul.msk.bf16.gmra.mxu1 %vm3758_vm1, %v3683_v20  ;;  %v3482_v20 = vunpack.c.l.b16 %v2958_v4  ;;  %v1299_v4 = vpop.permute.xlu1 %1298  ;;  %v11710_v60 = vpop.f32.mrf.mxu1  ;;  %v1938_v0 = vsub.f32 %v15669_v33, %v10188_v8 }
 0x502   : > { %v2193_v42 = vand.u32 2147483647, %v1937_v35  ;;  %v2504_v29 = vsub.f32 1.0, %v2248_v37  ;;  %15666 = vst [vmem:[#allocation192_spill] sm:$0xff] %v11710_v60  ;;  %v1995_v37 = vsub.f32 %v1299_v4, %v10188_v8 }
 0x503   : > { %v11702_v61 = vpop.f32.mrf.mxu2  ;;  %v3684_v63 = vpack.c.b16 %v3483_v28, %v3482_v20  ;;  %v3017_v28 = vpack.c.bf16 %v2761_v22, %v2761_v22  ;;  %v2194_v4 = vand.u32 2147483647, %v1938_v0 }
 0x504   : > { %15665 = vst [vmem:[#allocation172_spill] sm:$0xff] %v11702_v61  ;;  %v2449_v32 = vsub.f32 1.0, %v2193_v42  ;;  %v2760_v30 = vmax.f32 %v2504_v29, 0.0  ;;  %v15668_v42 = vld [vmem:[#allocation25_spill] sm:$0xff]  ;;  %v11719_v29 = vpop.permute.xlu2 %1316  ;;  %v2251_v36 = vand.u32 2147483647, %v1995_v37 }
 0x505   : > { %v1939_v20 = vsub.f32 %v15668_v42, %v10188_v8  ;;  %v3541_v42 = vunpack.c.l.b16 %v3017_v28  ;;  %v2450_v61 = vsub.f32 1.0, %v2194_v4 }
 0x506   : > { %v2705_v35 = vmax.f32 %v2449_v32, 0.0  ;;  %v3016_v50 = vpack.c.bf16 %v2760_v30, %v2760_v30  ;;  %v2960_v32 = vpack.c.bf16 %v2704_v3, %v2704_v3  ;;  %v2507_v54 = vsub.f32 1.0, %v2251_v36 }
 0x507   : > { %9695 = vset.pattern.permute.xlu2 %v10203_v38  ;;  %9694 = vset.pattern.permute.xlu1 %v10182_v6  ;;  %v2195_v30 = vand.u32 2147483647, %v1939_v20  ;;  %v2706_v20 = vmax.f32 %v2450_v61, 0.0 }
 0x508   : > { %v2961_v59 = vpack.c.bf16 %v2705_v35, %v2705_v35  ;;  %v3540_v1 = vunpack.c.l.b16 %v3016_v50  ;;  %v3484_v21 = vunpack.c.l.b16 %v2960_v32 }
 0x509   : > { %v2451_v43 = vsub.f32 1.0, %v2195_v30  ;;  %v11727_v22 = vpop.f32.mrf.mxu1  ;;  %v1311_v0 = vpop.permute.xlu1 %1310 }
 0x50a   : > { %v3485_v49 = vunpack.c.l.b16 %v2961_v59  ;;  %v3713_v35 = vpack.c.b16 %v3541_v42, %v3540_v1  ;;  %15671 = vst [vmem:[#allocation25_spill] sm:$0xff] %v11727_v22  ;;  %v1997_v28 = vsub.f32 %v1311_v0, %v10188_v8  ;;  %v15673_v1 = vld [vmem:[#allocation80_spill] sm:$0xff]  ;;  %v15677_v22 = vld [vmem:[#allocation41_spill] sm:$0xff] }
 0x50b   : > { %v2707_v37 = vmax.f32 %v2451_v43, 0.0  ;;  %v1940_v36 = vsub.f32 %v15673_v1, %v10188_v8  ;;  %v15674_v43 = vld [vmem:[#allocation179_spill] sm:$0xff] }
 0x50c   : > { %v3685_v31 = vpack.c.b16 %v3485_v49, %v3484_v21  ;;  %v11725_v40 = vpop.permute.xlu2 %1334  ;;  %v2253_v42 = vand.u32 2147483647, %v1997_v28 }
 0x50d   : > { %v2963_v32 = vpack.c.bf16 %v2707_v37, %v2707_v37 }
 0x50e   : > { %v2509_v1 = vsub.f32 1.0, %v2253_v42 }
 0x50f   : > { %1457 = vperm.xlu2 %9695, %v15659_v45   ;;  %1451 = vperm.xlu1 %9694, %v15659_v45  }
 0x510   : > { %9410 = vmatmul.msk.bf16.gmra.mxu2 %vm3758_vm1, %v3712_v10  ;;  %v11723_v10 = vpop.f32.mrf.mxu2  ;;  %v2765_v28 = vmax.f32 %v2509_v1, 0.0 }
 0x511   : > { %9382 = vmatmul.msk.bf16.gmra.mxu1 %vm3758_vm1, %v3684_v63  ;;  %15670 = vst [vmem:[#allocation101_spill] sm:$0xff] %v11723_v10  ;;  %v2250_v63 = vand.u32 2147483647, %v1994_v26  ;;  %v2763_v26 = vmax.f32 %v2507_v54, 0.0  ;;  %v1996_v54 = vsub.f32 %v11704_v17, %v10188_v8  ;;  %v11746_v61 = vpop.f32.mrf.mxu1 }
 0x512   : > { %15675 = vst [vmem:[#allocation80_spill] sm:$0xff] %v11746_v61 }
 0x513   : > { %v2506_v33 = vsub.f32 1.0, %v2250_v63  ;;  %v3019_v59 = vpack.c.bf16 %v2763_v26, %v2763_v26  ;;  %v2962_v63 = vpack.c.bf16 %v2706_v20, %v2706_v20  ;;  %v2252_v26 = vand.u32 2147483647, %v1996_v54 }
 0x514   : > { %v11738_v30 = vpop.permute.xlu2 %1347 }
 0x515   : > { %v2762_v3 = vmax.f32 %v2506_v33, 0.0  ;;  %v3543_v49 = vunpack.c.l.b16 %v3019_v59  ;;  %v3487_v33 = vunpack.c.l.b16 %v2963_v32 }
 0x517   : > { %9697 = vset.pattern.permute.xlu2 %v10216_v57  ;;  %9696 = vset.pattern.permute.xlu1 %v10179_v5  ;;  %v3018_v21 = vpack.c.bf16 %v2762_v3, %v2762_v3  ;;  %v2196_v3 = vand.u32 2147483647, %v1940_v36 }
 0x518   : > { %v11733_v50 = vpop.f32.mrf.mxu2 }
 0x519   : > { %15672 = vst [vmem:[#allocation176_spill] sm:$0xff] %v11733_v50  ;;  %v3542_v4 = vunpack.c.l.b16 %v3018_v21  ;;  %v2452_v50 = vsub.f32 1.0, %v2196_v3  ;;  %v2508_v21 = vsub.f32 1.0, %v2252_v26  ;;  %v11771_v3 = vperm.slane %v10300_v51, 5 }
 0x51b   : > { %v3714_v0 = vpack.c.b16 %v3543_v49, %v3542_v4  ;;  %v2708_v32 = vmax.f32 %v2452_v50, 0.0  ;;  %v2764_v36 = vmax.f32 %v2508_v21, 0.0  ;;  %v1998_v4 = vsub.f32 %v11719_v29, %v10188_v8  ;;  %v15683_v29 = vld [vmem:[#allocation181_spill] sm:$0xff]  ;;  %5862 = vperm.xlu0 %9948, %v11771_v3  }
 0x51c   : > { %v11750_v17 = vpop.permute.xlu2 %1365  ;;  %v3021_v49 = vpack.c.bf16 %v2765_v28, %v2765_v28 }
 0x51d   : > { %v2964_v42 = vpack.c.bf16 %v2708_v32, %v2708_v32  ;;  %v3020_v50 = vpack.c.bf16 %v2764_v36, %v2764_v36  ;;  %v2254_v1 = vand.u32 2147483647, %v1998_v4 }
 0x51e   : > { %v3545_v21 = vunpack.c.l.b16 %v3021_v49  ;;  %v1329_v49 = vpop.permute.xlu1 %1328 }
 0x51f   : > { %1469 = vperm.xlu2 %9697, %v15659_v45   ;;  %1463 = vperm.xlu1 %9696, %v15659_v45   ;;  %v3544_v32 = vunpack.c.l.b16 %v3020_v50  ;;  %v2510_v61 = vsub.f32 1.0, %v2254_v1  ;;  %v15686_v1 = vld [vmem:[#allocation40_spill] sm:$0xff] }
 0x520   : > { %9411 = vmatmul.msk.bf16.gmra.mxu2 %vm3758_vm1, %v3713_v35  ;;  %v3486_v35 = vunpack.c.l.b16 %v2962_v63  ;;  %v11748_v37 = vpop.f32.mrf.mxu2  ;;  %v11756_v63 = vpop.f32.mrf.mxu1 }
 0x521   : > { %9383 = vmatmul.msk.bf16.gmra.mxu1 %vm3758_vm1, %v3685_v31  ;;  %v1941_v31 = vsub.f32 %v15674_v43, %v10188_v8  ;;  %15676 = vst [vmem:[#allocation179_spill] sm:$0xff] %v11748_v37  ;;  %v15679_v43 = vld [vmem:[#allocation118_spill] sm:$0xff]  ;;  %v3715_v51 = vpack.c.b16 %v3545_v21, %v3544_v32  ;;  %v1944_v21 = vsub.f32 %v15686_v1, %v10188_v8 }
 0x522   : > { %v3686_v10 = vpack.c.b16 %v3487_v33, %v3486_v35  ;;  %15678 = vst [vmem:[#allocation41_spill] sm:$0xff] %v11756_v63  ;;  %v15681_v33 = vld [vmem:[#allocation180_spill] sm:$0xff] }
 0x523   : > { %v2197_v20 = vand.u32 2147483647, %v1941_v31  ;;  %v1999_v31 = vsub.f32 %v15679_v43, %v10188_v8  ;;  %v1942_v35 = vsub.f32 %v15681_v33, %v10188_v8  ;;  %15682 = vst [vmem:[#allocation180_spill] sm:$0xff] %v11771_v3 }
 0x525   : > { %v2453_v59 = vsub.f32 1.0, %v2197_v20  ;;  %v1943_v20 = vsub.f32 %v15683_v29, %v10188_v8  ;;  %v2198_v28 = vand.u32 2147483647, %v1942_v35  ;;  %v2766_v35 = vmax.f32 %v2510_v61, 0.0 }
 0x526   : > { %v2001_v61 = vsub.f32 %v11725_v40, %v10188_v8 }
 0x527   : > { %9699 = vset.pattern.permute.xlu2 %v10172_v2  ;;  %9698 = vset.pattern.permute.xlu1 %v10236_v12  ;;  %v2709_v54 = vmax.f32 %v2453_v59, 0.0  ;;  %v3488_v59 = vunpack.c.l.b16 %v2964_v42  ;;  %v2199_v33 = vand.u32 2147483647, %v1943_v20  ;;  %v3022_v20 = vpack.c.bf16 %v2766_v35, %v2766_v35 }
 0x528   : > { %v2257_v1 = vand.u32 2147483647, %v2001_v61 }
 0x529   : > { %v2965_v26 = vpack.c.bf16 %v2709_v54, %v2709_v54  ;;  %v2454_v54 = vsub.f32 1.0, %v2198_v28  ;;  %v2455_v4 = vsub.f32 1.0, %v2199_v33  ;;  %v15687_v28 = vld [vmem:[#allocation84_spill] sm:$0xff] }
 0x52a   : > { %v1945_v32 = vsub.f32 %v15687_v28, %v10188_v8 }
 0x52b   : > { %v3489_v43 = vunpack.c.l.b16 %v2965_v26  ;;  %v2710_v50 = vmax.f32 %v2454_v54, 0.0  ;;  %v2711_v26 = vmax.f32 %v2455_v4, 0.0  ;;  %v3546_v54 = vunpack.c.l.b16 %v3022_v20 }
 0x52d   : > { %v3687_v37 = vpack.c.b16 %v3489_v43, %v3488_v59  ;;  %v2966_v59 = vpack.c.bf16 %v2710_v50, %v2710_v50  ;;  %v2201_v50 = vand.u32 2147483647, %v1945_v32 }
 0x52f   : > { %1488 = vperm.xlu2 %9699, %v15677_v22   ;;  %1481 = vperm.xlu1 %9698, %v15659_v45   ;;  %v11762_v45 = vpop.f32.mrf.mxu2  ;;  %v3490_v35 = vunpack.c.l.b16 %v2966_v59  ;;  %v2457_v40 = vsub.f32 1.0, %v2201_v50 }
 0x530   : > { %9412 = vmatmul.msk.bf16.gmra.mxu2 %vm3758_vm1, %v3714_v0  ;;  %15680 = vst [vmem:[#allocation118_spill] sm:$0xff] %v11762_v45  ;;  %v2255_v0 = vand.u32 2147483647, %v1999_v31  ;;  %v11776_v45 = vpop.f32.mrf.mxu1 }
 0x531   : > { %9384 = vmatmul.msk.bf16.gmra.mxu1 %vm3758_vm1, %v3686_v10  ;;  %v11766_v10 = vpop.permute.xlu2 %1377  ;;  %15684 = vst [vmem:[#allocation181_spill] sm:$0xff] %v11776_v45  ;;  %v2713_v32 = vmax.f32 %v2457_v40, 0.0 }
 0x532   : > { %v2511_v36 = vsub.f32 1.0, %v2255_v0  ;;  %v2000_v0 = vsub.f32 %v1329_v49, %v10188_v8 }
 0x534   : > { %v2767_v42 = vmax.f32 %v2511_v36, 0.0  ;;  %v1342_v36 = vpop.permute.xlu1 %1341  ;;  %v2256_v4 = vand.u32 2147483647, %v2000_v0 }
 0x536   : > { %v3023_v29 = vpack.c.bf16 %v2767_v42, %v2767_v42  ;;  %v2200_v42 = vand.u32 2147483647, %v1944_v21  ;;  %v2512_v3 = vsub.f32 1.0, %v2256_v4  ;;  %v2002_v4 = vsub.f32 %v1342_v36, %v10188_v8 }
 0x537   : > { %9701 = vset.pattern.permute.xlu2 %v10182_v6  ;;  %9700 = vset.pattern.permute.xlu1 %v10185_v7  ;;  %v11782_v31 = vpop.f32.mrf.mxu2 }
 0x538   : > { %15685 = vst [vmem:[#allocation193_spill] sm:$0xff] %v11782_v31  ;;  %v11791_v43 = vpop.f32.mrf.mxu1  ;;  %v15690_v31 = vld [vmem:[#allocation28_spill] sm:$0xff]  ;;  %v2456_v27 = vsub.f32 1.0, %v2200_v42  ;;  %v2768_v21 = vmax.f32 %v2512_v3, 0.0 }
 0x539   : > { %v11778_v55 = vpop.permute.xlu2 %1396  ;;  %15688 = vst [vmem:[#allocation40_spill] sm:$0xff] %v11791_v43  ;;  %v2019_v45 = vsub.f32 %v15690_v31, %v10188_v8 }
 0x53a   : > { %v2712_v59 = vmax.f32 %v2456_v27, 0.0  ;;  %v2003_v27 = vsub.f32 %v11738_v30, %v10188_v8 }
 0x53b   : > { %v2275_v31 = vand.u32 2147483647, %v2019_v45  ;;  %v15694_v45 = vld [vmem:[#allocation75_spill] sm:$0xff] }
 0x53c   : > { %v11808_v20 = vpop.permute.xlu1 %1359  ;;  %v2968_v42 = vpack.c.bf16 %v2712_v59, %v2712_v59  ;;  %v1946_v3 = vsub.f32 %v15694_v45, %v10188_v8 }
 0x53e   : > { %v2202_v30 = vand.u32 2147483647, %v1946_v3 }
 0x53f   : > { %1500 = vperm.xlu2 %9701, %v15677_v22   ;;  %1494 = vperm.xlu1 %9700, %v15677_v22   ;;  %v11799_v49 = vpop.f32.mrf.mxu2 }
 0x540   : > { %9413 = vmatmul.msk.bf16.gmra.mxu2 %vm3758_vm1, %v3715_v51  ;;  %v3547_v51 = vunpack.c.l.b16 %v3023_v29  ;;  %15689 = vst [vmem:[#allocation84_spill] sm:$0xff] %v11799_v49  ;;  %v2513_v29 = vsub.f32 1.0, %v2257_v1  ;;  %v11810_v0 = vpop.f32.mrf.mxu1 }
 0x541   : > { %9385 = vmatmul.msk.bf16.gmra.mxu1 %vm3758_vm1, %v3687_v37  ;;  %v11793_v33 = vpop.permute.xlu2 %1408  ;;  %v2967_v37 = vpack.c.bf16 %v2711_v26, %v2711_v26  ;;  %15691 = vst [vmem:[#allocation28_spill] sm:$0xff] %v11810_v0 }
 0x542   : > { %v3716_v43 = vpack.c.b16 %v3547_v51, %v3546_v54  ;;  %v2769_v61 = vmax.f32 %v2513_v29, 0.0  ;;  %v2531_v51 = vsub.f32 1.0, %v2275_v31  ;;  %v3024_v54 = vpack.c.bf16 %v2768_v21, %v2768_v21 }
 0x543   : > { %v3491_v28 = vunpack.c.l.b16 %v2967_v37  ;;  %v2258_v29 = vand.u32 2147483647, %v2002_v4  ;;  %v3492_v21 = vunpack.c.l.b16 %v2968_v42 }
 0x544   : > { %v11824_v1 = vpop.permute.xlu1 %1371  ;;  %v2787_v36 = vmax.f32 %v2531_v51, 0.0  ;;  %v3548_v40 = vunpack.c.l.b16 %v3024_v54 }
 0x545   : > { %v3688_v46 = vpack.c.b16 %v3491_v28, %v3490_v35  ;;  %v2969_v35 = vpack.c.bf16 %v2713_v32, %v2713_v32  ;;  %v2514_v45 = vsub.f32 1.0, %v2258_v29 }
 0x546   : > { %v3043_v15 = vpack.c.bf16 %v2787_v36, %v2787_v36 }
 0x547   : > { %9703 = vset.pattern.permute.xlu2 %v10216_v57  ;;  %9702 = vset.pattern.permute.xlu1 %v10179_v5  ;;  %v11813_v37 = vpop.f32.mrf.mxu2  ;;  %v3493_v59 = vunpack.c.l.b16 %v2969_v35  ;;  %v2458_v35 = vsub.f32 1.0, %v2202_v30 }
 0x548   : > { %15692 = vst [vmem:[#allocation194_spill] sm:$0xff] %v11813_v37  ;;  %v2259_v37 = vand.u32 2147483647, %v2003_v27  ;;  %v2770_v27 = vmax.f32 %v2514_v45, 0.0 }
 0x549   : > { %v11805_v26 = vpop.permute.xlu2 %1426  ;;  %v3689_v51 = vpack.c.b16 %v3493_v59, %v3492_v21  ;;  %v15699_v21 = vld [vmem:[#allocation60_spill] sm:$0xff] }
 0x54a   : > { %v2515_v4 = vsub.f32 1.0, %v2259_v37  ;;  %v1949_v59 = vsub.f32 %v15699_v21, %v10188_v8 }
 0x54f   : > { %1518 = vperm.xlu2 %9703, %v15677_v22   ;;  %1512 = vperm.xlu1 %9702, %v15677_v22   ;;  %v11829_v0 = vpop.f32.mrf.mxu2 }
 0x550   : > { %9414 = vmatmul.msk.bf16.gmra.mxu2 %vm3758_vm1, %v3716_v43  ;;  %v15693_v43 = vld [vmem:[#allocation184_spill] sm:$0xff]  ;;  %15696 = vst [vmem:[#allocation75_spill] sm:$0xff] %v11829_v0 }
 0x551   : > { %9386 = vmatmul.msk.bf16.gmra.mxu1 %vm3758_vm1, %v3688_v46  ;;  %v1947_v50 = vsub.f32 %v15693_v43, %v10188_v8  ;;  %v3025_v46 = vpack.c.bf16 %v2769_v61, %v2769_v61  ;;  %v11827_v43 = vpop.f32.mrf.mxu1 }
 0x552   : > { %15695 = vst [vmem:[#allocation184_spill] sm:$0xff] %v11827_v43 }
 0x553   : > { %v2203_v32 = vand.u32 2147483647, %v1947_v50  ;;  %v3549_v61 = vunpack.c.l.b16 %v3025_v46  ;;  %v11834_v50 = vpop.permute.xlu1 %1390  ;;  %v3567_v46 = vunpack.c.l.b16 %v3043_v15  ;;  %v15700_v15 = vld [vmem:[#allocation185_spill] sm:$0xff] }
 0x555   : > { %v3717_v56 = vpack.c.b16 %v3549_v61, %v3548_v40  ;;  %v2459_v54 = vsub.f32 1.0, %v2203_v32  ;;  %v2714_v40 = vmax.f32 %v2458_v35, 0.0  ;;  %v1948_v32 = vsub.f32 %v15700_v15, %v10188_v8 }
 0x556   : > { %v2205_v35 = vand.u32 2147483647, %v1949_v59 }
 0x557   : > { %9705 = vset.pattern.permute.xlu2 %v10236_v12  ;;  %9704 = vset.pattern.permute.xlu1 %v10239_v13  ;;  %v11849_v45 = vpop.f32.mrf.mxu2 }
 0x558   : > { %v2461_v15 = vsub.f32 1.0, %v2205_v35  ;;  %v15705_v35 = vld [vmem:[#allocation79_spill] sm:$0xff] }
 0x559   : > { %v1440_v28 = vpop.permute.xlu2 %1439  ;;  %v11837_v29 = vpop.f32.mrf.mxu1 }
 0x55a   : > { %v2018_v31 = vsub.f32 %v1440_v28, %v10188_v8  ;;  %v2715_v28 = vmax.f32 %v2459_v54, 0.0  ;;  %15697 = vst [vmem:[#allocation195_spill] sm:$0xff] %v11837_v29  ;;  %v2717_v59 = vmax.f32 %v2461_v15, 0.0 }
 0x55b   : > { %v11852_v54 = vpop.permute.xlu1 %1402 }
 0x55c   : > { %v2274_v49 = vand.u32 2147483647, %v2018_v31  ;;  %v2971_v61 = vpack.c.bf16 %v2715_v28, %v2715_v28 }
 0x55e   : > { %v2530_v63 = vsub.f32 1.0, %v2274_v49  ;;  %v2771_v49 = vmax.f32 %v2515_v4, 0.0 }
 0x55f   : > { %1530 = vperm.xlu2 %9705, %v15677_v22   ;;  %1524 = vperm.xlu1 %9704, %v15677_v22   ;;  %v15698_v22 = vld [vmem:[#allocation137_spill] sm:$0xff] }
 0x560   : > { %v2786_v42 = vmax.f32 %v2530_v63, 0.0  ;;  %9415 = vmatmul.msk.bf16.gmra.mxu2 %vm3758_vm1, %v3717_v56  ;;  %v2004_v37 = vsub.f32 %v15698_v22, %v10188_v8  ;;  %v3026_v63 = vpack.c.bf16 %v2770_v27, %v2770_v27  ;;  %v2005_v56 = vsub.f32 %v11808_v20, %v10188_v8  ;;  %15701 = vst [vmem:[#allocation137_spill] sm:$0xff] %v11849_v45 }
 0x561   : > { %9387 = vmatmul.msk.bf16.gmra.mxu1 %vm3758_vm1, %v3689_v51  ;;  %v3027_v30 = vpack.c.bf16 %v2771_v49, %v2771_v49  ;;  %v2970_v51 = vpack.c.bf16 %v2714_v40, %v2714_v40  ;;  %v3495_v27 = vunpack.c.l.b16 %v2971_v61  ;;  %v11854_v43 = vpop.f32.mrf.mxu1 }
 0x562   : > { %v3042_v3 = vpack.c.bf16 %v2786_v42, %v2786_v42  ;;  %v2260_v20 = vand.u32 2147483647, %v2004_v37  ;;  %v3550_v4 = vunpack.c.l.b16 %v3026_v63  ;;  %v2261_v42 = vand.u32 2147483647, %v2005_v56  ;;  %15702 = vst [vmem:[#allocation60_spill] sm:$0xff] %v11854_v43  ;;  %v11862_v56 = vpop.f32.mrf.mxu2 }
 0x563   : > { %v3494_v28 = vunpack.c.l.b16 %v2970_v51  ;;  %v11859_v40 = vpop.permute.xlu1 %1420  ;;  %15704 = vst [vmem:[#allocation185_spill] sm:$0xff] %v11862_v56 }
 0x564   : > { %v3566_v36 = vunpack.c.l.b16 %v3042_v3  ;;  %v3551_v3 = vunpack.c.l.b16 %v3027_v30  ;;  %v2517_v21 = vsub.f32 1.0, %v2261_v42 }
 0x565   : > { %v3690_v0 = vpack.c.b16 %v3495_v27, %v3494_v28 }
 0x566   : > { %v3726_v31 = vpack.c.b16 %v3567_v46, %v3566_v36  ;;  %v2204_v46 = vand.u32 2147483647, %v1948_v32  ;;  %v2516_v36 = vsub.f32 1.0, %v2260_v20  ;;  %v3718_v22 = vpack.c.b16 %v3551_v3, %v3550_v4  ;;  %v15706_v3 = vld [vmem:[#allocation186_spill] sm:$0xff] }
 0x567   : > { %9707 = vset.pattern.permute.xlu2 %v10182_v6  ;;  %9706 = vset.pattern.permute.xlu1 %v10185_v7  ;;  %v2773_v63 = vmax.f32 %v2517_v21, 0.0  ;;  %v2007_v20 = vsub.f32 %v11824_v1, %v10188_v8  ;;  %v2973_v4 = vpack.c.bf16 %v2717_v59, %v2717_v59  ;;  %v1951_v28 = vsub.f32 %v15706_v3, %v10188_v8 }
 0x568   : > { %9424 = vmatmul.msk.bf16.vlgmr.msra.gmra.mxu3 %vm3758_vm1, %v3726_v31  ;;  %v2460_v49 = vsub.f32 1.0, %v2204_v46  ;;  %v15703_v31 = vld [vmem:[#allocation64_spill] sm:$0xff]  ;;  %v2772_v37 = vmax.f32 %v2516_v36, 0.0  ;;  %v1950_v46 = vsub.f32 %v15705_v35, %v10188_v8 }
 0x569   : > { %v1458_v61 = vpop.permute.xlu2 %1457  ;;  %v3029_v51 = vpack.c.bf16 %v2773_v63, %v2773_v63  ;;  %v11875_v36 = vpop.f32.mrf.mxu1  ;;  %v2263_v15 = vand.u32 2147483647, %v2007_v20 }
 0x56a   : > { %v2716_v32 = vmax.f32 %v2460_v49, 0.0  ;;  %v3028_v30 = vpack.c.bf16 %v2772_v37, %v2772_v37  ;;  %v2021_v27 = vsub.f32 %v1458_v61, %v10188_v8  ;;  %15707 = vst [vmem:[#allocation64_spill] sm:$0xff] %v11875_v36  ;;  %v3497_v49 = vunpack.c.l.b16 %v2973_v4 }
 0x56b   : > { %v3553_v21 = vunpack.c.l.b16 %v3029_v51  ;;  %v2206_v63 = vand.u32 2147483647, %v1950_v46  ;;  %v2519_v61 = vsub.f32 1.0, %v2263_v15 }
 0x56c   : > { %v2972_v42 = vpack.c.bf16 %v2716_v32, %v2716_v32  ;;  %v11879_v32 = vpop.f32.mrf.mxu2  ;;  %v2277_v35 = vand.u32 2147483647, %v2021_v27 }
 0x56d   : > { %15708 = vst [vmem:[#allocation79_spill] sm:$0xff] %v11879_v32  ;;  %v2462_v45 = vsub.f32 1.0, %v2206_v63  ;;  %v2775_v4 = vmax.f32 %v2519_v61, 0.0 }
 0x56e   : > { %v3496_v37 = vunpack.c.l.b16 %v2972_v42 }
 0x56f   : > { %1549 = vperm.xlu2 %9707, %v15703_v31   ;;  %1543 = vperm.xlu1 %9706, %v15703_v31   ;;  %v2718_v46 = vmax.f32 %v2462_v45, 0.0  ;;  %v3031_v63 = vpack.c.bf16 %v2775_v4, %v2775_v4  ;;  %v15712_v45 = vld [vmem:[#allocation24_spill] sm:$0xff] }
 0x570   : > { %9416 = vmatmul.msk.bf16.gmra.mxu2 %vm3758_vm1, %v3718_v22  ;;  %v3552_v22 = vunpack.c.l.b16 %v3028_v30  ;;  %v3691_v29 = vpack.c.b16 %v3497_v49, %v3496_v37  ;;  %v2533_v30 = vsub.f32 1.0, %v2277_v35  ;;  %v15710_v49 = vld [vmem:[#allocation71_spill] sm:$0xff] }
 0x571   : > { %9388 = vmatmul.msk.bf16.gmra.mxu1 %vm3758_vm1, %v3690_v0  ;;  %v2006_v0 = vsub.f32 %v11750_v17, %v10188_v8  ;;  %v11877_v1 = vpop.permute.xlu1 %1432  ;;  %v2207_v17 = vand.u32 2147483647, %v1951_v28  ;;  %v2009_v37 = vsub.f32 %v15710_v49, %v10188_v8  ;;  %v2974_v35 = vpack.c.bf16 %v2718_v46, %v2718_v46 }
 0x572   : > { %v3719_v56 = vpack.c.b16 %v3553_v21, %v3552_v22  ;;  %v2789_v28 = vmax.f32 %v2533_v30, 0.0 }
 0x573   : > { %v2262_v59 = vand.u32 2147483647, %v2006_v0  ;;  %v2463_v51 = vsub.f32 1.0, %v2207_v17  ;;  %v11886_v0 = vpop.f32.mrf.mxu1  ;;  %v1952_v17 = vsub.f32 %v15712_v45, %v10188_v8  ;;  %v3498_v32 = vunpack.c.l.b16 %v2974_v35 }
 0x574   : > { %15709 = vst [vmem:[#allocation186_spill] sm:$0xff] %v11886_v0 }
 0x575   : > { %v2518_v3 = vsub.f32 1.0, %v2262_v59  ;;  %v2719_v21 = vmax.f32 %v2463_v51, 0.0  ;;  %v2208_v36 = vand.u32 2147483647, %v1952_v17 }
 0x577   : > { %9709 = vset.pattern.permute.xlu2 %v10179_v5  ;;  %9708 = vset.pattern.permute.xlu1 %v10203_v38  ;;  %v2774_v27 = vmax.f32 %v2518_v3, 0.0  ;;  %v3045_v3 = vpack.c.bf16 %v2789_v28, %v2789_v28 }
 0x579   : > { %v1470_v15 = vpop.permute.xlu2 %1469  ;;  %v3030_v61 = vpack.c.bf16 %v2774_v27, %v2774_v27  ;;  %v3569_v0 = vunpack.c.l.b16 %v3045_v3 }
 0x57a   : > { %v2023_v30 = vsub.f32 %v1470_v15, %v10188_v8 }
 0x57b   : > { %v3554_v45 = vunpack.c.l.b16 %v3030_v61  ;;  %v11901_v28 = vpop.f32.mrf.mxu1 }
 0x57f   : > { %1561 = vperm.xlu2 %9709, %v15703_v31   ;;  %1555 = vperm.xlu1 %9708, %v15703_v31  }
 0x580   : > { %9417 = vmatmul.msk.bf16.gmra.mxu2 %vm3758_vm1, %v3719_v56  ;;  %v2008_v56 = vsub.f32 %v11766_v10, %v10188_v8  ;;  %v15713_v10 = vld [vmem:[#allocation188_spill] sm:$0xff] }
 0x581   : > { %9389 = vmatmul.msk.bf16.gmra.mxu1 %vm3758_vm1, %v3691_v29  ;;  %v1452_v20 = vpop.permute.xlu1 %1451  ;;  %v11892_v29 = vpop.f32.mrf.mxu2  ;;  %v1953_v4 = vsub.f32 %v15713_v10, %v10188_v8  ;;  %v2464_v10 = vsub.f32 1.0, %v2208_v36 }
 0x582   : > { %v2020_v42 = vsub.f32 %v1452_v20, %v10188_v8  ;;  %15711 = vst [vmem:[#allocation71_spill] sm:$0xff] %v11892_v29  ;;  %v2975_v20 = vpack.c.bf16 %v2719_v21, %v2719_v21  ;;  %v2264_v49 = vand.u32 2147483647, %v2008_v56  ;;  %v2279_v29 = vand.u32 2147483647, %v2023_v30 }
 0x583   : > { %v2209_v27 = vand.u32 2147483647, %v1953_v4  ;;  %v2011_v4 = vsub.f32 %v11778_v55, %v10188_v8 }
 0x584   : > { %v2276_v22 = vand.u32 2147483647, %v2020_v42  ;;  %v2265_v42 = vand.u32 2147483647, %v2009_v37  ;;  %v3499_v60 = vunpack.c.l.b16 %v2975_v20  ;;  %v2535_v56 = vsub.f32 1.0, %v2279_v29 }
 0x586   : > { %v2532_v59 = vsub.f32 1.0, %v2276_v22  ;;  %v3555_v22 = vunpack.c.l.b16 %v3031_v63  ;;  %v2521_v15 = vsub.f32 1.0, %v2265_v42  ;;  %v3692_v18 = vpack.c.b16 %v3499_v60, %v3498_v32 }
 0x587   : > { %9711 = vset.pattern.permute.xlu2 %v10236_v12  ;;  %9710 = vset.pattern.permute.xlu1 %v10239_v13  ;;  %v2465_v63 = vsub.f32 1.0, %v2209_v27  ;;  %v2791_v36 = vmax.f32 %v2535_v56, 0.0 }
 0x588   : > { %v2788_v51 = vmax.f32 %v2532_v59, 0.0  ;;  %v2520_v59 = vsub.f32 1.0, %v2264_v49  ;;  %v3720_v21 = vpack.c.b16 %v3555_v22, %v3554_v45  ;;  %v2777_v17 = vmax.f32 %v2521_v15, 0.0 }
 0x589   : > { %v11905_v37 = vpop.f32.mrf.mxu2  ;;  %v2721_v3 = vmax.f32 %v2465_v63, 0.0  ;;  %v3047_v42 = vpack.c.bf16 %v2791_v36, %v2791_v36  ;;  %v15718_v36 = vld [vmem:[#allocation119_spill] sm:$0xff] }
 0x58a   : > { %v3044_v46 = vpack.c.bf16 %v2788_v51, %v2788_v51  ;;  %15714 = vst [vmem:[#allocation24_spill] sm:$0xff] %v11905_v37  ;;  %v2776_v61 = vmax.f32 %v2520_v59, 0.0  ;;  %v3033_v29 = vpack.c.bf16 %v2777_v17, %v2777_v17 }
 0x58b   : > { %v3571_v56 = vunpack.c.l.b16 %v3047_v42 }
 0x58c   : > { %v3568_v43 = vunpack.c.l.b16 %v3044_v46  ;;  %v3032_v30 = vpack.c.bf16 %v2776_v61, %v2776_v61  ;;  %v2977_v46 = vpack.c.bf16 %v2721_v3, %v2721_v3  ;;  %v3557_v45 = vunpack.c.l.b16 %v3033_v29 }
 0x58e   : > { %v3727_v39 = vpack.c.b16 %v3569_v0, %v3568_v43  ;;  %v2720_v43 = vmax.f32 %v2464_v10, 0.0  ;;  %v3556_v27 = vunpack.c.l.b16 %v3032_v30  ;;  %v2267_v10 = vand.u32 2147483647, %v2011_v4  ;;  %v1489_v4 = vpop.permute.xlu2 %1488 }
 0x58f   : > { %1579 = vperm.xlu2 %9711, %v15703_v31   ;;  %1573 = vperm.xlu1 %9710, %v15703_v31   ;;  %v15715_v31 = vld [vmem:[#allocation44_spill] sm:$0xff] }
 0x590   : > { %9418 = vmatmul.msk.bf16.gmra.mxu2 %vm3758_vm1, %v3720_v21  ;;  %9425 = vmatmul.msk.bf16.gmra.mxu3 %vm3758_vm1, %v3727_v39  ;;  %v2024_v0 = vsub.f32 %v15715_v31, %v10188_v8  ;;  %v2010_v39 = vsub.f32 %v11834_v50, %v10188_v8  ;;  %v2976_v20 = vpack.c.bf16 %v2720_v43, %v2720_v43 }
 0x591   : > { %9390 = vmatmul.msk.bf16.gmra.mxu1 %vm3758_vm1, %v3692_v18  ;;  %v1464_v35 = vpop.permute.xlu1 %1463  ;;  %v11915_v18 = vpop.f32.mrf.mxu1  ;;  %v3721_v61 = vpack.c.b16 %v3557_v45, %v3556_v27  ;;  %v2013_v27 = vsub.f32 %v11793_v33, %v10188_v8 }
 0x592   : > { %v2022_v60 = vsub.f32 %v1464_v35, %v10188_v8  ;;  %15716 = vst [vmem:[#allocation188_spill] sm:$0xff] %v11915_v18  ;;  %v2280_v22 = vand.u32 2147483647, %v2024_v0  ;;  %v2266_v15 = vand.u32 2147483647, %v2010_v39  ;;  %v11921_v59 = vpop.f32.mrf.mxu2  ;;  %v3500_v21 = vunpack.c.l.b16 %v2976_v20 }
 0x593   : > { %15717 = vst [vmem:[#allocation44_spill] sm:$0xff] %v11921_v59  ;;  %v3501_v35 = vunpack.c.l.b16 %v2977_v46 }
 0x594   : > { %v2278_v32 = vand.u32 2147483647, %v2022_v60  ;;  %v2536_v17 = vsub.f32 1.0, %v2280_v22  ;;  %v2522_v60 = vsub.f32 1.0, %v2266_v15  ;;  %v2012_v22 = vsub.f32 %v11852_v54, %v10188_v8 }
 0x595   : > { %v3693_v55 = vpack.c.b16 %v3501_v35, %v3500_v21  ;;  %v2026_v15 = vsub.f32 %v1489_v4, %v10188_v8 }
 0x596   : > { %v2534_v51 = vsub.f32 1.0, %v2278_v32  ;;  %v2523_v32 = vsub.f32 1.0, %v2267_v10  ;;  %v2792_v3 = vmax.f32 %v2536_v17, 0.0  ;;  %v2778_v29 = vmax.f32 %v2522_v60, 0.0 }
 0x597   : > { %9713 = vset.pattern.permute.xlu2 %v10185_v7  ;;  %9712 = vset.pattern.permute.xlu1 %v10172_v2  ;;  %v2269_v17 = vand.u32 2147483647, %v2013_v27 }
 0x598   : > { %v2790_v49 = vmax.f32 %v2534_v51, 0.0  ;;  %v2779_v39 = vmax.f32 %v2523_v32, 0.0  ;;  %v3048_v42 = vpack.c.bf16 %v2792_v3, %v2792_v3 }
 0x599   : > { %v11927_v31 = vpop.f32.mrf.mxu1  ;;  %v2525_v33 = vsub.f32 1.0, %v2269_v17 }
 0x59a   : > { %v3046_v50 = vpack.c.bf16 %v2790_v49, %v2790_v49  ;;  %15719 = vst [vmem:[#allocation119_spill] sm:$0xff] %v11927_v31  ;;  %v11931_v51 = vpop.f32.mrf.mxu2  ;;  %v3034_v49 = vpack.c.bf16 %v2778_v29, %v2778_v29  ;;  %v3035_v45 = vpack.c.bf16 %v2779_v39, %v2779_v39  ;;  %v3572_v21 = vunpack.c.l.b16 %v3048_v42  ;;  %v1501_v39 = vpop.permute.xlu2 %1500 }
 0x59b   : > { %v2781_v4 = vmax.f32 %v2525_v33, 0.0 }
 0x59c   : > { %v3570_v63 = vunpack.c.l.b16 %v3046_v50  ;;  %v3558_v10 = vunpack.c.l.b16 %v3034_v49  ;;  %v3559_v35 = vunpack.c.l.b16 %v3035_v45 }
 0x59e   : > { %v3728_v43 = vpack.c.b16 %v3571_v56, %v3570_v63  ;;  %v2268_v56 = vand.u32 2147483647, %v2012_v22  ;;  %v3722_v60 = vpack.c.b16 %v3559_v35, %v3558_v10  ;;  %v15721_v22 = vld [vmem:[#allocation63_spill] sm:$0xff]  ;;  %v3037_v10 = vpack.c.bf16 %v2781_v4, %v2781_v4 }
 0x59f   : > { %1592 = vperm.xlu2 %9713, %v15718_v36   ;;  %1586 = vperm.xlu1 %9712, %v15718_v36  }
 0x5a0   : > { %9419 = vmatmul.msk.bf16.gmra.mxu2 %vm3758_vm1, %v3721_v61  ;;  %9426 = vmatmul.msk.bf16.gmra.mxu3 %vm3758_vm1, %v3728_v43  ;;  %v2282_v61 = vand.u32 2147483647, %v2026_v15  ;;  %v2524_v43 = vsub.f32 1.0, %v2268_v56  ;;  %v2015_v15 = vsub.f32 %v11859_v40, %v10188_v8  ;;  %v3561_v33 = vunpack.c.l.b16 %v3037_v10 }
 0x5a1   : > { %9391 = vmatmul.msk.bf16.gmra.mxu1 %vm3758_vm1, %v3693_v55  ;;  %v1482_v0 = vpop.permute.xlu1 %1481 }
 0x5a2   : > { %v2025_v30 = vsub.f32 %v1482_v0, %v10188_v8  ;;  %v11940_v55 = vpop.f32.mrf.mxu2  ;;  %v2538_v0 = vsub.f32 1.0, %v2282_v61  ;;  %v2780_v29 = vmax.f32 %v2524_v43, 0.0 }
 0x5a3   : > { %15720 = vst [vmem:[#allocation196_spill] sm:$0xff] %v11940_v55 }
 0x5a4   : > { %v2281_v20 = vand.u32 2147483647, %v2025_v30  ;;  %v2794_v42 = vmax.f32 %v2538_v0, 0.0  ;;  %v3036_v27 = vpack.c.bf16 %v2780_v29, %v2780_v29 }
 0x5a6   : > { %v2537_v46 = vsub.f32 1.0, %v2281_v20  ;;  %v1415_v20 = vpop.permute.xlu0 %1414 }
 0x5a7   : > { %9715 = vset.pattern.permute.xlu2 %v10179_v5  ;;  %9714 = vset.pattern.permute.xlu1 %v10203_v38  ;;  %v2014_v45 = vsub.f32 %v1415_v20, %v10188_v8 }
 0x5a8   : > { %v2793_v50 = vmax.f32 %v2537_v46, 0.0  ;;  %v2029_v46 = vsub.f32 %v15721_v22, %v10188_v8 }
 0x5a9   : > { %v2270_v61 = vand.u32 2147483647, %v2014_v45 }
 0x5aa   : > { %v3049_v63 = vpack.c.bf16 %v2793_v50, %v2793_v50  ;;  %v2028_v50 = vsub.f32 %v1501_v39, %v10188_v8  ;;  %v11955_v56 = vpop.f32.mrf.mxu2  ;;  %v2285_v17 = vand.u32 2147483647, %v2029_v46 }
 0x5ab   : > { %15722 = vst [vmem:[#allocation63_spill] sm:$0xff] %v11955_v56  ;;  %v2526_v29 = vsub.f32 1.0, %v2270_v61 }
 0x5ac   : > { %v3573_v54 = vunpack.c.l.b16 %v3049_v63  ;;  %v3050_v63 = vpack.c.bf16 %v2794_v42, %v2794_v42  ;;  %v2284_v43 = vand.u32 2147483647, %v2028_v50 }
 0x5ad   : > { %v2782_v42 = vmax.f32 %v2526_v29, 0.0 }
 0x5ae   : > { %v3729_v32 = vpack.c.b16 %v3573_v54, %v3572_v21  ;;  %v3560_v54 = vunpack.c.l.b16 %v3036_v27  ;;  %v3574_v40 = vunpack.c.l.b16 %v3050_v63  ;;  %v2540_v20 = vsub.f32 1.0, %v2284_v43 }
 0x5af   : > { %1610 = vperm.xlu2 %9715, %v15718_v36   ;;  %1604 = vperm.xlu1 %9714, %v15718_v36   ;;  %v3038_v50 = vpack.c.bf16 %v2782_v42, %v2782_v42  ;;  %v2017_v63 = vsub.f32 %v11877_v1, %v10188_v8 }
 0x5b0   : > { %9420 = vmatmul.msk.bf16.gmra.mxu2 %vm3758_vm1, %v3722_v60  ;;  %9427 = vmatmul.msk.bf16.gmra.mxu3 %vm3758_vm1, %v3729_v32  ;;  %v2271_v60 = vand.u32 2147483647, %v2015_v15  ;;  %v2796_v45 = vmax.f32 %v2540_v20, 0.0 }
 0x5b1   : > { %v1495_v3 = vpop.permute.xlu1 %1494 }
 0x5b2   : > { %v2027_v30 = vsub.f32 %v1495_v3, %v10188_v8  ;;  %v2541_v3 = vsub.f32 1.0, %v2285_v17  ;;  %v2527_v39 = vsub.f32 1.0, %v2271_v60  ;;  %v11961_v46 = vpop.f32.mrf.mxu2  ;;  %v2016_v17 = vsub.f32 %v11805_v26, %v10188_v8 }
 0x5b3   : > { %v3562_v60 = vunpack.c.l.b16 %v3038_v50 }
 0x5b4   : > { %v2283_v49 = vand.u32 2147483647, %v2027_v30  ;;  %v3723_v30 = vpack.c.b16 %v3561_v33, %v3560_v54  ;;  %v2797_v4 = vmax.f32 %v2541_v3, 0.0  ;;  %v2783_v22 = vmax.f32 %v2527_v39, 0.0 }
 0x5b6   : > { %v2539_v21 = vsub.f32 1.0, %v2283_v49  ;;  %v3053_v15 = vpack.c.bf16 %v2797_v4, %v2797_v4  ;;  %v3039_v10 = vpack.c.bf16 %v2783_v22, %v2783_v22 }
 0x5b7   : > { %9717 = vset.pattern.permute.xlu2 %v10239_v13  ;;  %9716 = vset.pattern.permute.xlu1 %v10216_v57 }
 0x5b8   : > { %v2795_v35 = vmax.f32 %v2539_v21, 0.0  ;;  %v1519_v21 = vpop.permute.xlu2 %1518  ;;  %v3577_v54 = vunpack.c.l.b16 %v3053_v15  ;;  %v3563_v43 = vunpack.c.l.b16 %v3039_v10 }
 0x5b9   : > { %v2031_v61 = vsub.f32 %v1519_v21, %v10188_v8 }
 0x5ba   : > { %v3051_v32 = vpack.c.bf16 %v2795_v35, %v2795_v35  ;;  %v3052_v35 = vpack.c.bf16 %v2796_v45, %v2796_v45  ;;  %v11971_v1 = vpop.f32.mrf.mxu2  ;;  %v3724_v29 = vpack.c.b16 %v3563_v43, %v3562_v60 }
 0x5bb   : > { %15723 = vst [vmem:[#allocation197_spill] sm:$0xff] %v11971_v1  ;;  %v2287_v3 = vand.u32 2147483647, %v2031_v61 }
 0x5bc   : > { %v3575_v0 = vunpack.c.l.b16 %v3051_v32  ;;  %v2273_v32 = vand.u32 2147483647, %v2017_v63  ;;  %v3576_v33 = vunpack.c.l.b16 %v3052_v35 }
 0x5bd   : > { %v2543_v4 = vsub.f32 1.0, %v2287_v3 }
 0x5be   : > { %v3730_v49 = vpack.c.b16 %v3575_v0, %v3574_v40  ;;  %v2272_v0 = vand.u32 2147483647, %v2016_v17  ;;  %v3731_v20 = vpack.c.b16 %v3577_v54, %v3576_v33 }
 0x5bf   : > { %1622 = vperm.xlu2 %9717, %v15718_v36   ;;  %1616 = vperm.xlu1 %9716, %v15718_v36   ;;  %v2799_v15 = vmax.f32 %v2543_v4, 0.0 }
 0x5c0   : > { %9421 = vmatmul.msk.bf16.gmra.mxu2 %vm3758_vm1, %v3723_v30  ;;  %9428 = vmatmul.msk.bf16.gmra.mxu3 %vm3758_vm1, %v3730_v49  ;;  %v2529_v30 = vsub.f32 1.0, %v2273_v32  ;;  %v15724_v49 = vld [vmem:[#allocation144_spill] sm:$0xff]  ;;  %v2528_v26 = vsub.f32 1.0, %v2272_v0  ;;  %v1531_v50 = vpop.permute.xlu2 %1530 }
 0x5c1   : > { %v1513_v27 = vpop.permute.xlu1 %1512  ;;  %v3055_v17 = vpack.c.bf16 %v2799_v15, %v2799_v15  ;;  %v2033_v61 = vsub.f32 %v1531_v50, %v10188_v8 }
 0x5c2   : > { %v2030_v36 = vsub.f32 %v1513_v27, %v10188_v8  ;;  %v2785_v42 = vmax.f32 %v2529_v30, 0.0  ;;  %v2784_v27 = vmax.f32 %v2528_v26, 0.0  ;;  %v11977_v10 = vpop.f32.mrf.mxu2 }
 0x5c3   : > { %15725 = vst [vmem:[#allocation144_spill] sm:$0xff] %v11977_v10  ;;  %v3579_v33 = vunpack.c.l.b16 %v3055_v17 }
 0x5c4   : > { %v2286_v40 = vand.u32 2147483647, %v2030_v36  ;;  %v3041_v21 = vpack.c.bf16 %v2785_v42, %v2785_v42  ;;  %v3040_v36 = vpack.c.bf16 %v2784_v27, %v2784_v27  ;;  %v15726_v42 = vld [vmem:[#allocation104_spill] sm:$0xff] }
 0x5c6   : > { %v2542_v39 = vsub.f32 1.0, %v2286_v40  ;;  %v3565_v54 = vunpack.c.l.b16 %v3041_v21  ;;  %v3564_v32 = vunpack.c.l.b16 %v3040_v36  ;;  %v2289_v40 = vand.u32 2147483647, %v2033_v61 }
 0x5c7   : > { %9719 = vset.pattern.permute.xlu2 %v10185_v7  ;;  %9718 = vset.pattern.permute.xlu1 %v10172_v2 }
 0x5c8   : > { %v2798_v22 = vmax.f32 %v2542_v39, 0.0  ;;  %v3725_v0 = vpack.c.b16 %v3565_v54, %v3564_v32  ;;  %v2545_v39 = vsub.f32 1.0, %v2289_v40 }
 0x5c9   : > { %v1550_v32 = vpop.permute.xlu2 %1549 }
 0x5ca   : > { %v3054_v63 = vpack.c.bf16 %v2798_v22, %v2798_v22  ;;  %v11985_v30 = vpop.f32.mrf.mxu2  ;;  %v2801_v4 = vmax.f32 %v2545_v39, 0.0  ;;  %v2034_v22 = vsub.f32 %v15726_v42, %v10188_v8 }
 0x5cc   : > { %v3578_v60 = vunpack.c.l.b16 %v3054_v63  ;;  %v3057_v15 = vpack.c.bf16 %v2801_v4, %v2801_v4  ;;  %v2290_v50 = vand.u32 2147483647, %v2034_v22  ;;  %v15727_v22 = vld [vmem:[#allocation15_spill] sm:$0xff] }
 0x5ce   : > { %v2546_v36 = vsub.f32 1.0, %v2290_v50 }
 0x5cf   : > { %1641 = vperm.xlu2 %9719, %v15724_v49   ;;  %1635 = vperm.xlu1 %9718, %v15724_v49  }
 0x5d0   : > { %9422 = vmatmul.msk.bf16.gmra.mxu2 %vm3758_vm1, %v3724_v29  ;;  %9429 = vmatmul.msk.bf16.gmra.mxu3 %vm3758_vm1, %v3731_v20  ;;  %v3732_v29 = vpack.c.b16 %v3579_v33, %v3578_v60  ;;  %v2802_v54 = vmax.f32 %v2546_v36, 0.0 }
 0x5d1   : > { %v1525_v45 = vpop.permute.xlu1 %1524 }
 0x5d2   : > { %v2032_v35 = vsub.f32 %v1525_v45, %v10188_v8  ;;  %v3058_v33 = vpack.c.bf16 %v2802_v54, %v2802_v54 }
 0x5d4   : > { %v2288_v43 = vand.u32 2147483647, %v2032_v35  ;;  %v3581_v35 = vunpack.c.l.b16 %v3057_v15 }
 0x5d6   : > { %v2544_v3 = vsub.f32 1.0, %v2288_v43 }
 0x5d7   : > { %9721 = vset.pattern.permute.xlu2 %v10203_v38  ;;  %9720 = vset.pattern.permute.xlu1 %v10182_v6 }
 0x5d8   : > { %v2800_v20 = vmax.f32 %v2544_v3, 0.0  ;;  %v2036_v3 = vsub.f32 %v1550_v32, %v10188_v8 }
 0x5d9   : > { %v1562_v50 = vpop.permute.xlu2 %1561 }
 0x5da   : > { %v3056_v45 = vpack.c.bf16 %v2800_v20, %v2800_v20  ;;  %v2038_v36 = vsub.f32 %v1562_v50, %v10188_v8 }
 0x5dc   : > { %v3580_v21 = vunpack.c.l.b16 %v3056_v45 }
 0x5de   : > { %v3733_v61 = vpack.c.b16 %v3581_v35, %v3580_v21 }
 0x5df   : > { %1653 = vperm.xlu2 %9721, %v15724_v49   ;;  %1647 = vperm.xlu1 %9720, %v15724_v49  }
 0x5e0   : > { %9423 = vmatmul.msk.bf16.gmra.mxu2 %vm3758_vm1, %v3725_v0  ;;  %9430 = vmatmul.msk.bf16.gmra.mxu3 %vm3758_vm1, %v3732_v29  ;;  %v3582_v29 = vunpack.c.l.b16 %v3058_v33 }
 0x5e1   : > { %v1544_v26 = vpop.permute.xlu1 %1543 }
 0x5e2   : > { %v2035_v27 = vsub.f32 %v1544_v26, %v10188_v8  ;;  %v2292_v26 = vand.u32 2147483647, %v2036_v3 }
 0x5e4   : > { %v2291_v63 = vand.u32 2147483647, %v2035_v27  ;;  %v2548_v45 = vsub.f32 1.0, %v2292_v26 }
 0x5e6   : > { %v2547_v17 = vsub.f32 1.0, %v2291_v63  ;;  %v2804_v21 = vmax.f32 %v2548_v45, 0.0  ;;  %v15729_v63 = vld [vmem:[#allocation120_spill] sm:$0xff] }
 0x5e7   : > { %9723 = vset.pattern.permute.xlu2 %v10239_v13  ;;  %9722 = vset.pattern.permute.xlu1 %v10216_v57  ;;  %v2039_v35 = vsub.f32 %v15729_v63, %v10188_v8 }
 0x5e8   : > { %v2803_v60 = vmax.f32 %v2547_v17, 0.0 }
 0x5ea   : > { %v3059_v40 = vpack.c.bf16 %v2803_v60, %v2803_v60  ;;  %v2295_v60 = vand.u32 2147483647, %v2039_v35 }
 0x5eb   : > { %v12004_v27 = vpop.f32.mrf.mxu3 }
 0x5ec   : > { %v3583_v39 = vunpack.c.l.b16 %v3059_v40  ;;  %15728 = vst [vmem:[#allocation104_spill] sm:$0xff] %v12004_v27  ;;  %v1660_v27 = vpop.permute.xlu0 %1659 }
 0x5ee   : > { %v3734_v42 = vpack.c.b16 %v3583_v39, %v3582_v29 }
 0x5ef   : > { %1671 = vperm.xlu2 %9723, %v15724_v49   ;;  %1665 = vperm.xlu1 %9722, %v15724_v49  }
 0x5f0   : > { %9431 = vmatmul.msk.bf16.gmra.mxu3 %vm3758_vm1, %v3733_v61  ;;  %v3060_v61 = vpack.c.bf16 %v2804_v21, %v2804_v21 }
 0x5f1   : > { %v1556_v43 = vpop.permute.xlu1 %1555 }
 0x5f2   : > { %v2037_v0 = vsub.f32 %v1556_v43, %v10188_v8  ;;  %v2294_v43 = vand.u32 2147483647, %v2038_v36  ;;  %v3584_v40 = vunpack.c.l.b16 %v3060_v61 }
 0x5f3   : > { %v12015_v33 = vpop.f32.mrf.mxu3 }
 0x5f4   : > { %v2293_v20 = vand.u32 2147483647, %v2037_v0  ;;  %15731 = vst [vmem:[#allocation15_spill] sm:$0xff] %v12015_v33  ;;  %v2551_v0 = vsub.f32 1.0, %v2295_v60  ;;  %v2550_v3 = vsub.f32 1.0, %v2294_v43 }
 0x5f6   : > { %v2549_v4 = vsub.f32 1.0, %v2293_v20  ;;  %v2807_v39 = vmax.f32 %v2551_v0, 0.0  ;;  %v2806_v20 = vmax.f32 %v2550_v3, 0.0 }
 0x5f7   : > { %9725 = vset.pattern.permute.xlu2 %v10172_v2  ;;  %9724 = vset.pattern.permute.xlu1 %v10236_v12 }
 0x5f8   : > { %v2805_v15 = vmax.f32 %v2549_v4, 0.0  ;;  %v3063_v45 = vpack.c.bf16 %v2807_v39, %v2807_v39 }
 0x5fa   : > { %v3061_v17 = vpack.c.bf16 %v2805_v15, %v2805_v15  ;;  %v3062_v15 = vpack.c.bf16 %v2806_v20, %v2806_v20  ;;  %v3587_v63 = vunpack.c.l.b16 %v3063_v45 }
 0x5fc   : > { %v3585_v32 = vunpack.c.l.b16 %v3061_v17  ;;  %v3586_v35 = vunpack.c.l.b16 %v3062_v15 }
 0x5fe   : > { %v3735_v29 = vpack.c.b16 %v3585_v32, %v3584_v40  ;;  %v3736_v43 = vpack.c.b16 %v3587_v63, %v3586_v35 }
 0x5ff   : > { %1684 = vperm.xlu2 %9725, %v15727_v22   ;;  %1677 = vperm.xlu1 %9724, %v15724_v49   ;;  %v15730_v49 = vld [vmem:[#allocation21_spill] sm:$0xff] }
 0x600   : > { %9432 = vmatmul.msk.bf16.gmra.mxu3 %vm3758_vm1, %v3734_v42  ;;  %v12012_v54 = vperm.slane %v15730_v49, 2  ;;  %v1580_v42 = vpop.permute.xlu2 %1579 }
 0x601   : > { %v1574_v26 = vpop.permute.xlu1 %1573  ;;  %v2041_v21 = vsub.f32 %v1580_v42, %v10188_v8 }
 0x602   : > { %6107 = vperm.xlu0 %9948, %v12012_v54   ;;  %v2040_v50 = vsub.f32 %v1574_v26, %v10188_v8 }
 0x603   : > { %v2297_v61 = vand.u32 2147483647, %v2041_v21 }
 0x604   : > { %v2296_v36 = vand.u32 2147483647, %v2040_v50 }
 0x605   : > { %v2553_v32 = vsub.f32 1.0, %v2297_v61 }
 0x606   : > { %v2552_v60 = vsub.f32 1.0, %v2296_v36 }
 0x607   : > { %9727 = vset.pattern.permute.xlu2 %v10203_v38  ;;  %9726 = vset.pattern.permute.xlu1 %v10182_v6 }
 0x608   : > { %v2808_v40 = vmax.f32 %v2552_v60, 0.0  ;;  %v1593_v39 = vpop.permute.xlu2 %1592  ;;  %v15734_v60 = vld [vmem:[#allocation43_spill] sm:$0xff] }
 0x609   : > { %v2043_v45 = vsub.f32 %v1593_v39, %v10188_v8  ;;  %v15736_v39 = vld [vmem:[#allocation12_spill] sm:$0xff] }
 0x60a   : > { %v3064_v20 = vpack.c.bf16 %v2808_v40, %v2808_v40 }
 0x60b   : > { %v2299_v35 = vand.u32 2147483647, %v2043_v45 }
 0x60c   : > { %v3588_v15 = vunpack.c.l.b16 %v3064_v20  ;;  %v2044_v20 = vsub.f32 %v15736_v39, %v10188_v8 }
 0x60f   : > { %1702 = vperm.xlu2 %9727, %v15727_v22   ;;  %1696 = vperm.xlu1 %9726, %v15727_v22  }
 0x610   : > { %9433 = vmatmul.msk.bf16.gmra.mxu3 %vm3758_vm1, %v3735_v29  ;;  %v2809_v29 = vmax.f32 %v2553_v32, 0.0 }
 0x611   : > { %v1587_v0 = vpop.permute.xlu1 %1586 }
 0x612   : > { %v2042_v26 = vsub.f32 %v1587_v0, %v10188_v8  ;;  %v3065_v42 = vpack.c.bf16 %v2809_v29, %v2809_v29 }
 0x613   : > { %v12020_v4 = vpop.f32.mrf.mxu3 }
 0x614   : > { %v2298_v50 = vand.u32 2147483647, %v2042_v26  ;;  %v3589_v63 = vunpack.c.l.b16 %v3065_v42 }
 0x616   : > { %v2554_v36 = vsub.f32 1.0, %v2298_v50  ;;  %v3737_v61 = vpack.c.b16 %v3589_v63, %v3588_v15 }
 0x617   : > { %9729 = vset.pattern.permute.xlu2 %v10216_v57  ;;  %9728 = vset.pattern.permute.xlu1 %v10179_v5 }
 0x618   : > { %v2810_v32 = vmax.f32 %v2554_v36, 0.0 }
 0x61a   : > { %v3066_v26 = vpack.c.bf16 %v2810_v32, %v2810_v32 }
 0x61b   : > { %v12026_v17 = vpop.f32.mrf.mxu3 }
 0x61c   : > { %15732 = vst [vmem:[#allocation120_spill] sm:$0xff] %v12026_v17  ;;  %v3590_v15 = vunpack.c.l.b16 %v3066_v26 }
 0x61f   : > { %1714 = vperm.xlu2 %9729, %v15727_v22   ;;  %1708 = vperm.xlu1 %9728, %v15727_v22  }
 0x620   : > { %9434 = vmatmul.msk.bf16.gmra.mxu3 %vm3758_vm1, %v3736_v43  ;;  %v2555_v43 = vsub.f32 1.0, %v2299_v35 }
 0x621   : > { %v1605_v40 = vpop.permute.xlu1 %1604 }
 0x622   : > { %v2811_v29 = vmax.f32 %v2555_v43, 0.0  ;;  %v2045_v42 = vsub.f32 %v1605_v40, %v10188_v8 }
 0x623   : > { %v12031_v3 = vpop.f32.mrf.mxu3 }
 0x624   : > { %15733 = vst [vmem:[#allocation21_spill] sm:$0xff] %v12031_v3  ;;  %v3067_v45 = vpack.c.bf16 %v2811_v29, %v2811_v29  ;;  %v2301_v50 = vand.u32 2147483647, %v2045_v42  ;;  %v1611_v29 = vpop.permute.xlu2 %1610 }
 0x626   : > { %v3591_v35 = vunpack.c.l.b16 %v3067_v45  ;;  %v2557_v43 = vsub.f32 1.0, %v2301_v50  ;;  %v2046_v45 = vsub.f32 %v1611_v29, %v10188_v8 }
 0x627   : > { %9731 = vset.pattern.permute.xlu2 %v10172_v2  ;;  %9730 = vset.pattern.permute.xlu1 %v10236_v12 }
 0x628   : > { %v2813_v40 = vmax.f32 %v2557_v43, 0.0 }
 0x62a   : > { %v3069_v26 = vpack.c.bf16 %v2813_v40, %v2813_v40 }
 0x62b   : > { %v12037_v21 = vpop.f32.mrf.mxu3 }
 0x62f   : > { %1733 = vperm.xlu2 %9731, %v15734_v60   ;;  %1726 = vperm.xlu1 %9730, %v15727_v22   ;;  %v2300_v22 = vand.u32 2147483647, %v2044_v20 }
 0x630   : > { %9435 = vmatmul.msk.bf16.gmra.mxu3 %vm3758_vm1, %v3737_v61  ;;  %v3738_v61 = vpack.c.b16 %v3591_v35, %v3590_v15  ;;  %v3593_v15 = vunpack.c.l.b16 %v3069_v26 }
 0x631   : > { %v2556_v36 = vsub.f32 1.0, %v2300_v22  ;;  %v1617_v39 = vpop.permute.xlu1 %1616 }
 0x632   : > { %v2047_v42 = vsub.f32 %v1617_v39, %v10188_v8  ;;  %v1623_v39 = vpop.permute.xlu2 %1622 }
 0x633   : > { %v12042_v0 = vpop.f32.mrf.mxu3  ;;  %v2812_v32 = vmax.f32 %v2556_v36, 0.0  ;;  %v2302_v36 = vand.u32 2147483647, %v2046_v45 }
 0x634   : > { %15735 = vst [vmem:[#allocation43_spill] sm:$0xff] %v12042_v0  ;;  %v2303_v50 = vand.u32 2147483647, %v2047_v42  ;;  %v2048_v42 = vsub.f32 %v1623_v39, %v10188_v8 }
 0x635   : > { %v3068_v20 = vpack.c.bf16 %v2812_v32, %v2812_v32  ;;  %v2558_v32 = vsub.f32 1.0, %v2302_v36 }
 0x636   : > { %v2559_v43 = vsub.f32 1.0, %v2303_v50  ;;  %v2304_v50 = vand.u32 2147483647, %v2048_v42 }
 0x637   : > { %9733 = vset.pattern.permute.xlu2 %v10182_v6  ;;  %9732 = vset.pattern.permute.xlu1 %v10185_v7  ;;  %v3592_v22 = vunpack.c.l.b16 %v3068_v20  ;;  %v2814_v29 = vmax.f32 %v2558_v32, 0.0  ;;  %v15740_v20 = vld [vmem:[#allocation148_spill] sm:$0xff] }
 0x638   : > { %v2815_v40 = vmax.f32 %v2559_v43, 0.0  ;;  %v2049_v26 = vsub.f32 %v15740_v20, %v10188_v8 }
 0x63a   : > { %v3071_v45 = vpack.c.bf16 %v2815_v40, %v2815_v40 }
 0x63b   : > { %v12049_v63 = vpop.f32.mrf.mxu3 }
 0x63c   : > { %15737 = vst [vmem:[#allocation12_spill] sm:$0xff] %v12049_v63  ;;  %v3595_v36 = vunpack.c.l.b16 %v3071_v45 }
 0x63f   : > { %1745 = vperm.xlu2 %9733, %v15734_v60   ;;  %1739 = vperm.xlu1 %9732, %v15734_v60  }
 0x640   : > { %9436 = vmatmul.msk.bf16.gmra.mxu3 %vm3758_vm1, %v3738_v61  ;;  %v3739_v61 = vpack.c.b16 %v3593_v15, %v3592_v22  ;;  %v3070_v22 = vpack.c.bf16 %v2814_v29, %v2814_v29  ;;  %v2305_v15 = vand.u32 2147483647, %v2049_v26  ;;  %v1642_v29 = vpop.permute.xlu2 %1641 }
 0x641   : > { %v1636_v20 = vpop.permute.xlu1 %1635 }
 0x642   : > { %v3594_v43 = vunpack.c.l.b16 %v3070_v22  ;;  %v2050_v45 = vsub.f32 %v1636_v20, %v10188_v8  ;;  %v2051_v22 = vsub.f32 %v1642_v29, %v10188_v8 }
 0x643   : > { %v12054_v0 = vpop.f32.mrf.mxu3 }
 0x644   : > { %v3740_v32 = vpack.c.b16 %v3595_v36, %v3594_v43  ;;  %v2307_v36 = vand.u32 2147483647, %v2051_v22 }
 0x647   : > { %9735 = vset.pattern.permute.xlu2 %v10216_v57  ;;  %9734 = vset.pattern.permute.xlu1 %v10179_v5 }
 0x648   : > { %v1654_v3 = vpop.permute.xlu2 %1653 }
 0x649   : > { %v2053_v22 = vsub.f32 %v1654_v3, %v10188_v8  ;;  %v2054_v3 = vsub.f32 %v1660_v27, %v10188_v8 }
 0x64b   : > { %v12060_v35 = vpop.f32.mrf.mxu3 }
 0x64c   : > { %15738 = vst [vmem:[#allocation198_spill] sm:$0xff] %v12060_v35  ;;  %v2561_v35 = vsub.f32 1.0, %v2305_v15 }
 0x64e   : > { %v2817_v40 = vmax.f32 %v2561_v35, 0.0 }
 0x64f   : > { %1763 = vperm.xlu2 %9735, %v15734_v60   ;;  %1757 = vperm.xlu1 %9734, %v15734_v60  }
 0x650   : > { %9437 = vmatmul.msk.bf16.gmra.mxu3 %vm3758_vm1, %v3739_v61  ;;  %v3073_v26 = vpack.c.bf16 %v2817_v40, %v2817_v40  ;;  %v2563_v40 = vsub.f32 1.0, %v2307_v36  ;;  %v2309_v36 = vand.u32 2147483647, %v2053_v22  ;;  %v2310_v22 = vand.u32 2147483647, %v2054_v3 }
 0x651   : > { %v1648_v20 = vpop.permute.xlu1 %1647 }
 0x652   : > { %v3597_v15 = vunpack.c.l.b16 %v3073_v26  ;;  %v2052_v26 = vsub.f32 %v1648_v20, %v10188_v8 }
 0x653   : > { %v12065_v63 = vpop.f32.mrf.mxu3 }
 0x654   : > { %15739 = vst [vmem:[#allocation199_spill] sm:$0xff] %v12065_v63  ;;  %v2560_v63 = vsub.f32 1.0, %v2304_v50  ;;  %v2306_v50 = vand.u32 2147483647, %v2050_v45 }
 0x656   : > { %v2816_v39 = vmax.f32 %v2560_v63, 0.0  ;;  %v2562_v43 = vsub.f32 1.0, %v2306_v50 }
 0x657   : > { %9737 = vset.pattern.permute.xlu2 %v10236_v12  ;;  %9736 = vset.pattern.permute.xlu1 %v10239_v13 }
 0x658   : > { %v3072_v42 = vpack.c.bf16 %v2816_v39, %v2816_v39  ;;  %v2818_v39 = vmax.f32 %v2562_v43, 0.0 }
 0x65a   : > { %v3074_v29 = vpack.c.bf16 %v2818_v39, %v2818_v39 }
 0x65b   : > { %v12072_v61 = vpop.f32.mrf.mxu3 }
 0x65f   : > { %1775 = vperm.xlu2 %9737, %v15734_v60   ;;  %1769 = vperm.xlu1 %9736, %v15734_v60   ;;  %v3596_v60 = vunpack.c.l.b16 %v3072_v42 }
 0x660   : > { %9438 = vmatmul.msk.bf16.gmra.mxu3 %vm3758_vm1, %v3740_v32  ;;  %v15743_v32 = vld [vmem:[#allocation67_spill] sm:$0xff] }
 0x661   : > { %v3741_v63 = vpack.c.b16 %v3597_v15, %v3596_v60  ;;  %v3598_v15 = vunpack.c.l.b16 %v3074_v29  ;;  %v2308_v60 = vand.u32 2147483647, %v2052_v26 }
 0x663   : > { %v12077_v17 = vpop.f32.mrf.mxu3  ;;  %v2564_v43 = vsub.f32 1.0, %v2308_v60 }
 0x664   : > { %15741 = vst [vmem:[#allocation148_spill] sm:$0xff] %v12077_v17  ;;  %v2819_v17 = vmax.f32 %v2563_v40, 0.0  ;;  %v2565_v40 = vsub.f32 1.0, %v2309_v36 }
 0x665   : > { %v2820_v20 = vmax.f32 %v2564_v43, 0.0 }
 0x666   : > { %v3075_v45 = vpack.c.bf16 %v2819_v17, %v2819_v17  ;;  %v2821_v17 = vmax.f32 %v2565_v40, 0.0 }
 0x667   : > { %9739 = vset.pattern.permute.xlu2 %v10182_v6  ;;  %9738 = vset.pattern.permute.xlu1 %v10185_v7  ;;  %v3076_v29 = vpack.c.bf16 %v2820_v20, %v2820_v20 }
 0x668   : > { %v3599_v50 = vunpack.c.l.b16 %v3075_v45  ;;  %v3077_v45 = vpack.c.bf16 %v2821_v17, %v2821_v17  ;;  %v1672_v17 = vpop.permute.xlu2 %1671 }
 0x66a   : > { %v3601_v36 = vunpack.c.l.b16 %v3077_v45  ;;  %v2056_v45 = vsub.f32 %v1672_v17, %v10188_v8  ;;  %v15748_v17 = vld [vmem:[#allocation29_spill] sm:$0xff] }
 0x66b   : > { %v12083_v35 = vpop.f32.mrf.mxu3 }
 0x66c   : > { %15742 = vst [vmem:[#allocation200_spill] sm:$0xff] %v12083_v35  ;;  %v1666_v35 = vpop.permute.xlu1 %1665 }
 0x66d   : > { %v2055_v26 = vsub.f32 %v1666_v35, %v10188_v8 }
 0x66f   : > { %1794 = vperm.xlu2 %9739, %v15743_v32   ;;  %1788 = vperm.xlu1 %9738, %v15743_v32   ;;  %v2311_v60 = vand.u32 2147483647, %v2055_v26 }
 0x670   : > { %9439 = vmatmul.msk.bf16.gmra.mxu3 %vm3758_vm1, %v3741_v63  ;;  %v3742_v63 = vpack.c.b16 %v3599_v50, %v3598_v15  ;;  %v3600_v15 = vunpack.c.l.b16 %v3076_v29 }
 0x671   : > { %v2567_v40 = vsub.f32 1.0, %v2311_v60  ;;  %v2312_v60 = vand.u32 2147483647, %v2056_v45 }
 0x672   : > { %v3743_v43 = vpack.c.b16 %v3601_v36, %v3600_v15 }
 0x673   : > { %v12089_v42 = vpop.f32.mrf.mxu3  ;;  %v2823_v35 = vmax.f32 %v2567_v40, 0.0  ;;  %v15747_v40 = vld [vmem:[#allocation121_spill] sm:$0xff] }
 0x674   : > { %v1678_v20 = vpop.permute.xlu1 %1677 }
 0x675   : > { %v3079_v29 = vpack.c.bf16 %v2823_v35, %v2823_v35  ;;  %v2057_v26 = vsub.f32 %v1678_v20, %v10188_v8  ;;  %v1685_v20 = vpop.permute.xlu2 %1684 }
 0x677   : > { %9741 = vset.pattern.permute.xlu2 %v10179_v5  ;;  %9740 = vset.pattern.permute.xlu1 %v10203_v38  ;;  %v2313_v15 = vand.u32 2147483647, %v2057_v26 }
 0x67b   : > { %v12096_v39 = vpop.f32.mrf.mxu3 }
 0x67c   : > { %15744 = vst [vmem:[#allocation67_spill] sm:$0xff] %v12096_v39 }
 0x67f   : > { %1806 = vperm.xlu2 %9741, %v15743_v32   ;;  %1800 = vperm.xlu1 %9740, %v15743_v32  }
 0x680   : > { %9440 = vmatmul.msk.bf16.gmra.mxu3 %vm3758_vm1, %v3742_v63  ;;  %v2566_v63 = vsub.f32 1.0, %v2310_v22 }
 0x682   : > { %v2822_v27 = vmax.f32 %v2566_v63, 0.0  ;;  %v2569_v63 = vsub.f32 1.0, %v2313_v15 }
 0x683   : > { %v12103_v50 = vpop.f32.mrf.mxu3 }
 0x684   : > { %15745 = vst [vmem:[#allocation201_spill] sm:$0xff] %v12103_v50  ;;  %v3078_v3 = vpack.c.bf16 %v2822_v27, %v2822_v27  ;;  %v2568_v27 = vsub.f32 1.0, %v2312_v60  ;;  %v2825_v35 = vmax.f32 %v2569_v63, 0.0 }
 0x686   : > { %v3602_v22 = vunpack.c.l.b16 %v3078_v3  ;;  %v2824_v50 = vmax.f32 %v2568_v27, 0.0  ;;  %v2059_v3 = vsub.f32 %v15748_v17, %v10188_v8  ;;  %v3081_v26 = vpack.c.bf16 %v2825_v35, %v2825_v35  ;;  %v1703_v35 = vpop.permute.xlu2 %1702 }
 0x687   : > { %9743 = vset.pattern.permute.xlu2 %v10236_v12  ;;  %9742 = vset.pattern.permute.xlu1 %v10239_v13 }
 0x688   : > { %v3080_v45 = vpack.c.bf16 %v2824_v50, %v2824_v50  ;;  %v3605_v60 = vunpack.c.l.b16 %v3081_v26  ;;  %v1697_v50 = vpop.permute.xlu1 %1696  ;;  %v2061_v26 = vsub.f32 %v1703_v35, %v10188_v8  ;;  %v12143_v35 = vperm.slane %v15730_v49, 7 }
 0x68a   : > { %15751 = vst [vmem:[#allocation203_spill] sm:$0xff] %v12143_v35  ;;  %6352 = vperm.xlu0 %9948, %v12143_v35  }
 0x68b   : > { %v12108_v39 = vpop.f32.mrf.mxu3 }
 0x68f   : > { %1824 = vperm.xlu2 %9743, %v15743_v32   ;;  %1818 = vperm.xlu1 %9742, %v15743_v32   ;;  %v3603_v32 = vunpack.c.l.b16 %v3079_v29  ;;  %v2058_v29 = vsub.f32 %v1685_v20, %v10188_v8 }
 0x690   : > { %9441 = vmatmul.msk.bf16.gmra.mxu3 %vm3758_vm1, %v3743_v43 }
 0x691   : > { %v3744_v36 = vpack.c.b16 %v3603_v32, %v3602_v22  ;;  %v2315_v32 = vand.u32 2147483647, %v2059_v3  ;;  %v2314_v15 = vand.u32 2147483647, %v2058_v29  ;;  %v2060_v29 = vsub.f32 %v1697_v50, %v10188_v8 }
 0x692   : > { %9956 = vset.pattern.permute.xlu0 %v10236_v12 }
 0x693   : > { %v12114_v43 = vpop.f32.mrf.mxu3  ;;  %v2571_v63 = vsub.f32 1.0, %v2315_v32 }
 0x694   : > { %15746 = vst [vmem:[#allocation202_spill] sm:$0xff] %v12114_v43  ;;  %v2570_v43 = vsub.f32 1.0, %v2314_v15 }
 0x695   : > { %v2827_v20 = vmax.f32 %v2571_v63, 0.0 }
 0x696   : > { %v2826_v17 = vmax.f32 %v2570_v43, 0.0 }
 0x697   : > { %9745 = vset.pattern.permute.xlu2 %v10185_v7  ;;  %9744 = vset.pattern.permute.xlu1 %v10172_v2 }
 0x698   : > { %v3082_v3 = vpack.c.bf16 %v2826_v17, %v2826_v17 }
 0x69a   : > { %v3606_v15 = vunpack.c.l.b16 %v3082_v3 }
 0x69b   : > { %v12124_v22 = vpop.f32.mrf.mxu3 }
 0x69c   : > { %15749 = vst [vmem:[#allocation121_spill] sm:$0xff] %v12124_v22  ;;  %v3083_v22 = vpack.c.bf16 %v2827_v20, %v2827_v20 }
 0x69e   : > { %v3607_v32 = vunpack.c.l.b16 %v3083_v22  ;;  %v1709_v22 = vpop.permute.xlu1 %1708 }
 0x69f   : > { %4815 = vperm.xlu2 %9745, %v15747_v40   ;;  %4809 = vperm.xlu1 %9744, %v15747_v40  }
 0x6a0   : > { %9442 = vmatmul.msk.bf16.gmra.mxu3 %vm3758_vm1, %v3744_v36  ;;  %v3604_v36 = vunpack.c.l.b16 %v3080_v45  ;;  %v1715_v45 = vpop.permute.xlu2 %1714  ;;  %v3746_v43 = vpack.c.b16 %v3607_v32, %v3606_v15 }
 0x6a1   : > { %v2063_v15 = vsub.f32 %v1715_v45, %v10188_v8 }
 0x6a2   : > { %v3745_v27 = vpack.c.b16 %v3605_v60, %v3604_v36  ;;  %v2316_v60 = vand.u32 2147483647, %v2060_v29  ;;  %v2317_v36 = vand.u32 2147483647, %v2061_v26  ;;  %v2062_v26 = vsub.f32 %v1709_v22, %v10188_v8  ;;  %v15753_v22 = vld [vmem:[#allocation149_spill] sm:$0xff] }
 0x6a3   : > { %v12129_v33 = vpop.f32.mrf.mxu3 }
 0x6a4   : > { %v2573_v20 = vsub.f32 1.0, %v2317_v36  ;;  %v2318_v36 = vand.u32 2147483647, %v2062_v26 }
 0x6a6   : > { %v2829_v3 = vmax.f32 %v2573_v20, 0.0 }
 0x6a7   : > { %9747 = vset.pattern.permute.xlu2 %v10179_v5  ;;  %9746 = vset.pattern.permute.xlu1 %v10203_v38 }
 0x6a8   : > { %v12140_v17 = vpop.permute.xlu2 %1733 }
 0x6ab   : > { %v12135_v63 = vpop.f32.mrf.mxu3 }
 0x6ac   : > { %15750 = vst [vmem:[#allocation29_spill] sm:$0xff] %v12135_v63 }
 0x6af   : > { %4833 = vperm.xlu2 %9747, %v15747_v40   ;;  %4827 = vperm.xlu1 %9746, %v15747_v40  }
 0x6b0   : > { %9443 = vmatmul.msk.bf16.gmra.mxu3 %vm3758_vm1, %v3745_v27  ;;  %v2572_v27 = vsub.f32 1.0, %v2316_v60  ;;  %v12152_v60 = vpop.permute.xlu2 %1745 }
 0x6b2   : > { %v2828_v50 = vmax.f32 %v2572_v27, 0.0  ;;  %v2319_v27 = vand.u32 2147483647, %v2063_v15 }
 0x6b3   : > { %v12147_v32 = vpop.f32.mrf.mxu3 }
 0x6b4   : > { %v3084_v29 = vpack.c.bf16 %v2828_v50, %v2828_v50  ;;  %15752 = vst [vmem:[#allocation204_spill] sm:$0xff] %v12147_v32  ;;  %v2574_v50 = vsub.f32 1.0, %v2318_v36  ;;  %v2575_v63 = vsub.f32 1.0, %v2319_v27 }
 0x6b6   : > { %v3608_v49 = vunpack.c.l.b16 %v3084_v29  ;;  %v1727_v29 = vpop.permute.xlu1 %1726  ;;  %v2831_v26 = vmax.f32 %v2575_v63, 0.0 }
 0x6b7   : > { %9749 = vset.pattern.permute.xlu2 %v10239_v13  ;;  %9748 = vset.pattern.permute.xlu1 %v10216_v57 }
 0x6b8   : > { %v12160_v45 = vpop.permute.xlu2 %1763  ;;  %v3087_v36 = vpack.c.bf16 %v2831_v26, %v2831_v26 }
 0x6bb   : > { %v12157_v32 = vpop.f32.mrf.mxu3 }
 0x6bc   : > { %15754 = vst [vmem:[#allocation149_spill] sm:$0xff] %v12157_v32 }
 0x6bf   : > { %4845 = vperm.xlu2 %9749, %v15747_v40   ;;  %4839 = vperm.xlu1 %9748, %v15747_v40   ;;  %v3085_v40 = vpack.c.bf16 %v2829_v3, %v2829_v3  ;;  %v2830_v3 = vmax.f32 %v2574_v50, 0.0  ;;  %v3611_v50 = vunpack.c.l.b16 %v3087_v36 }
 0x6c0   : > { %9444 = vmatmul.msk.bf16.gmra.mxu3 %vm3758_vm1, %v3746_v43 }
 0x6c1   : > { %v3609_v43 = vunpack.c.l.b16 %v3085_v40  ;;  %v15755_v40 = vld [vmem:[#allocation46_spill] sm:$0xff]  ;;  %v3086_v1 = vpack.c.bf16 %v2830_v3, %v2830_v3 }
 0x6c2   : > { %v2064_v15 = vsub.f32 %v15755_v40, %v10188_v8  ;;  %v1740_v40 = vpop.permute.xlu1 %1739 }
 0x6c3   : > { %v3747_v20 = vpack.c.b16 %v3609_v43, %v3608_v49  ;;  %v2065_v49 = vsub.f32 %v1727_v29, %v10188_v8  ;;  %v12167_v43 = vpop.permute.xlu2 %1775  ;;  %v12169_v10 = vpop.f32.mrf.mxu3  ;;  %v2067_v36 = vsub.f32 %v1740_v40, %v10188_v8 }
 0x6c4   : > { %v2320_v27 = vand.u32 2147483647, %v2064_v15  ;;  %15756 = vst [vmem:[#allocation46_spill] sm:$0xff] %v12169_v10 }
 0x6c5   : > { %v2321_v56 = vand.u32 2147483647, %v2065_v49 }
 0x6c6   : > { %v2576_v63 = vsub.f32 1.0, %v2320_v27 }
 0x6c7   : > { %9751 = vset.pattern.permute.xlu2 %v10185_v7  ;;  %9750 = vset.pattern.permute.xlu1 %v10172_v2  ;;  %v2577_v59 = vsub.f32 1.0, %v2321_v56  ;;  %v2066_v56 = vsub.f32 %v12140_v17, %v10188_v8 }
 0x6c8   : > { %v2832_v29 = vmax.f32 %v2576_v63, 0.0 }
 0x6c9   : > { %v2833_v26 = vmax.f32 %v2577_v59, 0.0  ;;  %v2322_v59 = vand.u32 2147483647, %v2066_v56 }
 0x6cb   : > { %v12174_v3 = vpop.permute.xlu2 %1794  ;;  %v12176_v15 = vpop.f32.mrf.mxu3  ;;  %v3089_v49 = vpack.c.bf16 %v2833_v26, %v2833_v26 }
 0x6cc   : > { %15757 = vst [vmem:[#allocation205_spill] sm:$0xff] %v12176_v15 }
 0x6cf   : > { %4864 = vperm.xlu2 %9751, %v15753_v22   ;;  %4858 = vperm.xlu1 %9750, %v15753_v22  }
 0x6d0   : > { %9445 = vmatmul.msk.bf16.gmra.mxu3 %vm3758_vm1, %v3747_v20  ;;  %v3610_v20 = vunpack.c.l.b16 %v3086_v1  ;;  %v3088_v1 = vpack.c.bf16 %v2832_v29, %v2832_v29  ;;  %v2578_v29 = vsub.f32 1.0, %v2322_v59 }
 0x6d2   : > { %v3748_v37 = vpack.c.b16 %v3611_v50, %v3610_v20  ;;  %v3613_v20 = vunpack.c.l.b16 %v3089_v49  ;;  %v2323_v50 = vand.u32 2147483647, %v2067_v36  ;;  %v2834_v40 = vmax.f32 %v2578_v29, 0.0 }
 0x6d3   : > { %v12185_v15 = vpop.f32.mrf.mxu3  ;;  %v2068_v36 = vsub.f32 %v12152_v60, %v10188_v8 }
 0x6d4   : > { %v2579_v10 = vsub.f32 1.0, %v2323_v50  ;;  %15758 = vst [vmem:[#allocation206_spill] sm:$0xff] %v12185_v15  ;;  %v1758_v50 = vpop.permute.xlu1 %1757  ;;  %v15761_v15 = vld [vmem:[#allocation16_spill] sm:$0xff] }
 0x6d5   : > { %v2324_v55 = vand.u32 2147483647, %v2068_v36 }
 0x6d6   : > { %v2835_v17 = vmax.f32 %v2579_v10, 0.0 }
 0x6d7   : > { %9753 = vset.pattern.permute.xlu2 %v10203_v38  ;;  %9752 = vset.pattern.permute.xlu1 %v10182_v6  ;;  %v2580_v35 = vsub.f32 1.0, %v2324_v55 }
 0x6d8   : > { %v3091_v56 = vpack.c.bf16 %v2835_v17, %v2835_v17 }
 0x6d9   : > { %v12183_v27 = vpop.permute.xlu2 %1806 }
 0x6da   : > { %v3615_v10 = vunpack.c.l.b16 %v3091_v56  ;;  %v15763_v56 = vld [vmem:[#allocation68_spill] sm:$0xff] }
 0x6df   : > { %4876 = vperm.xlu2 %9753, %v15753_v22   ;;  %4870 = vperm.xlu1 %9752, %v15753_v22  }
 0x6e0   : > { %9446 = vmatmul.msk.bf16.gmra.mxu3 %vm3758_vm1, %v3748_v37  ;;  %v3612_v37 = vunpack.c.l.b16 %v3088_v1  ;;  %v15759_v1 = vld [vmem:[#allocation66_spill] sm:$0xff] }
 0x6e1   : > { %v2069_v49 = vsub.f32 %v15759_v1, %v10188_v8 }
 0x6e2   : > { %v3749_v63 = vpack.c.b16 %v3613_v20, %v3612_v37  ;;  %v3090_v37 = vpack.c.bf16 %v2834_v40, %v2834_v40  ;;  %v12198_v20 = vpop.f32.mrf.mxu3 }
 0x6e3   : > { %15760 = vst [vmem:[#allocation66_spill] sm:$0xff] %v12198_v20  ;;  %v1770_v20 = vpop.permute.xlu1 %1769 }
 0x6e4   : > { %v3614_v31 = vunpack.c.l.b16 %v3090_v37 }
 0x6e6   : > { %v3750_v60 = vpack.c.b16 %v3615_v10, %v3614_v31 }
 0x6e7   : > { %9755 = vset.pattern.permute.xlu2 %v10239_v13  ;;  %9754 = vset.pattern.permute.xlu1 %v10216_v57 }
 0x6e9   : > { %v12190_v26 = vpop.permute.xlu2 %1824 }
 0x6ea   : > { %v12204_v36 = vpop.f32.mrf.mxu3 }
 0x6eb   : > { %15762 = vst [vmem:[#allocation16_spill] sm:$0xff] %v12204_v36  ;;  %v15773_v36 = vld [vmem:[#allocation45_spill] sm:$0xff] }
 0x6ef   : > { %4894 = vperm.xlu2 %9755, %v15753_v22   ;;  %4888 = vperm.xlu1 %9754, %v15753_v22  }
 0x6f0   : > { %9447 = vmatmul.msk.bf16.gmra.mxu3 %vm3758_vm1, %v3749_v63  ;;  %v2325_v63 = vand.u32 2147483647, %v2069_v49  ;;  %v2836_v49 = vmax.f32 %v2580_v35, 0.0 }
 0x6f2   : > { %v2581_v18 = vsub.f32 1.0, %v2325_v63  ;;  %v3092_v31 = vpack.c.bf16 %v2836_v49, %v2836_v49  ;;  %v2070_v63 = vsub.f32 %v1758_v50, %v10188_v8 }
 0x6f4   : > { %v2837_v32 = vmax.f32 %v2581_v18, 0.0  ;;  %v1789_v18 = vpop.permute.xlu1 %1788  ;;  %v3616_v10 = vunpack.c.l.b16 %v3092_v31  ;;  %v2073_v31 = vsub.f32 %v12167_v43, %v10188_v8 }
 0x6f6   : > { %v3093_v55 = vpack.c.bf16 %v2837_v32, %v2837_v32 }
 0x6f7   : > { %9757 = vset.pattern.permute.xlu2 %v10172_v2  ;;  %9756 = vset.pattern.permute.xlu1 %v10236_v12 }
 0x6f8   : > { %v3617_v35 = vunpack.c.l.b16 %v3093_v55 }
 0x6f9   : > { %v4816_v59 = vpop.permute.xlu2 %4815 }
 0x6fa   : > { %v6373_v29 = vsub.f32 %v4816_v59, %v10188_v8 }
 0x6fc   : > { %v6629_v1 = vand.u32 2147483647, %v6373_v29  ;;  %v2326_v29 = vand.u32 2147483647, %v2070_v63  ;;  %v1801_v50 = vpop.permute.xlu1 %1800 }
 0x6fe   : > { %v6885_v17 = vsub.f32 1.0, %v6629_v1 }
 0x6ff   : > { %4907 = vperm.xlu2 %9757, %v15761_v15   ;;  %4900 = vperm.xlu1 %9756, %v15753_v22   ;;  %v2071_v22 = vsub.f32 %v12160_v45, %v10188_v8 }
 0x700   : > { %9448 = vmatmul.msk.bf16.gmra.mxu3 %vm3758_vm1, %v3750_v60  ;;  %v7141_v40 = vmax.f32 %v6885_v17, 0.0  ;;  %v12213_v60 = vpop.f32.mrf.mxu3  ;;  %v3751_v17 = vpack.c.b16 %v3617_v35, %v3616_v10 }
 0x701   : > { %v2327_v1 = vand.u32 2147483647, %v2071_v22  ;;  %15764 = vst [vmem:[#allocation68_spill] sm:$0xff] %v12213_v60 }
 0x702   : > { %v7397_v59 = vmul.f32 %v7141_v40, %v15763_v56  ;;  %v2582_v40 = vsub.f32 1.0, %v2326_v29  ;;  %v2329_v29 = vand.u32 2147483647, %v2073_v31  ;;  %v2075_v31 = vsub.f32 %v1789_v18, %v10188_v8 }
 0x703   : > { %v2583_v32 = vsub.f32 1.0, %v2327_v1 }
 0x704   : > { %v7655_v37 = vsel %vm3758_vm1, %v7397_v59, 0.0  ;;  %v2838_v49 = vmax.f32 %v2582_v40, 0.0  ;;  %v2072_v59 = vsub.f32 %v1770_v20, %v10188_v8  ;;  %v12225_v63 = vpop.permute.xlu1 %1818  ;;  %v2585_v20 = vsub.f32 1.0, %v2329_v29 }
 0x705   : > { %7656 = vadd.xlane.f32.xlu0 %v7655_v37  ;;  %v2839_v56 = vmax.f32 %v2583_v32, 0.0 }
 0x706   : > { %v3094_v45 = vpack.c.bf16 %v2838_v49, %v2838_v49  ;;  %v2328_v35 = vand.u32 2147483647, %v2072_v59  ;;  %v2841_v49 = vmax.f32 %v2585_v20, 0.0 }
 0x707   : > { %9759 = vset.pattern.permute.xlu2 %v10203_v38  ;;  %9758 = vset.pattern.permute.xlu1 %v10182_v6  ;;  %v3095_v55 = vpack.c.bf16 %v2839_v56, %v2839_v56 }
 0x708   : > { %v12219_v37 = vpop.f32.mrf.mxu3  ;;  %v3618_v22 = vunpack.c.l.b16 %v3094_v45  ;;  %v15769_v45 = vld [vmem:[#allocation107_spill] sm:$0xff] }
 0x709   : > { %15765 = vst [vmem:[#allocation207_spill] sm:$0xff] %v12219_v37  ;;  %v3619_v10 = vunpack.c.l.b16 %v3095_v55  ;;  %v12234_v56 = vpop.permute.xlu2 %4833  ;;  %v2074_v59 = vsub.f32 %v15769_v45, %v10188_v8 }
 0x70a   : > { %15768 = vst [vmem:[#allocation210_spill] sm:$0xff] %v12234_v56 }
 0x70b   : > { %v3752_v1 = vpack.c.b16 %v3619_v10, %v3618_v22  ;;  %v3097_v22 = vpack.c.bf16 %v2841_v49, %v2841_v49  ;;  %v2330_v10 = vand.u32 2147483647, %v2074_v59 }
 0x70d   : > { %v3621_v20 = vunpack.c.l.b16 %v3097_v22 }
 0x70f   : > { %4925 = vperm.xlu2 %9759, %v15761_v15   ;;  %4919 = vperm.xlu1 %9758, %v15761_v15  }
 0x710   : > { %9449 = vmatmul.msk.bf16.gmra.mxu3 %vm3758_vm1, %v3751_v17  ;;  %v2584_v17 = vsub.f32 1.0, %v2328_v35  ;;  %v12229_v40 = vpop.f32.mrf.mxu3 }
 0x711   : > { %15766 = vst [vmem:[#allocation208_spill] sm:$0xff] %v12229_v40  ;;  %v12232_v32 = vpop.permute.xlu1 %4809  ;;  %v2586_v40 = vsub.f32 1.0, %v2330_v10 }
 0x712   : > { %15767 = vst [vmem:[#allocation209_spill] sm:$0xff] %v12232_v32  ;;  %v2840_v43 = vmax.f32 %v2584_v17, 0.0 }
 0x713   : > { %v2842_v49 = vmax.f32 %v2586_v40, 0.0 }
 0x714   : > { %v3096_v55 = vpack.c.bf16 %v2840_v43, %v2840_v43 }
 0x716   : > { %v3620_v29 = vunpack.c.l.b16 %v3096_v55 }
 0x717   : > { %9761 = vset.pattern.permute.xlu2 %v10216_v57  ;;  %9760 = vset.pattern.permute.xlu1 %v10179_v5 }
 0x718   : > { %v12243_v17 = vpop.f32.mrf.mxu3  ;;  %v3753_v45 = vpack.c.b16 %v3621_v20, %v3620_v29  ;;  %v2077_v29 = vsub.f32 %v1801_v50, %v10188_v8 }
 0x719   : > { %15771 = vst [vmem:[#allocation211_spill] sm:$0xff] %v12243_v17  ;;  %v12245_v37 = vpop.permute.xlu2 %4845 }
 0x71a   : > { %15772 = vst [vmem:[#allocation212_spill] sm:$0xff] %v12245_v37  ;;  %v3098_v37 = vpack.c.bf16 %v2842_v49, %v2842_v49 }
 0x71c   : > { %v3622_v20 = vunpack.c.l.b16 %v3098_v37 }
 0x71f   : > { %4937 = vperm.xlu2 %9761, %v15761_v15   ;;  %4931 = vperm.xlu1 %9760, %v15761_v15  }
 0x720   : > { %9450 = vmatmul.msk.bf16.gmra.mxu3 %vm3758_vm1, %v3752_v1  ;;  %v2331_v1 = vand.u32 2147483647, %v2075_v31  ;;  %v12251_v55 = vpop.f32.mrf.mxu3 }
 0x721   : > { %v12241_v35 = vpop.permute.xlu1 %4827  ;;  %15774 = vst [vmem:[#allocation45_spill] sm:$0xff] %v12251_v55 }
 0x722   : > { %15770 = vst [vmem:[#allocation107_spill] sm:$0xff] %v12241_v35  ;;  %v2587_v43 = vsub.f32 1.0, %v2331_v1 }
 0x724   : > { %v2843_v56 = vmax.f32 %v2587_v43, 0.0  ;;  %v2333_v43 = vand.u32 2147483647, %v2077_v29 }
 0x726   : > { %v3099_v10 = vpack.c.bf16 %v2843_v56, %v2843_v56 }
 0x727   : > { %9763 = vset.pattern.permute.xlu2 %v10172_v2  ;;  %9762 = vset.pattern.permute.xlu1 %v10236_v12 }
 0x729   : > { %v12253_v22 = vpop.permute.xlu2 %4864 }
 0x72a   : > { %15775 = vst [vmem:[#allocation213_spill] sm:$0xff] %v12253_v22  ;;  %v12262_v22 = vpop.f32.mrf.mxu3 }
 0x72f   : > { %4956 = vperm.xlu2 %9763, %v15773_v36   ;;  %4949 = vperm.xlu1 %9762, %v15761_v15   ;;  %v2076_v15 = vsub.f32 %v12174_v3, %v10188_v8 }
 0x730   : > { %9451 = vmatmul.msk.bf16.gmra.mxu3 %vm3758_vm1, %v3753_v45  ;;  %v3623_v45 = vunpack.c.l.b16 %v3099_v10 }
 0x731   : > { %v4840_v18 = vpop.permute.xlu1 %4839  ;;  %v2332_v55 = vand.u32 2147483647, %v2076_v15 }
 0x732   : > { %v6377_v59 = vsub.f32 %v4840_v18, %v10188_v8  ;;  %v15776_v18 = vld [vmem:[#allocation161_spill] sm:$0xff]  ;;  %v3754_v50 = vpack.c.b16 %v3623_v45, %v3622_v20  ;;  %v15778_v20 = vld [vmem:[#allocation122_spill] sm:$0xff] }
 0x733   : > { %15777 = vst [vmem:[#allocation161_spill] sm:$0xff] %v12262_v22  ;;  %v2588_v3 = vsub.f32 1.0, %v2332_v55  ;;  %v2079_v45 = vsub.f32 %v15778_v20, %v10188_v8  ;;  %v15779_v22 = vld [vmem:[#allocation175_spill] sm:$0xff] }
 0x734   : > { %v6633_v31 = vand.u32 2147483647, %v6377_v59 }
 0x735   : > { %v2844_v15 = vmax.f32 %v2588_v3, 0.0  ;;  %v2335_v3 = vand.u32 2147483647, %v2079_v45 }
 0x736   : > { %v6889_v1 = vsub.f32 1.0, %v6633_v31  ;;  %v2589_v31 = vsub.f32 1.0, %v2333_v43  ;;  %v2078_v43 = vsub.f32 %v12183_v27, %v10188_v8 }
 0x737   : > { %9765 = vset.pattern.permute.xlu2 %v10182_v6  ;;  %9764 = vset.pattern.permute.xlu1 %v10185_v7  ;;  %v3100_v55 = vpack.c.bf16 %v2844_v15, %v2844_v15  ;;  %v2591_v17 = vsub.f32 1.0, %v2335_v3 }
 0x738   : > { %v7145_v40 = vmax.f32 %v6889_v1, 0.0  ;;  %v2845_v29 = vmax.f32 %v2589_v31, 0.0 }
 0x739   : > { %v4877_v56 = vpop.permute.xlu2 %4876  ;;  %v3624_v27 = vunpack.c.l.b16 %v3100_v55 }
 0x73a   : > { %v7401_v59 = vmul.f32 %v7145_v40, %v15776_v18  ;;  %v6383_v37 = vsub.f32 %v4877_v56, %v10188_v8  ;;  %v12275_v56 = vpop.f32.mrf.mxu3 }
 0x73c   : > { %v7667_v49 = vsel %vm3758_vm1, %v7401_v59, 0.0  ;;  %v6639_v40 = vand.u32 2147483647, %v6383_v37  ;;  %v3101_v59 = vpack.c.bf16 %v2845_v29, %v2845_v29 }
 0x73d   : > { %7668 = vadd.xlane.f32.xlu0 %v7667_v49 }
 0x73f   : > { %4968 = vperm.xlu2 %9765, %v15773_v36   ;;  %4962 = vperm.xlu1 %9764, %v15773_v36  }
 0x740   : > { %9452 = vmatmul.msk.bf16.gmra.mxu3 %vm3758_vm1, %v3754_v50  ;;  %v6895_v50 = vsub.f32 1.0, %v6639_v40  ;;  %v15780_v40 = vld [vmem:[#allocation30_spill] sm:$0xff] }
 0x741   : > { %v4859_v10 = vpop.permute.xlu1 %4858  ;;  %v6389_v45 = vsub.f32 %v15780_v40, %v10188_v8 }
 0x742   : > { %v6380_v1 = vsub.f32 %v4859_v10, %v10188_v8  ;;  %v2334_v10 = vand.u32 2147483647, %v2078_v43  ;;  %v7151_v29 = vmax.f32 %v6895_v50, 0.0  ;;  %v12286_v50 = vpop.f32.mrf.mxu3 }
 0x743   : > { %15782 = vst [vmem:[#allocation122_spill] sm:$0xff] %v12286_v50 }
 0x744   : > { %v6636_v18 = vand.u32 2147483647, %v6380_v1  ;;  %v3625_v1 = vunpack.c.l.b16 %v3101_v59  ;;  %v2590_v15 = vsub.f32 1.0, %v2334_v10  ;;  %v2080_v10 = vsub.f32 %v12225_v63, %v10188_v8 }
 0x746   : > { %v6892_v49 = vsub.f32 1.0, %v6636_v18  ;;  %v3755_v60 = vpack.c.b16 %v3625_v1, %v3624_v27  ;;  %v2846_v55 = vmax.f32 %v2590_v15, 0.0 }
 0x747   : > { %9767 = vset.pattern.permute.xlu2 %v10216_v57  ;;  %9766 = vset.pattern.permute.xlu1 %v10179_v5 }
 0x748   : > { %v7148_v31 = vmax.f32 %v6892_v49, 0.0  ;;  %v2847_v49 = vmax.f32 %v2591_v17, 0.0  ;;  %v2081_v17 = vsub.f32 %v12190_v26, %v10188_v8 }
 0x749   : > { %v4895_v37 = vpop.permute.xlu2 %4894 }
 0x74a   : > { %v6386_v20 = vsub.f32 %v4895_v37, %v10188_v8  ;;  %v7404_v35 = vmul.f32 %v7148_v31, %v15779_v22  ;;  %v15781_v22 = vld [vmem:[#allocation183_spill] sm:$0xff]  ;;  %v3103_v3 = vpack.c.bf16 %v2847_v49, %v2847_v49  ;;  %v3102_v37 = vpack.c.bf16 %v2846_v55, %v2846_v55  ;;  %v12296_v40 = vpop.f32.mrf.mxu3 }
 0x74b   : > { %v7407_v59 = vmul.f32 %v7151_v29, %v15781_v22  ;;  %v2336_v29 = vand.u32 2147483647, %v2080_v10  ;;  %v2337_v15 = vand.u32 2147483647, %v2081_v17  ;;  %15783 = vst [vmem:[#allocation175_spill] sm:$0xff] %v12296_v40 }
 0x74c   : > { %v6642_v18 = vand.u32 2147483647, %v6386_v20  ;;  %v7676_v32 = vsel %vm3758_vm1, %v7404_v35, 0.0  ;;  %v3627_v20 = vunpack.c.l.b16 %v3103_v3  ;;  %v3626_v27 = vunpack.c.l.b16 %v3102_v37 }
 0x74d   : > { %7677 = vadd.xlane.f32.xlu0 %v7676_v32  ;;  %v6645_v32 = vand.u32 2147483647, %v6389_v45  ;;  %v7685_v31 = vsel %vm3758_vm1, %v7407_v59, 0.0  ;;  %v2593_v22 = vsub.f32 1.0, %v2337_v15 }
 0x74e   : > { %v6898_v43 = vsub.f32 1.0, %v6642_v18  ;;  %v3756_v63 = vpack.c.b16 %v3627_v20, %v3626_v27 }
 0x74f   : > { %4986 = vperm.xlu2 %9767, %v15773_v36   ;;  %4980 = vperm.xlu1 %9766, %v15773_v36   ;;  %v2849_v59 = vmax.f32 %v2593_v22, 0.0 }
 0x750   : > { %9453 = vmatmul.msk.bf16.gmra.mxu3 %vm3758_vm1, %v3755_v60  ;;  %v7154_v35 = vmax.f32 %v6898_v43, 0.0  ;;  %v6901_v60 = vsub.f32 1.0, %v6645_v32  ;;  %v2592_v43 = vsub.f32 1.0, %v2336_v29 }
 0x751   : > { %v12313_v10 = vpop.permute.xlu1 %4870 }
 0x752   : > { %v7410_v1 = vmul.f32 %v7154_v35, %v11248_v14  ;;  %v7157_v18 = vmax.f32 %v6901_v60, 0.0  ;;  %v2848_v14 = vmax.f32 %v2592_v43, 0.0  ;;  %v12304_v32 = vpop.f32.mrf.mxu3  ;;  %v3105_v35 = vpack.c.bf16 %v2849_v59, %v2849_v59 }
 0x754   : > { %v7694_v45 = vsel %vm3758_vm1, %v7410_v1, 0.0  ;;  %v7413_v26 = vmul.f32 %v7157_v18, %v11301_v24  ;;  %v3104_v55 = vpack.c.bf16 %v2848_v14, %v2848_v14  ;;  %v15784_v24 = vld [vmem:[#allocation70_spill] sm:$0xff] }
 0x755   : > { %7686 = vadd.xlane.f32.xlu0 %v7685_v31 }
 0x756   : > { %v7703_v49 = vsel %vm3758_vm1, %v7413_v26, 0.0  ;;  %v3628_v31 = vunpack.c.l.b16 %v3104_v55 }
 0x757   : > { %9769 = vset.pattern.permute.xlu2 %v10236_v12  ;;  %9768 = vset.pattern.permute.xlu1 %v10239_v13 }
 0x759   : > { %v12319_v17 = vpop.permute.xlu2 %4907 }
 0x75a   : > { %v12310_v37 = vpop.f32.mrf.mxu3 }
 0x75b   : > { %15785 = vst [vmem:[#allocation30_spill] sm:$0xff] %v12310_v37 }
 0x75d   : > { %7695 = vadd.xlane.f32.xlu0 %v7694_v45 }
 0x75f   : > { %4998 = vperm.xlu2 %9769, %v15773_v36   ;;  %4992 = vperm.xlu1 %9768, %v15773_v36   ;;  %v3629_v36 = vunpack.c.l.b16 %v3105_v35  ;;  %v12345_v35 = vpop.f32.mrf.mxu0 }
 0x760   : > { %9454 = vmatmul.msk.bf16.gmra.mxu3 %vm3758_vm1, %v3756_v63  ;;  %15787 = vst [vmem:[#allocation183_spill] sm:$0xff] %v12345_v35 }
 0x761   : > { %v3757_v3 = vpack.c.b16 %v3629_v36, %v3628_v31  ;;  %v12317_v60 = vpop.permute.xlu1 %4888 }
 0x765   : > { %7704 = vadd.xlane.f32.xlu0 %v7703_v49  ;;  %v15786_v49 = vld [vmem:[#allocation123_spill] sm:$0xff] }
 0x767   : > { %9771 = vset.pattern.permute.xlu2 %v10182_v6  ;;  %9770 = vset.pattern.permute.xlu1 %v10185_v7 }
 0x769   : > { %v12325_v20 = vpop.permute.xlu2 %4925 }
 0x76f   : > { %5017 = vperm.xlu2 %9771, %v15784_v24   ;;  %5011 = vperm.xlu1 %9770, %v15784_v24  }
 0x770   : > { %9455 = vmatmul.msk.bf16.gmra.mxu3 %vm3758_vm1, %v3757_v3 }
 0x771   : > { %v12323_v1 = vpop.permute.xlu1 %4900 }
 0x777   : > { %9773 = vset.pattern.permute.xlu2 %v10179_v5  ;;  %9772 = vset.pattern.permute.xlu1 %v10203_v38 }
 0x779   : > { %v12331_v29 = vpop.permute.xlu2 %4937 }
 0x77f   : > { %5029 = vperm.xlu2 %9773, %v15784_v24   ;;  %5023 = vperm.xlu1 %9772, %v15784_v24  }
 0x781   : > { %v12329_v27 = vpop.permute.xlu1 %4919 }
 0x787   : > { %9775 = vset.pattern.permute.xlu2 %v10236_v12  ;;  %9774 = vset.pattern.permute.xlu1 %v10239_v13 }
 0x789   : > { %v12336_v63 = vpop.permute.xlu2 %4956 }
 0x78f   : > { %5047 = vperm.xlu2 %9775, %v15784_v24   ;;  %5041 = vperm.xlu1 %9774, %v15784_v24  }
 0x791   : > { %v4932_v18 = vpop.permute.xlu1 %4931 }
 0x792   : > { %v6392_v15 = vsub.f32 %v4932_v18, %v10188_v8 }
 0x794   : > { %v6648_v45 = vand.u32 2147483647, %v6392_v15 }
 0x796   : > { %v6904_v43 = vsub.f32 1.0, %v6648_v45 }
 0x797   : > { %9777 = vset.pattern.permute.xlu2 %v10185_v7  ;;  %9776 = vset.pattern.permute.xlu1 %v10172_v2 }
 0x798   : > { %v7160_v26 = vmax.f32 %v6904_v43, 0.0 }
 0x799   : > { %v4969_v59 = vpop.permute.xlu2 %4968 }
 0x79a   : > { %v7416_v22 = vmul.f32 %v7160_v26, %v11335_v23  ;;  %v6398_v55 = vsub.f32 %v4969_v59, %v10188_v8 }
 0x79c   : > { %v7712_v14 = vsel %vm3758_vm1, %v7416_v22, 0.0  ;;  %v6654_v3 = vand.u32 2147483647, %v6398_v55  ;;  %v12352_v22 = vpop.f32.mrf.mxu0  ;;  %v15788_v55 = vld [vmem:[#allocation110_spill] sm:$0xff] }
 0x79d   : > { %7713 = vadd.xlane.f32.xlu0 %v7712_v14 }
 0x79e   : > { %v6910_v23 = vsub.f32 1.0, %v6654_v3 }
 0x79f   : > { %5060 = vperm.xlu2 %9777, %v15786_v49   ;;  %5054 = vperm.xlu1 %9776, %v15786_v49  }
 0x7a0   : > { %v7166_v14 = vmax.f32 %v6910_v23, 0.0 }
 0x7a1   : > { %v4950_v31 = vpop.permute.xlu1 %4949 }
 0x7a2   : > { %v6395_v36 = vsub.f32 %v4950_v31, %v10188_v8 }
 0x7a4   : > { %v6651_v24 = vand.u32 2147483647, %v6395_v36  ;;  %v6404_v36 = vsub.f32 %v15788_v55, %v10188_v8 }
 0x7a6   : > { %v6907_v18 = vsub.f32 1.0, %v6651_v24  ;;  %v7422_v24 = vmul.f32 %v7166_v14, %v11425_v25 }
 0x7a7   : > { %9779 = vset.pattern.permute.xlu2 %v10179_v5  ;;  %9778 = vset.pattern.permute.xlu1 %v10203_v38 }
 0x7a8   : > { %v7163_v15 = vmax.f32 %v6907_v18, 0.0  ;;  %v6660_v18 = vand.u32 2147483647, %v6404_v36 }
 0x7a9   : > { %v4987_v45 = vpop.permute.xlu2 %4986 }
 0x7aa   : > { %v6401_v43 = vsub.f32 %v4987_v45, %v10188_v8  ;;  %v7419_v26 = vmul.f32 %v7163_v15, %v11378_v53  ;;  %v7730_v53 = vsel %vm3758_vm1, %v7422_v24, 0.0  ;;  %v12361_v15 = vpop.f32.mrf.mxu0  ;;  %v6916_v23 = vsub.f32 1.0, %v6660_v18 }
 0x7ab   : > { %15789 = vst [vmem:[#allocation70_spill] sm:$0xff] %v12361_v15 }
 0x7ac   : > { %v6657_v59 = vand.u32 2147483647, %v6401_v43  ;;  %v7721_v31 = vsel %vm3758_vm1, %v7419_v26, 0.0  ;;  %v7172_v26 = vmax.f32 %v6916_v23, 0.0 }
 0x7ad   : > { %7722 = vadd.xlane.f32.xlu0 %v7721_v31 }
 0x7ae   : > { %v6913_v3 = vsub.f32 1.0, %v6657_v59  ;;  %v7428_v25 = vmul.f32 %v7172_v26, %v11520_v34 }
 0x7af   : > { %5078 = vperm.xlu2 %9779, %v15786_v49   ;;  %5072 = vperm.xlu1 %9778, %v15786_v49  }
 0x7b0   : > { %v7169_v45 = vmax.f32 %v6913_v3, 0.0  ;;  %v7748_v14 = vsel %vm3758_vm1, %v7428_v25, 0.0 }
 0x7b1   : > { %v12379_v55 = vpop.permute.xlu1 %4962 }
 0x7b2   : > { %v7425_v43 = vmul.f32 %v7169_v45, %v11468_v44  ;;  %v12367_v59 = vpop.f32.mrf.mxu0 }
 0x7b3   : > { %15790 = vst [vmem:[#allocation123_spill] sm:$0xff] %v12367_v59 }
 0x7b4   : > { %v7739_v31 = vsel %vm3758_vm1, %v7425_v43, 0.0 }
 0x7b5   : > { %7731 = vadd.xlane.f32.xlu0 %v7730_v53 }
 0x7b7   : > { %9781 = vset.pattern.permute.xlu2 %v10239_v13  ;;  %9780 = vset.pattern.permute.xlu1 %v10216_v57 }
 0x7b9   : > { %v12389_v3 = vpop.permute.xlu2 %4998 }
 0x7ba   : > { %v12375_v44 = vpop.f32.mrf.mxu0 }
 0x7bd   : > { %7740 = vadd.xlane.f32.xlu0 %v7739_v31 }
 0x7bf   : > { %5090 = vperm.xlu2 %9781, %v15786_v49   ;;  %5084 = vperm.xlu1 %9780, %v15786_v49  }
 0x7c1   : > { %v12385_v34 = vpop.permute.xlu1 %4980 }
 0x7c2   : > { %v12381_v36 = vpop.f32.mrf.mxu0 }
 0x7c3   : > { %15791 = vst [vmem:[#allocation110_spill] sm:$0xff] %v12381_v36 }
 0x7c5   : > { %7749 = vadd.xlane.f32.xlu0 %v7748_v14 }
 0x7c7   : > { %9783 = vset.pattern.permute.xlu2 %v10185_v7  ;;  %9782 = vset.pattern.permute.xlu1 %v10172_v2 }
 0x7c9   : > { %v12395_v18 = vpop.permute.xlu2 %5017 }
 0x7ca   : > { %v12387_v49 = vpop.f32.mrf.mxu0 }
 0x7cb   : > { %15792 = vst [vmem:[#allocation214_spill] sm:$0xff] %v12387_v49 }
 0x7cf   : > { %5109 = vperm.xlu2 %9783, %v11256_v62   ;;  %5103 = vperm.xlu1 %9782, %v11256_v62  }
 0x7d1   : > { %v12393_v24 = vpop.permute.xlu1 %4992 }
 0x7d2   : > { %v4281_v45 = vpop.f32.mrf.mxu0 }
 0x7d7   : > { %9785 = vset.pattern.permute.xlu2 %v10203_v38  ;;  %9784 = vset.pattern.permute.xlu1 %v10182_v6 }
 0x7d9   : > { %v12401_v23 = vpop.permute.xlu2 %5029 }
 0x7da   : > { %15793 = vst [vmem:[#allocation215_spill] sm:$0xff] %v12401_v23  ;;  %v12405_v43 = vpop.f32.mrf.mxu0 }
 0x7db   : > { %15794 = vst [vmem:[#allocation216_spill] sm:$0xff] %v12405_v43  ;;  %v15797_v43 = vld [vmem:[#allocation17_spill] sm:$0xff] }
 0x7df   : > { %5121 = vperm.xlu2 %9785, %v11256_v62   ;;  %5115 = vperm.xlu1 %9784, %v11256_v62  }
 0x7e1   : > { %v12399_v53 = vpop.permute.xlu1 %5011 }
 0x7e2   : > { %v12413_v36 = vpop.f32.mrf.mxu0 }
 0x7e3   : > { %15796 = vst [vmem:[#allocation218_spill] sm:$0xff] %v12413_v36 }
 0x7e7   : > { %9787 = vset.pattern.permute.xlu2 %v10239_v13  ;;  %9786 = vset.pattern.permute.xlu1 %v10216_v57 }
 0x7e9   : > { %v12408_v14 = vpop.permute.xlu2 %5047 }
 0x7ea   : > { %15795 = vst [vmem:[#allocation217_spill] sm:$0xff] %v12408_v14 }
 0x7ef   : > { %5139 = vperm.xlu2 %9787, %v11256_v62   ;;  %5133 = vperm.xlu1 %9786, %v11256_v62  }
 0x7f1   : > { %v5024_v26 = vpop.permute.xlu1 %5023 }
 0x7f2   : > { %v6407_v31 = vsub.f32 %v5024_v26, %v10188_v8 }
 0x7f4   : > { %v6663_v25 = vand.u32 2147483647, %v6407_v31 }
 0x7f6   : > { %v6919_v37 = vsub.f32 1.0, %v6663_v25 }
 0x7f7   : > { %9789 = vset.pattern.permute.xlu2 %v10172_v2  ;;  %9788 = vset.pattern.permute.xlu1 %v10236_v12 }
 0x7f8   : > { %v7175_v50 = vmax.f32 %v6919_v37, 0.0  ;;  %v12420_v37 = vpop.f32.mrf.mxu0 }
 0x7f9   : > { %v5061_v15 = vpop.permute.xlu2 %5060 }
 0x7fa   : > { %v7431_v40 = vmul.f32 %v7175_v50, %v11571_v47  ;;  %v6413_v26 = vsub.f32 %v5061_v15, %v10188_v8 }
 0x7fc   : > { %v7757_v49 = vsel %vm3758_vm1, %v7431_v40, 0.0  ;;  %v6669_v59 = vand.u32 2147483647, %v6413_v26 }
 0x7fd   : > { %7758 = vadd.xlane.f32.xlu0 %v7757_v49 }
 0x7fe   : > { %v6925_v50 = vsub.f32 1.0, %v6669_v59 }
 0x7ff   : > { %5152 = vperm.xlu2 %9789, %v15797_v43   ;;  %5145 = vperm.xlu1 %9788, %v11256_v62  }
 0x800   : > { %v7181_v15 = vmax.f32 %v6925_v50, 0.0  ;;  %v12427_v26 = vpop.f32.mrf.mxu0 }
 0x801   : > { %v5042_v31 = vpop.permute.xlu1 %5041  ;;  %15798 = vst [vmem:[#allocation17_spill] sm:$0xff] %v12427_v26 }
 0x802   : > { %v6410_v25 = vsub.f32 %v5042_v31, %v10188_v8 }
 0x804   : > { %v6666_v35 = vand.u32 2147483647, %v6410_v25 }
 0x806   : > { %v6922_v47 = vsub.f32 1.0, %v6666_v35  ;;  %v15799_v35 = vld [vmem:[#allocation157_spill] sm:$0xff] }
 0x807   : > { %9791 = vset.pattern.permute.xlu2 %v10203_v38  ;;  %9790 = vset.pattern.permute.xlu1 %v10182_v6  ;;  %v6419_v59 = vsub.f32 %v15799_v35, %v10188_v8 }
 0x808   : > { %v7178_v40 = vmax.f32 %v6922_v47, 0.0  ;;  %v7437_v47 = vmul.f32 %v7181_v15, %v12352_v22 }
 0x809   : > { %v5079_v49 = vpop.permute.xlu2 %5078 }
 0x80a   : > { %v6416_v36 = vsub.f32 %v5079_v49, %v10188_v8  ;;  %v7434_v62 = vmul.f32 %v7178_v40, %v11622_v52  ;;  %v6675_v49 = vand.u32 2147483647, %v6419_v59  ;;  %v7775_v52 = vsel %vm3758_vm1, %v7437_v47, 0.0  ;;  %v12438_v40 = vpop.f32.mrf.mxu0 }
 0x80b   : > { %15800 = vst [vmem:[#allocation157_spill] sm:$0xff] %v12438_v40 }
 0x80c   : > { %v6672_v14 = vand.u32 2147483647, %v6416_v36  ;;  %v7766_v31 = vsel %vm3758_vm1, %v7434_v62, 0.0  ;;  %v6931_v36 = vsub.f32 1.0, %v6675_v49 }
 0x80d   : > { %7767 = vadd.xlane.f32.xlu0 %v7766_v31 }
 0x80e   : > { %v6928_v25 = vsub.f32 1.0, %v6672_v14  ;;  %v7187_v62 = vmax.f32 %v6931_v36, 0.0 }
 0x80f   : > { %5170 = vperm.xlu2 %9791, %v15797_v43   ;;  %5164 = vperm.xlu1 %9790, %v15797_v43  }
 0x810   : > { %v7184_v23 = vmax.f32 %v6928_v25, 0.0  ;;  %v7443_v22 = vmul.f32 %v7187_v62, %v4281_v45 }
 0x811   : > { %v12450_v35 = vpop.permute.xlu1 %5054 }
 0x812   : > { %v7440_v50 = vmul.f32 %v7184_v23, %v12375_v44  ;;  %v4296_v14 = vpop.f32.mrf.mxu0  ;;  %v7793_v15 = vsel %vm3758_vm1, %v7443_v22, 0.0  ;;  %v15802_v23 = vld [vmem:[#allocation47_spill] sm:$0xff] }
 0x814   : > { %v7784_v31 = vsel %vm3758_vm1, %v7440_v50, 0.0 }
 0x815   : > { %7776 = vadd.xlane.f32.xlu0 %v7775_v52 }
 0x817   : > { %9793 = vset.pattern.permute.xlu2 %v10216_v57  ;;  %9792 = vset.pattern.permute.xlu1 %v10179_v5 }
 0x819   : > { %v12458_v25 = vpop.permute.xlu2 %5090 }
 0x81a   : > { %v12446_v44 = vpop.f32.mrf.mxu0  ;;  %15805 = vst [vmem:[#allocation221_spill] sm:$0xff] %v12458_v25 }
 0x81b   : > { %15801 = vst [vmem:[#allocation219_spill] sm:$0xff] %v12446_v44 }
 0x81d   : > { %7785 = vadd.xlane.f32.xlu0 %v7784_v31 }
 0x81f   : > { %5182 = vperm.xlu2 %9793, %v15797_v43   ;;  %5176 = vperm.xlu1 %9792, %v15797_v43  }
 0x821   : > { %v12456_v45 = vpop.permute.xlu1 %5072 }
 0x822   : > { %v12452_v59 = vpop.f32.mrf.mxu0  ;;  %15804 = vst [vmem:[#allocation220_spill] sm:$0xff] %v12456_v45 }
 0x823   : > { %15803 = vst [vmem:[#allocation47_spill] sm:$0xff] %v12452_v59 }
 0x825   : > { %7794 = vadd.xlane.f32.xlu0 %v7793_v15 }
 0x827   : > { %9795 = vset.pattern.permute.xlu2 %v10172_v2  ;;  %9794 = vset.pattern.permute.xlu1 %v10236_v12 }
 0x82a   : > { %v4304_v47 = vpop.f32.mrf.mxu0 }
 0x82f   : > { %5201 = vperm.xlu2 %9795, %v15802_v23   ;;  %5194 = vperm.xlu1 %9794, %v15797_v43   ;;  %v12464_v43 = vpop.permute.xlu2 %5109 }
 0x830   : > { %15807 = vst [vmem:[#allocation223_spill] sm:$0xff] %v12464_v43 }
 0x831   : > { %v12462_v49 = vpop.permute.xlu1 %5084 }
 0x832   : > { %15806 = vst [vmem:[#allocation222_spill] sm:$0xff] %v12462_v49  ;;  %v12470_v36 = vpop.f32.mrf.mxu0 }
 0x833   : > { %15809 = vst [vmem:[#allocation225_spill] sm:$0xff] %v12470_v36 }
 0x837   : > { %9797 = vset.pattern.permute.xlu2 %v10182_v6  ;;  %9796 = vset.pattern.permute.xlu1 %v10185_v7 }
 0x839   : > { %v12472_v50 = vpop.permute.xlu2 %5121 }
 0x83a   : > { %15810 = vst [vmem:[#allocation226_spill] sm:$0xff] %v12472_v50  ;;  %v12477_v15 = vpop.f32.mrf.mxu0 }
 0x83b   : > { %15811 = vst [vmem:[#allocation227_spill] sm:$0xff] %v12477_v15 }
 0x83f   : > { %5213 = vperm.xlu2 %9797, %v15802_v23   ;;  %5207 = vperm.xlu1 %9796, %v15802_v23  }
 0x841   : > { %v12468_v52 = vpop.permute.xlu1 %5103 }
 0x842   : > { %15808 = vst [vmem:[#allocation224_spill] sm:$0xff] %v12468_v52  ;;  %v4311_v52 = vpop.f32.mrf.mxu0 }
 0x847   : > { %9799 = vset.pattern.permute.xlu2 %v10216_v57  ;;  %9798 = vset.pattern.permute.xlu1 %v10179_v5 }
 0x849   : > { %v12479_v44 = vpop.permute.xlu2 %5139 }
 0x84a   : > { %15812 = vst [vmem:[#allocation228_spill] sm:$0xff] %v12479_v44 }
 0x84f   : > { %5231 = vperm.xlu2 %9799, %v15802_v23   ;;  %5225 = vperm.xlu1 %9798, %v15802_v23  }
 0x851   : > { %v5116_v62 = vpop.permute.xlu1 %5115 }
 0x852   : > { %v6422_v31 = vsub.f32 %v5116_v62, %v10188_v8 }
 0x854   : > { %v6678_v22 = vand.u32 2147483647, %v6422_v31 }
 0x856   : > { %v6934_v59 = vsub.f32 1.0, %v6678_v22 }
 0x857   : > { %9801 = vset.pattern.permute.xlu2 %v10236_v12  ;;  %9800 = vset.pattern.permute.xlu1 %v10239_v13 }
 0x858   : > { %v7190_v36 = vmax.f32 %v6934_v59, 0.0 }
 0x859   : > { %v5153_v50 = vpop.permute.xlu2 %5152 }
 0x85a   : > { %v7446_v26 = vmul.f32 %v7190_v36, %v12420_v37  ;;  %v6428_v62 = vsub.f32 %v5153_v50, %v10188_v8 }
 0x85c   : > { %v7802_v40 = vsel %vm3758_vm1, %v7446_v26, 0.0  ;;  %v6684_v15 = vand.u32 2147483647, %v6428_v62  ;;  %v15814_v62 = vld [vmem:[#allocation74_spill] sm:$0xff] }
 0x85d   : > { %7803 = vadd.xlane.f32.xlu0 %v7802_v40  ;;  %v12491_v40 = vpop.f32.mrf.mxu0 }
 0x85e   : > { %v6940_v37 = vsub.f32 1.0, %v6684_v15  ;;  %15813 = vst [vmem:[#allocation229_spill] sm:$0xff] %v12491_v40 }
 0x85f   : > { %5243 = vperm.xlu2 %9801, %v15802_v23   ;;  %5237 = vperm.xlu1 %9800, %v15802_v23  }
 0x860   : > { %v7196_v49 = vmax.f32 %v6940_v37, 0.0 }
 0x861   : > { %v5134_v31 = vpop.permute.xlu1 %5133 }
 0x862   : > { %v6425_v22 = vsub.f32 %v5134_v31, %v10188_v8 }
 0x864   : > { %v6681_v44 = vand.u32 2147483647, %v6425_v22 }
 0x865   : > { %v12499_v22 = vpop.f32.mrf.mxu0 }
 0x866   : > { %v6937_v43 = vsub.f32 1.0, %v6681_v44  ;;  %v15815_v44 = vld [vmem:[#allocation50_spill] sm:$0xff]  ;;  %15816 = vst [vmem:[#allocation74_spill] sm:$0xff] %v12499_v22 }
 0x867   : > { %9803 = vset.pattern.permute.xlu2 %v10182_v6  ;;  %9802 = vset.pattern.permute.xlu1 %v10185_v7  ;;  %v6434_v31 = vsub.f32 %v15815_v44, %v10188_v8 }
 0x868   : > { %v7193_v26 = vmax.f32 %v6937_v43, 0.0  ;;  %v7452_v43 = vmul.f32 %v7196_v49, %v4304_v47 }
 0x869   : > { %v5171_v59 = vpop.permute.xlu2 %5170  ;;  %v6690_v40 = vand.u32 2147483647, %v6434_v31 }
 0x86a   : > { %v6431_v36 = vsub.f32 %v5171_v59, %v10188_v8  ;;  %v7449_v23 = vmul.f32 %v7193_v26, %v4296_v14  ;;  %v7820_v14 = vsel %vm3758_vm1, %v7452_v43, 0.0 }
 0x86c   : > { %v6687_v50 = vand.u32 2147483647, %v6431_v36  ;;  %v7811_v25 = vsel %vm3758_vm1, %v7449_v23, 0.0  ;;  %v15817_v23 = vld [vmem:[#allocation125_spill] sm:$0xff] }
 0x86d   : > { %7812 = vadd.xlane.f32.xlu0 %v7811_v25  ;;  %v6946_v25 = vsub.f32 1.0, %v6690_v40  ;;  %v4319_v36 = vpop.f32.mrf.mxu0 }
 0x86e   : > { %v6943_v15 = vsub.f32 1.0, %v6687_v50 }
 0x86f   : > { %5262 = vperm.xlu2 %9803, %v15814_v62   ;;  %5256 = vperm.xlu1 %9802, %v15814_v62   ;;  %v7202_v26 = vmax.f32 %v6946_v25, 0.0 }
 0x870   : > { %v7199_v45 = vmax.f32 %v6943_v15, 0.0 }
 0x871   : > { %v7458_v47 = vmul.f32 %v7202_v26, %v4319_v36 }
 0x872   : > { %v7455_v37 = vmul.f32 %v7199_v45, %v4311_v52  ;;  %v12512_v45 = vpop.permute.xlu1 %5145 }
 0x873   : > { %v7838_v49 = vsel %vm3758_vm1, %v7458_v47, 0.0 }
 0x874   : > { %v7829_v59 = vsel %vm3758_vm1, %v7455_v37, 0.0 }
 0x875   : > { %7821 = vadd.xlane.f32.xlu0 %v7820_v14 }
 0x877   : > { %9805 = vset.pattern.permute.xlu2 %v10179_v5  ;;  %9804 = vset.pattern.permute.xlu1 %v10203_v38 }
 0x879   : > { %v12518_v40 = vpop.permute.xlu2 %5182 }
 0x87d   : > { %7830 = vadd.xlane.f32.xlu0 %v7829_v59 }
 0x87f   : > { %5274 = vperm.xlu2 %9805, %v15814_v62   ;;  %5268 = vperm.xlu1 %9804, %v15814_v62  }
 0x881   : > { %v12516_v52 = vpop.permute.xlu1 %5164 }
 0x885   : > { %7839 = vadd.xlane.f32.xlu0 %v7838_v49 }
 0x887   : > { %9807 = vset.pattern.permute.xlu2 %v10236_v12  ;;  %9806 = vset.pattern.permute.xlu1 %v10239_v13 }
 0x889   : > { %v12524_v44 = vpop.permute.xlu2 %5201 }
 0x88f   : > { %5292 = vperm.xlu2 %9807, %v15814_v62   ;;  %5286 = vperm.xlu1 %9806, %v15814_v62  }
 0x891   : > { %v12522_v50 = vpop.permute.xlu1 %5176 }
 0x897   : > { %9809 = vset.pattern.permute.xlu2 %v10185_v7  ;;  %9808 = vset.pattern.permute.xlu1 %v10172_v2 }
 0x899   : > { %v12530_v31 = vpop.permute.xlu2 %5213 }
 0x89a   : > { %15819 = vst [vmem:[#allocation125_spill] sm:$0xff] %v12530_v31 }
 0x89f   : > { %5305 = vperm.xlu2 %9809, %v15817_v23   ;;  %5299 = vperm.xlu1 %9808, %v15817_v23  }
 0x8a1   : > { %v12528_v62 = vpop.permute.xlu1 %5194 }
 0x8a2   : > { %15818 = vst [vmem:[#allocation50_spill] sm:$0xff] %v12528_v62 }
 0x8a7   : > { %9811 = vset.pattern.permute.xlu2 %v10179_v5  ;;  %9810 = vset.pattern.permute.xlu1 %v10203_v38 }
 0x8a9   : > { %v12535_v25 = vpop.permute.xlu2 %5231 }
 0x8aa   : > { %15820 = vst [vmem:[#allocation230_spill] sm:$0xff] %v12535_v25 }
 0x8af   : > { %5323 = vperm.xlu2 %9811, %v15817_v23   ;;  %5317 = vperm.xlu1 %9810, %v15817_v23  }
 0x8b1   : > { %v5208_v15 = vpop.permute.xlu1 %5207 }
 0x8b2   : > { %v6437_v43 = vsub.f32 %v5208_v15, %v10188_v8 }
 0x8b4   : > { %v6693_v14 = vand.u32 2147483647, %v6437_v43 }
 0x8b6   : > { %v6949_v37 = vsub.f32 1.0, %v6693_v14 }
 0x8b7   : > { %9813 = vset.pattern.permute.xlu2 %v10239_v13  ;;  %9812 = vset.pattern.permute.xlu1 %v10216_v57 }
 0x8b8   : > { %v7205_v26 = vmax.f32 %v6949_v37, 0.0 }
 0x8b9   : > { %v5244_v47 = vpop.permute.xlu2 %5243 }
 0x8ba   : > { %v7461_v59 = vmul.f32 %v7205_v26, %v11367_v9  ;;  %v6443_v49 = vsub.f32 %v5244_v47, %v10188_v8 }
 0x8bc   : > { %v7847_v36 = vsel %vm3758_vm1, %v7461_v59, 0.0  ;;  %v6699_v14 = vand.u32 2147483647, %v6443_v49 }
 0x8bd   : > { %7848 = vadd.xlane.f32.xlu0 %v7847_v36 }
 0x8be   : > { %v6955_v9 = vsub.f32 1.0, %v6699_v14 }
 0x8bf   : > { %5335 = vperm.xlu2 %9813, %v15817_v23   ;;  %5329 = vperm.xlu1 %9812, %v15817_v23  }
 0x8c0   : > { %v7211_v23 = vmax.f32 %v6955_v9, 0.0 }
 0x8c1   : > { %v5226_v15 = vpop.permute.xlu1 %5225 }
 0x8c2   : > { %v6440_v43 = vsub.f32 %v5226_v15, %v10188_v8 }
 0x8c4   : > { %v6696_v25 = vand.u32 2147483647, %v6440_v43 }
 0x8c6   : > { %v6952_v31 = vsub.f32 1.0, %v6696_v25  ;;  %v15821_v25 = vld [vmem:[#allocation126_spill] sm:$0xff] }
 0x8c7   : > { %9815 = vset.pattern.permute.xlu2 %v10185_v7  ;;  %9814 = vset.pattern.permute.xlu1 %v10172_v2  ;;  %v6449_v49 = vsub.f32 %v15821_v25, %v10188_v8 }
 0x8c8   : > { %v7208_v37 = vmax.f32 %v6952_v31, 0.0  ;;  %v7467_v31 = vmul.f32 %v7211_v23, %v11442_v19  ;;  %v15825_v23 = vld [vmem:[#allocation18_spill] sm:$0xff] }
 0x8c9   : > { %v5263_v26 = vpop.permute.xlu2 %5262  ;;  %v6705_v43 = vand.u32 2147483647, %v6449_v49 }
 0x8ca   : > { %v6446_v59 = vsub.f32 %v5263_v26, %v10188_v8  ;;  %v7464_v36 = vmul.f32 %v7208_v37, %v11408_v58  ;;  %v7865_v26 = vsel %vm3758_vm1, %v7467_v31, 0.0 }
 0x8cb   : > { %v6961_v58 = vsub.f32 1.0, %v6705_v43 }
 0x8cc   : > { %v6702_v22 = vand.u32 2147483647, %v6446_v59  ;;  %v7856_v47 = vsel %vm3758_vm1, %v7464_v36, 0.0 }
 0x8cd   : > { %7857 = vadd.xlane.f32.xlu0 %v7856_v47  ;;  %v7217_v37 = vmax.f32 %v6961_v58, 0.0 }
 0x8ce   : > { %v6958_v15 = vsub.f32 1.0, %v6702_v22 }
 0x8cf   : > { %5354 = vperm.xlu2 %9815, %v11270_v41   ;;  %5348 = vperm.xlu1 %9814, %v11270_v41   ;;  %v7473_v19 = vmul.f32 %v7217_v37, %v11540_v16 }
 0x8d0   : > { %v7214_v14 = vmax.f32 %v6958_v15, 0.0 }
 0x8d1   : > { %v7883_v22 = vsel %vm3758_vm1, %v7473_v19, 0.0 }
 0x8d2   : > { %v7470_v9 = vmul.f32 %v7214_v14, %v11487_v48  ;;  %v12568_v48 = vpop.permute.xlu1 %5237 }
 0x8d3   : > { %15822 = vst [vmem:[#allocation126_spill] sm:$0xff] %v12568_v48 }
 0x8d4   : > { %v7874_v59 = vsel %vm3758_vm1, %v7470_v9, 0.0 }
 0x8d5   : > { %7866 = vadd.xlane.f32.xlu0 %v7865_v26 }
 0x8d7   : > { %9817 = vset.pattern.permute.xlu2 %v10203_v38  ;;  %9816 = vset.pattern.permute.xlu1 %v10182_v6 }
 0x8d9   : > { %v12574_v16 = vpop.permute.xlu2 %5274 }
 0x8da   : > { %15824 = vst [vmem:[#allocation232_spill] sm:$0xff] %v12574_v16 }
 0x8dd   : > { %7875 = vadd.xlane.f32.xlu0 %v7874_v59  ;;  %v12597_v59 = vpop.permute.xlu0 %4882 }
 0x8df   : > { %5366 = vperm.xlu2 %9817, %v11270_v41   ;;  %5360 = vperm.xlu1 %9816, %v11270_v41  }
 0x8e1   : > { %v12572_v36 = vpop.permute.xlu1 %5256 }
 0x8e2   : > { %15823 = vst [vmem:[#allocation231_spill] sm:$0xff] %v12572_v36 }
 0x8e5   : > { %7884 = vadd.xlane.f32.xlu0 %v7883_v22 }
 0x8e7   : > { %9819 = vset.pattern.permute.xlu2 %v10239_v13  ;;  %9818 = vset.pattern.permute.xlu1 %v10216_v57 }
 0x8e9   : > { %v12580_v25 = vpop.permute.xlu2 %5292 }
 0x8ea   : > { %15827 = vst [vmem:[#allocation233_spill] sm:$0xff] %v12580_v25 }
 0x8ef   : > { %5384 = vperm.xlu2 %9819, %v11270_v41   ;;  %5378 = vperm.xlu1 %9818, %v11270_v41  }
 0x8f1   : > { %v12578_v47 = vpop.permute.xlu1 %5268 }
 0x8f2   : > { %15826 = vst [vmem:[#allocation18_spill] sm:$0xff] %v12578_v47 }
 0x8f7   : > { %9821 = vset.pattern.permute.xlu2 %v10172_v2  ;;  %9820 = vset.pattern.permute.xlu1 %v10236_v12 }
 0x8f9   : > { %v12586_v15 = vpop.permute.xlu2 %5305 }
 0x8fa   : > { %15829 = vst [vmem:[#allocation235_spill] sm:$0xff] %v12586_v15 }
 0x8ff   : > { %5397 = vperm.xlu2 %9821, %v15825_v23   ;;  %5390 = vperm.xlu1 %9820, %v11270_v41  }
 0x901   : > { %v12584_v49 = vpop.permute.xlu1 %5286 }
 0x902   : > { %15828 = vst [vmem:[#allocation234_spill] sm:$0xff] %v12584_v49  ;;  %v15831_v49 = vld [vmem:[#allocation76_spill] sm:$0xff] }
 0x907   : > { %9823 = vset.pattern.permute.xlu2 %v10203_v38  ;;  %9822 = vset.pattern.permute.xlu1 %v10182_v6 }
 0x909   : > { %v12591_v14 = vpop.permute.xlu2 %5323 }
 0x90a   : > { %15830 = vst [vmem:[#allocation236_spill] sm:$0xff] %v12591_v14 }
 0x90f   : > { %5415 = vperm.xlu2 %9823, %v15825_v23   ;;  %5409 = vperm.xlu1 %9822, %v15825_v23  }
 0x911   : > { %v5300_v31 = vpop.permute.xlu1 %5299 }
 0x912   : > { %v6452_v43 = vsub.f32 %v5300_v31, %v10188_v8 }
 0x914   : > { %v6708_v41 = vand.u32 2147483647, %v6452_v43 }
 0x916   : > { %v6964_v26 = vsub.f32 1.0, %v6708_v41 }
 0x917   : > { %9825 = vset.pattern.permute.xlu2 %v10216_v57  ;;  %9824 = vset.pattern.permute.xlu1 %v10179_v5 }
 0x918   : > { %v7220_v58 = vmax.f32 %v6964_v26, 0.0  ;;  %v12603_v26 = vpop.permute.xlu0 %5127 }
 0x919   : > { %v5336_v19 = vpop.permute.xlu2 %5335 }
 0x91a   : > { %v7476_v9 = vmul.f32 %v7220_v58, %v11592_v11  ;;  %v6458_v22 = vsub.f32 %v5336_v19, %v10188_v8 }
 0x91c   : > { %v7892_v37 = vsel %vm3758_vm1, %v7476_v9, 0.0  ;;  %v6714_v41 = vand.u32 2147483647, %v6458_v22 }
 0x91d   : > { %7893 = vadd.xlane.f32.xlu0 %v7892_v37 }
 0x91e   : > { %v6970_v58 = vsub.f32 1.0, %v6714_v41  ;;  %v15833_v41 = vld [vmem:[#allocation190_spill] sm:$0xff] }
 0x91f   : > { %5427 = vperm.xlu2 %9825, %v15825_v23   ;;  %5421 = vperm.xlu1 %9824, %v15825_v23  }
 0x920   : > { %v7226_v19 = vmax.f32 %v6970_v58, 0.0  ;;  %v5373_v22 = vpop.permute.xlu0 %5372 }
 0x921   : > { %v5318_v31 = vpop.permute.xlu1 %5317 }
 0x922   : > { %v6455_v43 = vsub.f32 %v5318_v31, %v10188_v8 }
 0x924   : > { %v6711_v14 = vand.u32 2147483647, %v6455_v43  ;;  %v15832_v43 = vld [vmem:[#allocation49_spill] sm:$0xff] }
 0x926   : > { %v6967_v11 = vsub.f32 1.0, %v6711_v14  ;;  %v6464_v14 = vsub.f32 %v5373_v22, %v10188_v8 }
 0x927   : > { %9827 = vset.pattern.permute.xlu2 %v10172_v2  ;;  %9826 = vset.pattern.permute.xlu1 %v10236_v12 }
 0x928   : > { %v7223_v9 = vmax.f32 %v6967_v11, 0.0  ;;  %v7482_v11 = vmul.f32 %v7226_v19, %v15833_v41  ;;  %v6720_v36 = vand.u32 2147483647, %v6464_v14 }
 0x929   : > { %v5355_v37 = vpop.permute.xlu2 %5354 }
 0x92a   : > { %v6461_v15 = vsub.f32 %v5355_v37, %v10188_v8  ;;  %v7479_v25 = vmul.f32 %v7223_v9, %v15831_v49  ;;  %v7910_v37 = vsel %vm3758_vm1, %v7482_v11, 0.0  ;;  %v15834_v49 = vld [vmem:[#allocation192_spill] sm:$0xff] }
 0x92c   : > { %v6717_v47 = vand.u32 2147483647, %v6461_v15  ;;  %v7901_v31 = vsel %vm3758_vm1, %v7479_v25, 0.0  ;;  %v6976_v25 = vsub.f32 1.0, %v6720_v36  ;;  %v12625_v36 = vpop.f32.mrf.mxu1 }
 0x92d   : > { %7902 = vadd.xlane.f32.xlu0 %v7901_v31 }
 0x92e   : > { %v6973_v16 = vsub.f32 1.0, %v6717_v47  ;;  %v7232_v58 = vmax.f32 %v6976_v25, 0.0  ;;  %v15835_v47 = vld [vmem:[#allocation41_spill] sm:$0xff] }
 0x92f   : > { %5446 = vperm.xlu2 %9827, %v15832_v43   ;;  %5439 = vperm.xlu1 %9826, %v15825_v23  }
 0x930   : > { %v7229_v48 = vmax.f32 %v6973_v16, 0.0  ;;  %v7488_v16 = vmul.f32 %v7232_v58, %v15835_v47 }
 0x932   : > { %v7485_v15 = vmul.f32 %v7229_v48, %v15834_v49  ;;  %v7928_v9 = vsel %vm3758_vm1, %v7488_v16, 0.0  ;;  %v12629_v48 = vpop.permute.xlu1 %5329 }
 0x933   : > { %15836 = vst [vmem:[#allocation76_spill] sm:$0xff] %v12629_v48 }
 0x934   : > { %v7919_v23 = vsel %vm3758_vm1, %v7485_v15, 0.0  ;;  %v12631_v19 = vpop.f32.mrf.mxu1  ;;  %v15845_v15 = vld [vmem:[#allocation78_spill] sm:$0xff] }
 0x935   : > { %7911 = vadd.xlane.f32.xlu0 %v7910_v37  ;;  %15837 = vst [vmem:[#allocation49_spill] sm:$0xff] %v12631_v19 }
 0x937   : > { %9829 = vset.pattern.permute.xlu2 %v10182_v6  ;;  %9828 = vset.pattern.permute.xlu1 %v10185_v7 }
 0x939   : > { %v12639_v14 = vpop.permute.xlu2 %5366 }
 0x93a   : > { %15840 = vst [vmem:[#allocation41_spill] sm:$0xff] %v12639_v14  ;;  %v15850_v14 = vld [vmem:[#allocation60_spill] sm:$0xff] }
 0x93c   : > { %v12637_v22 = vpop.f32.mrf.mxu1 }
 0x93d   : > { %7920 = vadd.xlane.f32.xlu0 %v7919_v23  ;;  %15839 = vst [vmem:[#allocation192_spill] sm:$0xff] %v12637_v22  ;;  %v15848_v22 = vld [vmem:[#allocation28_spill] sm:$0xff] }
 0x93f   : > { %5458 = vperm.xlu2 %9829, %v15832_v43   ;;  %5452 = vperm.xlu1 %9828, %v15832_v43  }
 0x941   : > { %v12635_v31 = vpop.permute.xlu1 %5348 }
 0x942   : > { %15838 = vst [vmem:[#allocation190_spill] sm:$0xff] %v12635_v31 }
 0x944   : > { %v4431_v37 = vpop.f32.mrf.mxu1 }
 0x945   : > { %7929 = vadd.xlane.f32.xlu0 %v7928_v9 }
 0x947   : > { %9831 = vset.pattern.permute.xlu2 %v10216_v57  ;;  %9830 = vset.pattern.permute.xlu1 %v10179_v5 }
 0x949   : > { %v12645_v11 = vpop.permute.xlu2 %5384 }
 0x94a   : > { %15842 = vst [vmem:[#allocation238_spill] sm:$0xff] %v12645_v11 }
 0x94c   : > { %v12655_v58 = vpop.f32.mrf.mxu1 }
 0x94d   : > { %15846 = vst [vmem:[#allocation78_spill] sm:$0xff] %v12655_v58 }
 0x94f   : > { %5476 = vperm.xlu2 %9831, %v15832_v43   ;;  %5470 = vperm.xlu1 %9830, %v15832_v43  }
 0x951   : > { %v12643_v41 = vpop.permute.xlu1 %5360 }
 0x952   : > { %15841 = vst [vmem:[#allocation237_spill] sm:$0xff] %v12643_v41 }
 0x957   : > { %9833 = vset.pattern.permute.xlu2 %v10236_v12  ;;  %9832 = vset.pattern.permute.xlu1 %v10239_v13 }
 0x959   : > { %v12651_v49 = vpop.permute.xlu2 %5397 }
 0x95a   : > { %15844 = vst [vmem:[#allocation240_spill] sm:$0xff] %v12651_v49 }
 0x95f   : > { %5488 = vperm.xlu2 %9833, %v15832_v43   ;;  %5482 = vperm.xlu1 %9832, %v15832_v43  }
 0x961   : > { %v12649_v25 = vpop.permute.xlu1 %5378 }
 0x962   : > { %15843 = vst [vmem:[#allocation239_spill] sm:$0xff] %v12649_v25  ;;  %v12663_v25 = vpop.f32.mrf.mxu1 }
 0x963   : > { %15849 = vst [vmem:[#allocation28_spill] sm:$0xff] %v12663_v25 }
 0x967   : > { %9835 = vset.pattern.permute.xlu2 %v10182_v6  ;;  %9834 = vset.pattern.permute.xlu1 %v10185_v7 }
 0x969   : > { %v12658_v16 = vpop.permute.xlu2 %5415 }
 0x96a   : > { %15847 = vst [vmem:[#allocation241_spill] sm:$0xff] %v12658_v16 }
 0x96f   : > { %5507 = vperm.xlu2 %9835, %v15845_v15   ;;  %5501 = vperm.xlu1 %9834, %v15845_v15  }
 0x971   : > { %v5391_v43 = vpop.permute.xlu1 %5390 }
 0x972   : > { %v6467_v23 = vsub.f32 %v5391_v43, %v10188_v8 }
 0x974   : > { %v6723_v47 = vand.u32 2147483647, %v6467_v23 }
 0x976   : > { %v6979_v9 = vsub.f32 1.0, %v6723_v47 }
 0x977   : > { %9837 = vset.pattern.permute.xlu2 %v10179_v5  ;;  %9836 = vset.pattern.permute.xlu1 %v10203_v38 }
 0x978   : > { %v7235_v19 = vmax.f32 %v6979_v9, 0.0  ;;  %v12670_v9 = vpop.f32.mrf.mxu1 }
 0x979   : > { %v5428_v41 = vpop.permute.xlu2 %5427 }
 0x97a   : > { %v7491_v49 = vmul.f32 %v7235_v19, %v15848_v22  ;;  %v6473_v43 = vsub.f32 %v5428_v41, %v10188_v8 }
 0x97c   : > { %v7937_v11 = vsel %vm3758_vm1, %v7491_v49, 0.0  ;;  %v6729_v58 = vand.u32 2147483647, %v6473_v43 }
 0x97d   : > { %7938 = vadd.xlane.f32.xlu0 %v7937_v11 }
 0x97e   : > { %v6985_v22 = vsub.f32 1.0, %v6729_v58 }
 0x97f   : > { %5519 = vperm.xlu2 %9837, %v15845_v15   ;;  %5513 = vperm.xlu1 %9836, %v15845_v15  }
 0x980   : > { %v7241_v41 = vmax.f32 %v6985_v22, 0.0  ;;  %v12677_v43 = vpop.f32.mrf.mxu1 }
 0x981   : > { %v5410_v23 = vpop.permute.xlu1 %5409  ;;  %15851 = vst [vmem:[#allocation60_spill] sm:$0xff] %v12677_v43 }
 0x982   : > { %v6470_v47 = vsub.f32 %v5410_v23, %v10188_v8 }
 0x984   : > { %v6726_v16 = vand.u32 2147483647, %v6470_v47 }
 0x986   : > { %v6982_v19 = vsub.f32 1.0, %v6726_v16  ;;  %v15852_v16 = vld [vmem:[#allocation77_spill] sm:$0xff] }
 0x987   : > { %9839 = vset.pattern.permute.xlu2 %v10236_v12  ;;  %9838 = vset.pattern.permute.xlu1 %v10239_v13  ;;  %v6479_v58 = vsub.f32 %v15852_v16, %v10188_v8 }
 0x988   : > { %v7238_v11 = vmax.f32 %v6982_v19, 0.0  ;;  %v7497_v19 = vmul.f32 %v7241_v41, %v11901_v28  ;;  %v12688_v22 = vpop.f32.mrf.mxu1 }
 0x989   : > { %v5447_v49 = vpop.permute.xlu2 %5446  ;;  %15853 = vst [vmem:[#allocation77_spill] sm:$0xff] %v12688_v22 }
 0x98a   : > { %v6476_v25 = vsub.f32 %v5447_v49, %v10188_v8  ;;  %v7494_v31 = vmul.f32 %v7238_v11, %v15850_v14  ;;  %v6735_v49 = vand.u32 2147483647, %v6479_v58  ;;  %v7955_v14 = vsel %vm3758_vm1, %v7497_v19, 0.0 }
 0x98c   : > { %v6732_v48 = vand.u32 2147483647, %v6476_v25  ;;  %v7946_v23 = vsel %vm3758_vm1, %v7494_v31, 0.0  ;;  %v6991_v31 = vsub.f32 1.0, %v6735_v49 }
 0x98d   : > { %7947 = vadd.xlane.f32.xlu0 %v7946_v23 }
 0x98e   : > { %v6988_v47 = vsub.f32 1.0, %v6732_v48  ;;  %v15854_v48 = vld [vmem:[#allocation127_spill] sm:$0xff] }
 0x98f   : > { %5537 = vperm.xlu2 %9839, %v15845_v15   ;;  %5531 = vperm.xlu1 %9838, %v15845_v15   ;;  %v7247_v15 = vmax.f32 %v6991_v31, 0.0 }
 0x990   : > { %v7244_v62 = vmax.f32 %v6988_v47, 0.0  ;;  %v4446_v41 = vpop.f32.mrf.mxu1 }
 0x991   : > { %v7503_v28 = vmul.f32 %v7247_v15, %v4431_v37  ;;  %v15864_v15 = vld [vmem:[#allocation92_spill] sm:$0xff] }
 0x992   : > { %v7500_v25 = vmul.f32 %v7244_v62, %v12625_v36  ;;  %v12700_v36 = vpop.permute.xlu1 %5421 }
 0x993   : > { %v7973_v23 = vsel %vm3758_vm1, %v7503_v28, 0.0 }
 0x994   : > { %v7964_v11 = vsel %vm3758_vm1, %v7500_v25, 0.0 }
 0x995   : > { %7956 = vadd.xlane.f32.xlu0 %v7955_v14 }
 0x997   : > { %9841 = vset.pattern.permute.xlu2 %v10185_v7  ;;  %9840 = vset.pattern.permute.xlu1 %v10172_v2 }
 0x998   : > { %v12696_v62 = vpop.f32.mrf.mxu1 }
 0x999   : > { %15855 = vst [vmem:[#allocation127_spill] sm:$0xff] %v12696_v62  ;;  %v12708_v58 = vpop.permute.xlu2 %5458 }
 0x99a   : > { %15858 = vst [vmem:[#allocation244_spill] sm:$0xff] %v12708_v58 }
 0x99d   : > { %7965 = vadd.xlane.f32.xlu0 %v7964_v11 }
 0x99f   : > { %5550 = vperm.xlu2 %9841, %v15854_v48   ;;  %5544 = vperm.xlu1 %9840, %v15854_v48  }
 0x9a0   : > { %v12702_v16 = vpop.f32.mrf.mxu1 }
 0x9a1   : > { %15856 = vst [vmem:[#allocation242_spill] sm:$0xff] %v12702_v16  ;;  %v12706_v37 = vpop.permute.xlu1 %5439 }
 0x9a2   : > { %15857 = vst [vmem:[#allocation243_spill] sm:$0xff] %v12706_v37 }
 0x9a5   : > { %7974 = vadd.xlane.f32.xlu0 %v7973_v23 }
 0x9a7   : > { %9843 = vset.pattern.permute.xlu2 %v10179_v5  ;;  %9842 = vset.pattern.permute.xlu1 %v10203_v38 }
 0x9a8   : > { %v4454_v47 = vpop.f32.mrf.mxu1 }
 0x9a9   : > { %v12714_v49 = vpop.permute.xlu2 %5476 }
 0x9aa   : > { %15860 = vst [vmem:[#allocation246_spill] sm:$0xff] %v12714_v49 }
 0x9af   : > { %5568 = vperm.xlu2 %9843, %v15854_v48   ;;  %5562 = vperm.xlu1 %9842, %v15854_v48  }
 0x9b0   : > { %v12720_v31 = vpop.f32.mrf.mxu1 }
 0x9b1   : > { %v12712_v19 = vpop.permute.xlu1 %5452  ;;  %15862 = vst [vmem:[#allocation248_spill] sm:$0xff] %v12720_v31 }
 0x9b2   : > { %15859 = vst [vmem:[#allocation245_spill] sm:$0xff] %v12712_v19 }
 0x9b7   : > { %9845 = vset.pattern.permute.xlu2 %v10239_v13  ;;  %9844 = vset.pattern.permute.xlu1 %v10216_v57 }
 0x9b8   : > { %v12727_v23 = vpop.f32.mrf.mxu1 }
 0x9b9   : > { %v12722_v25 = vpop.permute.xlu2 %5488  ;;  %15865 = vst [vmem:[#allocation92_spill] sm:$0xff] %v12727_v23 }
 0x9ba   : > { %15863 = vst [vmem:[#allocation249_spill] sm:$0xff] %v12722_v25 }
 0x9bf   : > { %5580 = vperm.xlu2 %9845, %v15854_v48   ;;  %5574 = vperm.xlu1 %9844, %v15854_v48  }
 0x9c1   : > { %v12718_v14 = vpop.permute.xlu1 %5470 }
 0x9c2   : > { %15861 = vst [vmem:[#allocation247_spill] sm:$0xff] %v12718_v14  ;;  %v4461_v14 = vpop.f32.mrf.mxu1 }
 0x9c7   : > { %9847 = vset.pattern.permute.xlu2 %v10185_v7  ;;  %9846 = vset.pattern.permute.xlu1 %v10172_v2 }
 0x9c9   : > { %v12729_v62 = vpop.permute.xlu2 %5507 }
 0x9ca   : > { %15866 = vst [vmem:[#allocation250_spill] sm:$0xff] %v12729_v62 }
 0x9cf   : > { %5599 = vperm.xlu2 %9847, %v15864_v15   ;;  %5593 = vperm.xlu1 %9846, %v15864_v15  }
 0x9d1   : > { %v5483_v11 = vpop.permute.xlu1 %5482 }
 0x9d2   : > { %v6482_v48 = vsub.f32 %v5483_v11, %v10188_v8 }
 0x9d4   : > { %v6738_v28 = vand.u32 2147483647, %v6482_v48 }
 0x9d6   : > { %v6994_v16 = vsub.f32 1.0, %v6738_v28 }
 0x9d7   : > { %9849 = vset.pattern.permute.xlu2 %v10203_v38  ;;  %9848 = vset.pattern.permute.xlu1 %v10182_v6 }
 0x9d8   : > { %v7250_v31 = vmax.f32 %v6994_v16, 0.0 }
 0x9d9   : > { %v5520_v25 = vpop.permute.xlu2 %5519 }
 0x9da   : > { %v7506_v43 = vmul.f32 %v7250_v31, %v12670_v9  ;;  %v6488_v11 = vsub.f32 %v5520_v25, %v10188_v8 }
 0x9dc   : > { %v7982_v22 = vsel %vm3758_vm1, %v7506_v43, 0.0  ;;  %v6744_v23 = vand.u32 2147483647, %v6488_v11 }
 0x9dd   : > { %7983 = vadd.xlane.f32.xlu0 %v7982_v22  ;;  %v12741_v22 = vpop.f32.mrf.mxu1 }
 0x9de   : > { %v7000_v9 = vsub.f32 1.0, %v6744_v23  ;;  %15867 = vst [vmem:[#allocation251_spill] sm:$0xff] %v12741_v22 }
 0x9df   : > { %5611 = vperm.xlu2 %9849, %v15864_v15   ;;  %5605 = vperm.xlu1 %9848, %v15864_v15  }
 0x9e0   : > { %v7256_v37 = vmax.f32 %v7000_v9, 0.0 }
 0x9e1   : > { %v5502_v48 = vpop.permute.xlu1 %5501 }
 0x9e2   : > { %v6485_v28 = vsub.f32 %v5502_v48, %v10188_v8 }
 0x9e4   : > { %v6741_v62 = vand.u32 2147483647, %v6485_v28 }
 0x9e5   : > { %v12749_v48 = vpop.f32.mrf.mxu1 }
 0x9e6   : > { %v6997_v49 = vsub.f32 1.0, %v6741_v62  ;;  %v15868_v62 = vld [vmem:[#allocation141_spill] sm:$0xff] }
 0x9e7   : > { %9851 = vset.pattern.permute.xlu2 %v10239_v13  ;;  %9850 = vset.pattern.permute.xlu1 %v10216_v57  ;;  %v6494_v11 = vsub.f32 %v15868_v62, %v10188_v8  ;;  %15869 = vst [vmem:[#allocation141_spill] sm:$0xff] %v12749_v48 }
 0x9e8   : > { %v7253_v43 = vmax.f32 %v6997_v49, 0.0  ;;  %v7512_v49 = vmul.f32 %v7256_v37, %v4454_v47 }
 0x9e9   : > { %v5538_v16 = vpop.permute.xlu2 %5537  ;;  %v6750_v28 = vand.u32 2147483647, %v6494_v11 }
 0x9ea   : > { %v6491_v31 = vsub.f32 %v5538_v16, %v10188_v8  ;;  %v7509_v19 = vmul.f32 %v7253_v43, %v4446_v41  ;;  %v8000_v41 = vsel %vm3758_vm1, %v7512_v49, 0.0 }
 0x9ec   : > { %v6747_v25 = vand.u32 2147483647, %v6491_v31  ;;  %v7991_v58 = vsel %vm3758_vm1, %v7509_v19, 0.0  ;;  %v15870_v31 = vld [vmem:[#allocation19_spill] sm:$0xff] }
 0x9ed   : > { %7992 = vadd.xlane.f32.xlu0 %v7991_v58  ;;  %v7006_v58 = vsub.f32 1.0, %v6750_v28  ;;  %v4469_v16 = vpop.f32.mrf.mxu1 }
 0x9ee   : > { %v7003_v23 = vsub.f32 1.0, %v6747_v25 }
 0x9ef   : > { %5629 = vperm.xlu2 %9851, %v15864_v15   ;;  %5623 = vperm.xlu1 %9850, %v15864_v15   ;;  %v7262_v9 = vmax.f32 %v7006_v58, 0.0 }
 0x9f0   : > { %v7259_v22 = vmax.f32 %v7003_v23, 0.0 }
 0x9f1   : > { %v7518_v37 = vmul.f32 %v7262_v9, %v4469_v16 }
 0x9f2   : > { %v7515_v19 = vmul.f32 %v7259_v22, %v4461_v14  ;;  %v12762_v14 = vpop.permute.xlu1 %5513 }
 0x9f3   : > { %v8018_v47 = vsel %vm3758_vm1, %v7518_v37, 0.0  ;;  %15871 = vst [vmem:[#allocation19_spill] sm:$0xff] %v12762_v14 }
 0x9f4   : > { %v8009_v43 = vsel %vm3758_vm1, %v7515_v19, 0.0 }
 0x9f5   : > { %8001 = vadd.xlane.f32.xlu0 %v8000_v41  ;;  %v12774_v62 = vpop.f32.mrf.mxu1  ;;  %v15880_v41 = vld [vmem:[#allocation51_spill] sm:$0xff] }
 0x9f6   : > { %15875 = vst [vmem:[#allocation255_spill] sm:$0xff] %v12774_v62 }
 0x9f7   : > { %9853 = vset.pattern.permute.xlu2 %v10172_v2  ;;  %9852 = vset.pattern.permute.xlu1 %v10236_v12 }
 0x9fd   : > { %8010 = vadd.xlane.f32.xlu0 %v8009_v43  ;;  %v12784_v28 = vpop.f32.mrf.mxu1 }
 0x9fe   : > { %15879 = vst [vmem:[#allocation259_spill] sm:$0xff] %v12784_v28 }
 0x9ff   : > { %5642 = vperm.xlu2 %9853, %v15870_v31   ;;  %5635 = vperm.xlu1 %9852, %v15864_v15   ;;  %v12768_v15 = vpop.permute.xlu2 %5550 }
 0xa00   : > { %15873 = vst [vmem:[#allocation253_spill] sm:$0xff] %v12768_v15 }
 0xa01   : > { %v12766_v22 = vpop.permute.xlu1 %5531 }
 0xa02   : > { %15872 = vst [vmem:[#allocation252_spill] sm:$0xff] %v12766_v22 }
 0xa05   : > { %8019 = vadd.xlane.f32.xlu0 %v8018_v47  ;;  %v4476_v47 = vpop.f32.mrf.mxu1 }
 0xa07   : > { %9855 = vset.pattern.permute.xlu2 %v10203_v38  ;;  %9854 = vset.pattern.permute.xlu1 %v10182_v6 }
 0xa09   : > { %v12776_v11 = vpop.permute.xlu2 %5568 }
 0xa0a   : > { %15876 = vst [vmem:[#allocation256_spill] sm:$0xff] %v12776_v11 }
 0xa0f   : > { %5660 = vperm.xlu2 %9855, %v15870_v31   ;;  %5654 = vperm.xlu1 %9854, %v15870_v31  }
 0xa11   : > { %v12772_v25 = vpop.permute.xlu1 %5544 }
 0xa12   : > { %15874 = vst [vmem:[#allocation254_spill] sm:$0xff] %v12772_v25 }
 0xa17   : > { %9857 = vset.pattern.permute.xlu2 %v10216_v57  ;;  %9856 = vset.pattern.permute.xlu1 %v10179_v5 }
 0xa19   : > { %v12782_v49 = vpop.permute.xlu2 %5580 }
 0xa1a   : > { %15878 = vst [vmem:[#allocation258_spill] sm:$0xff] %v12782_v49 }
 0xa1f   : > { %5672 = vperm.xlu2 %9857, %v15870_v31   ;;  %5666 = vperm.xlu1 %9856, %v15870_v31  }
 0xa21   : > { %v12780_v23 = vpop.permute.xlu1 %5562 }
 0xa22   : > { %15877 = vst [vmem:[#allocation257_spill] sm:$0xff] %v12780_v23 }
 0xa27   : > { %9859 = vset.pattern.permute.xlu2 %v10172_v2  ;;  %9858 = vset.pattern.permute.xlu1 %v10236_v12 }
 0xa29   : > { %v12789_v43 = vpop.permute.xlu2 %5599 }
 0xa2a   : > { %15881 = vst [vmem:[#allocation51_spill] sm:$0xff] %v12789_v43 }
 0xa2f   : > { %5691 = vperm.xlu2 %9859, %v15880_v41   ;;  %5684 = vperm.xlu1 %9858, %v15870_v31  }
 0xa31   : > { %v5575_v58 = vpop.permute.xlu1 %5574 }
 0xa32   : > { %v6497_v19 = vsub.f32 %v5575_v58, %v10188_v8 }
 0xa34   : > { %v6753_v9 = vand.u32 2147483647, %v6497_v19 }
 0xa36   : > { %v7009_v16 = vsub.f32 1.0, %v6753_v9 }
 0xa37   : > { %9861 = vset.pattern.permute.xlu2 %v10182_v6  ;;  %9860 = vset.pattern.permute.xlu1 %v10185_v7 }
 0xa38   : > { %v7265_v37 = vmax.f32 %v7009_v16, 0.0 }
 0xa39   : > { %v5612_v49 = vpop.permute.xlu2 %5611 }
 0xa3a   : > { %v7521_v62 = vmul.f32 %v7265_v37, %v4476_v47  ;;  %v6503_v31 = vsub.f32 %v5612_v49, %v10188_v8  ;;  %v15882_v47 = vld [vmem:[#allocation62_spill] sm:$0xff] }
 0xa3c   : > { %v8027_v28 = vsel %vm3758_vm1, %v7521_v62, 0.0  ;;  %v6759_v9 = vand.u32 2147483647, %v6503_v31 }
 0xa3d   : > { %8028 = vadd.xlane.f32.xlu0 %v8027_v28 }
 0xa3e   : > { %v7015_v16 = vsub.f32 1.0, %v6759_v9 }
 0xa3f   : > { %5703 = vperm.xlu2 %9861, %v15880_v41   ;;  %5697 = vperm.xlu1 %9860, %v15880_v41  }
 0xa40   : > { %v7271_v11 = vmax.f32 %v7015_v16, 0.0  ;;  %v15885_v16 = vld [vmem:[#allocation154_spill] sm:$0xff] }
 0xa41   : > { %v5594_v58 = vpop.permute.xlu1 %5593 }
 0xa42   : > { %v6500_v19 = vsub.f32 %v5594_v58, %v10188_v8 }
 0xa44   : > { %v6756_v43 = vand.u32 2147483647, %v6500_v19  ;;  %v15884_v19 = vld [vmem:[#allocation150_spill] sm:$0xff] }
 0xa46   : > { %v7012_v48 = vsub.f32 1.0, %v6756_v43  ;;  %v15883_v43 = vld [vmem:[#allocation33_spill] sm:$0xff] }
 0xa47   : > { %9863 = vset.pattern.permute.xlu2 %v10216_v57  ;;  %9862 = vset.pattern.permute.xlu1 %v10179_v5  ;;  %v6509_v31 = vsub.f32 %v15883_v43, %v10188_v8  ;;  %v12817_v43 = vpop.permute.xlu0 %5617 }
 0xa48   : > { %v7268_v62 = vmax.f32 %v7012_v48, 0.0  ;;  %v7527_v48 = vmul.f32 %v7271_v11, %v15884_v19  ;;  %15887 = vst [vmem:[#allocation62_spill] sm:$0xff] %v12817_v43 }
 0xa49   : > { %v5630_v37 = vpop.permute.xlu2 %5629  ;;  %v6765_v9 = vand.u32 2147483647, %v6509_v31 }
 0xa4a   : > { %v6506_v28 = vsub.f32 %v5630_v37, %v10188_v8  ;;  %v7524_v23 = vmul.f32 %v7268_v62, %v15882_v47  ;;  %v8045_v37 = vsel %vm3758_vm1, %v7527_v48, 0.0 }
 0xa4c   : > { %v6762_v25 = vand.u32 2147483647, %v6506_v28  ;;  %v8036_v49 = vsel %vm3758_vm1, %v7524_v23, 0.0  ;;  %v7021_v23 = vsub.f32 1.0, %v6765_v9 }
 0xa4d   : > { %8037 = vadd.xlane.f32.xlu0 %v8036_v49 }
 0xa4e   : > { %v7018_v58 = vsub.f32 1.0, %v6762_v25  ;;  %v7277_v28 = vmax.f32 %v7021_v23, 0.0  ;;  %v15886_v25 = vld [vmem:[#allocation105_spill] sm:$0xff] }
 0xa4f   : > { %5721 = vperm.xlu2 %9863, %v15880_v41   ;;  %5715 = vperm.xlu1 %9862, %v15880_v41  }
 0xa50   : > { %v7274_v15 = vmax.f32 %v7018_v58, 0.0  ;;  %v7533_v11 = vmul.f32 %v7277_v28, %v15886_v25 }
 0xa51   : > { %v12823_v31 = vpop.permute.xlu1 %5605 }
 0xa52   : > { %v7530_v62 = vmul.f32 %v7274_v15, %v15885_v16  ;;  %v8063_v49 = vsel %vm3758_vm1, %v7533_v11, 0.0  ;;  %v15888_v15 = vld [vmem:[#allocation81_spill] sm:$0xff]  ;;  %15889 = vst [vmem:[#allocation33_spill] sm:$0xff] %v12823_v31  ;;  %v15897_v11 = vld [vmem:[#allocation72_spill] sm:$0xff] }
 0xa54   : > { %v8054_v47 = vsel %vm3758_vm1, %v7530_v62, 0.0 }
 0xa55   : > { %8046 = vadd.xlane.f32.xlu0 %v8045_v37 }
 0xa57   : > { %9865 = vset.pattern.permute.xlu2 %v10236_v12  ;;  %9864 = vset.pattern.permute.xlu1 %v10239_v13 }
 0xa59   : > { %v12829_v58 = vpop.permute.xlu2 %5642 }
 0xa5a   : > { %15891 = vst [vmem:[#allocation154_spill] sm:$0xff] %v12829_v58 }
 0xa5d   : > { %8055 = vadd.xlane.f32.xlu0 %v8054_v47 }
 0xa5f   : > { %5733 = vperm.xlu2 %9865, %v15880_v41   ;;  %5727 = vperm.xlu1 %9864, %v15880_v41  }
 0xa61   : > { %v12827_v41 = vpop.permute.xlu1 %5623 }
 0xa62   : > { %15890 = vst [vmem:[#allocation150_spill] sm:$0xff] %v12827_v41 }
 0xa65   : > { %8064 = vadd.xlane.f32.xlu0 %v8063_v49 }
 0xa67   : > { %9867 = vset.pattern.permute.xlu2 %v10182_v6  ;;  %9866 = vset.pattern.permute.xlu1 %v10185_v7 }
 0xa69   : > { %v12835_v48 = vpop.permute.xlu2 %5660 }
 0xa6a   : > { %15893 = vst [vmem:[#allocation81_spill] sm:$0xff] %v12835_v48 }
 0xa6f   : > { %5752 = vperm.xlu2 %9867, %v15888_v15   ;;  %5746 = vperm.xlu1 %9866, %v15888_v15  }
 0xa71   : > { %v12833_v19 = vpop.permute.xlu1 %5635 }
 0xa72   : > { %15892 = vst [vmem:[#allocation105_spill] sm:$0xff] %v12833_v19 }
 0xa77   : > { %9869 = vset.pattern.permute.xlu2 %v10179_v5  ;;  %9868 = vset.pattern.permute.xlu1 %v10203_v38 }
 0xa79   : > { %v12841_v37 = vpop.permute.xlu2 %5672 }
 0xa7a   : > { %15895 = vst [vmem:[#allocation261_spill] sm:$0xff] %v12841_v37 }
 0xa7f   : > { %5764 = vperm.xlu2 %9869, %v15888_v15   ;;  %5758 = vperm.xlu1 %9868, %v15888_v15  }
 0xa81   : > { %v12839_v9 = vpop.permute.xlu1 %5654 }
 0xa82   : > { %15894 = vst [vmem:[#allocation260_spill] sm:$0xff] %v12839_v9  ;;  %v12852_v9 = vpop.permute.xlu0 %5862 }
 0xa83   : > { %15898 = vst [vmem:[#allocation72_spill] sm:$0xff] %v12852_v9  ;;  %v15900_v9 = vld [vmem:[#allocation169_spill] sm:$0xff] }
 0xa87   : > { %9871 = vset.pattern.permute.xlu2 %v10236_v12  ;;  %9870 = vset.pattern.permute.xlu1 %v10239_v13 }
 0xa89   : > { %v12846_v28 = vpop.permute.xlu2 %5691 }
 0xa8a   : > { %15896 = vst [vmem:[#allocation262_spill] sm:$0xff] %v12846_v28  ;;  %v12862_v43 = vpop.permute.xlu0 %6107 }
 0xa8f   : > { %5782 = vperm.xlu2 %9871, %v15888_v15   ;;  %5776 = vperm.xlu1 %9870, %v15888_v15   ;;  %v15899_v15 = vld [vmem:[#allocation129_spill] sm:$0xff] }
 0xa91   : > { %v5667_v23 = vpop.permute.xlu1 %5666 }
 0xa92   : > { %v6512_v16 = vsub.f32 %v5667_v23, %v10188_v8 }
 0xa94   : > { %v6768_v62 = vand.u32 2147483647, %v6512_v16 }
 0xa96   : > { %v7024_v47 = vsub.f32 1.0, %v6768_v62 }
 0xa97   : > { %9873 = vset.pattern.permute.xlu2 %v10185_v7  ;;  %9872 = vset.pattern.permute.xlu1 %v10172_v2 }
 0xa98   : > { %v7280_v25 = vmax.f32 %v7024_v47, 0.0 }
 0xa99   : > { %v5704_v48 = vpop.permute.xlu2 %5703 }
 0xa9a   : > { %v7536_v49 = vmul.f32 %v7280_v25, %v15897_v11  ;;  %v6518_v23 = vsub.f32 %v5704_v48, %v10188_v8 }
 0xa9c   : > { %v8072_v37 = vsel %vm3758_vm1, %v7536_v49, 0.0  ;;  %v6774_v28 = vand.u32 2147483647, %v6518_v23 }
 0xa9d   : > { %8073 = vadd.xlane.f32.xlu0 %v8072_v37 }
 0xa9e   : > { %v7030_v25 = vsub.f32 1.0, %v6774_v28 }
 0xa9f   : > { %5795 = vperm.xlu2 %9873, %v15899_v15   ;;  %5789 = vperm.xlu1 %9872, %v15899_v15  }
 0xaa0   : > { %v7286_v48 = vmax.f32 %v7030_v25, 0.0 }
 0xaa1   : > { %v5685_v16 = vpop.permute.xlu1 %5684 }
 0xaa2   : > { %v6515_v62 = vsub.f32 %v5685_v16, %v10188_v8 }
 0xaa4   : > { %v6771_v19 = vand.u32 2147483647, %v6515_v62  ;;  %v15902_v62 = vld [vmem:[#allocation172_spill] sm:$0xff] }
 0xaa6   : > { %v7027_v47 = vsub.f32 1.0, %v6771_v19  ;;  %v15901_v19 = vld [vmem:[#allocation114_spill] sm:$0xff] }
 0xaa7   : > { %9875 = vset.pattern.permute.xlu2 %v10179_v5  ;;  %9874 = vset.pattern.permute.xlu1 %v10203_v38  ;;  %v6524_v28 = vsub.f32 %v15901_v19, %v10188_v8 }
 0xaa8   : > { %v7283_v11 = vmax.f32 %v7027_v47, 0.0  ;;  %v7542_v47 = vmul.f32 %v7286_v48, %v15902_v62  ;;  %v15905_v48 = vld [vmem:[#allocation84_spill] sm:$0xff] }
 0xaa9   : > { %v5722_v49 = vpop.permute.xlu2 %5721 }
 0xaaa   : > { %v6521_v37 = vsub.f32 %v5722_v49, %v10188_v8  ;;  %v7539_v58 = vmul.f32 %v7283_v11, %v15900_v9  ;;  %v12870_v49 = vpop.permute.xlu0 %6352  ;;  %v6780_v9 = vand.u32 2147483647, %v6524_v28  ;;  %v8090_v25 = vsel %vm3758_vm1, %v7542_v47, 0.0  ;;  %v15907_v47 = vld [vmem:[#allocation180_spill] sm:$0xff] }
 0xaab   : > { %15903 = vst [vmem:[#allocation129_spill] sm:$0xff] %v12870_v49 }
 0xaac   : > { %v6777_v41 = vand.u32 2147483647, %v6521_v37  ;;  %v8081_v16 = vsel %vm3758_vm1, %v7539_v58, 0.0  ;;  %v7036_v58 = vsub.f32 1.0, %v6780_v9  ;;  %v15904_v37 = vld [vmem:[#allocation179_spill] sm:$0xff] }
 0xaad   : > { %8082 = vadd.xlane.f32.xlu0 %v8081_v16 }
 0xaae   : > { %v7033_v23 = vsub.f32 1.0, %v6777_v41  ;;  %v7292_v31 = vmax.f32 %v7036_v58, 0.0  ;;  %v12905_v58 = vpop.f32.mrf.mxu2 }
 0xaaf   : > { %5813 = vperm.xlu2 %9875, %v15899_v15   ;;  %5807 = vperm.xlu1 %9874, %v15899_v15   ;;  %15913 = vst [vmem:[#allocation263_spill] sm:$0xff] %v12905_v58 }
 0xab0   : > { %v7289_v11 = vmax.f32 %v7033_v23, 0.0  ;;  %v7548_v28 = vmul.f32 %v7292_v31, %v15905_v48 }
 0xab1   : > { %v12889_v9 = vpop.permute.xlu1 %5697 }
 0xab2   : > { %v7545_v16 = vmul.f32 %v7289_v11, %v15904_v37  ;;  %v12877_v41 = vpop.xlane.xlu0 %7656  ;;  %v8108_v23 = vsel %vm3758_vm1, %v7548_v28, 0.0  ;;  %15908 = vst [vmem:[#allocation114_spill] sm:$0xff] %v12889_v9 }
 0xab4   : > { %v8099_v19 = vsel %vm3758_vm1, %v7545_v16, 0.0 }
 0xab5   : > { %8091 = vadd.xlane.f32.xlu0 %v8090_v25 }
 0xab6   : > { %v12913_v48 = vpop.f32.mrf.mxu2 }
 0xab7   : > { %9877 = vset.pattern.permute.xlu2 %v10239_v13  ;;  %9876 = vset.pattern.permute.xlu1 %v10216_v57  ;;  %15916 = vst [vmem:[#allocation266_spill] sm:$0xff] %v12913_v48 }
 0xaba   : > { %v12883_v62 = vpop.xlane.xlu0 %7668 }
 0xabb   : > { %15906 = vst [vmem:[#allocation169_spill] sm:$0xff] %v12883_v62 }
 0xabd   : > { %8100 = vadd.xlane.f32.xlu0 %v8099_v19 }
 0xabf   : > { %5825 = vperm.xlu2 %9877, %v15899_v15   ;;  %5819 = vperm.xlu1 %9876, %v15899_v15   ;;  %v12895_v15 = vpop.permute.xlu2 %5733 }
 0xac0   : > { %15910 = vst [vmem:[#allocation179_spill] sm:$0xff] %v12895_v15 }
 0xac1   : > { %v12893_v31 = vpop.permute.xlu1 %5715 }
 0xac2   : > { %15909 = vst [vmem:[#allocation172_spill] sm:$0xff] %v12893_v31  ;;  %v12924_v31 = vpop.xlane.xlu0 %7677 }
 0xac5   : > { %8109 = vadd.xlane.f32.xlu0 %v8108_v23 }
 0xac7   : > { %9879 = vset.pattern.permute.xlu2 %v10185_v7  ;;  %9878 = vset.pattern.permute.xlu1 %v10172_v2 }
 0xac9   : > { %v12901_v25 = vpop.permute.xlu2 %5752 }
 0xaca   : > { %15912 = vst [vmem:[#allocation180_spill] sm:$0xff] %v12901_v25  ;;  %v12934_v22 = vpop.xlane.xlu0 %7686 }
 0xacf   : > { %5844 = vperm.xlu2 %9879, %v15907_v47   ;;  %5838 = vperm.xlu1 %9878, %v15907_v47  }
 0xad1   : > { %v12899_v11 = vpop.permute.xlu1 %5727 }
 0xad2   : > { %15911 = vst [vmem:[#allocation84_spill] sm:$0xff] %v12899_v11  ;;  %v12921_v11 = vpop.f32.mrf.mxu2 }
 0xad7   : > { %9881 = vset.pattern.permute.xlu2 %v10203_v38  ;;  %9880 = vset.pattern.permute.xlu1 %v10182_v6 }
 0xad9   : > { %v12909_v16 = vpop.permute.xlu2 %5764 }
 0xada   : > { %15915 = vst [vmem:[#allocation265_spill] sm:$0xff] %v12909_v16 }
 0xadf   : > { %5856 = vperm.xlu2 %9881, %v15907_v47   ;;  %5850 = vperm.xlu1 %9880, %v15907_v47  }
 0xae1   : > { %v12907_v37 = vpop.permute.xlu1 %5746 }
 0xae2   : > { %15914 = vst [vmem:[#allocation264_spill] sm:$0xff] %v12907_v37  ;;  %v15918_v37 = vld [vmem:[#allocation137_spill] sm:$0xff] }
 0xae3   : > { %15919 = vst [vmem:[#allocation137_spill] sm:$0xff] %v12924_v31 }
 0xae7   : > { %9883 = vset.pattern.permute.xlu2 %v10239_v13  ;;  %9882 = vset.pattern.permute.xlu1 %v10216_v57 }
 0xae9   : > { %v12916_v49 = vpop.permute.xlu2 %5782 }
 0xaea   : > { %15917 = vst [vmem:[#allocation267_spill] sm:$0xff] %v12916_v49 }
 0xaef   : > { %5874 = vperm.xlu2 %9883, %v15907_v47   ;;  %5868 = vperm.xlu1 %9882, %v15907_v47  }
 0xaf1   : > { %v5759_v19 = vpop.permute.xlu1 %5758 }
 0xaf2   : > { %v6527_v28 = vsub.f32 %v5759_v19, %v10188_v8  ;;  %v15920_v19 = vld [vmem:[#allocation20_spill] sm:$0xff] }
 0xaf4   : > { %v6783_v23 = vand.u32 2147483647, %v6527_v28 }
 0xaf6   : > { %v7039_v25 = vsub.f32 1.0, %v6783_v23 }
 0xaf7   : > { %9885 = vset.pattern.permute.xlu2 %v10172_v2  ;;  %9884 = vset.pattern.permute.xlu1 %v10236_v12 }
 0xaf8   : > { %v7295_v58 = vmax.f32 %v7039_v25, 0.0 }
 0xaf9   : > { %v5796_v48 = vpop.permute.xlu2 %5795 }
 0xafa   : > { %v7551_v16 = vmul.f32 %v7295_v58, %v15918_v37  ;;  %v6533_v28 = vsub.f32 %v5796_v48, %v10188_v8  ;;  %v12930_v37 = vpop.f32.mrf.mxu2  ;;  %v15922_v48 = vld [vmem:[#allocation71_spill] sm:$0xff] }
 0xafb   : > { %15921 = vst [vmem:[#allocation20_spill] sm:$0xff] %v12930_v37 }
 0xafc   : > { %v8117_v15 = vsel %vm3758_vm1, %v7551_v16, 0.0  ;;  %v6789_v25 = vand.u32 2147483647, %v6533_v28 }
 0xafd   : > { %8118 = vadd.xlane.f32.xlu0 %v8117_v15 }
 0xafe   : > { %v7045_v16 = vsub.f32 1.0, %v6789_v25 }
 0xaff   : > { %5887 = vperm.xlu2 %9885, %v15920_v19   ;;  %5880 = vperm.xlu1 %9884, %v15907_v47  }
 0xb00   : > { %v7301_v62 = vmax.f32 %v7045_v16, 0.0 }
 0xb01   : > { %v5777_v23 = vpop.permute.xlu1 %5776 }
 0xb02   : > { %v6530_v49 = vsub.f32 %v5777_v23, %v10188_v8  ;;  %v12944_v37 = vpop.f32.mrf.mxu2 }
 0xb03   : > { %15924 = vst [vmem:[#allocation71_spill] sm:$0xff] %v12944_v37 }
 0xb04   : > { %v6786_v9 = vand.u32 2147483647, %v6530_v49 }
 0xb06   : > { %v7042_v58 = vsub.f32 1.0, %v6786_v9  ;;  %v15923_v9 = vld [vmem:[#allocation168_spill] sm:$0xff] }
 0xb07   : > { %9887 = vset.pattern.permute.xlu2 %v10203_v38  ;;  %9886 = vset.pattern.permute.xlu1 %v10182_v6  ;;  %v6539_v28 = vsub.f32 %v15923_v9, %v10188_v8 }
 0xb08   : > { %v7298_v15 = vmax.f32 %v7042_v58, 0.0  ;;  %v7557_v58 = vmul.f32 %v7301_v62, %v11931_v51 }
 0xb09   : > { %v5814_v14 = vpop.permute.xlu2 %5813 }
 0xb0a   : > { %v6536_v47 = vsub.f32 %v5814_v14, %v10188_v8  ;;  %v7554_v31 = vmul.f32 %v7298_v15, %v15922_v48  ;;  %v12946_v14 = vpop.xlane.xlu0 %7695  ;;  %v6795_v15 = vand.u32 2147483647, %v6539_v28 }
 0xb0b   : > { %15925 = vst [vmem:[#allocation168_spill] sm:$0xff] %v12946_v14 }
 0xb0c   : > { %v6792_v23 = vand.u32 2147483647, %v6536_v47  ;;  %v8126_v49 = vsel %vm3758_vm1, %v7554_v31, 0.0  ;;  %v8135_v47 = vsel %vm3758_vm1, %v7557_v58, 0.0  ;;  %v7051_v31 = vsub.f32 1.0, %v6795_v15  ;;  %v15930_v15 = vld [vmem:[#allocation53_spill] sm:$0xff] }
 0xb0d   : > { %8127 = vadd.xlane.f32.xlu0 %v8126_v49  ;;  %v12952_v49 = vpop.f32.mrf.mxu2 }
 0xb0e   : > { %v7048_v25 = vsub.f32 1.0, %v6792_v23  ;;  %v7307_v23 = vmax.f32 %v7051_v31, 0.0 }
 0xb0f   : > { %5905 = vperm.xlu2 %9887, %v15920_v19   ;;  %5899 = vperm.xlu1 %9886, %v15920_v19  }
 0xb10   : > { %v7304_v16 = vmax.f32 %v7048_v25, 0.0  ;;  %v7563_v9 = vmul.f32 %v7307_v23, %v11985_v30 }
 0xb12   : > { %v7560_v48 = vmul.f32 %v7304_v16, %v11961_v46  ;;  %v12955_v62 = vpop.xlane.xlu0 %7704  ;;  %v8153_v28 = vsel %vm3758_vm1, %v7563_v9, 0.0  ;;  %v12971_v16 = vpop.permute.xlu1 %5789 }
 0xb13   : > { %15926 = vst [vmem:[#allocation268_spill] sm:$0xff] %v12955_v62 }
 0xb14   : > { %v8144_v51 = vsel %vm3758_vm1, %v7560_v48, 0.0  ;;  %15931 = vst [vmem:[#allocation53_spill] sm:$0xff] %v12971_v16 }
 0xb15   : > { %8136 = vadd.xlane.f32.xlu0 %v8135_v47  ;;  %v12961_v25 = vpop.f32.mrf.mxu2 }
 0xb16   : > { %15927 = vst [vmem:[#allocation269_spill] sm:$0xff] %v12961_v25 }
 0xb17   : > { %9889 = vset.pattern.permute.xlu2 %v10216_v57  ;;  %9888 = vset.pattern.permute.xlu1 %v10179_v5 }
 0xb19   : > { %v12977_v31 = vpop.permute.xlu2 %5825 }
 0xb1a   : > { %v12963_v58 = vpop.xlane.xlu0 %7713  ;;  %15933 = vst [vmem:[#allocation273_spill] sm:$0xff] %v12977_v31 }
 0xb1b   : > { %15928 = vst [vmem:[#allocation270_spill] sm:$0xff] %v12963_v58 }
 0xb1d   : > { %8145 = vadd.xlane.f32.xlu0 %v8144_v51  ;;  %v12967_v46 = vpop.f32.mrf.mxu2 }
 0xb1e   : > { %15929 = vst [vmem:[#allocation271_spill] sm:$0xff] %v12967_v46 }
 0xb1f   : > { %5917 = vperm.xlu2 %9889, %v15920_v19   ;;  %5911 = vperm.xlu1 %9888, %v15920_v19  }
 0xb21   : > { %v12975_v47 = vpop.permute.xlu1 %5807 }
 0xb22   : > { %15932 = vst [vmem:[#allocation272_spill] sm:$0xff] %v12975_v47  ;;  %v13004_v47 = vpop.xlane.xlu0 %7722 }
 0xb23   : > { %15941 = vst [vmem:[#allocation281_spill] sm:$0xff] %v13004_v47 }
 0xb25   : > { %8154 = vadd.xlane.f32.xlu0 %v8153_v28  ;;  %v4604_v30 = vpop.f32.mrf.mxu2 }
 0xb27   : > { %9891 = vset.pattern.permute.xlu2 %v10172_v2  ;;  %9890 = vset.pattern.permute.xlu1 %v10236_v12 }
 0xb2d   : > { %v12983_v23 = vpop.f32.mrf.mxu2 }
 0xb2e   : > { %15935 = vst [vmem:[#allocation275_spill] sm:$0xff] %v12983_v23 }
 0xb2f   : > { %5936 = vperm.xlu2 %9891, %v15930_v15   ;;  %5929 = vperm.xlu1 %9890, %v15920_v19   ;;  %v12985_v19 = vpop.permute.xlu2 %5844 }
 0xb30   : > { %15936 = vst [vmem:[#allocation276_spill] sm:$0xff] %v12985_v19 }
 0xb31   : > { %v12981_v48 = vpop.permute.xlu1 %5819 }
 0xb32   : > { %15934 = vst [vmem:[#allocation274_spill] sm:$0xff] %v12981_v48 }
 0xb35   : > { %v12991_v9 = vpop.f32.mrf.mxu2 }
 0xb36   : > { %15938 = vst [vmem:[#allocation278_spill] sm:$0xff] %v12991_v9 }
 0xb37   : > { %9893 = vset.pattern.permute.xlu2 %v10182_v6  ;;  %9892 = vset.pattern.permute.xlu1 %v10185_v7 }
 0xb39   : > { %v12993_v28 = vpop.permute.xlu2 %5856 }
 0xb3a   : > { %15939 = vst [vmem:[#allocation279_spill] sm:$0xff] %v12993_v28 }
 0xb3d   : > { %v4611_v19 = vpop.f32.mrf.mxu2 }
 0xb3f   : > { %5948 = vperm.xlu2 %9893, %v15930_v15   ;;  %5942 = vperm.xlu1 %9892, %v15930_v15  }
 0xb41   : > { %v12989_v51 = vpop.permute.xlu1 %5838 }
 0xb42   : > { %15937 = vst [vmem:[#allocation277_spill] sm:$0xff] %v12989_v51 }
 0xb47   : > { %9895 = vset.pattern.permute.xlu2 %v10216_v57  ;;  %9894 = vset.pattern.permute.xlu1 %v10179_v5 }
 0xb49   : > { %v12998_v37 = vpop.permute.xlu2 %5874 }
 0xb4a   : > { %15940 = vst [vmem:[#allocation280_spill] sm:$0xff] %v12998_v37 }
 0xb4f   : > { %5966 = vperm.xlu2 %9895, %v15930_v15   ;;  %5960 = vperm.xlu1 %9894, %v15930_v15  }
 0xb51   : > { %v5851_v25 = vpop.permute.xlu1 %5850 }
 0xb52   : > { %v6542_v46 = vsub.f32 %v5851_v25, %v10188_v8 }
 0xb54   : > { %v6798_v23 = vand.u32 2147483647, %v6542_v46  ;;  %v13009_v46 = vpop.f32.mrf.mxu2 }
 0xb55   : > { %15942 = vst [vmem:[#allocation282_spill] sm:$0xff] %v13009_v46 }
 0xb56   : > { %v7054_v48 = vsub.f32 1.0, %v6798_v23 }
 0xb57   : > { %9897 = vset.pattern.permute.xlu2 %v10236_v12  ;;  %9896 = vset.pattern.permute.xlu1 %v10239_v13 }
 0xb58   : > { %v7310_v51 = vmax.f32 %v7054_v48, 0.0 }
 0xb59   : > { %v5888_v31 = vpop.permute.xlu2 %5887 }
 0xb5a   : > { %v7566_v9 = vmul.f32 %v7310_v51, %v12921_v11  ;;  %v6548_v25 = vsub.f32 %v5888_v31, %v10188_v8 }
 0xb5c   : > { %v8162_v28 = vsel %vm3758_vm1, %v7566_v9, 0.0  ;;  %v6804_v48 = vand.u32 2147483647, %v6548_v25  ;;  %v13018_v46 = vpop.f32.mrf.mxu2  ;;  %v15946_v25 = vld [vmem:[#allocation56_spill] sm:$0xff] }
 0xb5d   : > { %8163 = vadd.xlane.f32.xlu0 %v8162_v28  ;;  %v13014_v28 = vpop.xlane.xlu0 %7731  ;;  %15944 = vst [vmem:[#allocation284_spill] sm:$0xff] %v13018_v46 }
 0xb5e   : > { %v7060_v51 = vsub.f32 1.0, %v6804_v48  ;;  %15943 = vst [vmem:[#allocation283_spill] sm:$0xff] %v13014_v28  ;;  %v6554_v48 = vsub.f32 %v15946_v25, %v10188_v8 }
 0xb5f   : > { %5978 = vperm.xlu2 %9897, %v15930_v15   ;;  %5972 = vperm.xlu1 %9896, %v15930_v15  }
 0xb60   : > { %v7316_v58 = vmax.f32 %v7060_v51, 0.0 }
 0xb61   : > { %v5869_v23 = vpop.permute.xlu1 %5868 }
 0xb62   : > { %v6545_v37 = vsub.f32 %v5869_v23, %v10188_v8  ;;  %v7572_v28 = vmul.f32 %v7316_v58, %v4604_v30 }
 0xb64   : > { %v6801_v16 = vand.u32 2147483647, %v6545_v37  ;;  %v4619_v51 = vpop.f32.mrf.mxu2 }
 0xb65   : > { %v13025_v62 = vpop.xlane.xlu0 %7740  ;;  %v16182_v14 = vld [vmem:[#allocation283_spill] sm:$0xff] }
 0xb66   : > { %v7057_v11 = vsub.f32 1.0, %v6801_v16  ;;  %v15945_v16 = vld [vmem:[#allocation85_spill] sm:$0xff] }
 0xb67   : > { %9899 = vset.pattern.permute.xlu2 %v10182_v6  ;;  %9898 = vset.pattern.permute.xlu1 %v10185_v7  ;;  %15947 = vst [vmem:[#allocation85_spill] sm:$0xff] %v13025_v62 }
 0xb68   : > { %v7313_v9 = vmax.f32 %v7057_v11, 0.0 }
 0xb69   : > { %v5906_v47 = vpop.permute.xlu2 %5905 }
 0xb6a   : > { %v6551_v15 = vsub.f32 %v5906_v47, %v10188_v8  ;;  %v7569_v31 = vmul.f32 %v7313_v9, %v12952_v49  ;;  %v6810_v47 = vand.u32 2147483647, %v6554_v48  ;;  %v8180_v9 = vsel %vm3758_vm1, %v7572_v28, 0.0 }
 0xb6c   : > { %v6807_v23 = vand.u32 2147483647, %v6551_v15  ;;  %v8171_v37 = vsel %vm3758_vm1, %v7569_v31, 0.0  ;;  %v7066_v15 = vsub.f32 1.0, %v6810_v47  ;;  %v13033_v58 = vpop.f32.mrf.mxu2 }
 0xb6d   : > { %8172 = vadd.xlane.f32.xlu0 %v8171_v37  ;;  %v13031_v25 = vpop.xlane.xlu0 %7749  ;;  %15949 = vst [vmem:[#allocation285_spill] sm:$0xff] %v13033_v58 }
 0xb6e   : > { %v7063_v11 = vsub.f32 1.0, %v6807_v23  ;;  %v7322_v37 = vmax.f32 %v7066_v15, 0.0  ;;  %15948 = vst [vmem:[#allocation56_spill] sm:$0xff] %v13031_v25 }
 0xb6f   : > { %5997 = vperm.xlu2 %9899, %v15945_v16   ;;  %5991 = vperm.xlu1 %9898, %v15945_v16  }
 0xb70   : > { %v7319_v49 = vmax.f32 %v7063_v11, 0.0  ;;  %v7578_v30 = vmul.f32 %v7322_v37, %v4619_v51 }
 0xb72   : > { %v7575_v31 = vmul.f32 %v7319_v49, %v4611_v19  ;;  %v8198_v28 = vsel %vm3758_vm1, %v7578_v30, 0.0 }
 0xb74   : > { %v8189_v46 = vsel %vm3758_vm1, %v7575_v31, 0.0  ;;  %v13042_v19 = vpop.f32.mrf.mxu2 }
 0xb75   : > { %8181 = vadd.xlane.f32.xlu0 %v8180_v9  ;;  %v13038_v23 = vpop.xlane.xlu0 %7758  ;;  %15951 = vst [vmem:[#allocation287_spill] sm:$0xff] %v13042_v19  ;;  %v15956_v9 = vld [vmem:[#allocation130_spill] sm:$0xff] }
 0xb76   : > { %15950 = vst [vmem:[#allocation286_spill] sm:$0xff] %v13038_v23 }
 0xb77   : > { %9901 = vset.pattern.permute.xlu2 %v10179_v5  ;;  %9900 = vset.pattern.permute.xlu1 %v10203_v38 }
 0xb79   : > { %v13054_v49 = vpop.permute.xlu2 %5917 }
 0xb7a   : > { %15955 = vst [vmem:[#allocation291_spill] sm:$0xff] %v13054_v49 }
 0xb7c   : > { %v4626_v48 = vpop.f32.mrf.mxu2 }
 0xb7d   : > { %8190 = vadd.xlane.f32.xlu0 %v8189_v46  ;;  %v13046_v46 = vpop.permute.xlu1 %5880  ;;  %v13080_v49 = vpop.xlane.xlu0 %7767 }
 0xb7e   : > { %15952 = vst [vmem:[#allocation288_spill] sm:$0xff] %v13046_v46 }
 0xb7f   : > { %6009 = vperm.xlu2 %9901, %v15945_v16   ;;  %6003 = vperm.xlu1 %9900, %v15945_v16   ;;  %15964 = vst [vmem:[#allocation298_spill] sm:$0xff] %v13080_v49 }
 0xb84   : > { %v13052_v47 = vpop.f32.mrf.mxu2 }
 0xb85   : > { %8199 = vadd.xlane.f32.xlu0 %v8198_v28  ;;  %v13050_v11 = vpop.permute.xlu1 %5899  ;;  %15954 = vst [vmem:[#allocation290_spill] sm:$0xff] %v13052_v47 }
 0xb86   : > { %15953 = vst [vmem:[#allocation289_spill] sm:$0xff] %v13050_v11 }
 0xb87   : > { %9903 = vset.pattern.permute.xlu2 %v10236_v12  ;;  %9902 = vset.pattern.permute.xlu1 %v10239_v13 }
 0xb8c   : > { %v13062_v15 = vpop.f32.mrf.mxu2 }
 0xb8d   : > { %15959 = vst [vmem:[#allocation293_spill] sm:$0xff] %v13062_v15 }
 0xb8f   : > { %6027 = vperm.xlu2 %9903, %v15945_v16   ;;  %6021 = vperm.xlu1 %9902, %v15945_v16   ;;  %v13060_v16 = vpop.permute.xlu2 %5936 }
 0xb90   : > { %15958 = vst [vmem:[#allocation292_spill] sm:$0xff] %v13060_v16 }
 0xb91   : > { %v13058_v51 = vpop.permute.xlu1 %5911 }
 0xb92   : > { %15957 = vst [vmem:[#allocation130_spill] sm:$0xff] %v13058_v51 }
 0xb94   : > { %v4634_v30 = vpop.f32.mrf.mxu2 }
 0xb97   : > { %9905 = vset.pattern.permute.xlu2 %v10185_v7  ;;  %9904 = vset.pattern.permute.xlu1 %v10172_v2 }
 0xb99   : > { %v13068_v37 = vpop.permute.xlu2 %5948 }
 0xb9a   : > { %15961 = vst [vmem:[#allocation295_spill] sm:$0xff] %v13068_v37 }
 0xb9c   : > { %v13077_v51 = vpop.f32.mrf.mxu2 }
 0xb9d   : > { %15963 = vst [vmem:[#allocation297_spill] sm:$0xff] %v13077_v51  ;;  %v13090_v51 = vpop.xlane.xlu0 %7776 }
 0xb9e   : > { %15966 = vst [vmem:[#allocation300_spill] sm:$0xff] %v13090_v51 }
 0xb9f   : > { %6040 = vperm.xlu2 %9905, %v15956_v9   ;;  %6034 = vperm.xlu1 %9904, %v15956_v9  }
 0xba1   : > { %v13066_v31 = vpop.permute.xlu1 %5929 }
 0xba2   : > { %15960 = vst [vmem:[#allocation294_spill] sm:$0xff] %v13066_v31 }
 0xba7   : > { %9907 = vset.pattern.permute.xlu2 %v10179_v5  ;;  %9906 = vset.pattern.permute.xlu1 %v10203_v38 }
 0xba9   : > { %v13073_v19 = vpop.permute.xlu2 %5966 }
 0xbaa   : > { %15962 = vst [vmem:[#allocation296_spill] sm:$0xff] %v13073_v19 }
 0xbaf   : > { %6058 = vperm.xlu2 %9907, %v15956_v9   ;;  %6052 = vperm.xlu1 %9906, %v15956_v9  }
 0xbb1   : > { %v5943_v28 = vpop.permute.xlu1 %5942 }
 0xbb2   : > { %v6557_v47 = vsub.f32 %v5943_v28, %v10188_v8 }
 0xbb4   : > { %v6813_v58 = vand.u32 2147483647, %v6557_v47 }
 0xbb6   : > { %v7069_v15 = vsub.f32 1.0, %v6813_v58 }
 0xbb7   : > { %9909 = vset.pattern.permute.xlu2 %v10239_v13  ;;  %9908 = vset.pattern.permute.xlu1 %v10216_v57 }
 0xbb8   : > { %v7325_v16 = vmax.f32 %v7069_v15, 0.0 }
 0xbb9   : > { %v5979_v11 = vpop.permute.xlu2 %5978 }
 0xbba   : > { %v7581_v31 = vmul.f32 %v7325_v16, %v4626_v48  ;;  %v6563_v58 = vsub.f32 %v5979_v11, %v10188_v8  ;;  %v13086_v48 = vpop.f32.mrf.mxu2 }
 0xbbb   : > { %15965 = vst [vmem:[#allocation299_spill] sm:$0xff] %v13086_v48  ;;  %v13098_v48 = vpop.xlane.xlu0 %7785 }
 0xbbc   : > { %v8207_v37 = vsel %vm3758_vm1, %v7581_v31, 0.0  ;;  %v6819_v19 = vand.u32 2147483647, %v6563_v58 }
 0xbbd   : > { %8208 = vadd.xlane.f32.xlu0 %v8207_v37 }
 0xbbe   : > { %v7075_v31 = vsub.f32 1.0, %v6819_v19 }
 0xbbf   : > { %6070 = vperm.xlu2 %9909, %v15956_v9   ;;  %6064 = vperm.xlu1 %9908, %v15956_v9  }
 0xbc0   : > { %v7331_v49 = vmax.f32 %v7075_v31, 0.0 }
 0xbc1   : > { %v5961_v47 = vpop.permute.xlu1 %5960 }
 0xbc2   : > { %v6560_v28 = vsub.f32 %v5961_v47, %v10188_v8  ;;  %v4641_v47 = vpop.f32.mrf.mxu2 }
 0xbc4   : > { %v6816_v15 = vand.u32 2147483647, %v6560_v28  ;;  %v15967_v28 = vld [vmem:[#allocation133_spill] sm:$0xff] }
 0xbc5   : > { %v6569_v19 = vsub.f32 %v15967_v28, %v10188_v8  ;;  %v15972_v28 = vld [vmem:[#allocation22_spill] sm:$0xff] }
 0xbc6   : > { %v7072_v16 = vsub.f32 1.0, %v6816_v15 }
 0xbc7   : > { %9911 = vset.pattern.permute.xlu2 %v10185_v7  ;;  %9910 = vset.pattern.permute.xlu1 %v10172_v2  ;;  %v6825_v51 = vand.u32 2147483647, %v6569_v19 }
 0xbc8   : > { %v7328_v37 = vmax.f32 %v7072_v16, 0.0  ;;  %v7587_v16 = vmul.f32 %v7331_v49, %v4641_v47 }
 0xbc9   : > { %v5998_v46 = vpop.permute.xlu2 %5997  ;;  %v7081_v31 = vsub.f32 1.0, %v6825_v51 }
 0xbca   : > { %v6566_v9 = vsub.f32 %v5998_v46, %v10188_v8  ;;  %v7584_v11 = vmul.f32 %v7328_v37, %v4634_v30  ;;  %v8225_v30 = vsel %vm3758_vm1, %v7587_v16, 0.0 }
 0xbcc   : > { %v6822_v23 = vand.u32 2147483647, %v6566_v9  ;;  %v8216_v58 = vsel %vm3758_vm1, %v7584_v11, 0.0  ;;  %v7337_v9 = vmax.f32 %v7081_v31, 0.0 }
 0xbcd   : > { %8217 = vadd.xlane.f32.xlu0 %v8216_v58  ;;  %v13105_v58 = vpop.xlane.xlu0 %7794 }
 0xbce   : > { %v7078_v15 = vsub.f32 1.0, %v6822_v23  ;;  %15968 = vst [vmem:[#allocation133_spill] sm:$0xff] %v13105_v58  ;;  %v7593_v23 = vmul.f32 %v7337_v9, %v12037_v21 }
 0xbcf   : > { %6089 = vperm.xlu2 %9911, %v12012_v54   ;;  %6083 = vperm.xlu1 %9910, %v12012_v54  }
 0xbd0   : > { %v7334_v46 = vmax.f32 %v7078_v15, 0.0  ;;  %v8243_v49 = vsel %vm3758_vm1, %v7593_v23, 0.0 }
 0xbd2   : > { %v7590_v37 = vmul.f32 %v7334_v46, %v12020_v4  ;;  %v13117_v4 = vpop.permute.xlu1 %5972 }
 0xbd3   : > { %15969 = vst [vmem:[#allocation301_spill] sm:$0xff] %v13117_v4 }
 0xbd4   : > { %v8234_v11 = vsel %vm3758_vm1, %v7590_v37, 0.0 }
 0xbd5   : > { %8226 = vadd.xlane.f32.xlu0 %v8225_v30  ;;  %v13111_v47 = vpop.xlane.xlu0 %7803 }
 0xbd7   : > { %9913 = vset.pattern.permute.xlu2 %v10203_v38  ;;  %9912 = vset.pattern.permute.xlu1 %v10182_v6 }
 0xbd9   : > { %v13123_v51 = vpop.permute.xlu2 %6009 }
 0xbda   : > { %15971 = vst [vmem:[#allocation303_spill] sm:$0xff] %v13123_v51 }
 0xbdd   : > { %8235 = vadd.xlane.f32.xlu0 %v8234_v11 }
 0xbdf   : > { %6101 = vperm.xlu2 %9913, %v12012_v54   ;;  %6095 = vperm.xlu1 %9912, %v12012_v54  }
 0xbe1   : > { %v13121_v21 = vpop.permute.xlu1 %5991 }
 0xbe2   : > { %15970 = vst [vmem:[#allocation302_spill] sm:$0xff] %v13121_v21 }
 0xbe5   : > { %8244 = vadd.xlane.f32.xlu0 %v8243_v49 }
 0xbe7   : > { %9915 = vset.pattern.permute.xlu2 %v10239_v13  ;;  %9914 = vset.pattern.permute.xlu1 %v10216_v57 }
 0xbe9   : > { %v13129_v15 = vpop.permute.xlu2 %6027 }
 0xbea   : > { %15974 = vst [vmem:[#allocation304_spill] sm:$0xff] %v13129_v15 }
 0xbef   : > { %6119 = vperm.xlu2 %9915, %v12012_v54   ;;  %6113 = vperm.xlu1 %9914, %v12012_v54  }
 0xbf1   : > { %v13127_v19 = vpop.permute.xlu1 %6003 }
 0xbf2   : > { %15973 = vst [vmem:[#allocation22_spill] sm:$0xff] %v13127_v19 }
 0xbf7   : > { %9917 = vset.pattern.permute.xlu2 %v10172_v2  ;;  %9916 = vset.pattern.permute.xlu1 %v10236_v12 }
 0xbf9   : > { %v13135_v46 = vpop.permute.xlu2 %6040 }
 0xbfa   : > { %15976 = vst [vmem:[#allocation306_spill] sm:$0xff] %v13135_v46  ;;  %v13146_v46 = vpop.xlane.xlu0 %7812 }
 0xbff   : > { %6132 = vperm.xlu2 %9917, %v15972_v28   ;;  %6125 = vperm.xlu1 %9916, %v12012_v54  }
 0xc01   : > { %v13133_v16 = vpop.permute.xlu1 %6021 }
 0xc02   : > { %15975 = vst [vmem:[#allocation305_spill] sm:$0xff] %v13133_v16 }
 0xc07   : > { %9920 = vset.pattern.permute.xlu2 %v10203_v38  ;;  %9919 = vset.pattern.permute.xlu1 %v10182_v6 }
 0xc09   : > { %v13140_v37 = vpop.permute.xlu2 %6058 }
 0xc0a   : > { %15977 = vst [vmem:[#allocation307_spill] sm:$0xff] %v13140_v37 }
 0xc0f   : > { %6150 = vperm.xlu2 %9920, %v15972_v28   ;;  %6144 = vperm.xlu1 %9919, %v15972_v28  }
 0xc11   : > { %v6035_v30 = vpop.permute.xlu1 %6034 }
 0xc12   : > { %v6572_v31 = vsub.f32 %v6035_v30, %v10188_v8 }
 0xc14   : > { %v6828_v54 = vand.u32 2147483647, %v6572_v31 }
 0xc16   : > { %v7084_v9 = vsub.f32 1.0, %v6828_v54 }
 0xc17   : > { %9922 = vset.pattern.permute.xlu2 %v10216_v57  ;;  %9921 = vset.pattern.permute.xlu1 %v10179_v5 }
 0xc18   : > { %v7340_v11 = vmax.f32 %v7084_v9, 0.0 }
 0xc19   : > { %v6071_v16 = vpop.permute.xlu2 %6070 }
 0xc1a   : > { %v7596_v23 = vmul.f32 %v7340_v11, %v12054_v0  ;;  %v6578_v30 = vsub.f32 %v6071_v16, %v10188_v8 }
 0xc1c   : > { %v8252_v49 = vsel %vm3758_vm1, %v7596_v23, 0.0  ;;  %v6834_v37 = vand.u32 2147483647, %v6578_v30  ;;  %v13154_v23 = vpop.xlane.xlu0 %7821  ;;  %v15978_v30 = vld [vmem:[#allocation54_spill] sm:$0xff] }
 0xc1d   : > { %8253 = vadd.xlane.f32.xlu0 %v8252_v49 }
 0xc1e   : > { %v7090_v0 = vsub.f32 1.0, %v6834_v37 }
 0xc1f   : > { %6162 = vperm.xlu2 %9922, %v15972_v28   ;;  %6156 = vperm.xlu1 %9921, %v15972_v28  }
 0xc20   : > { %v7346_v16 = vmax.f32 %v7090_v0, 0.0 }
 0xc21   : > { %v6053_v31 = vpop.permute.xlu1 %6052 }
 0xc22   : > { %v6575_v54 = vsub.f32 %v6053_v31, %v10188_v8 }
 0xc24   : > { %v6831_v15 = vand.u32 2147483647, %v6575_v54  ;;  %v7602_v54 = vmul.f32 %v7346_v16, %v12089_v42 }
 0xc26   : > { %v7087_v9 = vsub.f32 1.0, %v6831_v15  ;;  %v6584_v15 = vsub.f32 %v12862_v43, %v10188_v8 }
 0xc27   : > { %9925 = vset.pattern.permute.xlu2 %v10172_v2  ;;  %9924 = vset.pattern.permute.xlu1 %v10236_v12 }
 0xc28   : > { %v7343_v11 = vmax.f32 %v7087_v9, 0.0  ;;  %v13164_v9 = vpop.xlane.xlu0 %7830 }
 0xc29   : > { %v6090_v49 = vpop.permute.xlu2 %6089 }
 0xc2a   : > { %v6581_v19 = vsub.f32 %v6090_v49, %v10188_v8  ;;  %v7599_v51 = vmul.f32 %v7343_v11, %v12072_v61  ;;  %v6840_v49 = vand.u32 2147483647, %v6584_v15  ;;  %v8270_v61 = vsel %vm3758_vm1, %v7602_v54, 0.0  ;;  %v15987_v54 = vld [vmem:[#allocation89_spill] sm:$0xff] }
 0xc2c   : > { %v6837_v21 = vand.u32 2147483647, %v6581_v19  ;;  %v8261_v31 = vsel %vm3758_vm1, %v7599_v51, 0.0  ;;  %v7096_v51 = vsub.f32 1.0, %v6840_v49 }
 0xc2d   : > { %8262 = vadd.xlane.f32.xlu0 %v8261_v31 }
 0xc2e   : > { %v7093_v37 = vsub.f32 1.0, %v6837_v21  ;;  %v7352_v19 = vmax.f32 %v7096_v51, 0.0 }
 0xc2f   : > { %6181 = vperm.xlu2 %9925, %v15978_v30   ;;  %6174 = vperm.xlu1 %9924, %v15972_v28  }
 0xc30   : > { %v7349_v4 = vmax.f32 %v7093_v37, 0.0  ;;  %v13171_v21 = vpop.xlane.xlu0 %7839  ;;  %v7608_v42 = vmul.f32 %v7352_v19, %v12129_v33 }
 0xc32   : > { %v7605_v28 = vmul.f32 %v7349_v4, %v12108_v39  ;;  %v8288_v0 = vsel %vm3758_vm1, %v7608_v42, 0.0  ;;  %v13183_v39 = vpop.permute.xlu1 %6064 }
 0xc33   : > { %15980 = vst [vmem:[#allocation308_spill] sm:$0xff] %v13183_v39 }
 0xc34   : > { %v8279_v43 = vsel %vm3758_vm1, %v7605_v28, 0.0 }
 0xc35   : > { %8271 = vadd.xlane.f32.xlu0 %v8270_v61 }
 0xc37   : > { %9927 = vset.pattern.permute.xlu2 %v10182_v6  ;;  %9926 = vset.pattern.permute.xlu1 %v10185_v7 }
 0xc38   : > { %v13177_v11 = vpop.xlane.xlu0 %7848 }
 0xc39   : > { %15979 = vst [vmem:[#allocation54_spill] sm:$0xff] %v13177_v11  ;;  %v13189_v4 = vpop.permute.xlu2 %6101 }
 0xc3a   : > { %15982 = vst [vmem:[#allocation310_spill] sm:$0xff] %v13189_v4  ;;  %v15992_v4 = vld [vmem:[#allocation206_spill] sm:$0xff] }
 0xc3d   : > { %8280 = vadd.xlane.f32.xlu0 %v8279_v43  ;;  %v15989_v43 = vld [vmem:[#allocation149_spill] sm:$0xff] }
 0xc3f   : > { %6193 = vperm.xlu2 %9927, %v15978_v30   ;;  %6187 = vperm.xlu1 %9926, %v15978_v30  }
 0xc41   : > { %v13187_v33 = vpop.permute.xlu1 %6083 }
 0xc42   : > { %15981 = vst [vmem:[#allocation309_spill] sm:$0xff] %v13187_v33 }
 0xc45   : > { %8289 = vadd.xlane.f32.xlu0 %v8288_v0 }
 0xc47   : > { %9930 = vset.pattern.permute.xlu2 %v10216_v57  ;;  %9929 = vset.pattern.permute.xlu1 %v10179_v5 }
 0xc49   : > { %v13195_v31 = vpop.permute.xlu2 %6119 }
 0xc4a   : > { %15984 = vst [vmem:[#allocation312_spill] sm:$0xff] %v13195_v31 }
 0xc4f   : > { %6211 = vperm.xlu2 %9930, %v15978_v30   ;;  %6205 = vperm.xlu1 %9929, %v15978_v30  }
 0xc51   : > { %v13193_v16 = vpop.permute.xlu1 %6095 }
 0xc52   : > { %15983 = vst [vmem:[#allocation311_spill] sm:$0xff] %v13193_v16 }
 0xc57   : > { %9932 = vset.pattern.permute.xlu2 %v10236_v12  ;;  %9931 = vset.pattern.permute.xlu1 %v10239_v13 }
 0xc59   : > { %v13201_v37 = vpop.permute.xlu2 %6132 }
 0xc5a   : > { %15986 = vst [vmem:[#allocation314_spill] sm:$0xff] %v13201_v37  ;;  %v13212_v37 = vpop.xlane.xlu0 %7857 }
 0xc5b   : > { %15990 = vst [vmem:[#allocation149_spill] sm:$0xff] %v13212_v37 }
 0xc5f   : > { %6223 = vperm.xlu2 %9932, %v15978_v30   ;;  %6217 = vperm.xlu1 %9931, %v15978_v30  }
 0xc61   : > { %v13199_v15 = vpop.permute.xlu1 %6113 }
 0xc62   : > { %15985 = vst [vmem:[#allocation313_spill] sm:$0xff] %v13199_v15 }
 0xc67   : > { %9935 = vset.pattern.permute.xlu2 %v10182_v6  ;;  %9934 = vset.pattern.permute.xlu1 %v10185_v7 }
 0xc69   : > { %v13206_v51 = vpop.permute.xlu2 %6150 }
 0xc6a   : > { %15988 = vst [vmem:[#allocation89_spill] sm:$0xff] %v13206_v51 }
 0xc6f   : > { %6242 = vperm.xlu2 %9935, %v15987_v54   ;;  %6236 = vperm.xlu1 %9934, %v15987_v54  }
 0xc71   : > { %v6126_v49 = vpop.permute.xlu1 %6125 }
 0xc72   : > { %v6587_v61 = vsub.f32 %v6126_v49, %v10188_v8 }
 0xc74   : > { %v6843_v30 = vand.u32 2147483647, %v6587_v61 }
 0xc76   : > { %v7099_v28 = vsub.f32 1.0, %v6843_v30 }
 0xc77   : > { %9937 = vset.pattern.permute.xlu2 %v10179_v5  ;;  %9936 = vset.pattern.permute.xlu1 %v10203_v38 }
 0xc78   : > { %v7355_v19 = vmax.f32 %v7099_v28, 0.0 }
 0xc79   : > { %v6163_v15 = vpop.permute.xlu2 %6162 }
 0xc7a   : > { %v7611_v42 = vmul.f32 %v7355_v19, %v15989_v43  ;;  %v6593_v49 = vsub.f32 %v6163_v15, %v10188_v8 }
 0xc7c   : > { %v8297_v0 = vsel %vm3758_vm1, %v7611_v42, 0.0  ;;  %v6849_v51 = vand.u32 2147483647, %v6593_v49  ;;  %v13220_v42 = vpop.xlane.xlu0 %7866 }
 0xc7d   : > { %8298 = vadd.xlane.f32.xlu0 %v8297_v0  ;;  %15991 = vst [vmem:[#allocation315_spill] sm:$0xff] %v13220_v42  ;;  %v13230_v42 = vpop.f32.mrf.mxu3 }
 0xc7e   : > { %v7105_v19 = vsub.f32 1.0, %v6849_v51  ;;  %15995 = vst [vmem:[#allocation206_spill] sm:$0xff] %v13230_v42 }
 0xc7f   : > { %6254 = vperm.xlu2 %9937, %v15987_v54   ;;  %6248 = vperm.xlu1 %9936, %v15987_v54  }
 0xc80   : > { %v7361_v15 = vmax.f32 %v7105_v19, 0.0 }
 0xc81   : > { %v6145_v61 = vpop.permute.xlu1 %6144 }
 0xc82   : > { %v6590_v30 = vsub.f32 %v6145_v61, %v10188_v8 }
 0xc84   : > { %v6846_v31 = vand.u32 2147483647, %v6590_v30  ;;  %v15994_v30 = vld [vmem:[#allocation68_spill] sm:$0xff] }
 0xc86   : > { %v7102_v28 = vsub.f32 1.0, %v6846_v31  ;;  %v15993_v31 = vld [vmem:[#allocation91_spill] sm:$0xff] }
 0xc87   : > { %9940 = vset.pattern.permute.xlu2 %v10236_v12  ;;  %9939 = vset.pattern.permute.xlu1 %v10239_v13  ;;  %v6599_v51 = vsub.f32 %v15993_v31, %v10188_v8 }
 0xc88   : > { %v7358_v43 = vmax.f32 %v7102_v28, 0.0  ;;  %v7617_v28 = vmul.f32 %v7361_v15, %v15994_v30  ;;  %v4746_v15 = vpop.f32.mrf.mxu3  ;;  %v15999_v30 = vld [vmem:[#allocation132_spill] sm:$0xff] }
 0xc89   : > { %v6182_v0 = vpop.permute.xlu2 %6181 }
 0xc8a   : > { %v6596_v16 = vsub.f32 %v6182_v0, %v10188_v8  ;;  %v7614_v33 = vmul.f32 %v7358_v43, %v15992_v4  ;;  %v13232_v0 = vpop.xlane.xlu0 %7875  ;;  %v6855_v4 = vand.u32 2147483647, %v6599_v51 }
 0xc8b   : > { %15996 = vst [vmem:[#allocation91_spill] sm:$0xff] %v13232_v0 }
 0xc8c   : > { %v6852_v39 = vand.u32 2147483647, %v6596_v16  ;;  %v8306_v61 = vsel %vm3758_vm1, %v7614_v33, 0.0  ;;  %v8315_v16 = vsel %vm3758_vm1, %v7617_v28, 0.0  ;;  %v7111_v33 = vsub.f32 1.0, %v6855_v4 }
 0xc8d   : > { %8307 = vadd.xlane.f32.xlu0 %v8306_v61 }
 0xc8e   : > { %v7108_v49 = vsub.f32 1.0, %v6852_v39  ;;  %v7367_v61 = vmax.f32 %v7111_v33, 0.0 }
 0xc8f   : > { %6272 = vperm.xlu2 %9940, %v15987_v54   ;;  %6266 = vperm.xlu1 %9939, %v15987_v54   ;;  %v15997_v54 = vld [vmem:[#allocation211_spill] sm:$0xff] }
 0xc90   : > { %v7364_v19 = vmax.f32 %v7108_v49, 0.0  ;;  %v7623_v51 = vmul.f32 %v7367_v61, %v12275_v56  ;;  %v13247_v4 = vpop.f32.mrf.mxu3 }
 0xc91   : > { %16001 = vst [vmem:[#allocation132_spill] sm:$0xff] %v13247_v4  ;;  %v16012_v4 = vld [vmem:[#allocation203_spill] sm:$0xff] }
 0xc92   : > { %v7620_v43 = vmul.f32 %v7364_v19, %v15997_v54  ;;  %v13239_v31 = vpop.xlane.xlu0 %7884  ;;  %v8333_v49 = vsel %vm3758_vm1, %v7623_v51, 0.0 }
 0xc93   : > { %15998 = vst [vmem:[#allocation68_spill] sm:$0xff] %v13239_v31 }
 0xc94   : > { %v8324_v39 = vsel %vm3758_vm1, %v7620_v43, 0.0 }
 0xc95   : > { %8316 = vadd.xlane.f32.xlu0 %v8315_v16  ;;  %v13255_v16 = vpop.permute.xlu1 %6156 }
 0xc96   : > { %16003 = vst [vmem:[#allocation317_spill] sm:$0xff] %v13255_v16 }
 0xc97   : > { %9942 = vset.pattern.permute.xlu2 %v10185_v7  ;;  %9941 = vset.pattern.permute.xlu1 %v10172_v2 }
 0xc98   : > { %v13253_v19 = vpop.f32.mrf.mxu3 }
 0xc99   : > { %16002 = vst [vmem:[#allocation316_spill] sm:$0xff] %v13253_v19  ;;  %v13261_v54 = vpop.permute.xlu2 %6193 }
 0xc9a   : > { %v13245_v28 = vpop.xlane.xlu0 %7893  ;;  %16005 = vst [vmem:[#allocation319_spill] sm:$0xff] %v13261_v54 }
 0xc9b   : > { %16000 = vst [vmem:[#allocation211_spill] sm:$0xff] %v13245_v28  ;;  %v16148_v28 = vld [vmem:[#allocation41_spill] sm:$0xff] }
 0xc9d   : > { %8325 = vadd.xlane.f32.xlu0 %v8324_v39 }
 0xc9f   : > { %6285 = vperm.xlu2 %9942, %v15999_v30   ;;  %6279 = vperm.xlu1 %9941, %v15999_v30  }
 0xca0   : > { %v4754_v33 = vpop.f32.mrf.mxu3 }
 0xca1   : > { %v13259_v56 = vpop.permute.xlu1 %6174 }
 0xca2   : > { %16004 = vst [vmem:[#allocation318_spill] sm:$0xff] %v13259_v56 }
 0xca5   : > { %8334 = vadd.xlane.f32.xlu0 %v8333_v49 }
 0xca7   : > { %9945 = vset.pattern.permute.xlu2 %v10179_v5  ;;  %9944 = vset.pattern.permute.xlu1 %v10203_v38 }
 0xca8   : > { %v13267_v43 = vpop.f32.mrf.mxu3 }
 0xca9   : > { %16007 = vst [vmem:[#allocation321_spill] sm:$0xff] %v13267_v43  ;;  %v13269_v61 = vpop.permute.xlu2 %6211 }
 0xcaa   : > { %16008 = vst [vmem:[#allocation322_spill] sm:$0xff] %v13269_v61 }
 0xcaf   : > { %6303 = vperm.xlu2 %9945, %v15999_v30   ;;  %6297 = vperm.xlu1 %9944, %v15999_v30  }
 0xcb0   : > { %v13277_v49 = vpop.f32.mrf.mxu3 }
 0xcb1   : > { %v13265_v5 = vpop.permute.xlu1 %6187  ;;  %16011 = vst [vmem:[#allocation325_spill] sm:$0xff] %v13277_v49 }
 0xcb2   : > { %16006 = vst [vmem:[#allocation320_spill] sm:$0xff] %v13265_v5 }
 0xcb7   : > { %9947 = vset.pattern.permute.xlu2 %v10239_v13  ;;  %9946 = vset.pattern.permute.xlu1 %v10216_v57 }
 0xcb9   : > { %v13275_v51 = vpop.permute.xlu2 %6223 }
 0xcba   : > { %16010 = vst [vmem:[#allocation324_spill] sm:$0xff] %v13275_v51 }
 0xcbf   : > { %6315 = vperm.xlu2 %9947, %v15999_v30   ;;  %6309 = vperm.xlu1 %9946, %v15999_v30  }
 0xcc1   : > { %v13273_v39 = vpop.permute.xlu1 %6205 }
 0xcc2   : > { %16009 = vst [vmem:[#allocation323_spill] sm:$0xff] %v13273_v39  ;;  %v13290_v39 = vpop.xlane.xlu0 %7902 }
 0xcc3   : > { %16015 = vst [vmem:[#allocation327_spill] sm:$0xff] %v13290_v39 }
 0xcc7   : > { %9950 = vset.pattern.permute.xlu2 %v10185_v7  ;;  %9949 = vset.pattern.permute.xlu1 %v10172_v2  ;;  %v13286_v7 = vpop.f32.mrf.mxu3 }
 0xcc8   : > { %16014 = vst [vmem:[#allocation326_spill] sm:$0xff] %v13286_v7 }
 0xcc9   : > { %v13282_v42 = vpop.permute.xlu2 %6242 }
 0xcca   : > { %16013 = vst [vmem:[#allocation203_spill] sm:$0xff] %v13282_v42 }
 0xccf   : > { %6334 = vperm.xlu2 %9950, %v16012_v4   ;;  %6328 = vperm.xlu1 %9949, %v16012_v4  }
 0xcd1   : > { %v6218_v30 = vpop.permute.xlu1 %6217 }
 0xcd2   : > { %v6602_v19 = vsub.f32 %v6218_v30, %v10188_v8 }
 0xcd4   : > { %v6858_v43 = vand.u32 2147483647, %v6602_v19 }
 0xcd6   : > { %v7114_v61 = vsub.f32 1.0, %v6858_v43  ;;  %v4764_v43 = vpop.f32.mrf.mxu3 }
 0xcd7   : > { %9952 = vset.pattern.permute.xlu2 %v10203_v38  ;;  %9951 = vset.pattern.permute.xlu1 %v10182_v6 }
 0xcd8   : > { %v7370_v2 = vmax.f32 %v7114_v61, 0.0 }
 0xcd9   : > { %v6255_v5 = vpop.permute.xlu2 %6254 }
 0xcda   : > { %v7626_v49 = vmul.f32 %v7370_v2, %v12304_v32  ;;  %v6608_v19 = vsub.f32 %v6255_v5, %v10188_v8  ;;  %v13298_v2 = vpop.xlane.xlu0 %7911 }
 0xcdb   : > { %16016 = vst [vmem:[#allocation328_spill] sm:$0xff] %v13298_v2 }
 0xcdc   : > { %v8342_v51 = vsel %vm3758_vm1, %v7626_v49, 0.0  ;;  %v6864_v61 = vand.u32 2147483647, %v6608_v19 }
 0xcdd   : > { %8343 = vadd.xlane.f32.xlu0 %v8342_v51 }
 0xcde   : > { %v7120_v32 = vsub.f32 1.0, %v6864_v61  ;;  %v13301_v5 = vpop.f32.mrf.mxu3 }
 0xcdf   : > { %6346 = vperm.xlu2 %9952, %v16012_v4   ;;  %6340 = vperm.xlu1 %9951, %v16012_v4   ;;  %16017 = vst [vmem:[#allocation329_spill] sm:$0xff] %v13301_v5 }
 0xce0   : > { %v7376_v42 = vmax.f32 %v7120_v32, 0.0 }
 0xce1   : > { %v6237_v38 = vpop.permute.xlu1 %6236 }
 0xce2   : > { %v6605_v6 = vsub.f32 %v6237_v38, %v10188_v8  ;;  %v7632_v19 = vmul.f32 %v7376_v42, %v4754_v33  ;;  %v13306_v38 = vpop.xlane.xlu0 %7920 }
 0xce3   : > { %16018 = vst [vmem:[#allocation330_spill] sm:$0xff] %v13306_v38 }
 0xce4   : > { %v6861_v30 = vand.u32 2147483647, %v6605_v6 }
 0xce6   : > { %v7117_v7 = vsub.f32 1.0, %v6861_v30  ;;  %v16024_v30 = vld [vmem:[#allocation107_spill] sm:$0xff] }
 0xce7   : > { %9954 = vset.pattern.permute.xlu2 %v10239_v13  ;;  %9953 = vset.pattern.permute.xlu1 %v10216_v57  ;;  %v8360_v13 = vsel %vm3758_vm1, %v7632_v19, 0.0  ;;  %v13308_v57 = vpop.f32.mrf.mxu3  ;;  %v6375_v32 = vsub.f32 %v16024_v30, %v10188_v8 }
 0xce8   : > { %v7373_v49 = vmax.f32 %v7117_v7, 0.0  ;;  %16019 = vst [vmem:[#allocation331_spill] sm:$0xff] %v13308_v57  ;;  %v16027_v57 = vld [vmem:[#allocation26_spill] sm:$0xff] }
 0xcea   : > { %v7629_v51 = vmul.f32 %v7373_v49, %v4746_v15 }
 0xcec   : > { %v8351_v54 = vsel %vm3758_vm1, %v7629_v51, 0.0 }
 0xced   : > { %8352 = vadd.xlane.f32.xlu0 %v8351_v54  ;;  %v16022_v54 = vld [vmem:[#allocation209_spill] sm:$0xff] }
 0xcee   : > { %v6372_v6 = vsub.f32 %v16022_v54, %v10188_v8 }
 0xcef   : > { %6364 = vperm.xlu2 %9954, %v16012_v4   ;;  %6358 = vperm.xlu1 %9953, %v16012_v4   ;;  %v13312_v15 = vpop.f32.mrf.mxu3 }
 0xcf0   : > { %16020 = vst [vmem:[#allocation332_spill] sm:$0xff] %v13312_v15  ;;  %v6628_v61 = vand.u32 2147483647, %v6372_v6  ;;  %v16028_v6 = vld [vmem:[#allocation138_spill] sm:$0xff] }
 0xcf1   : > { %v13314_v7 = vpop.permute.xlu1 %6248 }
 0xcf2   : > { %16021 = vst [vmem:[#allocation333_spill] sm:$0xff] %v13314_v7  ;;  %v6884_v33 = vsub.f32 1.0, %v6628_v61 }
 0xcf4   : > { %v7140_v51 = vmax.f32 %v6884_v33, 0.0 }
 0xcf5   : > { %8361 = vadd.xlane.f32.xlu0 %v8360_v13  ;;  %v16026_v13 = vld [vmem:[#allocation210_spill] sm:$0xff] }
 0xcf6   : > { %v6376_v15 = vsub.f32 %v16026_v13, %v10188_v8  ;;  %v7396_v54 = vmul.f32 %v7140_v51, %v16027_v57  ;;  %v16029_v13 = vld [vmem:[#allocation153_spill] sm:$0xff]  ;;  %v16030_v57 = vld [vmem:[#allocation151_spill] sm:$0xff] }
 0xcf7   : > { %9955 = vset.pattern.permute.xlu1 %v10236_v12  ;;  %v13322_v49 = vpop.f32.mrf.mxu3  ;;  %v6631_v12 = vand.u32 2147483647, %v6375_v32 }
 0xcf8   : > { %16025 = vst [vmem:[#allocation107_spill] sm:$0xff] %v13322_v49  ;;  %v6632_v56 = vand.u32 2147483647, %v6376_v15  ;;  %v7652_v33 = vsel %vm3758_vm1, %v7396_v54, 0.0  ;;  %v13339_v15 = vpop.xlane.xlu0 %7929 }
 0xcf9   : > { %v6887_v5 = vsub.f32 1.0, %v6631_v12  ;;  %v6379_v12 = vsub.f32 %v16029_v13, %v10188_v8  ;;  %16032 = vst [vmem:[#allocation210_spill] sm:$0xff] %v13339_v15 }
 0xcfa   : > { %v6888_v38 = vsub.f32 1.0, %v6632_v56 }
 0xcfb   : > { %v7143_v49 = vmax.f32 %v6887_v5, 0.0  ;;  %v6635_v5 = vand.u32 2147483647, %v6379_v12 }
 0xcfd   : > { %v7399_v51 = vmul.f32 %v7143_v49, %v16030_v57  ;;  %v6891_v56 = vsub.f32 1.0, %v6635_v5  ;;  %v6382_v49 = vsub.f32 %v12313_v10, %v10188_v8 }
 0xcff   : > { %6370 = vperm.xlu1 %9955, %v16012_v4   ;;  %v13330_v7 = vpop.f32.mrf.mxu3 }
 0xd01   : > { %v13318_v42 = vpop.permute.xlu1 %6266 }
 0xd02   : > { %16023 = vst [vmem:[#allocation209_spill] sm:$0xff] %v13318_v42  ;;  %v6374_v42 = vsub.f32 %v16028_v6, %v10188_v8 }
 0xd04   : > { %v6630_v32 = vand.u32 2147483647, %v6374_v42  ;;  %v7144_v42 = vmax.f32 %v6888_v38, 0.0  ;;  %v7147_v38 = vmax.f32 %v6891_v56, 0.0 }
 0xd06   : > { %v6886_v2 = vsub.f32 1.0, %v6630_v32 }
 0xd07   : > { %v13341_v54 = vpop.f32.mrf.mxu3 }
 0xd0f   : > { %v13352_v5 = vpop.f32.mrf.mxu3 }
 0xd10   : > { %16036 = vst [vmem:[#allocation26_spill] sm:$0xff] %v13352_v5 }
 0xd11   : > { %v6280_v19 = vpop.permute.xlu1 %6279 }
 0xd12   : > { %v6612_v4 = vsub.f32 %v6280_v19, %v10188_v8 }
 0xd14   : > { %v6868_v61 = vand.u32 2147483647, %v6612_v4  ;;  %v16031_v4 = vld [vmem:[#allocation212_spill] sm:$0xff] }
 0xd15   : > { %v6378_v6 = vsub.f32 %v16031_v4, %v10188_v8  ;;  %v16035_v4 = vld [vmem:[#allocation146_spill] sm:$0xff] }
 0xd16   : > { %v7124_v30 = vsub.f32 1.0, %v6868_v61 }
 0xd18   : > { %v7380_v16 = vmax.f32 %v7124_v30, 0.0  ;;  %7653 = vadd.xlane.f32.xlu2 %v7652_v33  ;;  %v6634_v30 = vand.u32 2147483647, %v6378_v6  ;;  %v16033_v33 = vld [vmem:[#allocation156_spill] sm:$0xff] }
 0xd19   : > { %v7400_v32 = vmul.f32 %v7144_v42, %v16033_v33  ;;  %v6385_v42 = vsub.f32 %v12317_v60, %v10188_v8 }
 0xd1a   : > { %v7636_v19 = vmul.f32 %v7380_v16, %v4764_v43  ;;  %v7661_v16 = vsel %vm3758_vm1, %v7399_v51, 0.0  ;;  %v7142_v43 = vmax.f32 %v6886_v2, 0.0  ;;  %v6890_v13 = vsub.f32 1.0, %v6634_v30 }
 0xd1b   : > { %v7664_v15 = vsel %vm3758_vm1, %v7400_v32, 0.0  ;;  %v13360_v32 = vpop.permute.xlu2 %6272 }
 0xd1c   : > { %v8372_v61 = vsel %vm3758_vm1, %v7636_v19, 0.0  ;;  %v16034_v19 = vld [vmem:[#allocation213_spill] sm:$0xff]  ;;  %v7398_v12 = vmul.f32 %v7142_v43, %v16035_v4  ;;  %v7146_v51 = vmax.f32 %v6890_v13, 0.0  ;;  %v6384_v43 = vsub.f32 %v12597_v59, %v10188_v8  ;;  %16039 = vst [vmem:[#allocation138_spill] sm:$0xff] %v13360_v32 }
 0xd1d   : > { %8373 = vadd.xlane.f32.xlu0 %v8372_v61  ;;  %v6381_v57 = vsub.f32 %v16034_v19, %v10188_v8  ;;  %v6638_v61 = vand.u32 2147483647, %v6382_v49  ;;  %v16038_v49 = vld [vmem:[#allocation166_spill] sm:$0xff]  ;;  %v6641_v13 = vand.u32 2147483647, %v6385_v42  ;;  %v6388_v59 = vsub.f32 %v12319_v17, %v10188_v8 }
 0xd1e   : > { %v7658_v6 = vsel %vm3758_vm1, %v7398_v12, 0.0  ;;  %v7402_v33 = vmul.f32 %v7146_v51, %v16038_v49  ;;  %v16041_v51 = vld [vmem:[#allocation182_spill] sm:$0xff] }
 0xd1f   : > { %v6637_v2 = vand.u32 2147483647, %v6381_v57  ;;  %v6894_v10 = vsub.f32 1.0, %v6638_v61  ;;  %v6640_v57 = vand.u32 2147483647, %v6384_v43  ;;  %v4784_v61 = vpop.f32.mrf.mxu3  ;;  %v16042_v42 = vld [vmem:[#allocation178_spill] sm:$0xff] }
 0xd20   : > { %7662 = vadd.xlane.f32.xlu2 %v7661_v16  ;;  %v16037_v16 = vld [vmem:[#allocation170_spill] sm:$0xff]  ;;  %v7670_v12 = vsel %vm3758_vm1, %v7402_v33, 0.0  ;;  %v6644_v43 = vand.u32 2147483647, %v6388_v59  ;;  %v6390_v59 = vsub.f32 %v12329_v27, %v10188_v8  ;;  %v16048_v27 = vld [vmem:[#allocation48_spill] sm:$0xff] }
 0xd21   : > { %v7403_v30 = vmul.f32 %v7147_v38, %v16037_v16  ;;  %v6893_v56 = vsub.f32 1.0, %v6637_v2  ;;  %v13364_v60 = vpop.permute.xlu1 %6297  ;;  %v6897_v38 = vsub.f32 1.0, %v6641_v13 }
 0xd22   : > { %16040 = vst [vmem:[#allocation153_spill] sm:$0xff] %v13364_v60 }
 0xd23   : > { %v7673_v19 = vsel %vm3758_vm1, %v7403_v30, 0.0  ;;  %v7149_v4 = vmax.f32 %v6893_v56, 0.0  ;;  %v13372_v30 = vpop.permute.xlu2 %6285  ;;  %v7153_v56 = vmax.f32 %v6897_v38, 0.0  ;;  %v16045_v38 = vld [vmem:[#allocation23_spill] sm:$0xff] }
 0xd24   : > { %16043 = vst [vmem:[#allocation151_spill] sm:$0xff] %v13372_v30  ;;  %v16127_v30 = vld [vmem:[#allocation97_spill] sm:$0xff] }
 0xd25   : > { %v7405_v16 = vmul.f32 %v7149_v4, %v16042_v42 }
 0xd27   : > { %v7679_v17 = vsel %vm3758_vm1, %v7405_v16, 0.0 }
 0xd28   : > { %7665 = vadd.xlane.f32.xlu2 %v7664_v15  ;;  %v7150_v15 = vmax.f32 %v6894_v10, 0.0  ;;  %v6387_v10 = vsub.f32 %v12323_v1, %v10188_v8  ;;  %v6391_v1 = vsub.f32 %v12325_v20, %v10188_v8 }
 0xd29   : > { %7659 = vadd.xlane.f32.xlu1 %v7658_v6  ;;  %v6896_v6 = vsub.f32 1.0, %v6640_v57  ;;  %v16044_v57 = vld [vmem:[#allocation187_spill] sm:$0xff] }
 0xd2a   : > { %v7406_v2 = vmul.f32 %v7150_v15, %v16041_v51  ;;  %v6900_v15 = vsub.f32 1.0, %v6644_v43  ;;  %v7409_v4 = vmul.f32 %v7153_v56, %v16044_v57  ;;  %v6647_v42 = vand.u32 2147483647, %v6391_v1 }
 0xd2b   : > { %v7152_v33 = vmax.f32 %v6896_v6, 0.0  ;;  %v13386_v6 = vpop.permute.xlu2 %6303  ;;  %v6393_v57 = vsub.f32 %v12331_v29, %v10188_v8 }
 0xd2c   : > { %v7682_v49 = vsel %vm3758_vm1, %v7406_v2, 0.0  ;;  %v13384_v2 = vpop.f32.mrf.mxu3  ;;  %16047 = vst [vmem:[#allocation156_spill] sm:$0xff] %v13386_v6  ;;  %v7691_v16 = vsel %vm3758_vm1, %v7409_v4, 0.0 }
 0xd2d   : > { %v7408_v51 = vmul.f32 %v7152_v33, %v16045_v38  ;;  %16046 = vst [vmem:[#allocation212_spill] sm:$0xff] %v13384_v2  ;;  %v6394_v33 = vsub.f32 %v16048_v27, %v10188_v8  ;;  %v6649_v2 = vand.u32 2147483647, %v6393_v57  ;;  %v16052_v57 = vld [vmem:[#allocation86_spill] sm:$0xff] }
 0xd2f   : > { %v7688_v20 = vsel %vm3758_vm1, %v7408_v51, 0.0  ;;  %v6650_v5 = vand.u32 2147483647, %v6394_v33  ;;  %v6396_v33 = vsub.f32 %v12336_v63, %v10188_v8 }
 0xd30   : > { %7674 = vadd.xlane.f32.xlu2 %v7673_v19  ;;  %v6643_v19 = vand.u32 2147483647, %v6387_v10  ;;  %v7156_v10 = vmax.f32 %v6900_v15, 0.0  ;;  %v16049_v15 = vld [vmem:[#allocation83_spill] sm:$0xff] }
 0xd31   : > { %7671 = vadd.xlane.f32.xlu1 %v7670_v12  ;;  %v13376_v13 = vpop.permute.xlu1 %6309 }
 0xd32   : > { %v6899_v12 = vsub.f32 1.0, %v6643_v19  ;;  %v7412_v1 = vmul.f32 %v7156_v10, %v16049_v15  ;;  %v16051_v15 = vld [vmem:[#allocation36_spill] sm:$0xff] }
 0xd34   : > { %v7155_v43 = vmax.f32 %v6899_v12, 0.0  ;;  %v16050_v12 = vld [vmem:[#allocation88_spill] sm:$0xff]  ;;  %v7700_v32 = vsel %vm3758_vm1, %v7412_v1, 0.0 }
 0xd38   : > { %7683 = vadd.xlane.f32.xlu2 %v7682_v49  ;;  %v6646_v49 = vand.u32 2147483647, %v6390_v59  ;;  %v7411_v59 = vmul.f32 %v7155_v43, %v16050_v12  ;;  %v6397_v43 = vsub.f32 %v12379_v55, %v10188_v8  ;;  %v6652_v55 = vand.u32 2147483647, %v6396_v33 }
 0xd39   : > { %7680 = vadd.xlane.f32.xlu1 %v7679_v17  ;;  %v6903_v17 = vsub.f32 1.0, %v6647_v42 }
 0xd3a   : > { %v6902_v38 = vsub.f32 1.0, %v6646_v49  ;;  %v7697_v29 = vsel %vm3758_vm1, %v7411_v59, 0.0  ;;  %v6906_v49 = vsub.f32 1.0, %v6650_v5  ;;  %v6617_v59 = vsub.f32 %v13376_v13, %v10188_v8 }
 0xd3c   : > { %v7158_v27 = vmax.f32 %v6902_v38, 0.0  ;;  %v13408_v38 = vpop.xlane.xlu0 %7938  ;;  %v6873_v33 = vand.u32 2147483647, %v6617_v59 }
 0xd3d   : > { %16053 = vst [vmem:[#allocation213_spill] sm:$0xff] %v13408_v38 }
 0xd3e   : > { %v7414_v1 = vmul.f32 %v7158_v27, %v16052_v57  ;;  %v16056_v27 = vld [vmem:[#allocation69_spill] sm:$0xff] }
 0xd40   : > { %7692 = vadd.xlane.f32.xlu2 %v7691_v16  ;;  %v13397_v16 = vpop.permute.xlu2 %6315  ;;  %v7706_v63 = vsel %vm3758_vm1, %v7414_v1, 0.0 }
 0xd41   : > { %v6329_v56 = vpop.permute.xlu1 %6328  ;;  %7689 = vadd.xlane.f32.xlu1 %v7688_v20  ;;  %v7159_v20 = vmax.f32 %v6903_v17, 0.0 }
 0xd42   : > { %v6620_v19 = vsub.f32 %v6329_v56, %v10188_v8  ;;  %v4789_v56 = vpop.f32.mrf.mxu3 }
 0xd44   : > { %v6876_v4 = vand.u32 2147483647, %v6620_v19  ;;  %v6905_v19 = vsub.f32 1.0, %v6649_v2  ;;  %v6653_v2 = vand.u32 2147483647, %v6397_v43  ;;  %v6400_v43 = vsub.f32 %v12385_v34, %v10188_v8 }
 0xd45   : > { %v6618_v34 = vsub.f32 %v13397_v16, %v10188_v8 }
 0xd46   : > { %v7132_v51 = vsub.f32 1.0, %v6876_v4  ;;  %v7415_v4 = vmul.f32 %v7159_v20, %v16051_v15  ;;  %v7161_v5 = vmax.f32 %v6905_v19, 0.0  ;;  %v6909_v19 = vsub.f32 1.0, %v6653_v2  ;;  %v16058_v15 = vld [vmem:[#allocation13_spill] sm:$0xff] }
 0xd48   : > { %v7388_v42 = vmax.f32 %v7132_v51, 0.0  ;;  %7701 = vadd.xlane.f32.xlu2 %v7700_v32  ;;  %v13410_v32 = vpop.permute.xlu2 %6334  ;;  %v7709_v12 = vsel %vm3758_vm1, %v7415_v4, 0.0  ;;  %v7417_v13 = vmul.f32 %v7161_v5, %v16058_v15  ;;  %v6908_v4 = vsub.f32 1.0, %v6652_v55 }
 0xd49   : > { %7698 = vadd.xlane.f32.xlu1 %v7697_v29  ;;  %16054 = vst [vmem:[#allocation146_spill] sm:$0xff] %v13410_v32  ;;  %v7129_v5 = vsub.f32 1.0, %v6873_v33  ;;  %v16063_v33 = vld [vmem:[#allocation90_spill] sm:$0xff] }
 0xd4a   : > { %v7644_v10 = vmul.f32 %v7388_v42, %v4784_v61  ;;  %v7162_v61 = vmax.f32 %v6906_v49, 0.0  ;;  %v13416_v51 = vpop.f32.mrf.mxu3  ;;  %v6399_v42 = vsub.f32 %v16056_v27, %v10188_v8  ;;  %v13427_v27 = vpop.xlane.xlu0 %7947  ;;  %v7164_v2 = vmax.f32 %v6908_v4, 0.0 }
 0xd4b   : > { %16055 = vst [vmem:[#allocation170_spill] sm:$0xff] %v13416_v51  ;;  %v6656_v51 = vand.u32 2147483647, %v6400_v43  ;;  %v16062_v43 = vld [vmem:[#allocation93_spill] sm:$0xff]  ;;  %v7385_v4 = vmax.f32 %v7129_v5, 0.0 }
 0xd4c   : > { %v8396_v17 = vsel %vm3758_vm1, %v7644_v10, 0.0  ;;  %v16057_v10 = vld [vmem:[#allocation38_spill] sm:$0xff]  ;;  %v6655_v1 = vand.u32 2147483647, %v6399_v42  ;;  %16060 = vst [vmem:[#allocation182_spill] sm:$0xff] %v13427_v27  ;;  %v6403_v42 = vsub.f32 %v12389_v3, %v10188_v8 }
 0xd4d   : > { %8397 = vadd.xlane.f32.xlu0 %v8396_v17  ;;  %v7418_v49 = vmul.f32 %v7162_v61, %v16057_v10  ;;  %v7715_v61 = vsel %vm3758_vm1, %v7417_v13, 0.0  ;;  %v6912_v10 = vsub.f32 1.0, %v6656_v51  ;;  %v6874_v13 = vand.u32 2147483647, %v6618_v34 }
 0xd4e   : > { %v6911_v59 = vsub.f32 1.0, %v6655_v1  ;;  %v6659_v1 = vand.u32 2147483647, %v6403_v42  ;;  %v7641_v34 = vmul.f32 %v7385_v4, %v13330_v7 }
 0xd50   : > { %7710 = vadd.xlane.f32.xlu2 %v7709_v12  ;;  %v13425_v57 = vpop.permute.xlu2 %6346 }
 0xd51   : > { %v6341_v20 = vpop.permute.xlu1 %6340  ;;  %7707 = vadd.xlane.f32.xlu1 %v7706_v63  ;;  %16059 = vst [vmem:[#allocation166_spill] sm:$0xff] %v13425_v57  ;;  %v7165_v63 = vmax.f32 %v6909_v19, 0.0  ;;  %v6402_v19 = vsub.f32 %v12393_v24, %v10188_v8 }
 0xd52   : > { %v6622_v29 = vsub.f32 %v6341_v20, %v10188_v8  ;;  %v7718_v20 = vsel %vm3758_vm1, %v7418_v49, 0.0  ;;  %v13437_v49 = vpop.f32.mrf.mxu3  ;;  %v13446_v5 = vpop.xlane.xlu0 %7956 }
 0xd53   : > { %16061 = vst [vmem:[#allocation178_spill] sm:$0xff] %v13437_v49  ;;  %v7421_v15 = vmul.f32 %v7165_v63, %v16062_v43  ;;  %v6658_v3 = vand.u32 2147483647, %v6402_v19  ;;  %v6405_v43 = vsub.f32 %v12399_v53, %v10188_v8  ;;  %v16068_v53 = vld [vmem:[#allocation124_spill] sm:$0xff] }
 0xd54   : > { %v6878_v17 = vand.u32 2147483647, %v6622_v29  ;;  %16064 = vst [vmem:[#allocation187_spill] sm:$0xff] %v13446_v5 }
 0xd55   : > { %v7727_v51 = vsel %vm3758_vm1, %v7421_v15, 0.0  ;;  %v6914_v42 = vsub.f32 1.0, %v6658_v3  ;;  %v6409_v3 = vsub.f32 %v16068_v53, %v10188_v8 }
 0xd56   : > { %v7134_v12 = vsub.f32 1.0, %v6878_v17  ;;  %v7420_v17 = vmul.f32 %v7164_v2, %v16063_v33  ;;  %v16065_v2 = vld [vmem:[#allocation95_spill] sm:$0xff] }
 0xd58   : > { %v7390_v55 = vmax.f32 %v7134_v12, 0.0  ;;  %7719 = vadd.xlane.f32.xlu2 %v7718_v20  ;;  %v6365_v12 = vpop.permute.xlu2 %6364  ;;  %v7168_v20 = vmax.f32 %v6912_v10, 0.0  ;;  %v7724_v63 = vsel %vm3758_vm1, %v7420_v17, 0.0  ;;  %v16066_v10 = vld [vmem:[#allocation98_spill] sm:$0xff] }
 0xd59   : > { %7716 = vadd.xlane.f32.xlu1 %v7715_v61  ;;  %v7130_v61 = vsub.f32 1.0, %v6874_v13  ;;  %v6626_v24 = vsub.f32 %v6365_v12, %v10188_v8 }
 0xd5a   : > { %v7646_v29 = vmul.f32 %v7390_v55, %v4789_v56  ;;  %v7167_v56 = vmax.f32 %v6911_v59, 0.0  ;;  %v6406_v59 = vsub.f32 %v12395_v18, %v10188_v8  ;;  %v7424_v19 = vmul.f32 %v7168_v20, %v16066_v10  ;;  %v13455_v7 = vpop.f32.mrf.mxu3 }
 0xd5b   : > { %v7386_v15 = vmax.f32 %v7130_v61, 0.0  ;;  %v6882_v13 = vand.u32 2147483647, %v6626_v24  ;;  %16067 = vst [vmem:[#allocation23_spill] sm:$0xff] %v13455_v7  ;;  %v7170_v18 = vmax.f32 %v6914_v42, 0.0  ;;  %v16069_v61 = vld [vmem:[#allocation215_spill] sm:$0xff] }
 0xd5c   : > { %v8402_v16 = vsel %vm3758_vm1, %v7646_v29, 0.0  ;;  %v7423_v55 = vmul.f32 %v7167_v56, %v16065_v2  ;;  %v6915_v29 = vsub.f32 1.0, %v6659_v1  ;;  %v6662_v33 = vand.u32 2147483647, %v6406_v59  ;;  %v16072_v42 = vld [vmem:[#allocation189_spill] sm:$0xff] }
 0xd5d   : > { %8403 = vadd.xlane.f32.xlu0 %v8402_v16  ;;  %v8387_v16 = vsel %vm3758_vm1, %v7641_v34, 0.0  ;;  %v7736_v17 = vsel %vm3758_vm1, %v7424_v19, 0.0  ;;  %v6661_v56 = vand.u32 2147483647, %v6405_v43  ;;  %v7138_v1 = vsub.f32 1.0, %v6882_v13  ;;  %v16071_v34 = vld [vmem:[#allocation100_spill] sm:$0xff] }
 0xd5e   : > { %v7171_v4 = vmax.f32 %v6915_v29, 0.0  ;;  %v7733_v12 = vsel %vm3758_vm1, %v7423_v55, 0.0  ;;  %v7642_v20 = vmul.f32 %v7386_v15, %v13341_v54  ;;  %v6408_v24 = vsub.f32 %v16069_v61, %v10188_v8 }
 0xd5f   : > { %v6917_v29 = vsub.f32 1.0, %v6661_v56  ;;  %v7394_v55 = vmax.f32 %v7138_v1, 0.0  ;;  %v7426_v10 = vmul.f32 %v7170_v18, %v16072_v42  ;;  %v6665_v54 = vand.u32 2147483647, %v6409_v3  ;;  %v16073_v56 = vld [vmem:[#allocation135_spill] sm:$0xff]  ;;  %v16077_v42 = vld [vmem:[#allocation158_spill] sm:$0xff] }
 0xd60   : > { %7728 = vadd.xlane.f32.xlu2 %v7727_v51  ;;  %v6918_v51 = vsub.f32 1.0, %v6662_v33  ;;  %v7427_v2 = vmul.f32 %v7171_v4, %v16071_v34  ;;  %v8390_v59 = vsel %vm3758_vm1, %v7642_v20, 0.0  ;;  %v6664_v13 = vand.u32 2147483647, %v6408_v24  ;;  %v16074_v20 = vld [vmem:[#allocation217_spill] sm:$0xff] }
 0xd61   : > { %7725 = vadd.xlane.f32.xlu1 %v7724_v63  ;;  %v13464_v63 = vpop.xlane.xlu0 %7965  ;;  %v7742_v33 = vsel %vm3758_vm1, %v7426_v10, 0.0  ;;  %v6921_v4 = vsub.f32 1.0, %v6665_v54  ;;  %v6411_v53 = vsub.f32 %v16074_v20, %v10188_v8 }
 0xd62   : > { %16070 = vst [vmem:[#allocation48_spill] sm:$0xff] %v13464_v63  ;;  %v7174_v19 = vmax.f32 %v6918_v51, 0.0  ;;  %v4799_v43 = vpop.f32.mrf.mxu3  ;;  %v7745_v15 = vsel %vm3758_vm1, %v7427_v2, 0.0  ;;  %v6920_v18 = vsub.f32 1.0, %v6664_v13  ;;  %v16075_v51 = vld [vmem:[#allocation152_spill] sm:$0xff] }
 0xd63   : > { %v7177_v34 = vmax.f32 %v6921_v4, 0.0 }
 0xd64   : > { %v7430_v1 = vmul.f32 %v7174_v19, %v16073_v56  ;;  %v16078_v19 = vld [vmem:[#allocation220_spill] sm:$0xff] }
 0xd65   : > { %8388 = vadd.xlane.f32.xlu0 %v8387_v16  ;;  %v7173_v16 = vmax.f32 %v6917_v29, 0.0  ;;  %v7433_v10 = vmul.f32 %v7177_v34, %v16077_v42 }
 0xd66   : > { %v7754_v29 = vsel %vm3758_vm1, %v7430_v1, 0.0 }
 0xd67   : > { %v7429_v61 = vmul.f32 %v7173_v16, %v16075_v51  ;;  %v7763_v56 = vsel %vm3758_vm1, %v7433_v10, 0.0 }
 0xd68   : > { %7737 = vadd.xlane.f32.xlu2 %v7736_v17  ;;  %v7650_v17 = vmul.f32 %v7394_v55, %v4799_v43  ;;  %v7176_v55 = vmax.f32 %v6920_v18, 0.0  ;;  %v6415_v43 = vsub.f32 %v16078_v19, %v10188_v8 }
 0xd69   : > { %7734 = vadd.xlane.f32.xlu1 %v7733_v12  ;;  %v6412_v12 = vsub.f32 %v12450_v35, %v10188_v8  ;;  %v13478_v24 = vpop.xlane.xlu0 %7974  ;;  %v7751_v35 = vsel %vm3758_vm1, %v7429_v61, 0.0  ;;  %v16082_v61 = vld [vmem:[#allocation183_spill] sm:$0xff] }
 0xd6a   : > { %v8414_v3 = vsel %vm3758_vm1, %v7650_v17, 0.0  ;;  %16076 = vst [vmem:[#allocation83_spill] sm:$0xff] %v13478_v24 }
 0xd6b   : > { %v6668_v2 = vand.u32 2147483647, %v6412_v12  ;;  %v6671_v12 = vand.u32 2147483647, %v6415_v43 }
 0xd6d   : > { %8391 = vadd.xlane.f32.xlu0 %v8390_v59  ;;  %v6667_v59 = vand.u32 2147483647, %v6411_v53  ;;  %v6924_v54 = vsub.f32 1.0, %v6668_v2  ;;  %v16081_v53 = vld [vmem:[#allocation221_spill] sm:$0xff]  ;;  %v6927_v51 = vsub.f32 1.0, %v6671_v12 }
 0xd6f   : > { %v6923_v16 = vsub.f32 1.0, %v6667_v59  ;;  %v7180_v4 = vmax.f32 %v6924_v54, 0.0  ;;  %v16084_v59 = vld [vmem:[#allocation162_spill] sm:$0xff]  ;;  %v7183_v10 = vmax.f32 %v6927_v51, 0.0 }
 0xd70   : > { %7746 = vadd.xlane.f32.xlu2 %v7745_v15  ;;  %v16079_v15 = vld [vmem:[#allocation139_spill] sm:$0xff] }
 0xd71   : > { %7743 = vadd.xlane.f32.xlu1 %v7742_v33  ;;  %v6414_v13 = vsub.f32 %v16079_v15, %v10188_v8  ;;  %v16080_v33 = vld [vmem:[#allocation111_spill] sm:$0xff]  ;;  %v7179_v18 = vmax.f32 %v6923_v16, 0.0  ;;  %v7436_v34 = vmul.f32 %v7180_v4, %v16082_v61 }
 0xd72   : > { %v7432_v17 = vmul.f32 %v7176_v55, %v16080_v33  ;;  %v16085_v16 = vld [vmem:[#allocation223_spill] sm:$0xff] }
 0xd73   : > { %v6670_v1 = vand.u32 2147483647, %v6414_v13  ;;  %v7772_v54 = vsel %vm3758_vm1, %v7436_v34, 0.0  ;;  %v6421_v33 = vsub.f32 %v16085_v16, %v10188_v8  ;;  %v16086_v4 = vld [vmem:[#allocation123_spill] sm:$0xff]  ;;  %v16093_v16 = vld [vmem:[#allocation110_spill] sm:$0xff] }
 0xd74   : > { %v7760_v20 = vsel %vm3758_vm1, %v7432_v17, 0.0  ;;  %v7439_v12 = vmul.f32 %v7183_v10, %v16086_v4  ;;  %v16090_v10 = vld [vmem:[#allocation214_spill] sm:$0xff] }
 0xd75   : > { %8415 = vadd.xlane.f32.xlu0 %v8414_v3  ;;  %v6418_v3 = vsub.f32 %v16081_v53, %v10188_v8  ;;  %v6926_v2 = vsub.f32 1.0, %v6670_v1  ;;  %v6677_v61 = vand.u32 2147483647, %v6421_v33 }
 0xd76   : > { %v7781_v34 = vsel %vm3758_vm1, %v7439_v12, 0.0 }
 0xd77   : > { %v6674_v42 = vand.u32 2147483647, %v6418_v3  ;;  %v7182_v19 = vmax.f32 %v6926_v2, 0.0  ;;  %v13506_v3 = vpop.permute.xlu1 %6358 }
 0xd78   : > { %7755 = vadd.xlane.f32.xlu2 %v7754_v29  ;;  %v16083_v29 = vld [vmem:[#allocation222_spill] sm:$0xff]  ;;  %16089 = vst [vmem:[#allocation88_spill] sm:$0xff] %v13506_v3 }
 0xd79   : > { %7752 = vadd.xlane.f32.xlu1 %v7751_v35  ;;  %v6417_v55 = vsub.f32 %v16083_v29, %v10188_v8  ;;  %v7435_v35 = vmul.f32 %v7179_v18, %v16084_v59  ;;  %v6930_v13 = vsub.f32 1.0, %v6674_v42  ;;  %v6424_v59 = vsub.f32 %v12603_v26, %v10188_v8 }
 0xd7b   : > { %v6673_v43 = vand.u32 2147483647, %v6417_v55  ;;  %v7769_v15 = vsel %vm3758_vm1, %v7435_v35, 0.0  ;;  %v7186_v51 = vmax.f32 %v6930_v13, 0.0  ;;  %v6933_v35 = vsub.f32 1.0, %v6677_v61  ;;  %v16094_v61 = vld [vmem:[#allocation218_spill] sm:$0xff] }
 0xd7c   : > { %v6680_v4 = vand.u32 2147483647, %v6424_v59 }
 0xd7d   : > { %v6929_v18 = vsub.f32 1.0, %v6673_v43  ;;  %v7189_v12 = vmax.f32 %v6933_v35, 0.0  ;;  %v16096_v35 = vld [vmem:[#allocation216_spill] sm:$0xff] }
 0xd7f   : > { %v7185_v2 = vmax.f32 %v6929_v18, 0.0  ;;  %v13517_v13 = vpop.permute.xlu1 %6370 }
 0xd80   : > { %7764 = vadd.xlane.f32.xlu2 %v7763_v56  ;;  %v16087_v56 = vld [vmem:[#allocation70_spill] sm:$0xff]  ;;  %16092 = vst [vmem:[#allocation36_spill] sm:$0xff] %v13517_v13 }
 0xd81   : > { %7761 = vadd.xlane.f32.xlu1 %v7760_v20  ;;  %v7438_v1 = vmul.f32 %v7182_v19, %v16087_v56  ;;  %v16088_v20 = vld [vmem:[#allocation224_spill] sm:$0xff]  ;;  %v16091_v19 = vld [vmem:[#allocation226_spill] sm:$0xff]  ;;  %v7441_v33 = vmul.f32 %v7185_v2, %v16093_v16 }
 0xd82   : > { %v6420_v53 = vsub.f32 %v16088_v20, %v10188_v8  ;;  %v6423_v43 = vsub.f32 %v16091_v19, %v10188_v8  ;;  %v6936_v20 = vsub.f32 1.0, %v6680_v4  ;;  %v16095_v2 = vld [vmem:[#allocation228_spill] sm:$0xff]  ;;  %v16112_v13 = vld [vmem:[#allocation94_spill] sm:$0xff] }
 0xd83   : > { %v7778_v55 = vsel %vm3758_vm1, %v7438_v1, 0.0  ;;  %v7787_v26 = vsel %vm3758_vm1, %v7441_v33, 0.0  ;;  %v16097_v33 = vld [vmem:[#allocation157_spill] sm:$0xff] }
 0xd84   : > { %v6676_v29 = vand.u32 2147483647, %v6420_v53  ;;  %v6679_v1 = vand.u32 2147483647, %v6423_v43  ;;  %v6427_v53 = vsub.f32 %v12512_v45, %v10188_v8 }
 0xd86   : > { %v6683_v19 = vand.u32 2147483647, %v6427_v53 }
 0xd88   : > { %7773 = vadd.xlane.f32.xlu2 %v7772_v54  ;;  %v7442_v54 = vmul.f32 %v7186_v51, %v16090_v10 }
 0xd89   : > { %7770 = vadd.xlane.f32.xlu1 %v7769_v15  ;;  %v6932_v15 = vsub.f32 1.0, %v6676_v29  ;;  %v6935_v29 = vsub.f32 1.0, %v6679_v1 }
 0xd8a   : > { %v7790_v56 = vsel %vm3758_vm1, %v7442_v54, 0.0  ;;  %v7192_v54 = vmax.f32 %v6936_v20, 0.0 }
 0xd8b   : > { %v13500_v17 = vpop.xlane.xlu2 %7653  ;;  %v7188_v18 = vmax.f32 %v6932_v15, 0.0  ;;  %v7191_v15 = vmax.f32 %v6935_v29, 0.0 }
 0xd8c   : > { %v7448_v4 = vmul.f32 %v7192_v54, %v16097_v33 }
 0xd8d   : > { %v7444_v10 = vmul.f32 %v7188_v18, %v16096_v35  ;;  %v16098_v18 = vld [vmem:[#allocation31_spill] sm:$0xff] }
 0xd8f   : > { %v7796_v45 = vsel %vm3758_vm1, %v7444_v10, 0.0 }
 0xd90   : > { %7782 = vadd.xlane.f32.xlu2 %v7781_v34  ;;  %v7445_v34 = vmul.f32 %v7189_v12, %v16094_v61  ;;  %v6939_v12 = vsub.f32 1.0, %v6683_v19  ;;  %v16099_v61 = vld [vmem:[#allocation17_spill] sm:$0xff] }
 0xd91   : > { %7779 = vadd.xlane.f32.xlu1 %v7778_v55  ;;  %v6426_v55 = vsub.f32 %v16095_v2, %v10188_v8 }
 0xd92   : > { %v7799_v43 = vsel %vm3758_vm1, %v7445_v34, 0.0  ;;  %v7447_v34 = vmul.f32 %v7191_v15, %v16099_v61  ;;  %v7195_v29 = vmax.f32 %v6939_v12, 0.0  ;;  %v6432_v15 = vsub.f32 %v12522_v50, %v10188_v8  ;;  %v16102_v50 = vld [vmem:[#allocation227_spill] sm:$0xff] }
 0xd93   : > { %v13512_v42 = vpop.xlane.xlu2 %7662  ;;  %v6682_v16 = vand.u32 2147483647, %v6426_v55  ;;  %v7808_v55 = vsel %vm3758_vm1, %v7448_v4, 0.0  ;;  %v16101_v4 = vld [vmem:[#allocation219_spill] sm:$0xff] }
 0xd94   : > { %v7805_v54 = vsel %vm3758_vm1, %v7447_v34, 0.0  ;;  %v6688_v34 = vand.u32 2147483647, %v6432_v15 }
 0xd95   : > { %v6938_v20 = vsub.f32 1.0, %v6682_v16  ;;  %v16100_v16 = vld [vmem:[#allocation47_spill] sm:$0xff] }
 0xd97   : > { %v7194_v10 = vmax.f32 %v6938_v20, 0.0 }
 0xd98   : > { %7791 = vadd.xlane.f32.xlu2 %v7790_v56  ;;  %v6430_v56 = vsub.f32 %v12516_v52, %v10188_v8  ;;  %v6433_v52 = vsub.f32 %v12518_v40, %v10188_v8 }
 0xd99   : > { %7788 = vadd.xlane.f32.xlu1 %v7787_v26  ;;  %v6429_v26 = vsub.f32 %v16098_v18, %v10188_v8 }
 0xd9a   : > { %v6686_v2 = vand.u32 2147483647, %v6430_v56  ;;  %v7450_v56 = vmul.f32 %v7194_v10, %v16101_v4  ;;  %v6689_v18 = vand.u32 2147483647, %v6433_v52  ;;  %v6944_v52 = vsub.f32 1.0, %v6688_v34 }
 0xd9b   : > { %v13524_v51 = vpop.xlane.xlu2 %7665  ;;  %v6685_v35 = vand.u32 2147483647, %v6429_v26 }
 0xd9c   : > { %v13529_v59 = vpop.xlane.xlu1 %7659  ;;  %v6942_v19 = vsub.f32 1.0, %v6686_v2  ;;  %v7814_v40 = vsel %vm3758_vm1, %v7450_v56, 0.0  ;;  %v6945_v2 = vsub.f32 1.0, %v6689_v18  ;;  %v7200_v56 = vmax.f32 %v6944_v52, 0.0 }
 0xd9d   : > { %v6941_v33 = vsub.f32 1.0, %v6685_v35 }
 0xd9e   : > { %v7198_v26 = vmax.f32 %v6942_v19, 0.0  ;;  %v16104_v19 = vld [vmem:[#allocation50_spill] sm:$0xff] }
 0xd9f   : > { %v7197_v61 = vmax.f32 %v6941_v33, 0.0  ;;  %v7201_v33 = vmax.f32 %v6945_v2, 0.0 }
 0xda0   : > { %7800 = vadd.xlane.f32.xlu2 %v7799_v43  ;;  %v7454_v35 = vmul.f32 %v7198_v26, %v16102_v50  ;;  %v16105_v26 = vld [vmem:[#allocation73_spill] sm:$0xff] }
 0xda1   : > { %7797 = vadd.xlane.f32.xlu1 %v7796_v45  ;;  %v7451_v45 = vmul.f32 %v7195_v29, %v16100_v16  ;;  %v6436_v29 = vsub.f32 %v12524_v44, %v10188_v8  ;;  %v6435_v16 = vsub.f32 %v16104_v19, %v10188_v8 }
 0xda2   : > { %v7826_v4 = vsel %vm3758_vm1, %v7454_v35, 0.0  ;;  %v16109_v35 = vld [vmem:[#allocation229_spill] sm:$0xff] }
 0xda3   : > { %v13537_v1 = vpop.xlane.xlu2 %7674  ;;  %v7817_v20 = vsel %vm3758_vm1, %v7451_v45, 0.0  ;;  %v6692_v15 = vand.u32 2147483647, %v6436_v29  ;;  %v6691_v18 = vand.u32 2147483647, %v6435_v16  ;;  %v7456_v52 = vmul.f32 %v7200_v56, %v16109_v35 }
 0xda4   : > { %v13541_v53 = vpop.xlane.xlu1 %7671 }
 0xda5   : > { %v6947_v29 = vsub.f32 1.0, %v6691_v18 }
 0xda7   : > { %v7203_v7 = vmax.f32 %v6947_v29, 0.0 }
 0xda8   : > { %7809 = vadd.xlane.f32.xlu2 %v7808_v55 }
 0xda9   : > { %7806 = vadd.xlane.f32.xlu1 %v7805_v54  ;;  %v16103_v54 = vld [vmem:[#allocation225_spill] sm:$0xff] }
 0xdaa   : > { %v7453_v10 = vmul.f32 %v7197_v61, %v16103_v54  ;;  %v6948_v61 = vsub.f32 1.0, %v6692_v15  ;;  %v16107_v54 = vld [vmem:[#allocation125_spill] sm:$0xff]  ;;  %v7832_v15 = vsel %vm3758_vm1, %v7456_v52, 0.0 }
 0xdab   : > { %v13548_v43 = vpop.xlane.xlu2 %7683  ;;  %v6438_v2 = vsub.f32 %v16107_v54, %v10188_v8 }
 0xdac   : > { %v13553_v12 = vpop.xlane.xlu1 %7680  ;;  %v7823_v44 = vsel %vm3758_vm1, %v7453_v10, 0.0 }
 0xdb0   : > { %7818 = vadd.xlane.f32.xlu2 %v7817_v20  ;;  %v6439_v20 = vsub.f32 %v16105_v26, %v10188_v8 }
 0xdb1   : > { %7815 = vadd.xlane.f32.xlu1 %v7814_v40  ;;  %v16106_v40 = vld [vmem:[#allocation74_spill] sm:$0xff] }
 0xdb2   : > { %v7457_v50 = vmul.f32 %v7201_v33, %v16106_v40  ;;  %v6695_v16 = vand.u32 2147483647, %v6439_v20  ;;  %v4321_v33 = vpop.f32.mrf.mxu0  ;;  %v16110_v40 = vld [vmem:[#allocation126_spill] sm:$0xff] }
 0xdb3   : > { %v13560_v55 = vpop.xlane.xlu2 %7692  ;;  %v6442_v54 = vsub.f32 %v16110_v40, %v10188_v8  ;;  %v16113_v20 = vld [vmem:[#allocation230_spill] sm:$0xff] }
 0xdb4   : > { %v13566_v45 = vpop.xlane.xlu1 %7689  ;;  %v7835_v10 = vsel %vm3758_vm1, %v7457_v50, 0.0  ;;  %v6951_v26 = vsub.f32 1.0, %v6695_v16  ;;  %v16114_v40 = vld [vmem:[#allocation58_spill] sm:$0xff] }
 0xdb5   : > { %v6698_v35 = vand.u32 2147483647, %v6442_v54 }
 0xdb6   : > { %v7207_v29 = vmax.f32 %v6951_v26, 0.0 }
 0xdb8   : > { %7827 = vadd.xlane.f32.xlu2 %v7826_v4  ;;  %v7204_v4 = vmax.f32 %v6948_v61, 0.0  ;;  %v6441_v61 = vsub.f32 %v16113_v20, %v10188_v8  ;;  %v7463_v3 = vmul.f32 %v7207_v29, %v16114_v40  ;;  %v16120_v40 = vld [vmem:[#allocation232_spill] sm:$0xff] }
 0xdb9   : > { %7824 = vadd.xlane.f32.xlu1 %v7823_v44  ;;  %v6694_v44 = vand.u32 2147483647, %v6438_v2  ;;  %v7459_v2 = vmul.f32 %v7203_v7, %v4321_v33  ;;  %v16117_v7 = vld [vmem:[#allocation112_spill] sm:$0xff] }
 0xdba   : > { %v7460_v49 = vmul.f32 %v7204_v4, %v16112_v13  ;;  %v6954_v13 = vsub.f32 1.0, %v6698_v35  ;;  %v16115_v4 = vld [vmem:[#allocation231_spill] sm:$0xff]  ;;  %v6444_v26 = vsub.f32 %v16117_v7, %v10188_v8 }
 0xdbb   : > { %v13572_v34 = vpop.xlane.xlu2 %7701  ;;  %v6950_v56 = vsub.f32 1.0, %v6694_v44  ;;  %v6445_v44 = vsub.f32 %v16115_v4, %v10188_v8  ;;  %v6448_v4 = vsub.f32 %v16120_v40, %v10188_v8 }
 0xdbc   : > { %v13577_v19 = vpop.xlane.xlu1 %7698  ;;  %v7844_v52 = vsel %vm3758_vm1, %v7460_v49, 0.0  ;;  %v16119_v49 = vld [vmem:[#allocation96_spill] sm:$0xff] }
 0xdbd   : > { %16108 = vst [vmem:[#allocation86_spill] sm:$0xff] %v13577_v19  ;;  %v7206_v16 = vmax.f32 %v6950_v56, 0.0 }
 0xdbf   : > { %v7462_v56 = vmul.f32 %v7206_v16, %v16119_v49  ;;  %v16122_v16 = vld [vmem:[#allocation18_spill] sm:$0xff] }
 0xdc0   : > { %7836 = vadd.xlane.f32.xlu2 %v7835_v10  ;;  %v6697_v10 = vand.u32 2147483647, %v6441_v61  ;;  %v7210_v61 = vmax.f32 %v6954_v13, 0.0  ;;  %v6447_v13 = vsub.f32 %v16122_v16, %v10188_v8  ;;  %v16126_v16 = vld [vmem:[#allocation99_spill] sm:$0xff] }
 0xdc1   : > { %7833 = vadd.xlane.f32.xlu1 %v7832_v15  ;;  %v7841_v15 = vsel %vm3758_vm1, %v7459_v2, 0.0  ;;  %v7853_v2 = vsel %vm3758_vm1, %v7463_v3, 0.0  ;;  %v7850_v35 = vsel %vm3758_vm1, %v7462_v56, 0.0  ;;  %v16123_v3 = vld [vmem:[#allocation59_spill] sm:$0xff] }
 0xdc2   : > { %v6953_v33 = vsub.f32 1.0, %v6697_v10  ;;  %v16121_v10 = vld [vmem:[#allocation39_spill] sm:$0xff] }
 0xdc3   : > { %v13584_v18 = vpop.xlane.xlu2 %7710  ;;  %v7466_v57 = vmul.f32 %v7210_v61, %v16121_v10  ;;  %v16124_v61 = vld [vmem:[#allocation233_spill] sm:$0xff] }
 0xdc4   : > { %16111 = vst [vmem:[#allocation69_spill] sm:$0xff] %v13584_v18  ;;  %v13589_v50 = vpop.xlane.xlu1 %7707  ;;  %v7209_v29 = vmax.f32 %v6953_v33, 0.0  ;;  %v6704_v33 = vand.u32 2147483647, %v6448_v4 }
 0xdc5   : > { %v7862_v56 = vsel %vm3758_vm1, %v7466_v57, 0.0 }
 0xdc6   : > { %v6960_v40 = vsub.f32 1.0, %v6704_v33 }
 0xdc8   : > { %7845 = vadd.xlane.f32.xlu2 %v7844_v52  ;;  %v6701_v52 = vand.u32 2147483647, %v6445_v44 }
 0xdc9   : > { %7842 = vadd.xlane.f32.xlu1 %v7841_v15  ;;  %v6700_v15 = vand.u32 2147483647, %v6444_v26  ;;  %v7465_v26 = vmul.f32 %v7209_v29, %v16123_v3 }
 0xdca   : > { %v6957_v6 = vsub.f32 1.0, %v6701_v52 }
 0xdcb   : > { %v13596_v20 = vpop.xlane.xlu2 %7719  ;;  %v6956_v32 = vsub.f32 1.0, %v6700_v15  ;;  %v7859_v52 = vsel %vm3758_vm1, %v7465_v26, 0.0  ;;  %v6451_v15 = vsub.f32 %v16124_v61, %v10188_v8 }
 0xdcc   : > { %16116 = vst [vmem:[#allocation38_spill] sm:$0xff] %v13596_v20  ;;  %v13600_v54 = vpop.xlane.xlu1 %7716  ;;  %v7213_v49 = vmax.f32 %v6957_v6, 0.0  ;;  %v16128_v6 = vld [vmem:[#allocation234_spill] sm:$0xff] }
 0xdcd   : > { %16118 = vst [vmem:[#allocation13_spill] sm:$0xff] %v13600_v54  ;;  %v6450_v57 = vsub.f32 %v16128_v6, %v10188_v8  ;;  %v6707_v3 = vand.u32 2147483647, %v6451_v15  ;;  %v16132_v6 = vld [vmem:[#allocation235_spill] sm:$0xff] }
 0xdce   : > { %v7469_v60 = vmul.f32 %v7213_v49, %v16126_v16  ;;  %v16129_v49 = vld [vmem:[#allocation140_spill] sm:$0xff] }
 0xdcf   : > { %v6454_v61 = vsub.f32 %v16129_v49, %v10188_v8 }
 0xdd0   : > { %7854 = vadd.xlane.f32.xlu2 %v7853_v2  ;;  %v7212_v2 = vmax.f32 %v6956_v32, 0.0  ;;  %v7871_v26 = vsel %vm3758_vm1, %v7469_v60, 0.0  ;;  %v16134_v60 = vld [vmem:[#allocation147_spill] sm:$0xff] }
 0xdd1   : > { %7851 = vadd.xlane.f32.xlu1 %v7850_v35  ;;  %v6703_v35 = vand.u32 2147483647, %v6447_v13  ;;  %v7216_v13 = vmax.f32 %v6960_v40, 0.0  ;;  %v6453_v40 = vsub.f32 %v16132_v6, %v10188_v8 }
 0xdd2   : > { %v7468_v29 = vmul.f32 %v7212_v2, %v16127_v30  ;;  %v6963_v30 = vsub.f32 1.0, %v6707_v3 }
 0xdd3   : > { %v13607_v7 = vpop.xlane.xlu2 %7728  ;;  %v6959_v4 = vsub.f32 1.0, %v6703_v35  ;;  %v16131_v35 = vld [vmem:[#allocation106_spill] sm:$0xff] }
 0xdd4   : > { %v13612_v44 = vpop.xlane.xlu1 %7725  ;;  %v7472_v16 = vmul.f32 %v7216_v13, %v16131_v35  ;;  %v16135_v13 = vld [vmem:[#allocation76_spill] sm:$0xff] }
 0xdd5   : > { %v7215_v33 = vmax.f32 %v6959_v4, 0.0  ;;  %v6457_v35 = vsub.f32 %v16135_v13, %v10188_v8  ;;  %v16140_v13 = vld [vmem:[#allocation42_spill] sm:$0xff] }
 0xdd7   : > { %v7471_v4 = vmul.f32 %v7215_v33, %v16134_v60  ;;  %v16138_v33 = vld [vmem:[#allocation236_spill] sm:$0xff]  ;;  %v6713_v60 = vand.u32 2147483647, %v6457_v35 }
 0xdd8   : > { %7863 = vadd.xlane.f32.xlu2 %v7862_v56  ;;  %v6706_v56 = vand.u32 2147483647, %v6450_v57  ;;  %v6710_v57 = vand.u32 2147483647, %v6454_v61  ;;  %v6456_v61 = vsub.f32 %v16138_v33, %v10188_v8 }
 0xdd9   : > { %7860 = vadd.xlane.f32.xlu1 %v7859_v52  ;;  %v7868_v52 = vsel %vm3758_vm1, %v7468_v29, 0.0  ;;  %v7880_v29 = vsel %vm3758_vm1, %v7472_v16, 0.0  ;;  %v7877_v3 = vsel %vm3758_vm1, %v7471_v4, 0.0  ;;  %v16139_v16 = vld [vmem:[#allocation117_spill] sm:$0xff] }
 0xdda   : > { %v6962_v15 = vsub.f32 1.0, %v6706_v56  ;;  %v6966_v49 = vsub.f32 1.0, %v6710_v57  ;;  %v16137_v56 = vld [vmem:[#allocation136_spill] sm:$0xff] }
 0xddb   : > { %v13619_v10 = vpop.xlane.xlu2 %7737 }
 0xddc   : > { %16125 = vst [vmem:[#allocation93_spill] sm:$0xff] %v13619_v10  ;;  %v13625_v32 = vpop.xlane.xlu1 %7734  ;;  %v7218_v63 = vmax.f32 %v6962_v15, 0.0  ;;  %v7222_v15 = vmax.f32 %v6966_v49, 0.0 }
 0xde0   : > { %7872 = vadd.xlane.f32.xlu2 %v7871_v26  ;;  %v7219_v26 = vmax.f32 %v6963_v30, 0.0 }
 0xde1   : > { %7869 = vadd.xlane.f32.xlu1 %v7868_v52  ;;  %v6709_v52 = vand.u32 2147483647, %v6453_v40  ;;  %v7474_v40 = vmul.f32 %v7218_v63, %v16139_v16  ;;  %v16143_v63 = vld [vmem:[#allocation160_spill] sm:$0xff] }
 0xde2   : > { %v7475_v5 = vmul.f32 %v7219_v26, %v16137_v56  ;;  %v7478_v26 = vmul.f32 %v7222_v15, %v16140_v13  ;;  %v16141_v56 = vld [vmem:[#allocation190_spill] sm:$0xff]  ;;  %v6459_v49 = vsub.f32 %v16143_v63, %v10188_v8 }
 0xde3   : > { %v13631_v2 = vpop.xlane.xlu2 %7746  ;;  %v6965_v27 = vsub.f32 1.0, %v6709_v52  ;;  %v6969_v52 = vsub.f32 1.0, %v6713_v60  ;;  %v6460_v33 = vsub.f32 %v16141_v56, %v10188_v8 }
 0xde4   : > { %16130 = vst [vmem:[#allocation90_spill] sm:$0xff] %v13631_v2  ;;  %v13636_v24 = vpop.xlane.xlu1 %7743  ;;  %v7889_v4 = vsel %vm3758_vm1, %v7475_v5, 0.0  ;;  %v7898_v13 = vsel %vm3758_vm1, %v7478_v26, 0.0  ;;  %v6715_v56 = vand.u32 2147483647, %v6459_v49  ;;  %v16155_v2 = vld [vmem:[#allocation238_spill] sm:$0xff] }
 0xde5   : > { %16133 = vst [vmem:[#allocation95_spill] sm:$0xff] %v13636_v24  ;;  %v7221_v57 = vmax.f32 %v6965_v27, 0.0  ;;  %v16145_v27 = vld [vmem:[#allocation65_spill] sm:$0xff]  ;;  %v7225_v60 = vmax.f32 %v6969_v52, 0.0  ;;  %v16151_v52 = vld [vmem:[#allocation167_spill] sm:$0xff] }
 0xde6   : > { %v6971_v26 = vsub.f32 1.0, %v6715_v56 }
 0xde7   : > { %v7477_v5 = vmul.f32 %v7221_v57, %v16145_v27  ;;  %v6463_v57 = vsub.f32 %v16148_v28, %v10188_v8 }
 0xde8   : > { %7881 = vadd.xlane.f32.xlu2 %v7880_v29  ;;  %v6712_v29 = vand.u32 2147483647, %v6456_v61  ;;  %v16146_v61 = vld [vmem:[#allocation32_spill] sm:$0xff] }
 0xde9   : > { %7878 = vadd.xlane.f32.xlu1 %v7877_v3  ;;  %v7886_v3 = vsel %vm3758_vm1, %v7474_v40, 0.0  ;;  %v6469_v40 = vsub.f32 %v16146_v61, %v10188_v8  ;;  %v7895_v63 = vsel %vm3758_vm1, %v7477_v5, 0.0  ;;  %v16149_v61 = vld [vmem:[#allocation237_spill] sm:$0xff] }
 0xdea   : > { %v6968_v35 = vsub.f32 1.0, %v6712_v29  ;;  %v6462_v0 = vsub.f32 %v16149_v61, %v10188_v8 }
 0xdeb   : > { %v13643_v6 = vpop.xlane.xlu2 %7755  ;;  %v6725_v29 = vand.u32 2147483647, %v6469_v40 }
 0xdec   : > { %16136 = vst [vmem:[#allocation98_spill] sm:$0xff] %v13643_v6  ;;  %v13648_v30 = vpop.xlane.xlu1 %7752  ;;  %v7224_v39 = vmax.f32 %v6968_v35, 0.0  ;;  %v16153_v35 = vld [vmem:[#allocation165_spill] sm:$0xff]  ;;  %v6718_v11 = vand.u32 2147483647, %v6462_v0 }
 0xded   : > { %v6981_v5 = vsub.f32 1.0, %v6725_v29 }
 0xdef   : > { %v7237_v61 = vmax.f32 %v6981_v5, 0.0 }
 0xdf0   : > { %7890 = vadd.xlane.f32.xlu2 %v7889_v4  ;;  %v16147_v4 = vld [vmem:[#allocation52_spill] sm:$0xff] }
 0xdf1   : > { %7887 = vadd.xlane.f32.xlu1 %v7886_v3  ;;  %v6474_v15 = vsub.f32 %v16147_v4, %v10188_v8  ;;  %v6716_v3 = vand.u32 2147483647, %v6460_v33  ;;  %v7481_v33 = vmul.f32 %v7225_v60, %v16151_v52  ;;  %v16154_v60 = vld [vmem:[#allocation113_spill] sm:$0xff] }
 0xdf2   : > { %v6484_v56 = vsub.f32 %v16154_v60, %v10188_v8 }
 0xdf3   : > { %v13656_v38 = vpop.xlane.xlu2 %7764  ;;  %v6730_v27 = vand.u32 2147483647, %v6474_v15  ;;  %v6972_v31 = vsub.f32 1.0, %v6716_v3  ;;  %v7907_v28 = vsel %vm3758_vm1, %v7481_v33, 0.0  ;;  %v7227_v15 = vmax.f32 %v6971_v26, 0.0  ;;  %v16158_v33 = vld [vmem:[#allocation174_spill] sm:$0xff] }
 0xdf4   : > { %16142 = vst [vmem:[#allocation124_spill] sm:$0xff] %v13656_v38  ;;  %v13660_v16 = vpop.xlane.xlu1 %7761  ;;  %v13693_v5 = vand.u32 2147483647, %v6484_v56 }
 0xdf5   : > { %16144 = vst [vmem:[#allocation215_spill] sm:$0xff] %v13660_v16  ;;  %v6986_v40 = vsub.f32 1.0, %v6730_v27  ;;  %v7228_v37 = vmax.f32 %v6972_v31, 0.0  ;;  %v16156_v31 = vld [vmem:[#allocation239_spill] sm:$0xff]  ;;  %v16174_v16 = vld [vmem:[#allocation169_spill] sm:$0xff] }
 0xdf6   : > { %v6465_v0 = vsub.f32 %v16156_v31, %v10188_v8  ;;  %16161 = vst [vmem:[#allocation152_spill] sm:$0xff] %v13693_v5  ;;  %v16173_v5 = vld [vmem:[#allocation243_spill] sm:$0xff] }
 0xdf7   : > { %v7242_v29 = vmax.f32 %v6986_v40, 0.0  ;;  %v7484_v26 = vmul.f32 %v7228_v37, %v16158_v33  ;;  %v16164_v33 = vld [vmem:[#allocation80_spill] sm:$0xff] }
 0xdf8   : > { %7899 = vadd.xlane.f32.xlu2 %v7898_v13  ;;  %v7480_v13 = vmul.f32 %v7224_v39, %v16153_v35  ;;  %v6466_v39 = vsub.f32 %v16155_v2, %v10188_v8  ;;  %v16159_v35 = vld [vmem:[#allocation14_spill] sm:$0xff]  ;;  %v16163_v2 = vld [vmem:[#allocation188_spill] sm:$0xff]  ;;  %v6721_v38 = vand.u32 2147483647, %v6465_v0 }
 0xdf9   : > { %7896 = vadd.xlane.f32.xlu1 %v7895_v63  ;;  %v6719_v63 = vand.u32 2147483647, %v6463_v57  ;;  %v6974_v57 = vsub.f32 1.0, %v6718_v11  ;;  %v7498_v40 = vmul.f32 %v7242_v29, %v16163_v2  ;;  %v7916_v31 = vsel %vm3758_vm1, %v7484_v26, 0.0 }
 0xdfa   : > { %v7904_v3 = vsel %vm3758_vm1, %v7480_v13, 0.0  ;;  %v7483_v13 = vmul.f32 %v7227_v15, %v16159_v35 }
 0xdfb   : > { %v13673_v4 = vpop.xlane.xlu2 %7773  ;;  %v6975_v52 = vsub.f32 1.0, %v6719_v63  ;;  %v7230_v11 = vmax.f32 %v6974_v57, 0.0  ;;  %v16167_v57 = vld [vmem:[#allocation25_spill] sm:$0xff]  ;;  %v13710_v26 = vsel %vm3758_vm1, %v7498_v40, 0.0 }
 0xdfc   : > { %16150 = vst [vmem:[#allocation100_spill] sm:$0xff] %v13673_v4  ;;  %v13676_v49 = vpop.xlane.xlu1 %7770  ;;  %v7913_v19 = vsel %vm3758_vm1, %v7483_v13, 0.0 }
 0xdfd   : > { %16152 = vst [vmem:[#allocation189_spill] sm:$0xff] %v13676_v49  ;;  %v7231_v60 = vmax.f32 %v6975_v52, 0.0  ;;  %v6722_v49 = vand.u32 2147483647, %v6466_v39  ;;  %v6977_v39 = vsub.f32 1.0, %v6721_v38  ;;  %v7486_v0 = vmul.f32 %v7230_v11, %v16167_v57 }
 0xdfe   : > { %16168 = vst [vmem:[#allocation220_spill] sm:$0xff] %v13710_v26 }
 0xdff   : > { %v6978_v15 = vsub.f32 1.0, %v6722_v49  ;;  %v7487_v56 = vmul.f32 %v7231_v60, %v16164_v33  ;;  %v16170_v49 = vld [vmem:[#allocation241_spill] sm:$0xff]  ;;  %v16171_v60 = vld [vmem:[#allocation244_spill] sm:$0xff]  ;;  %v7233_v37 = vmax.f32 %v6977_v39, 0.0  ;;  %v7922_v24 = vsel %vm3758_vm1, %v7486_v0, 0.0 }
 0xe00   : > { %7908 = vadd.xlane.f32.xlu2 %v7907_v28  ;;  %v6478_v2 = vsub.f32 %v16171_v60, %v10188_v8  ;;  %v16176_v39 = vld [vmem:[#allocation268_spill] sm:$0xff] }
 0xe01   : > { %7905 = vadd.xlane.f32.xlu1 %v7904_v3  ;;  %v16162_v3 = vld [vmem:[#allocation195_spill] sm:$0xff]  ;;  %v7234_v57 = vmax.f32 %v6978_v15, 0.0  ;;  %v16175_v15 = vld [vmem:[#allocation137_spill] sm:$0xff] }
 0xe02   : > { %v7493_v63 = vmul.f32 %v7237_v61, %v16162_v3  ;;  %v16165_v61 = vld [vmem:[#allocation240_spill] sm:$0xff]  ;;  %v6471_v3 = vsub.f32 %v16170_v49, %v10188_v8  ;;  %v7925_v49 = vsel %vm3758_vm1, %v7487_v56, 0.0 }
 0xe03   : > { %v13687_v27 = vpop.xlane.xlu2 %7782  ;;  %v6468_v52 = vsub.f32 %v16165_v61, %v10188_v8 }
 0xe04   : > { %16157 = vst [vmem:[#allocation135_spill] sm:$0xff] %v13687_v27  ;;  %v13691_v28 = vpop.xlane.xlu1 %7779  ;;  %v13702_v35 = vsel %vm3758_vm1, %v7493_v63, 0.0  ;;  %v6472_v63 = vsub.f32 %v12700_v36, %v10188_v8  ;;  %v6734_v27 = vand.u32 2147483647, %v6478_v2 }
 0xe05   : > { %16160 = vst [vmem:[#allocation217_spill] sm:$0xff] %v13691_v28  ;;  %v6724_v60 = vand.u32 2147483647, %v6468_v52  ;;  %v16180_v52 = vld [vmem:[#allocation40_spill] sm:$0xff] }
 0xe06   : > { %v6728_v20 = vand.u32 2147483647, %v6472_v63  ;;  %v7490_v28 = vmul.f32 %v7234_v57, %v16180_v52  ;;  %v16184_v57 = vld [vmem:[#allocation246_spill] sm:$0xff] }
 0xe07   : > { %v6980_v56 = vsub.f32 1.0, %v6724_v60 }
 0xe08   : > { %7917 = vadd.xlane.f32.xlu2 %v7916_v31  ;;  %v6984_v4 = vsub.f32 1.0, %v6728_v20  ;;  %v16186_v20 = vld [vmem:[#allocation300_spill] sm:$0xff] }
 0xe09   : > { %7914 = vadd.xlane.f32.xlu1 %v7913_v19  ;;  %v16169_v19 = vld [vmem:[#allocation11_spill] sm:$0xff]  ;;  %v7236_v2 = vmax.f32 %v6980_v56, 0.0 }
 0xe0a   : > { %v13713_v13 = vadd.s32 4294967288, %v16169_v19  ;;  %v13724_v31 = vadd.s32 4294967256, %v16169_v19  ;;  %v13727_v40 = vadd.s32 4294967272, %v16169_v19  ;;  %v13730_v11 = vadd.s32 4294967248, %v16169_v19 }
 0xe0b   : > { %v13706_v29 = vpop.xlane.xlu2 %7791  ;;  %v13733_v33 = vadd.s32 4294967264, %v16169_v19  ;;  %v13736_v61 = vadd.s32 4294967240, %v16169_v19  ;;  %v13739_v36 = vadd.s32 4294967280, %v16169_v19  ;;  %v7240_v60 = vmax.f32 %v6984_v4, 0.0 }
 0xe0c   : > { %16166 = vst [vmem:[#allocation158_spill] sm:$0xff] %v13706_v29  ;;  %v13721_v38 = vpop.xlane.xlu1 %7788  ;;  %v6475_v29 = vsub.f32 %v16173_v5, %v10188_v8  ;;  %v8678_v26 = vperm.slane %v12877_v41, %v13713_v13  ;;  %v16181_v5 = vld [vmem:[#allocation181_spill] sm:$0xff] }
 0xe0d   : > { %16172 = vst [vmem:[#allocation139_spill] sm:$0xff] %v13721_v38  ;;  %v6727_v38 = vand.u32 2147483647, %v6471_v3  ;;  %v6990_v3 = vsub.f32 1.0, %v6734_v27 }
 0xe0e   : > { %v6731_v6 = vand.u32 2147483647, %v6475_v29  ;;  %v7934_v29 = vsel %vm3758_vm1, %v7490_v28, 0.0 }
 0xe0f   : > { %v6983_v18 = vsub.f32 1.0, %v6727_v38  ;;  %v7246_v25 = vmax.f32 %v6990_v3, 0.0  ;;  %v16190_v38 = vld [vmem:[#allocation64_spill] sm:$0xff] }
 0xe10   : > { %7926 = vadd.xlane.f32.xlu2 %v7925_v49  ;;  %v16179_v49 = vld [vmem:[#allocation245_spill] sm:$0xff]  ;;  %v6987_v63 = vsub.f32 1.0, %v6731_v6  ;;  %v16191_v6 = vld [vmem:[#allocation192_spill] sm:$0xff] }
 0xe11   : > { %7923 = vadd.xlane.f32.xlu1 %v7922_v24  ;;  %v6477_v10 = vsub.f32 %v16179_v49, %v10188_v8  ;;  %v7489_v24 = vmul.f32 %v7233_v37, %v16181_v5  ;;  %v6481_v37 = vsub.f32 %v16184_v57, %v10188_v8  ;;  %v7239_v49 = vmax.f32 %v6983_v18, 0.0  ;;  %v16187_v18 = vld [vmem:[#allocation247_spill] sm:$0xff] }
 0xe12   : > { %v8676_v57 = vperm.slane %v13500_v17, %v16169_v19  ;;  %v6480_v4 = vsub.f32 %v16187_v18, %v10188_v8  ;;  %v7243_v3 = vmax.f32 %v6987_v63, 0.0  ;;  %v7502_v58 = vmul.f32 %v7246_v25, %v16191_v6 }
 0xe13   : > { %v13763_v54 = vpop.xlane.xlu2 %7800  ;;  %v6733_v41 = vand.u32 2147483647, %v6477_v10  ;;  %v7931_v62 = vsel %vm3758_vm1, %v7489_v24, 0.0  ;;  %v6737_v27 = vand.u32 2147483647, %v6481_v37  ;;  %v8682_v10 = vperm.slane %v13529_v59, %v13739_v36 }
 0xe14   : > { %v13769_v0 = vpop.xlane.xlu1 %7797  ;;  %v7495_v18 = vmul.f32 %v7239_v49, %v16190_v38  ;;  %v8706_v63 = vperm.slane %v13553_v12, %v13713_v13  ;;  %v8806_v25 = vperm.slane %v13171_v21, %v13730_v11 }
 0xe15   : > { %v6989_v28 = vsub.f32 1.0, %v6733_v41  ;;  %v16189_v41 = vld [vmem:[#allocation186_spill] sm:$0xff]  ;;  %v6993_v52 = vsub.f32 1.0, %v6737_v27  ;;  %v16193_v27 = vld [vmem:[#allocation119_spill] sm:$0xff] }
 0xe16   : > { %v7496_v5 = vmul.f32 %v7240_v60, %v16189_v41  ;;  %v8800_v60 = vperm.slane %v13164_v9, %v13727_v40  ;;  %v7499_v38 = vmul.f32 %v7243_v3, %v16193_v27  ;;  %v7949_v6 = vsel %vm3758_vm1, %v7495_v18, 0.0 }
 0xe17   : > { %v7245_v56 = vmax.f32 %v6989_v28, 0.0  ;;  %v8690_v28 = vperm.slane %v13524_v51, %v13733_v33  ;;  %v13834_v3 = vsel %vm3758_vm1, %v7502_v58, 0.0 }
 0xe18   : > { %7935 = vadd.xlane.f32.xlu2 %v7934_v29  ;;  %v16188_v29 = vld [vmem:[#allocation184_spill] sm:$0xff]  ;;  %v7961_v18 = vsel %vm3758_vm1, %v7499_v38, 0.0  ;;  %v16198_v38 = vperm.slane %v12934_v22, %v13727_v40 }
 0xe19   : > { %7932 = vadd.xlane.f32.xlu1 %v7931_v62  ;;  %v7492_v59 = vmul.f32 %v7236_v2, %v16188_v29  ;;  %v8680_v62 = vsel %vm8679_vm2, %v8678_v26, %v8676_v57  ;;  %v16192_v2 = vld [vmem:[#allocation249_spill] sm:$0xff]  ;;  %v6736_v26 = vand.u32 2147483647, %v6480_v4  ;;  %v8686_v57 = vperm.slane %v13512_v42, %v13727_v40 }
 0xe1a   : > { %v8684_v17 = vsel %vm8683_vm3, %v8682_v10, %v8680_v62  ;;  %v6483_v29 = vsub.f32 %v16192_v2, %v10188_v8  ;;  %v7952_v10 = vsel %vm3758_vm1, %v7496_v5, 0.0  ;;  %v7249_v42 = vmax.f32 %v6993_v52, 0.0  ;;  %v16195_v62 = vld [vmem:[#allocation49_spill] sm:$0xff] }
 0xe1b   : > { %v13801_v24 = vpop.xlane.xlu2 %7809  ;;  %v7940_v49 = vsel %vm3758_vm1, %v7492_v59, 0.0  ;;  %v8688_v12 = vsel %vm8687_vm4, %v8686_v57, %v8684_v17  ;;  %v16194_v4 = vperm.slane %v16175_v15, %v16169_v19  ;;  %v8708_v5 = vperm.slane %v13548_v43, %v13739_v36 }
 0xe1c   : > { %v13805_v37 = vpop.xlane.xlu1 %7806  ;;  %v13836_v17 = vand.u32 2147483647, %v6483_v29  ;;  %v7501_v52 = vmul.f32 %v7245_v56, %v16195_v62  ;;  %v8692_v51 = vsel %vm8691_vm5, %v8690_v28, %v8688_v12  ;;  %v8698_v15 = vperm.slane %v13541_v53, %v13730_v11  ;;  %v16201_v62 = vld [vmem:[#allocation69_spill] sm:$0xff] }
 0xe1d   : > { %v8707_v59 = vsel %vm8679_vm2, %v8706_v63, %v16194_v4  ;;  %v8712_v63 = vperm.slane %v13566_v45, %v13733_v33  ;;  %v8720_v43 = vperm.slane %v13572_v34, %v16169_v19  ;;  %v8723_v2 = vperm.slane %v13589_v50, %v13739_v36 }
 0xe1e   : > { %v8709_v58 = vsel %vm8683_vm3, %v8708_v5, %v8707_v59  ;;  %v8736_v53 = vperm.slane %v13607_v7, %v13713_v13  ;;  %v8735_v29 = vperm.slane %v13612_v44, %v16169_v19  ;;  %v16197_v34 = vperm.slane %v16174_v16, %v13724_v31 }
 0xe1f   : > { %v13871_v50 = vsel %vm3758_vm1, %v7501_v52, 0.0  ;;  %v8702_v7 = vperm.slane %v13537_v1, %v13736_v61  ;;  %v8711_v12 = vsel %vm8687_vm4, %v16198_v38, %v8709_v58  ;;  %v16199_v28 = vperm.slane %v16176_v39, %v13713_v13  ;;  %v16202_v52 = vld [vmem:[#allocation217_spill] sm:$0xff] }
 0xe20   : > { %7944 = vadd.xlane.f32.xlu2 %v13702_v35  ;;  %v6992_v35 = vsub.f32 1.0, %v6736_v26  ;;  %v16196_v26 = vld [vmem:[#allocation28_spill] sm:$0xff]  ;;  %v8696_v27 = vsel %vm8695_vm6, %v16197_v34, %v8692_v51  ;;  %v8713_v16 = vsel %vm8691_vm5, %v8712_v63, %v8711_v12  ;;  %v8751_v1 = vperm.slane %v13648_v30, %v13713_v13  ;;  %v16209_v12 = vld [vmem:[#allocation98_spill] sm:$0xff] }
 0xe21   : > { %7941 = vadd.xlane.f32.xlu1 %v7940_v49  ;;  %v13861_v57 = vmul.f32 %v7249_v42, %v16196_v26  ;;  %v6995_v49 = vsub.f32 1.0, %v13836_v17  ;;  %v8700_v44 = vsel %vm8699_vm7, %v8698_v15, %v8696_v27  ;;  %v8714_v42 = vperm.slane %v13560_v55, %v13724_v31  ;;  %v16200_v55 = vld [vmem:[#allocation100_spill] sm:$0xff]  ;;  %v16203_v15 = vld [vmem:[#allocation250_spill] sm:$0xff] }
 0xe22   : > { %v13864_v45 = vmax.f32 %v6992_v35, 0.0  ;;  %v8722_v4 = vsel %vm8679_vm2, %v16199_v28, %v8720_v43  ;;  %v8737_v22 = vsel %vm8679_vm2, %v8736_v53, %v8735_v29  ;;  %v8740_v35 = vperm.slane %v13625_v32, %v13727_v40  ;;  %v16204_v32 = vld [vmem:[#allocation19_spill] sm:$0xff]  ;;  %v16205_v29 = vld [vmem:[#allocation13_spill] sm:$0xff]  ;;  %v16207_v34 = vld [vmem:[#allocation56_spill] sm:$0xff] }
 0xe23   : > { %v13844_v41 = vpop.xlane.xlu2 %7818  ;;  %v8724_v59 = vsel %vm8683_vm3, %v8723_v2, %v8722_v4  ;;  %v8765_v5 = vperm.slane %v16200_v55, %v16169_v19  ;;  %v8725_v39 = vperm.slane %v16201_v62, %v13727_v40  ;;  %v8768_v51 = vperm.slane %v16202_v52, %v13739_v36  ;;  %v16211_v4 = vld [vmem:[#allocation93_spill] sm:$0xff]  ;;  %v16212_v55 = vld [vmem:[#allocation270_spill] sm:$0xff]  ;;  %v16245_v17 = vld [vmem:[#allocation252_spill] sm:$0xff] }
 0xe24   : > { %v13852_v56 = vpop.xlane.xlu1 %7815  ;;  %v8781_v30 = vperm.slane %v13763_v54, %v13713_v13  ;;  %v6486_v58 = vsub.f32 %v16203_v15, %v10188_v8  ;;  %v6487_v63 = vsub.f32 %v16204_v32, %v10188_v8  ;;  %v8715_v43 = vsel %vm8695_vm6, %v8714_v42, %v8713_v16  ;;  %v16246_v15 = vld [vmem:[#allocation128_spill] sm:$0xff] }
 0xe25   : > { %v8726_v53 = vsel %vm8687_vm4, %v8725_v39, %v8724_v59  ;;  %v8729_v54 = vperm.slane %v16205_v29, %v13724_v31  ;;  %v16208_v27 = vperm.slane %v16207_v34, %v16169_v19  ;;  %v8753_v42 = vperm.slane %v16209_v12, %v13739_v36  ;;  %v16214_v39 = vld [vmem:[#allocation215_spill] sm:$0xff] }
 0xe26   : > { %v16210_v16 = vperm.slane %v16186_v20, %v13713_v13  ;;  %v8742_v59 = vperm.slane %v16211_v4, %v13733_v33  ;;  %v16213_v62 = vperm.slane %v16212_v55, %v13733_v33  ;;  %v8757_v52 = vperm.slane %v16214_v39, %v13733_v33  ;;  %v16215_v29 = vld [vmem:[#allocation135_spill] sm:$0xff]  ;;  %v16227_v39 = vld [vmem:[#allocation85_spill] sm:$0xff] }
 0xe27   : > { %v8752_v38 = vsel %vm8679_vm2, %v8751_v1, %v16208_v27  ;;  %v16220_v12 = vperm.slane %v13111_v47, %v13739_v36  ;;  %v6742_v21 = vand.u32 2147483647, %v6486_v58  ;;  %v6489_v58 = vsub.f32 %v16246_v15, %v10188_v8 }
 0xe28   : > { %7953 = vadd.xlane.f32.xlu2 %v7952_v10  ;;  %v8780_v10 = vperm.slane %v13769_v0, %v16169_v19  ;;  %v16206_v0 = vperm.slane %v16182_v14, %v13739_v36  ;;  %v8767_v28 = vsel %vm8679_vm2, %v16210_v16, %v8765_v5  ;;  %v8728_v20 = vsel %vm8691_vm5, %v16213_v62, %v8726_v53 }
 0xe29   : > { %7950 = vadd.xlane.f32.xlu1 %v7949_v6  ;;  %v13908_v6 = vsel %vm8703_vm8, %v8702_v7, %v8700_v44  ;;  %v8754_v5 = vsel %vm8683_vm3, %v8753_v42, %v8752_v38  ;;  %v8730_v34 = vsel %vm8695_vm6, %v8729_v54, %v8728_v20  ;;  %v16219_v38 = vld [vmem:[#allocation139_spill] sm:$0xff]  ;;  %v16222_v54 = vld [vmem:[#allocation220_spill] sm:$0xff]  ;;  %v8787_v62 = vperm.slane %v13801_v24, %v13733_v33 }
 0xe2a   : > { %v8739_v26 = vsel %vm8683_vm3, %v16206_v0, %v8737_v22  ;;  %v8769_v22 = vsel %vm8683_vm3, %v8768_v51, %v8767_v28  ;;  %v8782_v1 = vsel %vm8679_vm2, %v8781_v30, %v8780_v10  ;;  %v8770_v0 = vperm.slane %v16215_v29, %v13727_v40  ;;  %v16216_v51 = vld [vmem:[#allocation168_spill] sm:$0xff]  ;;  %v16224_v28 = vld [vmem:[#allocation286_spill] sm:$0xff] }
 0xe2b   : > { %v7828_v2 = vpop.xlane.xlu2 %7827  ;;  %v8741_v44 = vsel %vm8687_vm4, %v8740_v35, %v8739_v26  ;;  %v8785_v35 = vperm.slane %v13805_v37, %v13727_v40  ;;  %v16217_v30 = vperm.slane %v16216_v51, %v13730_v11  ;;  %v16218_v37 = vld [vmem:[#allocation38_spill] sm:$0xff]  ;;  %v8784_v42 = vsel %vm8683_vm3, %v16220_v12, %v8782_v1 }
 0xe2c   : > { %v7825_v7 = vpop.xlane.xlu1 %7824  ;;  %v8731_v26 = vperm.slane %v16218_v37, %v13730_v11  ;;  %v8743_v53 = vsel %vm8691_vm5, %v8742_v59, %v8741_v44  ;;  %v8771_v27 = vsel %vm8687_vm4, %v8770_v0, %v8769_v22  ;;  %v16223_v44 = vld [vmem:[#allocation95_spill] sm:$0xff]  ;;  %v16225_v4 = vperm.slane %v16224_v28, %v13727_v40  ;;  %v16226_v1 = vld [vmem:[#allocation86_spill] sm:$0xff] }
 0xe2d   : > { %v8796_v14 = vperm.slane %v7825_v7, %v13713_v13  ;;  %v8717_v10 = vsel %vm8699_vm7, %v16217_v30, %v8715_v43  ;;  %v8774_v7 = vperm.slane %v16219_v38, %v13724_v31  ;;  %v16221_v43 = vperm.slane %v13154_v23, %v16169_v19  ;;  %v16232_v12 = vld [vmem:[#allocation158_spill] sm:$0xff] }
 0xe2e   : > { %v8756_v59 = vsel %vm8687_vm4, %v16225_v4, %v8754_v5  ;;  %v8786_v22 = vsel %vm8687_vm4, %v8785_v35, %v8784_v42  ;;  %v8798_v47 = vperm.slane %v7828_v2, %v13739_v36  ;;  %v8718_v55 = vperm.slane %v16226_v1, %v13736_v61  ;;  %v16229_v35 = vld [vmem:[#allocation124_spill] sm:$0xff] }
 0xe2f   : > { %v8797_v16 = vsel %vm8679_vm2, %v8796_v14, %v16221_v43  ;;  %v8732_v23 = vsel %vm8699_vm7, %v8731_v26, %v8730_v34  ;;  %v8758_v14 = vsel %vm8691_vm5, %v8757_v52, %v8756_v59  ;;  %v16228_v29 = vperm.slane %v16227_v39, %v13724_v31  ;;  %v16233_v43 = vld [vmem:[#allocation90_spill] sm:$0xff] }
 0xe30   : > { %7962 = vadd.xlane.f32.xlu2 %v7961_v18  ;;  %v8746_v18 = vperm.slane %v16223_v44, %v13730_v11  ;;  %v8759_v0 = vperm.slane %v16229_v35, %v13724_v31  ;;  %v16230_v2 = vperm.slane %v13098_v48, %v13733_v33  ;;  %v8799_v30 = vsel %vm8683_vm3, %v8798_v47, %v8797_v16  ;;  %v16231_v48 = vld [vmem:[#allocation189_spill] sm:$0xff]  ;;  %v16241_v35 = vld [vmem:[#allocation78_spill] sm:$0xff] }
 0xe31   : > { %7959 = vadd.xlane.f32.xlu1 %v16222_v54  ;;  %v8745_v5 = vsel %vm8695_vm6, %v16228_v29, %v8743_v53  ;;  %v8788_v24 = vsel %vm8691_vm5, %v8787_v62, %v8786_v22  ;;  %v8791_v26 = vperm.slane %v13852_v56, %v13730_v11  ;;  %v8776_v42 = vperm.slane %v16232_v12, %v13730_v11  ;;  %v16234_v54 = vld [vmem:[#allocation281_spill] sm:$0xff] }
 0xe32   : > { %v8773_v51 = vsel %vm8691_vm5, %v16230_v2, %v8771_v27  ;;  %v8747_v53 = vsel %vm8699_vm7, %v8746_v18, %v8745_v5  ;;  %v8760_v38 = vsel %vm8695_vm6, %v8759_v0, %v8758_v14  ;;  %v8763_v27 = vperm.slane %v16231_v48, %v13736_v61  ;;  %v16239_v62 = vld [vmem:[#allocation133_spill] sm:$0xff] }
 0xe33   : > { %v7837_v20 = vpop.xlane.xlu2 %7836  ;;  %v8775_v37 = vsel %vm8695_vm6, %v8774_v7, %v8773_v51  ;;  %v8719_v7 = vsel %vm8703_vm8, %v8718_v55, %v8717_v10  ;;  %v8748_v16 = vperm.slane %v16233_v43, %v13736_v61  ;;  %v8801_v56 = vsel %vm8687_vm4, %v8800_v60, %v8799_v30  ;;  %v16237_v60 = vld [vmem:[#allocation298_spill] sm:$0xff]  ;;  %v16242_v30 = vld [vmem:[#allocation152_spill] sm:$0xff] }
 0xe34   : > { %v7834_v52 = vpop.xlane.xlu1 %7833  ;;  %v16235_v44 = vperm.slane %v16234_v54, %v13736_v61  ;;  %v8777_v28 = vsel %vm8699_vm7, %v8776_v42, %v8775_v37  ;;  %v16236_v4 = vperm.slane %v13146_v46, %v13724_v31  ;;  %v16238_v22 = vperm.slane %v16237_v60, %v13730_v11  ;;  %v16247_v43 = vld [vmem:[#allocation60_spill] sm:$0xff] }
 0xe35   : > { %v8802_v34 = vperm.slane %v7834_v52, %v13733_v33  ;;  %v8749_v9 = vsel %vm8703_vm8, %v8748_v16, %v8747_v53  ;;  %v8804_v55 = vperm.slane %v7837_v20, %v13724_v31  ;;  %v9171_v46 = vsel %vm9170_vm9, %v8719_v7, %v13908_v6 }
 0xe36   : > { %v8734_v18 = vsel %vm8703_vm8, %v16235_v44, %v8732_v23  ;;  %v8790_v10 = vsel %vm8695_vm6, %v16236_v4, %v8788_v24  ;;  %v8762_v47 = vsel %vm8699_vm7, %v16238_v22, %v8760_v38  ;;  %v8793_v23 = vperm.slane %v13844_v41, %v13736_v61  ;;  %v16250_v22 = vld [vmem:[#allocation242_spill] sm:$0xff] }
 0xe37   : > { %v8803_v59 = vsel %vm8691_vm5, %v8802_v34, %v8801_v56  ;;  %v8792_v1 = vsel %vm8699_vm7, %v8791_v26, %v8790_v10  ;;  %v9173_v14 = vsel %vm9172_vm10, %v8734_v18, %v9171_v46  ;;  %v16240_v39 = vperm.slane %v16239_v62, %v13736_v61  ;;  %v16248_v10 = vld [vmem:[#allocation253_spill] sm:$0xff] }
 0xe38   : > { %7971 = vadd.xlane.f32.xlu2 %v13834_v3  ;;  %v8764_v3 = vsel %vm8703_vm8, %v8763_v27, %v8762_v47  ;;  %v8805_v20 = vsel %vm8695_vm6, %v8804_v55, %v8803_v59  ;;  %v8794_v6 = vsel %vm8703_vm8, %v8793_v23, %v8792_v1  ;;  %v7504_v0 = vmul.f32 %v13864_v45, %v16241_v35  ;;  %v16251_v55 = vld [vmem:[#allocation254_spill] sm:$0xff]  ;;  %v16252_v23 = vld [vmem:[#allocation127_spill] sm:$0xff]  ;;  %v16253_v35 = vld [vmem:[#allocation256_spill] sm:$0xff] }
 0xe39   : > { %7968 = vadd.xlane.f32.xlu1 %v13871_v50  ;;  %v8779_v29 = vsel %vm8703_vm8, %v16240_v39, %v8777_v28  ;;  %v9175_v50 = vsel %vm9174_vm11, %v8749_v9, %v9173_v14  ;;  %v16243_v52 = vsub.f32 1.0, %v16242_v30  ;;  %v8807_v24 = vsel %vm8699_vm7, %v8806_v25, %v8805_v20 }
 0xe3a   : > { %v9177_v2 = vsel %vm9176_vm12, %v8764_v3, %v9175_v50  ;;  %v6743_v34 = vand.u32 2147483647, %v6487_v63  ;;  %v7979_v38 = vsel %vm3758_vm1, %v13861_v57, 0.0  ;;  %v7251_v48 = vmax.f32 %v6995_v49, 0.0  ;;  %v16244_v63 = vld [vmem:[#allocation77_spill] sm:$0xff] }
 0xe3b   : > { %v14039_v5 = vpop.xlane.xlu2 %7845  ;;  %v7252_v37 = vmax.f32 %v16243_v52, 0.0  ;;  %v9179_v26 = vsel %vm9178_vm13, %v8779_v29, %v9177_v2  ;;  %v7976_v32 = vsel %vm3758_vm1, %v7504_v0, 0.0  ;;  %v6490_v49 = vsub.f32 %v16245_v17, %v10188_v8  ;;  %v16255_v52 = vld [vmem:[#allocation248_spill] sm:$0xff] }
 0xe3c   : > { %v7843_v41 = vpop.xlane.xlu1 %7842  ;;  %v9181_v53 = vsel %vm9180_vm14, %v8794_v6, %v9179_v26  ;;  %v6999_v27 = vsub.f32 1.0, %v6743_v34  ;;  %v6998_v42 = vsub.f32 1.0, %v6742_v21  ;;  %v7507_v16 = vmul.f32 %v7251_v48, %v16247_v43  ;;  %v16256_v26 = vld [vmem:[#allocation257_spill] sm:$0xff] }
 0xe3d   : > { %v8808_v51 = vperm.slane %v7843_v41, %v13736_v61  ;;  %v7508_v57 = vmul.f32 %v7252_v37, %v16244_v63  ;;  %v6746_v54 = vand.u32 2147483647, %v6490_v49  ;;  %v6745_v18 = vand.u32 2147483647, %v6489_v58  ;;  %v16257_v63 = vld [vmem:[#allocation164_spill] sm:$0xff]  ;;  %v16258_v49 = vld [vmem:[#allocation141_spill] sm:$0xff] }
 0xe3e   : > { %v7255_v56 = vmax.f32 %v6999_v27, 0.0  ;;  %v7254_v28 = vmax.f32 %v6998_v42, 0.0  ;;  %v7985_v4 = vsel %vm3758_vm1, %v7507_v16, 0.0  ;;  %v6493_v59 = vsub.f32 %v16248_v10, %v10188_v8  ;;  %v16259_v58 = vld [vmem:[#allocation258_spill] sm:$0xff] }
 0xe3f   : > { %v8809_v45 = vsel %vm8703_vm8, %v8808_v51, %v8807_v24  ;;  %v7988_v44 = vsel %vm3758_vm1, %v7508_v57, 0.0  ;;  %v7002_v9 = vsub.f32 1.0, %v6746_v54  ;;  %v7001_v1 = vsub.f32 1.0, %v6745_v18  ;;  %v16254_v51 = vld [vmem:[#allocation92_spill] sm:$0xff] }
 0xe40   : > { %v9183_v25 = vsel %vm9182_vm15, %v8809_v45, %v9181_v53  ;;  %7980 = vadd.xlane.f32.xlu2 %v7979_v38  ;;  %v7511_v47 = vmul.f32 %v7255_v56, %v16250_v22  ;;  %v6492_v46 = vsub.f32 %v16251_v55, %v10188_v8  ;;  %v7510_v14 = vmul.f32 %v7254_v28, %v16252_v23  ;;  %v16260_v56 = vld [vmem:[#allocation251_spill] sm:$0xff] }
 0xe41   : > { %9209 = vst.msk [vmem:[%s14070_s21] sm:$0xff] %vm3758_vm1, %v9183_v25  ;;  %7977 = vadd.xlane.f32.xlu1 %v7976_v32  ;;  %v6749_v62 = vand.u32 2147483647, %v6493_v59  ;;  %v7258_v39 = vmax.f32 %v7002_v9, 0.0  ;;  %v7257_v20 = vmax.f32 %v7001_v1, 0.0  ;;  %v6496_v0 = vsub.f32 %v16253_v35, %v10188_v8 }
 0xe42   : > { %v7997_v29 = vsel %vm3758_vm1, %v7511_v47, 0.0  ;;  %v6748_v50 = vand.u32 2147483647, %v6492_v46  ;;  %v7994_v6 = vsel %vm3758_vm1, %v7510_v14, 0.0  ;;  %v6495_v34 = vsub.f32 %v16256_v26, %v10188_v8  ;;  %v16261_v47 = vld [vmem:[#allocation33_spill] sm:$0xff]  ;;  %v16263_v46 = vld [vmem:[#allocation259_spill] sm:$0xff] }
 0xe43   : > { %v14077_v12 = vpop.xlane.xlu2 %7854  ;;  %v7005_v41 = vsub.f32 1.0, %v6749_v62  ;;  %v7514_v30 = vmul.f32 %v7258_v39, %v16254_v51  ;;  %v7513_v37 = vmul.f32 %v7257_v20, %v16255_v52  ;;  %v6752_v38 = vand.u32 2147483647, %v6496_v0  ;;  %v16264_v62 = vld [vmem:[#allocation51_spill] sm:$0xff]  ;;  %v16266_v26 = vld [vmem:[#allocation150_spill] sm:$0xff] }
 0xe44   : > { %v14081_v7 = vpop.xlane.xlu1 %7851  ;;  %v7004_v24 = vsub.f32 1.0, %v6748_v50  ;;  %v6751_v25 = vand.u32 2147483647, %v6495_v34  ;;  %v6499_v57 = vsub.f32 %v16257_v63, %v10188_v8  ;;  %v6498_v42 = vsub.f32 %v16259_v58, %v10188_v8  ;;  %v16265_v20 = vld [vmem:[#allocation255_spill] sm:$0xff] }
 0xe45   : > { %v7261_v53 = vmax.f32 %v7005_v41, 0.0  ;;  %v8006_v48 = vsel %vm3758_vm1, %v7514_v30, 0.0  ;;  %v8003_v32 = vsel %vm3758_vm1, %v7513_v37, 0.0  ;;  %v7008_v27 = vsub.f32 1.0, %v6752_v38  ;;  %v16267_v38 = vld [vmem:[#allocation62_spill] sm:$0xff] }
 0xe46   : > { %v7260_v21 = vmax.f32 %v7004_v24, 0.0  ;;  %v7007_v43 = vsub.f32 1.0, %v6751_v25  ;;  %v6755_v18 = vand.u32 2147483647, %v6499_v57  ;;  %v6754_v10 = vand.u32 2147483647, %v6498_v42 }
 0xe47   : > { %v7517_v15 = vmul.f32 %v7261_v53, %v16258_v49  ;;  %v7264_v28 = vmax.f32 %v7008_v27, 0.0  ;;  %v6502_v1 = vsub.f32 %v16261_v47, %v10188_v8  ;;  %v6501_v39 = vsub.f32 %v16264_v62, %v10188_v8  ;;  %v16268_v42 = vld [vmem:[#allocation154_spill] sm:$0xff] }
 0xe48   : > { %7989 = vadd.xlane.f32.xlu2 %v7988_v44  ;;  %v7516_v54 = vmul.f32 %v7260_v21, %v16260_v56  ;;  %v4479_v44 = vpop.f32.mrf.mxu1  ;;  %v7263_v59 = vmax.f32 %v7007_v43, 0.0  ;;  %v7011_v22 = vsub.f32 1.0, %v6755_v18  ;;  %v7010_v14 = vsub.f32 1.0, %v6754_v10  ;;  %v16270_v18 = vld [vmem:[#allocation103_spill] sm:$0xff] }
 0xe49   : > { %7986 = vadd.xlane.f32.xlu1 %v7985_v4  ;;  %v8015_v4 = vsel %vm3758_vm1, %v7517_v15, 0.0  ;;  %v7520_v23 = vmul.f32 %v7264_v28, %v16263_v46  ;;  %v6758_v41 = vand.u32 2147483647, %v6502_v1  ;;  %v6757_v30 = vand.u32 2147483647, %v6501_v39 }
 0xe4a   : > { %v8012_v9 = vsel %vm3758_vm1, %v7516_v54, 0.0  ;;  %v7519_v50 = vmul.f32 %v7263_v59, %v16265_v20  ;;  %v7266_v51 = vmax.f32 %v7010_v14, 0.0  ;;  %v6505_v34 = vsub.f32 %v16266_v26, %v10188_v8  ;;  %v16273_v20 = vld [vmem:[#allocation81_spill] sm:$0xff] }
 0xe4b   : > { %v14088_v60 = vpop.xlane.xlu2 %7863  ;;  %v8024_v35 = vsel %vm3758_vm1, %v7520_v23, 0.0  ;;  %v7014_v24 = vsub.f32 1.0, %v6758_v41  ;;  %v7013_v21 = vsub.f32 1.0, %v6757_v30  ;;  %v6508_v43 = vsub.f32 %v16268_v42, %v10188_v8  ;;  %v16274_v41 = vld [vmem:[#allocation27_spill] sm:$0xff] }
 0xe4c   : > { %16249 = vst [vmem:[#allocation111_spill] sm:$0xff] %v14088_v60  ;;  %v14093_v3 = vpop.xlane.xlu1 %7860  ;;  %v8021_v52 = vsel %vm3758_vm1, %v7519_v50, 0.0  ;;  %v6761_v57 = vand.u32 2147483647, %v6505_v34  ;;  %v6511_v50 = vsub.f32 %v16273_v20, %v10188_v8 }
 0xe4d   : > { %v7270_v63 = vmax.f32 %v7014_v24, 0.0  ;;  %v7269_v15 = vmax.f32 %v7013_v21, 0.0  ;;  %v6764_v47 = vand.u32 2147483647, %v6508_v43  ;;  %v16282_v43 = vld [vmem:[#allocation261_spill] sm:$0xff] }
 0xe4e   : > { %v7017_v56 = vsub.f32 1.0, %v6761_v57  ;;  %v6767_v34 = vand.u32 2147483647, %v6511_v50  ;;  %v16279_v57 = vld [vmem:[#allocation55_spill] sm:$0xff]  ;;  %v16286_v50 = vld [vmem:[#allocation108_spill] sm:$0xff] }
 0xe4f   : > { %v7526_v28 = vmul.f32 %v7270_v63, %v16270_v18  ;;  %v7020_v39 = vsub.f32 1.0, %v6764_v47  ;;  %v14168_v63 = vpop.xlane.xlu0 %7983 }
 0xe50   : > { %7998 = vadd.xlane.f32.xlu2 %v7997_v29  ;;  %v4481_v0 = vpop.f32.mrf.mxu1  ;;  %v7273_v1 = vmax.f32 %v7017_v56, 0.0  ;;  %16278 = vst [vmem:[#allocation162_spill] sm:$0xff] %v14168_v63  ;;  %v6513_v56 = vsub.f32 %v16282_v43, %v10188_v8 }
 0xe51   : > { %7995 = vadd.xlane.f32.xlu1 %v7994_v6  ;;  %v7267_v6 = vmax.f32 %v7011_v22, 0.0  ;;  %v8042_v46 = vsel %vm3758_vm1, %v7526_v28, 0.0  ;;  %v7276_v26 = vmax.f32 %v7020_v39, 0.0 }
 0xe52   : > { %v6769_v47 = vand.u32 2147483647, %v6513_v56 }
 0xe53   : > { %v14100_v2 = vpop.xlane.xlu2 %7872  ;;  %v7523_v37 = vmul.f32 %v7267_v6, %v4481_v0  ;;  %v16275_v0 = vld [vmem:[#allocation102_spill] sm:$0xff] }
 0xe54   : > { %v14106_v45 = vpop.xlane.xlu1 %7869 }
 0xe55   : > { %v8033_v27 = vsel %vm3758_vm1, %v7523_v37, 0.0 }
 0xe58   : > { %8007 = vadd.xlane.f32.xlu2 %v8006_v48  ;;  %v6504_v48 = vsub.f32 %v16267_v38, %v10188_v8 }
 0xe59   : > { %8004 = vadd.xlane.f32.xlu1 %v8003_v32  ;;  %v7522_v32 = vmul.f32 %v7266_v51, %v4479_v44  ;;  %v16271_v44 = vld [vmem:[#allocation105_spill] sm:$0xff] }
 0xe5a   : > { %v6760_v49 = vand.u32 2147483647, %v6504_v48  ;;  %v6507_v10 = vsub.f32 %v16271_v44, %v10188_v8 }
 0xe5b   : > { %v14112_v17 = vpop.xlane.xlu2 %7881  ;;  %v8030_v58 = vsel %vm3758_vm1, %v7522_v32, 0.0 }
 0xe5c   : > { %v14117_v16 = vpop.xlane.xlu1 %7878  ;;  %v6763_v14 = vand.u32 2147483647, %v6507_v10 }
 0xe5e   : > { %v7019_v30 = vsub.f32 1.0, %v6763_v14 }
 0xe60   : > { %8016 = vadd.xlane.f32.xlu2 %v8015_v4  ;;  %v7016_v4 = vsub.f32 1.0, %v6760_v49  ;;  %v7275_v48 = vmax.f32 %v7019_v30, 0.0  ;;  %v7023_v49 = vsub.f32 1.0, %v6767_v34 }
 0xe61   : > { %8013 = vadd.xlane.f32.xlu1 %v8012_v9  ;;  %v16272_v9 = vld [vmem:[#allocation145_spill] sm:$0xff] }
 0xe62   : > { %v7525_v22 = vmul.f32 %v7269_v15, %v16272_v9  ;;  %v7272_v23 = vmax.f32 %v7016_v4, 0.0  ;;  %v16283_v4 = vld [vmem:[#allocation109_spill] sm:$0xff]  ;;  %v7279_v9 = vmax.f32 %v7023_v49, 0.0 }
 0xe63   : > { %v14124_v55 = vpop.xlane.xlu2 %7890  ;;  %v7531_v44 = vmul.f32 %v7275_v48, %v16283_v4 }
 0xe64   : > { %16262 = vst [vmem:[#allocation221_spill] sm:$0xff] %v14124_v55  ;;  %v14129_v29 = vpop.xlane.xlu1 %7887  ;;  %v8039_v62 = vsel %vm3758_vm1, %v7525_v22, 0.0  ;;  %v7528_v51 = vmul.f32 %v7272_v23, %v16275_v0  ;;  %v14182_v23 = vpop.xlane.xlu0 %7992  ;;  %v16287_v0 = vld [vmem:[#allocation262_spill] sm:$0xff]  ;;  %v16323_v55 = vld [vmem:[#allocation276_spill] sm:$0xff] }
 0xe66   : > { %v8048_v32 = vsel %vm3758_vm1, %v7528_v51, 0.0  ;;  %v6516_v51 = vsub.f32 %v16287_v0, %v10188_v8 }
 0xe68   : > { %8025 = vadd.xlane.f32.xlu2 %v8024_v35  ;;  %v7529_v35 = vmul.f32 %v7273_v1, %v16274_v41  ;;  %v7535_v41 = vmul.f32 %v7279_v9, %v16286_v50  ;;  %v16293_v9 = vld [vmem:[#allocation163_spill] sm:$0xff] }
 0xe69   : > { %8022 = vadd.xlane.f32.xlu1 %v8021_v52  ;;  %v16276_v52 = vld [vmem:[#allocation260_spill] sm:$0xff]  ;;  %v16294_v50 = vld [vmem:[#allocation179_spill] sm:$0xff] }
 0xe6a   : > { %v6510_v37 = vsub.f32 %v16276_v52, %v10188_v8  ;;  %v8051_v38 = vsel %vm3758_vm1, %v7529_v35, 0.0  ;;  %v7025_v35 = vsub.f32 1.0, %v6769_v47  ;;  %v16289_v52 = vld [vmem:[#allocation159_spill] sm:$0xff] }
 0xe6b   : > { %v14136_v53 = vpop.xlane.xlu2 %7899 }
 0xe6c   : > { %v14140_v25 = vpop.xlane.xlu1 %7896  ;;  %v6766_v21 = vand.u32 2147483647, %v6510_v37  ;;  %v7281_v48 = vmax.f32 %v7025_v35, 0.0  ;;  %v14197_v49 = vpop.xlane.xlu0 %8001 }
 0xe6e   : > { %v7022_v18 = vsub.f32 1.0, %v6766_v21  ;;  %v6772_v21 = vand.u32 2147483647, %v6516_v51  ;;  %v16296_v51 = vld [vmem:[#allocation191_spill] sm:$0xff] }
 0xe70   : > { %8034 = vadd.xlane.f32.xlu2 %v8033_v27  ;;  %v6514_v27 = vsub.f32 %v16279_v57, %v10188_v8  ;;  %v7278_v1 = vmax.f32 %v7022_v18, 0.0  ;;  %v16290_v57 = vld [vmem:[#allocation61_spill] sm:$0xff]  ;;  %v16292_v18 = vld [vmem:[#allocation82_spill] sm:$0xff] }
 0xe71   : > { %8031 = vadd.xlane.f32.xlu1 %v8030_v58  ;;  %v16281_v58 = vld [vmem:[#allocation155_spill] sm:$0xff]  ;;  %v6519_v4 = vsub.f32 %v16292_v18, %v10188_v8 }
 0xe72   : > { %v7532_v42 = vmul.f32 %v7276_v26, %v16281_v58  ;;  %v6770_v10 = vand.u32 2147483647, %v6514_v27  ;;  %v7534_v37 = vmul.f32 %v7278_v1, %v16289_v52 }
 0xe73   : > { %v14146_v54 = vpop.xlane.xlu2 %7908 }
 0xe74   : > { %16269 = vst [vmem:[#allocation183_spill] sm:$0xff] %v14146_v54  ;;  %v14151_v59 = vpop.xlane.xlu1 %7905  ;;  %v8060_v22 = vsel %vm3758_vm1, %v7532_v42, 0.0  ;;  %v7026_v14 = vsub.f32 1.0, %v6770_v10  ;;  %v16291_v42 = vld [vmem:[#allocation172_spill] sm:$0xff]  ;;  %v16340_v54 = vld [vmem:[#allocation330_spill] sm:$0xff] }
 0xe75   : > { %v6520_v43 = vsub.f32 %v16291_v42, %v10188_v8 }
 0xe76   : > { %v7282_v26 = vmax.f32 %v7026_v14, 0.0  ;;  %v6775_v14 = vand.u32 2147483647, %v6519_v4 }
 0xe77   : > { %v6776_v1 = vand.u32 2147483647, %v6520_v43 }
 0xe78   : > { %8043 = vadd.xlane.f32.xlu2 %v8042_v46  ;;  %v8057_v46 = vsel %vm3758_vm1, %v7531_v44, 0.0  ;;  %v7538_v27 = vmul.f32 %v7282_v26, %v16290_v57  ;;  %v7028_v44 = vsub.f32 1.0, %v6772_v21  ;;  %v16297_v26 = vld [vmem:[#allocation84_spill] sm:$0xff] }
 0xe79   : > { %8040 = vadd.xlane.f32.xlu1 %v8039_v62  ;;  %v16284_v62 = vld [vmem:[#allocation114_spill] sm:$0xff]  ;;  %v7032_v35 = vsub.f32 1.0, %v6776_v1 }
 0xe7a   : > { %v6517_v39 = vsub.f32 %v16284_v62, %v10188_v8  ;;  %v7284_v62 = vmax.f32 %v7028_v44, 0.0  ;;  %v16300_v44 = vld [vmem:[#allocation180_spill] sm:$0xff] }
 0xe7b   : > { %v14158_v6 = vpop.xlane.xlu2 %7917 }
 0xe7c   : > { %v14164_v24 = vpop.xlane.xlu1 %7914  ;;  %v6773_v34 = vand.u32 2147483647, %v6517_v39 }
 0xe7d   : > { %16277 = vst [vmem:[#allocation222_spill] sm:$0xff] %v14164_v24 }
 0xe7e   : > { %v7029_v58 = vsub.f32 1.0, %v6773_v34  ;;  %v6522_v34 = vsub.f32 %v16297_v26, %v10188_v8 }
 0xe80   : > { %8052 = vadd.xlane.f32.xlu2 %v8051_v38  ;;  %v8069_v38 = vsel %vm3758_vm1, %v7535_v41, 0.0  ;;  %v7285_v47 = vmax.f32 %v7029_v58, 0.0  ;;  %v6523_v41 = vsub.f32 %v16294_v50, %v10188_v8  ;;  %v6778_v43 = vand.u32 2147483647, %v6522_v34 }
 0xe81   : > { %8049 = vadd.xlane.f32.xlu1 %v8048_v32  ;;  %v8066_v32 = vsel %vm3758_vm1, %v7534_v37, 0.0  ;;  %v7031_v37 = vsub.f32 1.0, %v6775_v14 }
 0xe82   : > { %v7541_v52 = vmul.f32 %v7285_v47, %v16296_v51  ;;  %v6779_v57 = vand.u32 2147483647, %v6523_v41  ;;  %v16302_v47 = vld [vmem:[#allocation176_spill] sm:$0xff] }
 0xe83   : > { %v14172_v15 = vpop.xlane.xlu2 %7926  ;;  %v7287_v42 = vmax.f32 %v7031_v37, 0.0 }
 0xe84   : > { %16280 = vst [vmem:[#allocation223_spill] sm:$0xff] %v14172_v15  ;;  %v14177_v28 = vpop.xlane.xlu1 %7923  ;;  %v8087_v58 = vsel %vm3758_vm1, %v7541_v52, 0.0  ;;  %v7035_v4 = vsub.f32 1.0, %v6779_v57  ;;  %v16350_v15 = vld [vmem:[#allocation83_spill] sm:$0xff] }
 0xe86   : > { %v7291_v37 = vmax.f32 %v7035_v4, 0.0  ;;  %v16310_v4 = vld [vmem:[#allocation193_spill] sm:$0xff] }
 0xe88   : > { %8061 = vadd.xlane.f32.xlu2 %v8060_v22  ;;  %v7537_v22 = vmul.f32 %v7281_v48, %v16293_v9  ;;  %v16299_v48 = vld [vmem:[#allocation171_spill] sm:$0xff]  ;;  %v6526_v9 = vsub.f32 %v16300_v44, %v10188_v8 }
 0xe89   : > { %8058 = vadd.xlane.f32.xlu1 %v8057_v46  ;;  %v8078_v46 = vsel %vm3758_vm1, %v7538_v27, 0.0  ;;  %v7540_v21 = vmul.f32 %v7284_v62, %v16299_v48  ;;  %v7288_v27 = vmax.f32 %v7032_v35, 0.0  ;;  %v7034_v62 = vsub.f32 1.0, %v6778_v43  ;;  %v16306_v35 = vld [vmem:[#allocation131_spill] sm:$0xff] }
 0xe8a   : > { %v8075_v39 = vsel %vm3758_vm1, %v7537_v22, 0.0  ;;  %v6529_v51 = vsub.f32 %v16306_v35, %v10188_v8  ;;  %v6782_v26 = vand.u32 2147483647, %v6526_v9  ;;  %v7547_v9 = vmul.f32 %v7291_v37, %v16310_v4 }
 0xe8b   : > { %v14186_v20 = vpop.xlane.xlu2 %7935  ;;  %v8084_v18 = vsel %vm3758_vm1, %v7540_v21, 0.0  ;;  %v7544_v1 = vmul.f32 %v7288_v27, %v16302_v47  ;;  %v7290_v48 = vmax.f32 %v7034_v62, 0.0  ;;  %v16307_v27 = vld [vmem:[#allocation142_spill] sm:$0xff] }
 0xe8c   : > { %16285 = vst [vmem:[#allocation123_spill] sm:$0xff] %v14186_v20  ;;  %v14191_v30 = vpop.xlane.xlu1 %7932  ;;  %v7038_v43 = vsub.f32 1.0, %v6782_v26  ;;  %v16311_v62 = vld [vmem:[#allocation118_spill] sm:$0xff] }
 0xe8d   : > { %16288 = vst [vmem:[#allocation70_spill] sm:$0xff] %v14191_v30  ;;  %v8096_v34 = vsel %vm3758_vm1, %v7544_v1, 0.0 }
 0xe90   : > { %8070 = vadd.xlane.f32.xlu2 %v8069_v38 }
 0xe91   : > { %8067 = vadd.xlane.f32.xlu1 %v8066_v32  ;;  %v14220_v32 = vpop.xlane.xlu0 %8010 }
 0xe93   : > { %v14201_v56 = vpop.xlane.xlu2 %7944 }
 0xe94   : > { %v14205_v10 = vpop.xlane.xlu1 %7941 }
 0xe98   : > { %8079 = vadd.xlane.f32.xlu2 %v8078_v46  ;;  %v16303_v46 = vld [vmem:[#allocation101_spill] sm:$0xff] }
 0xe99   : > { %8076 = vadd.xlane.f32.xlu1 %v8075_v39  ;;  %v7543_v14 = vmul.f32 %v7287_v42, %v16303_v46  ;;  %v16304_v39 = vld [vmem:[#allocation264_spill] sm:$0xff]  ;;  %v14236_v52 = vpop.xlane.xlu0 %8019  ;;  %v6785_v42 = vand.u32 2147483647, %v6529_v51  ;;  %v7294_v51 = vmax.f32 %v7038_v43, 0.0  ;;  %v16316_v43 = vld [vmem:[#allocation267_spill] sm:$0xff] }
 0xe9a   : > { %v6525_v50 = vsub.f32 %v16304_v39, %v10188_v8  ;;  %v7546_v39 = vmul.f32 %v7290_v48, %v16311_v62 }
 0xe9b   : > { %v14212_v0 = vpop.xlane.xlu2 %7953  ;;  %v8093_v57 = vsel %vm3758_vm1, %v7543_v14, 0.0  ;;  %v16312_v14 = vld [vmem:[#allocation72_spill] sm:$0xff] }
 0xe9c   : > { %16295 = vst [vmem:[#allocation224_spill] sm:$0xff] %v14212_v0  ;;  %v14217_v38 = vpop.xlane.xlu1 %7950  ;;  %v6781_v21 = vand.u32 2147483647, %v6525_v50  ;;  %v6544_v35 = vsub.f32 %v16312_v14, %v10188_v8  ;;  %v8102_v37 = vsel %vm3758_vm1, %v7546_v39, 0.0  ;;  %v16337_v0 = vld [vmem:[#allocation211_spill] sm:$0xff] }
 0xe9d   : > { %16298 = vst [vmem:[#allocation214_spill] sm:$0xff] %v14217_v38 }
 0xe9e   : > { %v7037_v46 = vsub.f32 1.0, %v6781_v21  ;;  %v6800_v4 = vand.u32 2147483647, %v6544_v35  ;;  %v16319_v35 = vld [vmem:[#allocation79_spill] sm:$0xff] }
 0xea0   : > { %8088 = vadd.xlane.f32.xlu2 %v8087_v58  ;;  %v6534_v58 = vsub.f32 %v16307_v27, %v10188_v8  ;;  %v8105_v27 = vsel %vm3758_vm1, %v7547_v9, 0.0 }
 0xea1   : > { %8085 = vadd.xlane.f32.xlu1 %v8084_v18  ;;  %v16308_v18 = vld [vmem:[#allocation265_spill] sm:$0xff] }
 0xea2   : > { %v6528_v44 = vsub.f32 %v16308_v18, %v10188_v8  ;;  %v6790_v50 = vand.u32 2147483647, %v6534_v58  ;;  %v7293_v18 = vmax.f32 %v7037_v46, 0.0  ;;  %v16313_v58 = vld [vmem:[#allocation53_spill] sm:$0xff]  ;;  %v16318_v46 = vld [vmem:[#allocation194_spill] sm:$0xff] }
 0xea3   : > { %v14226_v22 = vpop.xlane.xlu2 %7962  ;;  %v6532_v62 = vsub.f32 %v16313_v58, %v10188_v8  ;;  %v16321_v58 = vld [vmem:[#allocation273_spill] sm:$0xff] }
 0xea4   : > { %16301 = vst [vmem:[#allocation226_spill] sm:$0xff] %v14226_v22  ;;  %v14232_v41 = vpop.xlane.xlu1 %7959  ;;  %v6784_v26 = vand.u32 2147483647, %v6528_v44  ;;  %v7046_v21 = vsub.f32 1.0, %v6790_v50  ;;  %v6531_v44 = vsub.f32 %v16316_v43, %v10188_v8  ;;  %v7056_v50 = vsub.f32 1.0, %v6800_v4  ;;  %v16322_v43 = vld [vmem:[#allocation272_spill] sm:$0xff] }
 0xea5   : > { %16305 = vst [vmem:[#allocation110_spill] sm:$0xff] %v14232_v41  ;;  %v6788_v24 = vand.u32 2147483647, %v6532_v62  ;;  %v6535_v41 = vsub.f32 %v16322_v43, %v10188_v8 }
 0xea6   : > { %v7040_v48 = vsub.f32 1.0, %v6784_v26  ;;  %v7302_v39 = vmax.f32 %v7046_v21, 0.0 }
 0xea8   : > { %8097 = vadd.xlane.f32.xlu2 %v8096_v34  ;;  %v7041_v34 = vsub.f32 1.0, %v6785_v42  ;;  %v16315_v42 = vld [vmem:[#allocation75_spill] sm:$0xff]  ;;  %v7296_v26 = vmax.f32 %v7040_v48, 0.0  ;;  %v16325_v48 = vld [vmem:[#allocation274_spill] sm:$0xff] }
 0xea9   : > { %8094 = vadd.xlane.f32.xlu1 %v8093_v57  ;;  %v14252_v57 = vpop.xlane.xlu0 %8028  ;;  %v7550_v20 = vmul.f32 %v7294_v51, %v16315_v42  ;;  %v6787_v42 = vand.u32 2147483647, %v6531_v44  ;;  %v6537_v62 = vsub.f32 %v16325_v48, %v10188_v8  ;;  %v7044_v44 = vsub.f32 1.0, %v6788_v24  ;;  %v16331_v48 = vld [vmem:[#allocation54_spill] sm:$0xff]  ;;  %v16332_v24 = vld [vmem:[#allocation277_spill] sm:$0xff] }
 0xeaa   : > { %v7297_v22 = vmax.f32 %v7041_v34, 0.0 }
 0xeab   : > { %v14244_v47 = vpop.xlane.xlu2 %7971  ;;  %v8114_v51 = vsel %vm3758_vm1, %v7550_v20, 0.0 }
 0xeac   : > { %16309 = vst [vmem:[#allocation218_spill] sm:$0xff] %v14244_v47  ;;  %v14247_v1 = vpop.xlane.xlu1 %7968 }
 0xeb0   : > { %8106 = vadd.xlane.f32.xlu2 %v8105_v27  ;;  %v7549_v27 = vmul.f32 %v7293_v18, %v16318_v46  ;;  %v6541_v18 = vsub.f32 %v16323_v55, %v10188_v8  ;;  %v7312_v46 = vmax.f32 %v7056_v50, 0.0  ;;  %v7043_v55 = vsub.f32 1.0, %v6787_v42 }
 0xeb1   : > { %8103 = vadd.xlane.f32.xlu1 %v8102_v37  ;;  %v7553_v37 = vmul.f32 %v7297_v22, %v16319_v35  ;;  %v14267_v34 = vpop.xlane.xlu0 %8037  ;;  %v16324_v22 = vld [vmem:[#allocation196_spill] sm:$0xff] }
 0xeb2   : > { %16320 = vst [vmem:[#allocation157_spill] sm:$0xff] %v14267_v34  ;;  %v8111_v21 = vsel %vm3758_vm1, %v7549_v27, 0.0  ;;  %v7558_v4 = vmul.f32 %v7302_v39, %v16324_v22  ;;  %v16328_v39 = vld [vmem:[#allocation185_spill] sm:$0xff] }
 0xeb3   : > { %v14258_v14 = vpop.xlane.xlu2 %7980  ;;  %v8123_v43 = vsel %vm3758_vm1, %v7553_v37, 0.0  ;;  %v7552_v50 = vmul.f32 %v7296_v26, %v16328_v39  ;;  %v16333_v37 = vld [vmem:[#allocation149_spill] sm:$0xff]  ;;  %v16335_v26 = vld [vmem:[#allocation91_spill] sm:$0xff] }
 0xeb4   : > { %16314 = vst [vmem:[#allocation228_spill] sm:$0xff] %v14258_v14  ;;  %v14263_v9 = vpop.xlane.xlu1 %7977  ;;  %v6538_v14 = vsub.f32 %v16321_v58, %v10188_v8  ;;  %v14296_v20 = vsel %vm3758_vm1, %v7558_v4, 0.0  ;;  %v7299_v4 = vmax.f32 %v7043_v55, 0.0  ;;  %v16346_v39 = vld [vmem:[#allocation187_spill] sm:$0xff] }
 0xeb5   : > { %16317 = vst [vmem:[#allocation216_spill] sm:$0xff] %v14263_v9  ;;  %v6797_v9 = vand.u32 2147483647, %v6541_v18 }
 0xeb6   : > { %v6794_v58 = vand.u32 2147483647, %v6538_v14  ;;  %v6540_v14 = vsub.f32 %v16332_v24, %v10188_v8  ;;  %v7300_v24 = vmax.f32 %v7044_v44, 0.0  ;;  %v16352_v44 = vld [vmem:[#allocation63_spill] sm:$0xff] }
 0xeb7   : > { %v7053_v30 = vsub.f32 1.0, %v6797_v9  ;;  %v16349_v9 = vld [vmem:[#allocation24_spill] sm:$0xff] }
 0xeb8   : > { %8115 = vadd.xlane.f32.xlu2 %v8114_v51  ;;  %v6791_v51 = vand.u32 2147483647, %v6535_v41  ;;  %v8120_v41 = vsel %vm3758_vm1, %v7552_v50, 0.0  ;;  %v6796_v35 = vand.u32 2147483647, %v6540_v14  ;;  %v16347_v14 = vld [vmem:[#allocation44_spill] sm:$0xff] }
 0xeb9   : > { %8112 = vadd.xlane.f32.xlu1 %v8111_v21  ;;  %v16329_v21 = vld [vmem:[#allocation71_spill] sm:$0xff]  ;;  %v14315_v60 = vpop.xlane.xlu0 %8046 }
 0xeba   : > { %v14289_v22 = vmul.f32 %v7312_v46, %v16329_v21  ;;  %v6793_v46 = vand.u32 2147483647, %v6537_v62  ;;  %v16336_v21 = vld [vmem:[#allocation68_spill] sm:$0xff]  ;;  %v7047_v47 = vsub.f32 1.0, %v6791_v51  ;;  %16341 = vst [vmem:[#allocation47_spill] sm:$0xff] %v14315_v60  ;;  %v16344_v51 = vld [vmem:[#allocation279_spill] sm:$0xff] }
 0xebb   : > { %v14282_v34 = vpop.xlane.xlu2 %7989  ;;  %v6543_v50 = vsub.f32 %v16344_v51, %v10188_v8  ;;  %v7555_v51 = vmul.f32 %v7299_v4, %v16349_v9  ;;  %v7052_v42 = vsub.f32 1.0, %v6796_v35  ;;  %v8810_v35 = vperm.slane %v14039_v5, %v16169_v19 }
 0xebc   : > { %v14285_v27 = vpop.xlane.xlu1 %7986  ;;  %16330 = vst [vmem:[#allocation17_spill] sm:$0xff] %v14289_v22  ;;  %v7049_v55 = vsub.f32 1.0, %v6793_v46  ;;  %v7303_v38 = vmax.f32 %v7047_v47, 0.0  ;;  %v8825_v22 = vperm.slane %v14106_v45, %v16169_v19  ;;  %v8813_v45 = vperm.slane %v14081_v7, %v13739_v36 }
 0xebd   : > { %16327 = vst [vmem:[#allocation31_spill] sm:$0xff] %v14285_v27  ;;  %v7050_v27 = vsub.f32 1.0, %v6794_v58  ;;  %v16348_v58 = vld [vmem:[#allocation48_spill] sm:$0xff]  ;;  %v8913_v4 = vperm.slane %v14220_v32, %v13736_v61  ;;  %v7308_v63 = vmax.f32 %v7052_v42, 0.0  ;;  %v8918_v7 = vperm.slane %v14236_v52, %v13739_v36  ;;  %v16391_v52 = vld [vmem:[#allocation226_spill] sm:$0xff] }
 0xebe   : > { %v7305_v47 = vmax.f32 %v7049_v55, 0.0  ;;  %v16353_v55 = vld [vmem:[#allocation266_spill] sm:$0xff] }
 0xebf   : > { %v7306_v18 = vmax.f32 %v7050_v27, 0.0  ;;  %v8826_v27 = vperm.slane %v14100_v2, %v13713_v13  ;;  %v16351_v2 = vld [vmem:[#allocation144_spill] sm:$0xff] }
 0xec0   : > { %8124 = vadd.xlane.f32.xlu2 %v8123_v43  ;;  %v7309_v43 = vmax.f32 %v7053_v30, 0.0  ;;  %v7559_v30 = vmul.f32 %v7303_v38, %v16352_v44  ;;  %v16354_v38 = vld [vmem:[#allocation197_spill] sm:$0xff] }
 0xec1   : > { %8121 = vadd.xlane.f32.xlu1 %v8120_v41  ;;  %v7556_v41 = vmul.f32 %v7300_v24, %v16347_v14  ;;  %v6799_v14 = vand.u32 2147483647, %v6543_v50  ;;  %v7562_v62 = vmul.f32 %v7306_v18, %v16351_v2  ;;  %v8129_v24 = vsel %vm3758_vm1, %v7555_v51, 0.0 }
 0xec2   : > { %v7565_v50 = vmul.f32 %v7309_v43, %v16353_v55  ;;  %v8827_v5 = vsel %vm8679_vm2, %v8826_v27, %v8825_v22  ;;  %v8924_v18 = vperm.slane %v14252_v57, %v13724_v31  ;;  %v7561_v44 = vmul.f32 %v7305_v47, %v16354_v38  ;;  %v14366_v43 = vpop.xlane.xlu0 %8055 }
 0xec3   : > { %v14327_v60 = vpop.xlane.xlu2 %7998  ;;  %v8132_v9 = vsel %vm3758_vm1, %v7556_v41, 0.0  ;;  %v8830_v41 = vperm.slane %v14117_v16, %v13727_v40  ;;  %v7055_v51 = vsub.f32 1.0, %v6799_v14  ;;  %v16356_v22 = vperm.slane %v16331_v48, %v13713_v13 }
 0xec4   : > { %v14332_v46 = vpop.xlane.xlu1 %7995  ;;  %v8841_v27 = vperm.slane %v14140_v25, %v13713_v13  ;;  %v8150_v2 = vsel %vm3758_vm1, %v7562_v62, 0.0  ;;  %v16357_v47 = vperm.slane %v16335_v26, %v13739_v36  ;;  %v8141_v48 = vsel %vm3758_vm1, %v7559_v30, 0.0  ;;  %v16358_v25 = vld [vmem:[#allocation288_spill] sm:$0xff] }
 0xec5   : > { %v8812_v16 = vsel %vm8679_vm2, %v16356_v22, %v8810_v35  ;;  %v14388_v35 = vsel %vm3758_vm1, %v7565_v50, 0.0  ;;  %v8815_v62 = vperm.slane %v14077_v12, %v13727_v40  ;;  %v16359_v22 = vld [vmem:[#allocation263_spill] sm:$0xff]  ;;  %v14396_v26 = vmax.f32 %v7055_v51, 0.0 }
 0xec6   : > { %v8814_v14 = vsel %vm8683_vm3, %v8813_v45, %v8812_v16  ;;  %v8829_v55 = vsel %vm8683_vm3, %v16357_v47, %v8827_v5  ;;  %v7564_v16 = vmul.f32 %v7308_v63, %v16359_v22  ;;  %v8832_v5 = vperm.slane %v14112_v17, %v13733_v33 }
 0xec7   : > { %v8831_v45 = vsel %vm8687_vm4, %v8830_v41, %v8829_v55  ;;  %v8855_v30 = vperm.slane %v14158_v6, %v16169_v19  ;;  %v8147_v50 = vsel %vm3758_vm1, %v7561_v44, 0.0  ;;  %v16360_v12 = vperm.slane %v16337_v0, %v16169_v19 }
 0xec8   : > { %8133 = vadd.xlane.f32.xlu2 %v8132_v9  ;;  %v16355_v9 = vld [vmem:[#allocation280_spill] sm:$0xff]  ;;  %v8858_v63 = vperm.slane %v14177_v28, %v13739_v36  ;;  %v8833_v51 = vsel %vm8691_vm5, %v8832_v5, %v8831_v45  ;;  %v8843_v17 = vperm.slane %v14136_v53, %v13739_v36  ;;  %v8871_v6 = vperm.slane %v14201_v56, %v13713_v13 }
 0xec9   : > { %8130 = vadd.xlane.f32.xlu1 %v8129_v24  ;;  %v6546_v42 = vsub.f32 %v16355_v9, %v10188_v8  ;;  %v6547_v9 = vsub.f32 %v16358_v25, %v10188_v8  ;;  %v8816_v25 = vsel %vm8687_vm4, %v8815_v62, %v8814_v14  ;;  %v8842_v41 = vsel %vm8679_vm2, %v8841_v27, %v16360_v12  ;;  %v16364_v62 = vld [vmem:[#allocation223_spill] sm:$0xff] }
 0xeca   : > { %v8870_v44 = vperm.slane %v14205_v10, %v16169_v19  ;;  %v8819_v0 = vperm.slane %v14093_v3, %v13724_v31  ;;  %v8836_v28 = vperm.slane %v14129_v29, %v13730_v11  ;;  %v14427_v27 = vsel %vm3758_vm1, %v7564_v16, 0.0  ;;  %v14456_v5 = vpop.xlane.xlu0 %8064 }
 0xecb   : > { %v14376_v24 = vpop.xlane.xlu2 %8007  ;;  %v14403_v47 = vand.u32 2147483647, %v6546_v42  ;;  %v14419_v42 = vand.u32 2147483647, %v6547_v9  ;;  %v8844_v53 = vsel %vm8683_vm3, %v8843_v17, %v8842_v41  ;;  %v8847_v56 = vperm.slane %v14151_v59, %v13733_v33  ;;  %v16367_v41 = vld [vmem:[#allocation327_spill] sm:$0xff] }
 0xecc   : > { %v14384_v38 = vpop.xlane.xlu1 %8004  ;;  %v16361_v10 = vperm.slane %v16340_v54, %v13713_v13  ;;  %v8886_v3 = vperm.slane %v14247_v1, %v13713_v13  ;;  %v16362_v29 = vperm.slane %v16333_v37, %v13733_v33  ;;  %v16363_v55 = vperm.slane %v16336_v21, %v13724_v31  ;;  %v16365_v37 = vld [vmem:[#allocation214_spill] sm:$0xff]  ;;  %v16369_v17 = vld [vmem:[#allocation183_spill] sm:$0xff] }
 0xecd   : > { %v8900_v54 = vperm.slane %v14282_v34, %v16169_v19  ;;  %v8860_v45 = vperm.slane %v16364_v62, %v13727_v40  ;;  %v8872_v1 = vsel %vm8679_vm2, %v8871_v6, %v8870_v44  ;;  %v8875_v22 = vperm.slane %v16365_v37, %v13727_v40  ;;  %v16376_v37 = vld [vmem:[#allocation224_spill] sm:$0xff] }
 0xece   : > { %v8857_v14 = vsel %vm8679_vm2, %v16361_v10, %v8855_v30  ;;  %v8903_v16 = vperm.slane %v14332_v46, %v13739_v36  ;;  %v16366_v30 = vld [vmem:[#allocation111_spill] sm:$0xff]  ;;  %v8849_v6 = vperm.slane %v16369_v17, %v13724_v31  ;;  %v16370_v10 = vperm.slane %v16348_v58, %v16169_v19 }
 0xecf   : > { %v8859_v59 = vsel %vm8683_vm3, %v8858_v63, %v8857_v14  ;;  %v16368_v63 = vperm.slane %v16367_v41, %v13727_v40  ;;  %v16377_v41 = vld [vmem:[#allocation216_spill] sm:$0xff] }
 0xed0   : > { %8142 = vadd.xlane.f32.xlu2 %v8141_v48  ;;  %v8835_v48 = vsel %vm8695_vm6, %v16363_v55, %v8833_v51  ;;  %v8861_v44 = vsel %vm8687_vm4, %v8860_v45, %v8859_v59  ;;  %v8887_v14 = vsel %vm8679_vm2, %v8886_v3, %v16370_v10  ;;  %v16374_v55 = vld [vmem:[#allocation218_spill] sm:$0xff] }
 0xed1   : > { %8139 = vadd.xlane.f32.xlu1 %v14296_v20  ;;  %v8818_v20 = vsel %vm8691_vm5, %v16362_v29, %v8816_v25  ;;  %v8821_v25 = vperm.slane %v16366_v30, %v13730_v11  ;;  %v8837_v12 = vsel %vm8699_vm7, %v8836_v28, %v8835_v48  ;;  %v8846_v51 = vsel %vm8687_vm4, %v16368_v63, %v8844_v53  ;;  %v16372_v29 = vld [vmem:[#allocation182_spill] sm:$0xff] }
 0xed2   : > { %v8820_v34 = vsel %vm8695_vm6, %v8819_v0, %v8818_v20  ;;  %v8848_v46 = vsel %vm8691_vm5, %v8847_v56, %v8846_v51  ;;  %v16371_v0 = vld [vmem:[#allocation70_spill] sm:$0xff]  ;;  %v16373_v20 = vperm.slane %v16372_v29, %v13739_v36  ;;  %v8888_v48 = vperm.slane %v16374_v55, %v13739_v36 }
 0xed3   : > { %v8017_v9 = vpop.xlane.xlu2 %8016  ;;  %v8864_v28 = vperm.slane %v16371_v0, %v13724_v31  ;;  %v16375_v56 = vperm.slane %v14182_v23, %v13713_v13  ;;  %v8892_v63 = vperm.slane %v16377_v41, %v13733_v33  ;;  %v8905_v23 = vperm.slane %v14327_v60, %v13727_v40  ;;  %v16381_v10 = vld [vmem:[#allocation110_spill] sm:$0xff] }
 0xed4   : > { %v8014_v21 = vpop.xlane.xlu1 %8013  ;;  %v8874_v53 = vsel %vm8683_vm3, %v16373_v20, %v8872_v1  ;;  %v8916_v62 = vperm.slane %v8017_v9, %v13713_v13  ;;  %v8877_v1 = vperm.slane %v16376_v37, %v13733_v33  ;;  %v8889_v30 = vsel %vm8683_vm3, %v8888_v48, %v8887_v14  ;;  %v14518_v20 = vpop.xlane.xlu0 %8073 }
 0xed5   : > { %v8902_v59 = vsel %vm8679_vm2, %v16375_v56, %v8900_v54  ;;  %v8876_v58 = vsel %vm8687_vm4, %v8875_v22, %v8874_v53  ;;  %v8915_v45 = vperm.slane %v8014_v21, %v16169_v19  ;;  %v8822_v54 = vsel %vm8699_vm7, %v8821_v25, %v8820_v34  ;;  %v16378_v22 = vld [vmem:[#allocation221_spill] sm:$0xff]  ;;  %v16383_v53 = vld [vmem:[#allocation222_spill] sm:$0xff]  ;;  %v16385_v56 = vld [vmem:[#allocation328_spill] sm:$0xff] }
 0xed6   : > { %v8904_v3 = vsel %vm8683_vm3, %v8903_v16, %v8902_v59  ;;  %v8838_v9 = vperm.slane %v16378_v22, %v13736_v61  ;;  %v8850_v16 = vsel %vm8695_vm6, %v8849_v6, %v8848_v46  ;;  %v8878_v17 = vsel %vm8691_vm5, %v8877_v1, %v8876_v58  ;;  %v16390_v22 = vld [vmem:[#allocation31_spill] sm:$0xff] }
 0xed7   : > { %v8881_v14 = vperm.slane %v16381_v10, %v13730_v11  ;;  %v8906_v60 = vsel %vm8687_vm4, %v8905_v23, %v8904_v3  ;;  %v16382_v46 = vperm.slane %v16350_v15, %v13727_v40  ;;  %v8917_v0 = vsel %vm8679_vm2, %v8916_v62, %v8915_v45  ;;  %v16388_v62 = vld [vmem:[#allocation228_spill] sm:$0xff] }
 0xed8   : > { %8151 = vadd.xlane.f32.xlu2 %v8150_v2  ;;  %v16379_v2 = vld [vmem:[#allocation210_spill] sm:$0xff]  ;;  %v8839_v34 = vsel %vm8703_vm8, %v8838_v9, %v8837_v12  ;;  %v8853_v55 = vperm.slane %v16383_v53, %v13736_v61  ;;  %v16386_v15 = vperm.slane %v16385_v56, %v13730_v11  ;;  %v16387_v58 = vperm.slane %v16346_v39, %v13724_v31 }
 0xed9   : > { %8148 = vadd.xlane.f32.xlu1 %v8147_v50  ;;  %v16380_v21 = vperm.slane %v16379_v2, %v13733_v33  ;;  %v8909_v50 = vperm.slane %v14384_v38, %v13724_v31  ;;  %v16384_v38 = vld [vmem:[#allocation123_spill] sm:$0xff]  ;;  %v8894_v45 = vperm.slane %v16388_v62, %v13724_v31  ;;  %v16389_v37 = vperm.slane %v14197_v49, %v13733_v33 }
 0xeda   : > { %v8866_v48 = vperm.slane %v16384_v38, %v13730_v11  ;;  %v8852_v59 = vsel %vm8699_vm7, %v16386_v15, %v8850_v16  ;;  %v8880_v3 = vsel %vm8695_vm6, %v16387_v58, %v8878_v17  ;;  %v8919_v39 = vsel %vm8683_vm3, %v8918_v7, %v8917_v0  ;;  %v16392_v17 = vld [vmem:[#allocation289_spill] sm:$0xff] }
 0xedb   : > { %v8863_v51 = vsel %vm8691_vm5, %v16380_v21, %v8861_v44  ;;  %v8026_v25 = vpop.xlane.xlu2 %8025  ;;  %v8891_v44 = vsel %vm8687_vm4, %v16382_v46, %v8889_v30  ;;  %v8908_v1 = vsel %vm8691_vm5, %v16389_v37, %v8906_v60  ;;  %v8882_v41 = vsel %vm8699_vm7, %v8881_v14, %v8880_v3  ;;  %v16393_v14 = vld [vmem:[#allocation315_spill] sm:$0xff]  ;;  %v16402_v37 = vld [vmem:[#allocation17_spill] sm:$0xff] }
 0xedc   : > { %v8865_v6 = vsel %vm8695_vm6, %v8864_v28, %v8863_v51  ;;  %v8023_v29 = vpop.xlane.xlu1 %8022  ;;  %v8893_v12 = vsel %vm8691_vm5, %v8892_v63, %v8891_v44  ;;  %v8910_v63 = vsel %vm8695_vm6, %v8909_v50, %v8908_v1  ;;  %v8898_v9 = vperm.slane %v16390_v22, %v13736_v61 }
 0xedd   : > { %v8920_v28 = vperm.slane %v8023_v29, %v13727_v40  ;;  %v8867_v30 = vsel %vm8699_vm7, %v8866_v48, %v8865_v6  ;;  %v8895_v23 = vsel %vm8695_vm6, %v8894_v45, %v8893_v12  ;;  %v8911_v49 = vperm.slane %v14376_v24, %v13730_v11  ;;  %v16399_v12 = vld [vmem:[#allocation20_spill] sm:$0xff] }
 0xede   : > { %v7059_v2 = vsub.f32 1.0, %v14419_v42  ;;  %v8854_v21 = vsel %vm8703_vm8, %v8853_v55, %v8852_v59  ;;  %v8883_v51 = vperm.slane %v16391_v52, %v13736_v61  ;;  %v8922_v7 = vperm.slane %v8026_v25, %v13733_v33  ;;  %v14586_v59 = vpop.xlane.xlu0 %8082 }
 0xedf   : > { %v8921_v16 = vsel %vm8687_vm4, %v8920_v28, %v8919_v39  ;;  %v6550_v10 = vsub.f32 %v16392_v17, %v10188_v8  ;;  %v16394_v24 = vperm.slane %v16393_v14, %v13736_v61  ;;  %v8912_v6 = vsel %vm8699_vm7, %v8911_v49, %v8910_v63  ;;  %v16400_v28 = vld [vmem:[#allocation34_spill] sm:$0xff] }
 0xee0   : > { %8160 = vadd.xlane.f32.xlu2 %v14388_v35  ;;  %v16395_v35 = vld [vmem:[#allocation213_spill] sm:$0xff]  ;;  %v8884_v25 = vsel %vm8703_vm8, %v8883_v51, %v8882_v41  ;;  %v8923_v29 = vsel %vm8691_vm5, %v8922_v7, %v8921_v16  ;;  %v16401_v56 = vsub.f32 %v16400_v28, %v10188_v8  ;;  %v8168_v1 = vsel %vm3758_vm1, %v16402_v37, 0.0  ;;  %v16405_v51 = vld [vmem:[#allocation130_spill] sm:$0xff] }
 0xee1   : > { %8157 = vadd.xlane.f32.xlu1 %v14427_v27  ;;  %v8824_v60 = vsel %vm8703_vm8, %v16394_v24, %v8822_v54  ;;  %v16396_v42 = vperm.slane %v16395_v35, %v13736_v61  ;;  %v16397_v27 = vld [vmem:[#allocation162_spill] sm:$0xff]  ;;  %v7058_v54 = vsub.f32 1.0, %v14403_v47  ;;  %v8914_v47 = vsel %vm8703_vm8, %v8913_v4, %v8912_v6  ;;  %v16407_v24 = vld [vmem:[#allocation157_spill] sm:$0xff] }
 0xee2   : > { %v9184_v46 = vsel %vm9170_vm9, %v8839_v34, %v8824_v60  ;;  %v16398_v44 = vperm.slane %v16397_v27, %v13730_v11  ;;  %v7567_v34 = vmul.f32 %v14396_v26, %v16399_v12  ;;  %v6805_v15 = vand.u32 2147483647, %v16401_v56  ;;  %v16409_v12 = vld [vmem:[#allocation292_spill] sm:$0xff]  ;;  %v16410_v56 = vld [vmem:[#allocation278_spill] sm:$0xff] }
 0xee3   : > { %v8869_v50 = vsel %vm8703_vm8, %v16396_v42, %v8867_v30  ;;  %v8035_v53 = vpop.xlane.xlu2 %8034  ;;  %v9185_v55 = vsel %vm9172_vm10, %v8854_v21, %v9184_v46  ;;  %v8925_v45 = vsel %vm8695_vm6, %v8924_v18, %v8923_v29  ;;  %v7315_v30 = vmax.f32 %v7059_v2, 0.0  ;;  %v16403_v18 = vld [vmem:[#allocation291_spill] sm:$0xff] }
 0xee4   : > { %v8897_v0 = vsel %vm8699_vm7, %v16398_v44, %v8895_v23  ;;  %v8032_v48 = vpop.xlane.xlu1 %8031  ;;  %v9186_v58 = vsel %vm9174_vm11, %v8869_v50, %v9185_v55  ;;  %v8928_v26 = vperm.slane %v8035_v53, %v13736_v61  ;;  %v6806_v41 = vand.u32 2147483647, %v6550_v10  ;;  %v16404_v2 = vld [vmem:[#allocation271_spill] sm:$0xff]  ;;  %v16406_v10 = vld [vmem:[#allocation269_spill] sm:$0xff] }
 0xee5   : > { %v8899_v38 = vsel %vm8703_vm8, %v8898_v9, %v8897_v0  ;;  %v8926_v3 = vperm.slane %v8032_v48, %v13730_v11  ;;  %v9187_v62 = vsel %vm9176_vm12, %v8884_v25, %v9186_v58  ;;  %v7314_v63 = vmax.f32 %v7058_v54, 0.0  ;;  %v16408_v42 = vld [vmem:[#allocation47_spill] sm:$0xff] }
 0xee6   : > { %v9188_v32 = vsel %vm9178_vm13, %v8899_v38, %v9187_v62  ;;  %v8165_v22 = vsel %vm3758_vm1, %v7567_v34, 0.0  ;;  %v6553_v9 = vsub.f32 %v16403_v18, %v10188_v8  ;;  %v7062_v49 = vsub.f32 1.0, %v6806_v41  ;;  %v14622_v46 = vpop.xlane.xlu0 %8091  ;;  %v16411_v58 = vld [vmem:[#allocation275_spill] sm:$0xff]  ;;  %v16412_v62 = vld [vmem:[#allocation294_spill] sm:$0xff] }
 0xee7   : > { %v8927_v4 = vsel %vm8699_vm7, %v8926_v3, %v8925_v45  ;;  %v9189_v23 = vsel %vm9180_vm14, %v8914_v47, %v9188_v32  ;;  %v7571_v21 = vmul.f32 %v7315_v30, %v16404_v2  ;;  %v7061_v52 = vsub.f32 1.0, %v6805_v15 }
 0xee8   : > { %v8929_v39 = vsel %vm8703_vm8, %v8928_v26, %v8927_v4  ;;  %8169 = vadd.xlane.f32.xlu2 %v8168_v1  ;;  %v6552_v7 = vsub.f32 %v16405_v51, %v10188_v8  ;;  %v7570_v14 = vmul.f32 %v7314_v63, %v16406_v10  ;;  %v8930_v60 = vperm.slane %v16407_v24, %v16169_v19 }
 0xee9   : > { %v9190_v57 = vsel %vm9182_vm15, %v8929_v39, %v9189_v23  ;;  %8166 = vadd.xlane.f32.xlu1 %v8165_v22  ;;  %v8935_v50 = vperm.slane %v16408_v42, %v13727_v40  ;;  %v6809_v25 = vand.u32 2147483647, %v6553_v9  ;;  %v7318_v27 = vmax.f32 %v7062_v49, 0.0  ;;  %v16413_v9 = vld [vmem:[#allocation87_spill] sm:$0xff] }
 0xeea   : > { %9210 = vst.msk [vmem:[%s14070_s21 + $0x8] sm:$0xff] %vm3758_vm1, %v9190_v57  ;;  %v8177_v0 = vsel %vm3758_vm1, %v7571_v21, 0.0  ;;  %v7317_v29 = vmax.f32 %v7061_v52, 0.0  ;;  %v6808_v53 = vand.u32 2147483647, %v6552_v7  ;;  %v8174_v55 = vsel %vm3758_vm1, %v7570_v14, 0.0 }
 0xeeb   : > { %v8044_v16 = vpop.xlane.xlu2 %8043  ;;  %v7065_v48 = vsub.f32 1.0, %v6809_v25  ;;  %v6556_v34 = vsub.f32 %v16409_v12, %v10188_v8  ;;  %v7574_v15 = vmul.f32 %v7318_v27, %v16410_v56  ;;  %v6555_v26 = vsub.f32 %v16412_v62, %v10188_v8  ;;  %v16414_v52 = vld [vmem:[#allocation284_spill] sm:$0xff]  ;;  %v16415_v7 = vld [vmem:[#allocation295_spill] sm:$0xff] }
 0xeec   : > { %v8041_v17 = vpop.xlane.xlu1 %8040  ;;  %v8933_v6 = vperm.slane %v8044_v16, %v13739_v36  ;;  %v7573_v47 = vmul.f32 %v7317_v29, %v16411_v58  ;;  %v7064_v3 = vsub.f32 1.0, %v6808_v53  ;;  %v8941_v1 = vperm.slane %v14366_v43, %v13730_v11  ;;  %v16418_v12 = vld [vmem:[#allocation287_spill] sm:$0xff]  ;;  %v16419_v56 = vld [vmem:[#allocation296_spill] sm:$0xff] }
 0xeed   : > { %v8931_v35 = vperm.slane %v8041_v17, %v13713_v13  ;;  %v7321_v41 = vmax.f32 %v7065_v48, 0.0  ;;  %v6812_v32 = vand.u32 2147483647, %v6556_v34  ;;  %v8186_v63 = vsel %vm3758_vm1, %v7574_v15, 0.0 }
 0xeee   : > { %v7320_v39 = vmax.f32 %v7064_v3, 0.0  ;;  %v6811_v23 = vand.u32 2147483647, %v6555_v26  ;;  %v8183_v57 = vsel %vm3758_vm1, %v7573_v47, 0.0  ;;  %v14643_v18 = vpop.xlane.xlu0 %8100  ;;  %v6559_v49 = vsub.f32 %v16413_v9, %v10188_v8  ;;  %v16420_v47 = vld [vmem:[#allocation285_spill] sm:$0xff]  ;;  %v16422_v9 = vld [vmem:[#allocation302_spill] sm:$0xff] }
 0xeef   : > { %v8932_v44 = vsel %vm8679_vm2, %v8931_v35, %v8930_v60  ;;  %v8946_v16 = vperm.slane %v14456_v5, %v13713_v13  ;;  %v7068_v2 = vsub.f32 1.0, %v6812_v32  ;;  %v7577_v51 = vmul.f32 %v7321_v41, %v16414_v52  ;;  %v16416_v60 = vld [vmem:[#allocation282_spill] sm:$0xff] }
 0xef0   : > { %v8934_v54 = vsel %vm8683_vm3, %v8933_v6, %v8932_v44  ;;  %8178 = vadd.xlane.f32.xlu2 %v8177_v0  ;;  %v6558_v17 = vsub.f32 %v16415_v7, %v10188_v8  ;;  %v7067_v10 = vsub.f32 1.0, %v6811_v23  ;;  %v7576_v35 = vmul.f32 %v7320_v39, %v16416_v60  ;;  %v16424_v7 = vld [vmem:[#allocation290_spill] sm:$0xff] }
 0xef1   : > { %8175 = vadd.xlane.f32.xlu1 %v8174_v55  ;;  %v8936_v38 = vsel %vm8687_vm4, %v8935_v50, %v8934_v54  ;;  %v6815_v50 = vand.u32 2147483647, %v6559_v49  ;;  %v7324_v25 = vmax.f32 %v7068_v2, 0.0  ;;  %v8195_v27 = vsel %vm3758_vm1, %v7577_v51, 0.0  ;;  %v16417_v55 = vld [vmem:[#allocation301_spill] sm:$0xff]  ;;  %v16423_v2 = vld [vmem:[#allocation115_spill] sm:$0xff] }
 0xef2   : > { %v6814_v44 = vand.u32 2147483647, %v6558_v17  ;;  %v7323_v0 = vmax.f32 %v7067_v10, 0.0  ;;  %v8192_v29 = vsel %vm3758_vm1, %v7576_v35, 0.0  ;;  %v6561_v15 = vsub.f32 %v16419_v56, %v10188_v8  ;;  %v16427_v56 = vld [vmem:[#allocation22_spill] sm:$0xff] }
 0xef3   : > { %v8053_v28 = vpop.xlane.xlu2 %8052  ;;  %v7071_v53 = vsub.f32 1.0, %v6815_v50  ;;  %v7580_v34 = vmul.f32 %v7324_v25, %v16418_v12  ;;  %v6565_v49 = vsub.f32 %v16422_v9, %v10188_v8  ;;  %v8958_v60 = vperm.slane %v14586_v59, %v13736_v61  ;;  %v16425_v59 = vld [vmem:[#allocation303_spill] sm:$0xff]  ;;  %v16431_v9 = vld [vmem:[#allocation104_spill] sm:$0xff] }
 0xef4   : > { %v8050_v45 = vpop.xlane.xlu1 %8049  ;;  %v8939_v30 = vperm.slane %v8053_v28, %v13724_v31  ;;  %v7070_v28 = vsub.f32 1.0, %v6814_v44  ;;  %v7579_v3 = vmul.f32 %v7323_v0, %v16420_v47  ;;  %v16426_v12 = vld [vmem:[#allocation299_spill] sm:$0xff] }
 0xef5   : > { %v8937_v37 = vperm.slane %v8050_v45, %v13733_v33  ;;  %v7327_v26 = vmax.f32 %v7071_v53, 0.0  ;;  %v8204_v41 = vsel %vm3758_vm1, %v7580_v34, 0.0 }
 0xef6   : > { %v14660_v54 = vpop.xlane.xlu0 %8109  ;;  %v7326_v32 = vmax.f32 %v7070_v28, 0.0  ;;  %v8201_v39 = vsel %vm3758_vm1, %v7579_v3, 0.0  ;;  %v16428_v3 = vld [vmem:[#allocation297_spill] sm:$0xff] }
 0xef7   : > { %v8938_v4 = vsel %vm8691_vm5, %v8937_v37, %v8936_v38  ;;  %v6562_v38 = vsub.f32 %v16417_v55, %v10188_v8  ;;  %v8952_v37 = vperm.slane %v14518_v20, %v13733_v33  ;;  %v6568_v55 = vsub.f32 %v16425_v59, %v10188_v8 }
 0xef8   : > { %v8940_v22 = vsel %vm8695_vm6, %v8939_v30, %v8938_v4  ;;  %8187 = vadd.xlane.f32.xlu2 %v8186_v63  ;;  %v6817_v4 = vand.u32 2147483647, %v6561_v15  ;;  %v7582_v17 = vmul.f32 %v7326_v32, %v16424_v7  ;;  %v6567_v15 = vsub.f32 %v16427_v56, %v10188_v8  ;;  %v16436_v56 = vld [vmem:[#allocation120_spill] sm:$0xff] }
 0xef9   : > { %8184 = vadd.xlane.f32.xlu1 %v8183_v57  ;;  %v8942_v43 = vsel %vm8699_vm7, %v8941_v1, %v8940_v22  ;;  %v6818_v1 = vand.u32 2147483647, %v6562_v38  ;;  %v16421_v22 = vld [vmem:[#allocation293_spill] sm:$0xff] }
 0xefa   : > { %v7583_v57 = vmul.f32 %v7327_v26, %v16421_v22  ;;  %v7073_v52 = vsub.f32 1.0, %v6817_v4  ;;  %v8210_v44 = vsel %vm3758_vm1, %v7582_v17, 0.0  ;;  %v8963_v26 = vperm.slane %v14622_v46, %v13739_v36  ;;  %v16430_v46 = vld [vmem:[#allocation15_spill] sm:$0xff] }
 0xefb   : > { %v8062_v21 = vpop.xlane.xlu2 %8061  ;;  %v7074_v20 = vsub.f32 1.0, %v6818_v1  ;;  %v6823_v32 = vand.u32 2147483647, %v6567_v15  ;;  %v8969_v17 = vperm.slane %v14643_v18, %v13724_v31  ;;  %v16433_v18 = vld [vmem:[#allocation37_spill] sm:$0xff] }
 0xefc   : > { %v8945_v14 = vperm.slane %v8062_v21, %v16169_v19  ;;  %v8059_v24 = vpop.xlane.xlu1 %8058  ;;  %v6564_v21 = vsub.f32 %v16423_v2, %v10188_v8  ;;  %v7329_v25 = vmax.f32 %v7073_v52, 0.0  ;;  %v16432_v2 = vld [vmem:[#allocation305_spill] sm:$0xff] }
 0xefd   : > { %v8943_v42 = vperm.slane %v8059_v24, %v13736_v61  ;;  %v8213_v24 = vsel %vm3758_vm1, %v7583_v57, 0.0  ;;  %v7330_v35 = vmax.f32 %v7074_v20, 0.0 }
 0xefe   : > { %v8947_v6 = vsel %vm8679_vm2, %v8946_v16, %v8945_v14 }
 0xeff   : > { %v8944_v5 = vsel %vm8703_vm8, %v8943_v42, %v8942_v43  ;;  %v14678_v43 = vpop.xlane.xlu0 %8118  ;;  %v6821_v42 = vand.u32 2147483647, %v6565_v49  ;;  %v7586_v34 = vmul.f32 %v7330_v35, %v16426_v12 }
 0xf00   : > { %8196 = vadd.xlane.f32.xlu2 %v8195_v27 }
 0xf01   : > { %8193 = vadd.xlane.f32.xlu1 %v8192_v29  ;;  %v7077_v38 = vsub.f32 1.0, %v6821_v42 }
 0xf03   : > { %v8071_v48 = vpop.xlane.xlu2 %8070 }
 0xf04   : > { %v8068_v58 = vpop.xlane.xlu1 %8067  ;;  %v8950_v45 = vperm.slane %v8071_v48, %v13727_v40 }
 0xf05   : > { %v8948_v62 = vperm.slane %v8068_v58, %v13739_v36 }
 0xf07   : > { %v8949_v30 = vsel %vm8683_vm3, %v8948_v62, %v8947_v6  ;;  %v6820_v6 = vand.u32 2147483647, %v6564_v21  ;;  %v14697_v53 = vpop.xlane.xlu0 %8127  ;;  %v7585_v62 = vmul.f32 %v7329_v25, %v16428_v3  ;;  %v6570_v21 = vsub.f32 %v16432_v2, %v10188_v8 }
 0xf08   : > { %v8951_v63 = vsel %vm8687_vm4, %v8950_v45, %v8949_v30  ;;  %8205 = vadd.xlane.f32.xlu2 %v8204_v41  ;;  %v6824_v45 = vand.u32 2147483647, %v6568_v55  ;;  %v8222_v30 = vsel %vm3758_vm1, %v7586_v34, 0.0  ;;  %v16434_v55 = vld [vmem:[#allocation21_spill] sm:$0xff] }
 0xf09   : > { %8202 = vadd.xlane.f32.xlu1 %v8201_v39  ;;  %v8953_v23 = vsel %vm8691_vm5, %v8952_v37, %v8951_v63  ;;  %v7076_v28 = vsub.f32 1.0, %v6820_v6  ;;  %v7333_v37 = vmax.f32 %v7077_v38, 0.0  ;;  %v8219_v4 = vsel %vm3758_vm1, %v7585_v62, 0.0 }
 0xf0a   : > { %v7080_v39 = vsub.f32 1.0, %v6824_v45 }
 0xf0b   : > { %v8080_v16 = vpop.xlane.xlu2 %8079  ;;  %v7332_v41 = vmax.f32 %v7076_v28, 0.0  ;;  %v7589_v20 = vmul.f32 %v7333_v37, %v16430_v46 }
 0xf0c   : > { %v8077_v51 = vpop.xlane.xlu1 %8076  ;;  %v8956_v14 = vperm.slane %v8080_v16, %v13730_v11  ;;  %v7079_v16 = vsub.f32 1.0, %v6823_v32 }
 0xf0d   : > { %v8954_v10 = vperm.slane %v8077_v51, %v13724_v31  ;;  %v7588_v49 = vmul.f32 %v7332_v41, %v16431_v9  ;;  %v8231_v35 = vsel %vm3758_vm1, %v7589_v20, 0.0  ;;  %v16439_v20 = vld [vmem:[#allocation307_spill] sm:$0xff] }
 0xf0e   : > { %v7335_v42 = vmax.f32 %v7079_v16, 0.0  ;;  %v6576_v9 = vsub.f32 %v16439_v20, %v10188_v8  ;;  %v16440_v16 = vld [vmem:[#allocation43_spill] sm:$0xff] }
 0xf0f   : > { %v8955_v50 = vsel %vm8695_vm6, %v8954_v10, %v8953_v23  ;;  %v16429_v23 = vld [vmem:[#allocation304_spill] sm:$0xff]  ;;  %v14719_v51 = vpop.xlane.xlu0 %8136  ;;  %v8228_v25 = vsel %vm3758_vm1, %v7588_v49, 0.0  ;;  %v16447_v20 = vld [vmem:[#allocation311_spill] sm:$0xff] }
 0xf10   : > { %v8957_v27 = vsel %vm8699_vm7, %v8956_v14, %v8955_v50  ;;  %8214 = vadd.xlane.f32.xlu2 %v8213_v24  ;;  %v6571_v22 = vsub.f32 %v16429_v23, %v10188_v8  ;;  %v7336_v14 = vmax.f32 %v7080_v39, 0.0  ;;  %v6826_v50 = vand.u32 2147483647, %v6570_v21 }
 0xf11   : > { %v8959_v0 = vsel %vm8703_vm8, %v8958_v60, %v8957_v27  ;;  %8211 = vadd.xlane.f32.xlu1 %v8210_v44  ;;  %v6574_v44 = vsub.f32 %v16433_v18, %v10188_v8  ;;  %v7591_v15 = vmul.f32 %v7335_v42, %v16436_v56  ;;  %v8975_v21 = vperm.slane %v14660_v54, %v16169_v19 }
 0xf12   : > { %v14695_v29 = vsel %vm9170_vm9, %v8959_v0, %v8944_v5  ;;  %v6827_v24 = vand.u32 2147483647, %v6571_v22  ;;  %v7592_v38 = vmul.f32 %v7336_v14, %v16434_v55  ;;  %v7082_v34 = vsub.f32 1.0, %v6826_v50  ;;  %v16438_v22 = vld [vmem:[#allocation12_spill] sm:$0xff] }
 0xf13   : > { %v8089_v48 = vpop.xlane.xlu2 %8088  ;;  %v8237_v41 = vsel %vm3758_vm1, %v7591_v15, 0.0 }
 0xf14   : > { %v8961_v58 = vperm.slane %v8089_v48, %v13713_v13  ;;  %v8086_v47 = vpop.xlane.xlu1 %8085  ;;  %v7083_v0 = vsub.f32 1.0, %v6827_v24  ;;  %v16435_v48 = vld [vmem:[#allocation306_spill] sm:$0xff]  ;;  %v8240_v45 = vsel %vm3758_vm1, %v7592_v38, 0.0 }
 0xf15   : > { %v8960_v5 = vperm.slane %v8086_v47, %v16169_v19  ;;  %v6573_v12 = vsub.f32 %v16435_v48, %v10188_v8  ;;  %v6830_v47 = vand.u32 2147483647, %v6574_v44 }
 0xf17   : > { %v8962_v1 = vsel %vm8679_vm2, %v8961_v58, %v8960_v5  ;;  %v14738_v62 = vpop.xlane.xlu0 %8145  ;;  %v7339_v5 = vmax.f32 %v7083_v0, 0.0  ;;  %v6829_v37 = vand.u32 2147483647, %v6573_v12  ;;  %v16443_v0 = vld [vmem:[#allocation309_spill] sm:$0xff]  ;;  %v16444_v12 = vld [vmem:[#allocation198_spill] sm:$0xff] }
 0xf18   : > { %8223 = vadd.xlane.f32.xlu2 %v8222_v30  ;;  %v8964_v63 = vsel %vm8683_vm3, %v8963_v26, %v8962_v1  ;;  %v7338_v1 = vmax.f32 %v7082_v34, 0.0 }
 0xf19   : > { %8220 = vadd.xlane.f32.xlu1 %v8219_v4  ;;  %v7086_v4 = vsub.f32 1.0, %v6830_v47  ;;  %v7085_v46 = vsub.f32 1.0, %v6829_v37  ;;  %v8986_v47 = vperm.slane %v14697_v53, %v13730_v11 }
 0xf1a   : > { %v7594_v2 = vmul.f32 %v7338_v1, %v16440_v16 }
 0xf1b   : > { %v8098_v57 = vpop.xlane.xlu2 %8097 }
 0xf1c   : > { %v8095_v52 = vpop.xlane.xlu1 %8094  ;;  %v8967_v10 = vperm.slane %v8098_v57, %v13733_v33  ;;  %v7595_v57 = vmul.f32 %v7339_v5, %v16438_v22  ;;  %v8246_v54 = vsel %vm3758_vm1, %v7594_v2, 0.0  ;;  %v16446_v22 = vld [vmem:[#allocation200_spill] sm:$0xff] }
 0xf1d   : > { %v8965_v7 = vperm.slane %v8095_v52, %v13727_v40  ;;  %v7342_v52 = vmax.f32 %v7086_v4, 0.0  ;;  %v16448_v2 = vld [vmem:[#allocation148_spill] sm:$0xff] }
 0xf1e   : > { %v8249_v24 = vsel %vm3758_vm1, %v7595_v57, 0.0 }
 0xf1f   : > { %v8966_v60 = vsel %vm8687_vm4, %v8965_v7, %v8964_v63  ;;  %v16437_v63 = vld [vmem:[#allocation308_spill] sm:$0xff]  ;;  %v14764_v50 = vpop.xlane.xlu0 %8154 }
 0xf20   : > { %v8968_v6 = vsel %vm8691_vm5, %v8967_v10, %v8966_v60  ;;  %8232 = vadd.xlane.f32.xlu2 %v8231_v35  ;;  %v6577_v39 = vsub.f32 %v16437_v63, %v10188_v8  ;;  %v7341_v60 = vmax.f32 %v7085_v46, 0.0  ;;  %v6832_v35 = vand.u32 2147483647, %v6576_v9  ;;  %v16445_v63 = vld [vmem:[#allocation310_spill] sm:$0xff] }
 0xf21   : > { %8229 = vadd.xlane.f32.xlu1 %v8228_v25  ;;  %v8970_v27 = vsel %vm8695_vm6, %v8969_v17, %v8968_v6  ;;  %v8980_v17 = vperm.slane %v14678_v43, %v13727_v40  ;;  %v16441_v25 = vld [vmem:[#allocation173_spill] sm:$0xff]  ;;  %v8991_v46 = vperm.slane %v14719_v51, %v13713_v13  ;;  %v6582_v9 = vsub.f32 %v16447_v20, %v10188_v8 }
 0xf22   : > { %v6833_v10 = vand.u32 2147483647, %v6577_v39  ;;  %v6579_v43 = vsub.f32 %v16441_v25, %v10188_v8  ;;  %v7088_v38 = vsub.f32 1.0, %v6832_v35  ;;  %v7597_v34 = vmul.f32 %v7341_v60, %v16444_v12 }
 0xf23   : > { %v8107_v59 = vpop.xlane.xlu2 %8106  ;;  %v6583_v39 = vsub.f32 %v16445_v63, %v10188_v8  ;;  %v6838_v51 = vand.u32 2147483647, %v6582_v9  ;;  %v8997_v12 = vperm.slane %v14738_v62, %v13733_v33  ;;  %v16453_v62 = vld [vmem:[#allocation35_spill] sm:$0xff]  ;;  %v16454_v63 = vld [vmem:[#allocation121_spill] sm:$0xff] }
 0xf24   : > { %v8104_v28 = vpop.xlane.xlu1 %8103  ;;  %v8973_v3 = vperm.slane %v8107_v59, %v13736_v61  ;;  %v7089_v44 = vsub.f32 1.0, %v6833_v10  ;;  %v6580_v59 = vsub.f32 %v16443_v0, %v10188_v8  ;;  %v6835_v56 = vand.u32 2147483647, %v6579_v43 }
 0xf25   : > { %v8971_v58 = vperm.slane %v8104_v28, %v13730_v11  ;;  %v8255_v1 = vsel %vm3758_vm1, %v7597_v34, 0.0 }
 0xf26   : > { %v6836_v5 = vand.u32 2147483647, %v6580_v59  ;;  %v7091_v4 = vsub.f32 1.0, %v6835_v56  ;;  %v7094_v59 = vsub.f32 1.0, %v6838_v51 }
 0xf27   : > { %v8972_v26 = vsel %vm8699_vm7, %v8971_v58, %v8970_v27  ;;  %v16442_v27 = vld [vmem:[#allocation199_spill] sm:$0xff] }
 0xf28   : > { %v8974_v30 = vsel %vm8703_vm8, %v8973_v3, %v8972_v26  ;;  %8241 = vadd.xlane.f32.xlu2 %v8240_v45  ;;  %v7598_v18 = vmul.f32 %v7342_v52, %v16442_v27  ;;  %v7345_v3 = vmax.f32 %v7089_v44, 0.0  ;;  %v7344_v45 = vmax.f32 %v7088_v38, 0.0  ;;  %v16450_v27 = vld [vmem:[#allocation201_spill] sm:$0xff]  ;;  %v16451_v44 = vld [vmem:[#allocation67_spill] sm:$0xff] }
 0xf29   : > { %8238 = vadd.xlane.f32.xlu1 %v8237_v41  ;;  %v14746_v32 = vsel %vm9172_vm10, %v8974_v30, %v14695_v29  ;;  %v14781_v30 = vpop.xlane.xlu0 %8163  ;;  %v7092_v53 = vsub.f32 1.0, %v6836_v5 }
 0xf2a   : > { %v8258_v58 = vsel %vm3758_vm1, %v7598_v18, 0.0  ;;  %v7601_v57 = vmul.f32 %v7345_v3, %v16446_v22 }
 0xf2b   : > { %v8116_v23 = vpop.xlane.xlu2 %8115 }
 0xf2c   : > { %v8113_v49 = vpop.xlane.xlu1 %8112  ;;  %v8978_v7 = vperm.slane %v8116_v23, %v13739_v36 }
 0xf2d   : > { %v8976_v29 = vperm.slane %v8113_v49, %v13713_v13 }
 0xf2f   : > { %v8977_v14 = vsel %vm8679_vm2, %v8976_v29, %v8975_v21  ;;  %v7600_v21 = vmul.f32 %v7344_v45, %v16448_v2  ;;  %v9003_v2 = vperm.slane %v14764_v50, %v13736_v61  ;;  %v16457_v50 = vld [vmem:[#allocation317_spill] sm:$0xff] }
 0xf30   : > { %v8979_v42 = vsel %vm8683_vm3, %v8978_v7, %v8977_v14  ;;  %8250 = vadd.xlane.f32.xlu2 %v8249_v24  ;;  %v6839_v7 = vand.u32 2147483647, %v6583_v39  ;;  %v8267_v14 = vsel %vm3758_vm1, %v7601_v57, 0.0  ;;  %v7347_v24 = vmax.f32 %v7091_v4, 0.0 }
 0xf31   : > { %8247 = vadd.xlane.f32.xlu1 %v8246_v54  ;;  %v8981_v6 = vsel %vm8687_vm4, %v8980_v17, %v8979_v42  ;;  %v7348_v17 = vmax.f32 %v7092_v53, 0.0  ;;  %v8264_v35 = vsel %vm3758_vm1, %v7600_v21, 0.0  ;;  %v14800_v42 = vpop.xlane.xlu0 %8172  ;;  %v16455_v53 = vld [vmem:[#allocation314_spill] sm:$0xff] }
 0xf32   : > { %v7095_v54 = vsub.f32 1.0, %v6839_v7  ;;  %v7603_v0 = vmul.f32 %v7347_v24, %v16451_v44 }
 0xf33   : > { %v8125_v55 = vpop.xlane.xlu2 %8124  ;;  %v7604_v18 = vmul.f32 %v7348_v17, %v16450_v27 }
 0xf34   : > { %v8122_v48 = vpop.xlane.xlu1 %8121  ;;  %v8984_v15 = vperm.slane %v8125_v55, %v13724_v31  ;;  %v16452_v55 = vld [vmem:[#allocation313_spill] sm:$0xff] }
 0xf35   : > { %v8982_v28 = vperm.slane %v8122_v48, %v13733_v33  ;;  %v6585_v38 = vsub.f32 %v16452_v55, %v10188_v8 }
 0xf37   : > { %v8983_v26 = vsel %vm8691_vm5, %v8982_v28, %v8981_v6  ;;  %v16449_v6 = vld [vmem:[#allocation312_spill] sm:$0xff]  ;;  %v7351_v28 = vmax.f32 %v7095_v54, 0.0  ;;  %v6841_v3 = vand.u32 2147483647, %v6585_v38  ;;  %v6592_v54 = vsub.f32 %v16457_v50, %v10188_v8 }
 0xf38   : > { %v8985_v37 = vsel %vm8695_vm6, %v8984_v15, %v8983_v26  ;;  %8259 = vadd.xlane.f32.xlu2 %v8258_v58  ;;  %v6586_v25 = vsub.f32 %v16449_v6, %v10188_v8  ;;  %v8276_v58 = vsel %vm3758_vm1, %v7604_v18, 0.0  ;;  %v8273_v26 = vsel %vm3758_vm1, %v7603_v0, 0.0  ;;  %v16459_v18 = vld [vmem:[#allocation89_spill] sm:$0xff] }
 0xf39   : > { %8256 = vadd.xlane.f32.xlu1 %v8255_v1  ;;  %v8987_v41 = vsel %vm8699_vm7, %v8986_v47, %v8985_v37  ;;  %v7350_v47 = vmax.f32 %v7094_v59, 0.0  ;;  %v6589_v37 = vsub.f32 %v16453_v62, %v10188_v8  ;;  %v14819_v1 = vpop.xlane.xlu0 %8181  ;;  %v7607_v39 = vmul.f32 %v7351_v28, %v16454_v63  ;;  %v16460_v59 = vld [vmem:[#allocation29_spill] sm:$0xff] }
 0xf3a   : > { %v6842_v56 = vand.u32 2147483647, %v6586_v25  ;;  %v7097_v22 = vsub.f32 1.0, %v6841_v3  ;;  %v16458_v25 = vld [vmem:[#allocation204_spill] sm:$0xff]  ;;  %v6591_v44 = vsub.f32 %v16459_v18, %v10188_v8 }
 0xf3b   : > { %v8134_v23 = vpop.xlane.xlu2 %8133 }
 0xf3c   : > { %v8990_v49 = vperm.slane %v8134_v23, %v16169_v19  ;;  %v8131_v16 = vpop.xlane.xlu1 %8130  ;;  %v6588_v23 = vsub.f32 %v16455_v53, %v10188_v8  ;;  %v7353_v17 = vmax.f32 %v7097_v22, 0.0 }
 0xf3d   : > { %v8988_v29 = vperm.slane %v8131_v16, %v13736_v61 }
 0xf3e   : > { %v8992_v52 = vsel %vm8679_vm2, %v8991_v46, %v8990_v49  ;;  %v16456_v46 = vld [vmem:[#allocation202_spill] sm:$0xff]  ;;  %v6845_v49 = vand.u32 2147483647, %v6589_v37  ;;  %v6844_v7 = vand.u32 2147483647, %v6588_v23  ;;  %v7609_v55 = vmul.f32 %v7353_v17, %v16460_v59 }
 0xf3f   : > { %v8989_v10 = vsel %vm8703_vm8, %v8988_v29, %v8987_v41  ;;  %v7098_v41 = vsub.f32 1.0, %v6842_v56  ;;  %v7606_v20 = vmul.f32 %v7350_v47, %v16456_v46  ;;  %v16461_v56 = vld [vmem:[#allocation205_spill] sm:$0xff]  ;;  %v16462_v47 = vld [vmem:[#allocation318_spill] sm:$0xff] }
 0xf40   : > { %v9193_v60 = vsel %vm9174_vm11, %v8989_v10, %v14746_v32  ;;  %8268 = vadd.xlane.f32.xlu2 %v8267_v14  ;;  %v7100_v27 = vsub.f32 1.0, %v6844_v7  ;;  %v8291_v28 = vsel %vm3758_vm1, %v7609_v55, 0.0  ;;  %v6595_v3 = vsub.f32 %v16462_v47, %v10188_v8 }
 0xf41   : > { %8265 = vadd.xlane.f32.xlu1 %v8264_v35  ;;  %v7354_v21 = vmax.f32 %v7098_v41, 0.0  ;;  %v8282_v14 = vsel %vm3758_vm1, %v7606_v20, 0.0  ;;  %v7101_v35 = vsub.f32 1.0, %v6845_v49  ;;  %v14847_v38 = vpop.xlane.xlu0 %8190  ;;  %v16464_v41 = vld [vmem:[#allocation46_spill] sm:$0xff]  ;;  %v16465_v20 = vld [vmem:[#allocation319_spill] sm:$0xff] }
 0xf42   : > { %v6851_v53 = vand.u32 2147483647, %v6595_v3 }
 0xf43   : > { %v8143_v43 = vpop.xlane.xlu2 %8142 }
 0xf44   : > { %v8140_v32 = vpop.xlane.xlu1 %8139  ;;  %v8995_v34 = vperm.slane %v8143_v43, %v13727_v40  ;;  %v7610_v43 = vmul.f32 %v7354_v21, %v16458_v25  ;;  %v7107_v49 = vsub.f32 1.0, %v6851_v53 }
 0xf45   : > { %v8993_v48 = vperm.slane %v8140_v32, %v13739_v36  ;;  %v6848_v32 = vand.u32 2147483647, %v6592_v54 }
 0xf46   : > { %v7363_v50 = vmax.f32 %v7107_v49, 0.0 }
 0xf47   : > { %v8994_v15 = vsel %vm8683_vm3, %v8993_v48, %v8992_v52  ;;  %v8285_v52 = vsel %vm3758_vm1, %v7607_v39, 0.0  ;;  %v8294_v48 = vsel %vm3758_vm1, %v7610_v43, 0.0 }
 0xf48   : > { %v8996_v5 = vsel %vm8687_vm4, %v8995_v34, %v8994_v15  ;;  %8277 = vadd.xlane.f32.xlu2 %v8276_v58  ;;  %v6847_v34 = vand.u32 2147483647, %v6591_v44  ;;  %v7104_v58 = vsub.f32 1.0, %v6848_v32  ;;  %v16469_v44 = vld [vmem:[#allocation322_spill] sm:$0xff] }
 0xf49   : > { %8274 = vadd.xlane.f32.xlu1 %v8273_v26  ;;  %v8998_v45 = vsel %vm8691_vm5, %v8997_v12, %v8996_v5  ;;  %v7356_v12 = vmax.f32 %v7100_v27, 0.0  ;;  %v16463_v26 = vld [vmem:[#allocation57_spill] sm:$0xff]  ;;  %v14861_v63 = vpop.xlane.xlu0 %8199  ;;  %v6601_v59 = vsub.f32 %v16469_v44, %v10188_v8 }
 0xf4a   : > { %v7103_v62 = vsub.f32 1.0, %v6847_v34  ;;  %v7360_v39 = vmax.f32 %v7104_v58, 0.0 }
 0xf4b   : > { %v8152_v4 = vpop.xlane.xlu2 %8151  ;;  %v6857_v3 = vand.u32 2147483647, %v6601_v59  ;;  %v16478_v59 = vld [vmem:[#allocation175_spill] sm:$0xff] }
 0xf4c   : > { %v8149_v57 = vpop.xlane.xlu1 %8148  ;;  %v9001_v16 = vperm.slane %v8152_v4, %v13730_v11  ;;  %v7612_v4 = vmul.f32 %v7356_v12, %v16464_v41 }
 0xf4d   : > { %v8999_v9 = vperm.slane %v8149_v57, %v13724_v31  ;;  %v7359_v57 = vmax.f32 %v7103_v62, 0.0  ;;  %v7113_v53 = vsub.f32 1.0, %v6857_v3 }
 0xf4e   : > { %v8300_v46 = vsel %vm3758_vm1, %v7612_v4, 0.0  ;;  %v16473_v4 = vld [vmem:[#allocation116_spill] sm:$0xff] }
 0xf4f   : > { %v9000_v29 = vsel %vm8695_vm6, %v8999_v9, %v8998_v45  ;;  %v6594_v45 = vsub.f32 %v16463_v26, %v10188_v8  ;;  %v6598_v9 = vsub.f32 %v16465_v20, %v10188_v8 }
 0xf50   : > { %v9002_v10 = vsel %vm8699_vm7, %v9001_v16, %v9000_v29  ;;  %8286 = vadd.xlane.f32.xlu2 %v8285_v52  ;;  %v16467_v52 = vld [vmem:[#allocation320_spill] sm:$0xff] }
 0xf51   : > { %v9004_v24 = vsel %vm8703_vm8, %v9003_v2, %v9002_v10  ;;  %8283 = vadd.xlane.f32.xlu1 %v8282_v14  ;;  %v6850_v22 = vand.u32 2147483647, %v6594_v45  ;;  %v16466_v2 = vld [vmem:[#allocation16_spill] sm:$0xff]  ;;  %v6597_v7 = vsub.f32 %v16467_v52, %v10188_v8  ;;  %v16468_v10 = vld [vmem:[#allocation66_spill] sm:$0xff]  ;;  %v7369_v52 = vmax.f32 %v7113_v53, 0.0 }
 0xf52   : > { %v14835_v51 = vsel %vm9176_vm12, %v9004_v24, %v9193_v60  ;;  %v7357_v60 = vmax.f32 %v7101_v35, 0.0  ;;  %v7616_v21 = vmul.f32 %v7360_v39, %v16466_v2  ;;  %v7615_v14 = vmul.f32 %v7359_v57, %v16468_v10  ;;  %v14875_v24 = vpop.xlane.xlu0 %8208  ;;  %v16476_v2 = vld [vmem:[#allocation45_spill] sm:$0xff] }
 0xf53   : > { %v14839_v6 = vpop.xlane.xlu2 %8160  ;;  %v7106_v29 = vsub.f32 1.0, %v6850_v22  ;;  %v6854_v35 = vand.u32 2147483647, %v6598_v9  ;;  %v6853_v43 = vand.u32 2147483647, %v6597_v7  ;;  %v6604_v39 = vsub.f32 %v16473_v4, %v10188_v8  ;;  %v16474_v22 = vld [vmem:[#allocation161_spill] sm:$0xff] }
 0xf54   : > { %v14844_v0 = vpop.xlane.xlu1 %8157  ;;  %v7613_v15 = vmul.f32 %v7357_v60, %v16461_v56  ;;  %v8312_v54 = vsel %vm3758_vm1, %v7616_v21, 0.0  ;;  %v8309_v27 = vsel %vm3758_vm1, %v7615_v14, 0.0  ;;  %v16470_v60 = vld [vmem:[#allocation208_spill] sm:$0xff] }
 0xf55   : > { %v7362_v25 = vmax.f32 %v7106_v29, 0.0  ;;  %v7110_v18 = vsub.f32 1.0, %v6854_v35  ;;  %v7619_v32 = vmul.f32 %v7363_v50, %v16470_v60  ;;  %v7109_v34 = vsub.f32 1.0, %v6853_v43 }
 0xf56   : > { %v8303_v23 = vsel %vm3758_vm1, %v7613_v15, 0.0  ;;  %v6860_v29 = vand.u32 2147483647, %v6604_v39  ;;  %v7625_v60 = vmul.f32 %v7369_v52, %v16478_v59  ;;  %v9036_v59 = vperm.slane %v14875_v24, %v13713_v13 }
 0xf57   : > { %v7366_v47 = vmax.f32 %v7110_v18, 0.0  ;;  %v8321_v26 = vsel %vm3758_vm1, %v7619_v32, 0.0  ;;  %v7365_v45 = vmax.f32 %v7109_v34, 0.0  ;;  %v9005_v18 = vperm.slane %v14844_v0, %v16169_v19 }
 0xf58   : > { %8295 = vadd.xlane.f32.xlu2 %v8294_v48  ;;  %v16471_v48 = vld [vmem:[#allocation207_spill] sm:$0xff]  ;;  %v7116_v50 = vsub.f32 1.0, %v6860_v29  ;;  %v9008_v0 = vperm.slane %v14781_v30, %v13739_v36 }
 0xf59   : > { %8292 = vadd.xlane.f32.xlu1 %v8291_v28  ;;  %v7618_v12 = vmul.f32 %v7362_v25, %v16471_v48  ;;  %v16472_v28 = vld [vmem:[#allocation323_spill] sm:$0xff]  ;;  %v7622_v57 = vmul.f32 %v7366_v47, %v16474_v22  ;;  %v7621_v21 = vmul.f32 %v7365_v45, %v16476_v2  ;;  %v16477_v25 = vld [vmem:[#allocation333_spill] sm:$0xff] }
 0xf5a   : > { %v6600_v56 = vsub.f32 %v16472_v28, %v10188_v8  ;;  %v14887_v58 = vpop.xlane.xlu0 %8217  ;;  %v6607_v43 = vsub.f32 %v16477_v25, %v10188_v8  ;;  %v16479_v48 = vld [vmem:[#allocation203_spill] sm:$0xff]  ;;  %v7372_v3 = vmax.f32 %v7116_v50, 0.0 }
 0xf5b   : > { %v14854_v5 = vpop.xlane.xlu2 %8169  ;;  %v8318_v41 = vsel %vm3758_vm1, %v7618_v12, 0.0  ;;  %v8330_v7 = vsel %vm3758_vm1, %v7622_v57, 0.0  ;;  %v8327_v35 = vsel %vm3758_vm1, %v7621_v21, 0.0  ;;  %v6606_v12 = vsub.f32 %v16479_v48, %v10188_v8  ;;  %v16482_v57 = vld [vmem:[#allocation206_spill] sm:$0xff] }
 0xf5c   : > { %v14858_v37 = vpop.xlane.xlu1 %8166  ;;  %v6856_v62 = vand.u32 2147483647, %v6600_v56  ;;  %v16480_v56 = vld [vmem:[#allocation122_spill] sm:$0xff]  ;;  %v9012_v50 = vperm.slane %v14854_v5, %v13733_v33 }
 0xf5d   : > { %v6862_v4 = vand.u32 2147483647, %v6606_v12 }
 0xf5e   : > { %v7112_v9 = vsub.f32 1.0, %v6856_v62  ;;  %v9010_v62 = vperm.slane %v14858_v37, %v13727_v40  ;;  %v16483_v37 = vld [vmem:[#allocation209_spill] sm:$0xff] }
 0xf60   : > { %8304 = vadd.xlane.f32.xlu2 %v8303_v23  ;;  %v7368_v14 = vmax.f32 %v7112_v9, 0.0  ;;  %v6610_v9 = vsub.f32 %v16483_v37, %v10188_v8  ;;  %v16488_v37 = vld [vmem:[#allocation132_spill] sm:$0xff] }
 0xf61   : > { %8301 = vadd.xlane.f32.xlu1 %v8300_v46  ;;  %v16475_v46 = vld [vmem:[#allocation324_spill] sm:$0xff] }
 0xf62   : > { %v6603_v20 = vsub.f32 %v16475_v46, %v10188_v8  ;;  %v7624_v47 = vmul.f32 %v7368_v14, %v16480_v56  ;;  %v7628_v46 = vmul.f32 %v7372_v3, %v16482_v57  ;;  %v6866_v12 = vand.u32 2147483647, %v6610_v9 }
 0xf63   : > { %v14867_v16 = vpop.xlane.xlu2 %8178 }
 0xf64   : > { %v14872_v17 = vpop.xlane.xlu1 %8175  ;;  %v6859_v10 = vand.u32 2147483647, %v6603_v20  ;;  %v8336_v53 = vsel %vm3758_vm1, %v7624_v47, 0.0 }
 0xf66   : > { %v7115_v32 = vsub.f32 1.0, %v6859_v10 }
 0xf68   : > { %8313 = vadd.xlane.f32.xlu2 %v8312_v54  ;;  %v14903_v54 = vpop.xlane.xlu0 %8226 }
 0xf69   : > { %8310 = vadd.xlane.f32.xlu1 %v8309_v27  ;;  %v9006_v27 = vperm.slane %v14839_v6, %v13713_v13  ;;  %v9020_v6 = vperm.slane %v14819_v1, %v16169_v19  ;;  %v16481_v1 = vld [vmem:[#allocation134_spill] sm:$0xff] }
 0xf6a   : > { %v6609_v22 = vsub.f32 %v16481_v1, %v10188_v8 }
 0xf6b   : > { %v14881_v55 = vpop.xlane.xlu2 %8187  ;;  %v9007_v45 = vsel %vm8679_vm2, %v9006_v27, %v9005_v18 }
 0xf6c   : > { %v8185_v15 = vpop.xlane.xlu1 %8184  ;;  %v9023_v30 = vperm.slane %v14881_v55, %v13739_v36  ;;  %v9009_v2 = vsel %vm8683_vm3, %v9008_v0, %v9007_v45  ;;  %v9025_v55 = vperm.slane %v14847_v38, %v13727_v40  ;;  %v6865_v18 = vand.u32 2147483647, %v6609_v22  ;;  %v16486_v22 = vld [vmem:[#allocation316_spill] sm:$0xff] }
 0xf6d   : > { %v9021_v34 = vperm.slane %v8185_v15, %v13713_v13  ;;  %v7371_v15 = vmax.f32 %v7115_v32, 0.0  ;;  %v9011_v29 = vsel %vm8687_vm4, %v9010_v62, %v9009_v2  ;;  %v9016_v32 = vperm.slane %v14872_v17, %v13730_v11  ;;  %v16485_v17 = vld [vmem:[#allocation143_spill] sm:$0xff] }
 0xf6e   : > { %v9013_v38 = vsel %vm8691_vm5, %v9012_v50, %v9011_v29  ;;  %v9031_v62 = vperm.slane %v14861_v63, %v13730_v11  ;;  %v16487_v63 = vld [vmem:[#allocation151_spill] sm:$0xff] }
 0xf6f   : > { %v9022_v39 = vsel %vm8679_vm2, %v9021_v34, %v9020_v6  ;;  %v7121_v6 = vsub.f32 1.0, %v6865_v18 }
 0xf70   : > { %8322 = vadd.xlane.f32.xlu2 %v8321_v26  ;;  %v6863_v26 = vand.u32 2147483647, %v6607_v43  ;;  %v14936_v21 = vpop.xlane.xlu0 %8235  ;;  %v9024_v52 = vsel %vm8683_vm3, %v9023_v30, %v9022_v39  ;;  %v16484_v43 = vld [vmem:[#allocation30_spill] sm:$0xff]  ;;  %v9018_v39 = vperm.slane %v14867_v16, %v13736_v61  ;;  %v6613_v30 = vsub.f32 %v16487_v63, %v10188_v8  ;;  %v16495_v63 = vld [vmem:[#allocation156_spill] sm:$0xff] }
 0xf71   : > { %8319 = vadd.xlane.f32.xlu1 %v8318_v41  ;;  %v8339_v41 = vsel %vm3758_vm1, %v7625_v60, 0.0  ;;  %v7627_v27 = vmul.f32 %v7371_v15, %v16484_v43  ;;  %v9026_v5 = vsel %vm8687_vm4, %v9025_v55, %v9024_v52  ;;  %v9048_v55 = vperm.slane %v14903_v54, %v13736_v61 }
 0xf72   : > { %v7119_v20 = vsub.f32 1.0, %v6863_v26  ;;  %v6614_v26 = vsub.f32 %v16485_v17, %v10188_v8  ;;  %v6869_v43 = vand.u32 2147483647, %v6613_v30  ;;  %v6616_v30 = vsub.f32 %v16495_v63, %v10188_v8 }
 0xf73   : > { %v14893_v23 = vpop.xlane.xlu2 %8196 }
 0xf74   : > { %v14898_v49 = vpop.xlane.xlu1 %8193  ;;  %v7375_v48 = vmax.f32 %v7119_v20, 0.0  ;;  %v9029_v47 = vperm.slane %v14893_v23, %v13724_v31  ;;  %v6870_v2 = vand.u32 2147483647, %v6614_v26 }
 0xf76   : > { %v7631_v57 = vmul.f32 %v7375_v48, %v16486_v22  ;;  %v7126_v54 = vsub.f32 1.0, %v6870_v2 }
 0xf78   : > { %8331 = vadd.xlane.f32.xlu2 %v8330_v7  ;;  %v9027_v7 = vperm.slane %v14898_v49, %v13733_v33  ;;  %v8348_v49 = vsel %vm3758_vm1, %v7628_v46, 0.0  ;;  %v9042_v46 = vperm.slane %v14887_v58, %v13733_v33  ;;  %v7382_v26 = vmax.f32 %v7126_v54, 0.0 }
 0xf79   : > { %8328 = vadd.xlane.f32.xlu1 %v8327_v35  ;;  %v7118_v35 = vsub.f32 1.0, %v6862_v4  ;;  %v7122_v4 = vsub.f32 1.0, %v6866_v12  ;;  %v16491_v12 = vld [vmem:[#allocation321_spill] sm:$0xff] }
 0xf7a   : > { %v9028_v34 = vsel %vm8691_vm5, %v9027_v7, %v9026_v5  ;;  %v7377_v7 = vmax.f32 %v7121_v6, 0.0 }
 0xf7b   : > { %v8206_v44 = vpop.xlane.xlu2 %8205  ;;  %v7374_v56 = vmax.f32 %v7118_v35, 0.0  ;;  %v9030_v23 = vsel %vm8695_vm6, %v9029_v47, %v9028_v34  ;;  %v7378_v35 = vmax.f32 %v7122_v4, 0.0 }
 0xf7c   : > { %v14915_v28 = vpop.xlane.xlu1 %8202  ;;  %v9035_v10 = vperm.slane %v8206_v44, %v16169_v19  ;;  %v9014_v44 = vperm.slane %v14800_v42, %v13724_v31  ;;  %v8345_v42 = vsel %vm3758_vm1, %v7627_v27, 0.0  ;;  %v9032_v16 = vsel %vm8699_vm7, %v9031_v62, %v9030_v23 }
 0xf7d   : > { %v9033_v15 = vperm.slane %v14915_v28, %v13736_v61  ;;  %v7630_v9 = vmul.f32 %v7374_v56, %v16488_v37  ;;  %v14983_v28 = vpop.xlane.xlu0 %8244  ;;  %v7633_v34 = vmul.f32 %v7377_v7, %v16491_v12  ;;  %v16492_v56 = vld [vmem:[#allocation146_spill] sm:$0xff] }
 0xf7e   : > { %v9037_v24 = vsel %vm8679_vm2, %v9036_v59, %v9035_v10  ;;  %v9015_v0 = vsel %vm8695_vm6, %v9014_v44, %v9013_v38  ;;  %v16489_v38 = vld [vmem:[#allocation153_spill] sm:$0xff]  ;;  %v6621_v47 = vsub.f32 %v16492_v56, %v10188_v8 }
 0xf7f   : > { %v9034_v10 = vsel %vm8703_vm8, %v9033_v15, %v9032_v16  ;;  %v8354_v59 = vsel %vm3758_vm1, %v7630_v9, 0.0  ;;  %v8363_v4 = vsel %vm3758_vm1, %v7633_v34, 0.0  ;;  %v16496_v9 = vld [vmem:[#allocation329_spill] sm:$0xff] }
 0xf80   : > { %8340 = vadd.xlane.f32.xlu2 %v8339_v41  ;;  %v9017_v41 = vsel %vm8699_vm7, %v9016_v32, %v9015_v0  ;;  %v6615_v32 = vsub.f32 %v16489_v38, %v10188_v8  ;;  %v9053_v0 = vperm.slane %v14936_v21, %v13739_v36  ;;  %v6877_v15 = vand.u32 2147483647, %v6621_v47 }
 0xf81   : > { %8337 = vadd.xlane.f32.xlu1 %v8336_v53  ;;  %v9019_v29 = vsel %vm8703_vm8, %v9018_v39, %v9017_v41 }
 0xf82   : > { %v9195_v27 = vsel %vm9178_vm13, %v9019_v29, %v14835_v51  ;;  %v16490_v51 = vld [vmem:[#allocation325_spill] sm:$0xff] }
 0xf83   : > { %v8215_v14 = vpop.xlane.xlu2 %8214  ;;  %v7634_v48 = vmul.f32 %v7378_v35, %v16490_v51  ;;  %v6872_v35 = vand.u32 2147483647, %v6616_v30  ;;  %v16500_v51 = vld [vmem:[#allocation212_spill] sm:$0xff] }
 0xf84   : > { %v8212_v25 = vpop.xlane.xlu1 %8211  ;;  %v9040_v45 = vperm.slane %v8215_v14, %v13727_v40 }
 0xf85   : > { %v9038_v60 = vperm.slane %v8212_v25, %v13739_v36  ;;  %v8357_v25 = vsel %vm3758_vm1, %v7631_v57, 0.0  ;;  %v15011_v6 = vpop.xlane.xlu0 %8253  ;;  %v8366_v41 = vsel %vm3758_vm1, %v7634_v48, 0.0  ;;  %v16494_v57 = vld [vmem:[#allocation166_spill] sm:$0xff] }
 0xf86   : > { %v9065_v63 = vperm.slane %v15011_v6, %v16169_v19 }
 0xf87   : > { %v9039_v3 = vsel %vm8683_vm3, %v9038_v60, %v9037_v24  ;;  %v9196_v60 = vsel %vm9180_vm14, %v9034_v10, %v9195_v27  ;;  %v7125_v24 = vsub.f32 1.0, %v6869_v43  ;;  %v9059_v10 = vperm.slane %v14983_v28, %v13724_v31  ;;  %v16498_v28 = vld [vmem:[#allocation332_spill] sm:$0xff] }
 0xf88   : > { %8349 = vadd.xlane.f32.xlu2 %v8348_v49  ;;  %v9041_v53 = vsel %vm8687_vm4, %v9040_v45, %v9039_v3  ;;  %v6871_v45 = vand.u32 2147483647, %v6615_v32  ;;  %v7128_v32 = vsub.f32 1.0, %v6872_v35 }
 0xf89   : > { %8346 = vadd.xlane.f32.xlu1 %v8345_v42  ;;  %v9043_v14 = vsel %vm8691_vm5, %v9042_v46, %v9041_v53  ;;  %v7381_v23 = vmax.f32 %v7125_v24, 0.0  ;;  %v16493_v53 = vld [vmem:[#allocation331_spill] sm:$0xff]  ;;  %v6623_v46 = vsub.f32 %v16494_v57, %v10188_v8 }
 0xf8a   : > { %v7127_v22 = vsub.f32 1.0, %v6871_v45 }
 0xf8b   : > { %v8224_v1 = vpop.xlane.xlu2 %8223  ;;  %v7637_v2 = vmul.f32 %v7381_v23, %v16496_v9 }
 0xf8c   : > { %v8221_v20 = vpop.xlane.xlu1 %8220  ;;  %v9046_v58 = vperm.slane %v8224_v1, %v13730_v11  ;;  %v7638_v1 = vmul.f32 %v7382_v26, %v16493_v53  ;;  %v7384_v26 = vmax.f32 %v7128_v32, 0.0 }
 0xf8d   : > { %v9044_v52 = vperm.slane %v8221_v20, %v13724_v31  ;;  %v7133_v20 = vsub.f32 1.0, %v6877_v15  ;;  %v8263_v29 = vpop.xlane.xlu0 %8262  ;;  %v8375_v43 = vsel %vm3758_vm1, %v7637_v2, 0.0 }
 0xf8e   : > { %v8378_v7 = vsel %vm3758_vm1, %v7638_v1, 0.0  ;;  %v16503_v1 = vld [vmem:[#allocation88_spill] sm:$0xff]  ;;  %v9070_v9 = vperm.slane %v8263_v29, %v13727_v40 }
 0xf8f   : > { %v9045_v50 = vsel %vm8695_vm6, %v9044_v52, %v9043_v14  ;;  %v6879_v14 = vand.u32 2147483647, %v6623_v46  ;;  %v16504_v46 = vld [vmem:[#allocation107_spill] sm:$0xff] }
 0xf90   : > { %v9047_v18 = vsel %vm8699_vm7, %v9046_v58, %v9045_v50  ;;  %8358 = vadd.xlane.f32.xlu2 %v8357_v25  ;;  %v7383_v58 = vmax.f32 %v7127_v22, 0.0  ;;  %v7389_v50 = vmax.f32 %v7133_v20, 0.0  ;;  %v6625_v22 = vsub.f32 %v16503_v1, %v10188_v8 }
 0xf91   : > { %v9049_v49 = vsel %vm8703_vm8, %v9048_v55, %v9047_v18  ;;  %8355 = vadd.xlane.f32.xlu1 %v8354_v59  ;;  %v16497_v18 = vld [vmem:[#allocation138_spill] sm:$0xff] }
 0xf92   : > { %v9197_v44 = vsel %vm9182_vm15, %v9049_v49, %v9196_v60  ;;  %v6611_v59 = vsub.f32 %v16497_v18, %v10188_v8  ;;  %v7135_v60 = vsub.f32 1.0, %v6879_v14  ;;  %v7639_v54 = vmul.f32 %v7383_v58, %v16498_v28 }
 0xf93   : > { %9211 = vst.msk [vmem:[%s14070_s21 + $0x10] sm:$0xff] %vm3758_vm1, %v9197_v44  ;;  %v8233_v5 = vpop.xlane.xlu2 %8232  ;;  %v16499_v44 = vld [vmem:[#allocation129_spill] sm:$0xff]  ;;  %v7645_v48 = vmul.f32 %v7389_v50, %v16500_v51 }
 0xf94   : > { %v9051_v3 = vperm.slane %v8233_v5, %v13713_v13  ;;  %v8230_v42 = vpop.xlane.xlu1 %8229  ;;  %v6624_v38 = vsub.f32 %v16499_v44, %v10188_v8  ;;  %v6867_v56 = vand.u32 2147483647, %v6611_v59  ;;  %v7391_v47 = vmax.f32 %v7135_v60, 0.0  ;;  %v16507_v59 = vld [vmem:[#allocation36_spill] sm:$0xff] }
 0xf95   : > { %v9050_v17 = vperm.slane %v8230_v42, %v16169_v19  ;;  %v8272_v24 = vpop.xlane.xlu0 %8271  ;;  %v8381_v42 = vsel %vm3758_vm1, %v7639_v54, 0.0  ;;  %v8399_v45 = vsel %vm3758_vm1, %v7645_v48, 0.0  ;;  %v6627_v60 = vsub.f32 %v16507_v59, %v10188_v8 }
 0xf96   : > { %v7123_v23 = vsub.f32 1.0, %v6867_v56  ;;  %v16508_v56 = vld [vmem:[#allocation26_spill] sm:$0xff] }
 0xf97   : > { %v9052_v62 = vsel %vm8679_vm2, %v9051_v3, %v9050_v17  ;;  %v6880_v17 = vand.u32 2147483647, %v6624_v38  ;;  %v9076_v38 = vperm.slane %v8272_v24, %v13730_v11  ;;  %v6883_v48 = vand.u32 2147483647, %v6627_v60 }
 0xf98   : > { %8367 = vadd.xlane.f32.xlu2 %v8366_v41  ;;  %v9054_v39 = vsel %vm8683_vm3, %v9053_v0, %v9052_v62  ;;  %v16501_v62 = vld [vmem:[#allocation177_spill] sm:$0xff]  ;;  %v7379_v2 = vmax.f32 %v7123_v23, 0.0 }
 0xf99   : > { %8364 = vadd.xlane.f32.xlu1 %v8363_v4  ;;  %v6619_v41 = vsub.f32 %v16501_v62, %v10188_v8  ;;  %v16502_v4 = vld [vmem:[#allocation170_spill] sm:$0xff]  ;;  %v7136_v53 = vsub.f32 1.0, %v6880_v17  ;;  %v7139_v17 = vsub.f32 1.0, %v6883_v48  ;;  %v16509_v62 = vld [vmem:[#allocation23_spill] sm:$0xff] }
 0xf9b   : > { %v8242_v21 = vpop.xlane.xlu2 %8241  ;;  %v6875_v20 = vand.u32 2147483647, %v6619_v41 }
 0xf9c   : > { %v8239_v37 = vpop.xlane.xlu1 %8238  ;;  %v9057_v52 = vperm.slane %v8242_v21, %v13733_v33  ;;  %v7640_v21 = vmul.f32 %v7384_v26, %v16504_v46 }
 0xf9d   : > { %v9055_v16 = vperm.slane %v8239_v37, %v13727_v40  ;;  %v8281_v6 = vpop.xlane.xlu0 %8280  ;;  %v7131_v35 = vsub.f32 1.0, %v6875_v20 }
 0xf9e   : > { %v8384_v14 = vsel %vm3758_vm1, %v7640_v21, 0.0  ;;  %v9081_v24 = vperm.slane %v8281_v6, %v13713_v13 }
 0xf9f   : > { %v9056_v55 = vsel %vm8687_vm4, %v9055_v16, %v9054_v39  ;;  %v7647_v39 = vmul.f32 %v7391_v47, %v16502_v4  ;;  %v7387_v44 = vmax.f32 %v7131_v35, 0.0 }
 0xfa0   : > { %v9058_v25 = vsel %vm8691_vm5, %v9057_v52, %v9056_v55  ;;  %8379 = vadd.xlane.f32.xlu2 %v8378_v7  ;;  %v7392_v7 = vmax.f32 %v7136_v53, 0.0  ;;  %v7395_v53 = vmax.f32 %v7139_v17, 0.0 }
 0xfa1   : > { %8376 = vadd.xlane.f32.xlu1 %v8375_v43  ;;  %v9060_v27 = vsel %vm8695_vm6, %v9059_v10, %v9058_v25  ;;  %v8405_v52 = vsel %vm3758_vm1, %v7647_v39, 0.0  ;;  %v6881_v10 = vand.u32 2147483647, %v6625_v22  ;;  %v16505_v25 = vld [vmem:[#allocation326_spill] sm:$0xff]  ;;  %v7643_v47 = vmul.f32 %v7387_v44, %v16508_v56 }
 0xfa2   : > { %v7635_v29 = vmul.f32 %v7379_v2, %v16505_v25  ;;  %v16506_v43 = vld [vmem:[#allocation178_spill] sm:$0xff] }
 0xfa3   : > { %v8251_v49 = vpop.xlane.xlu2 %8250  ;;  %v7137_v18 = vsub.f32 1.0, %v6881_v10  ;;  %v8393_v39 = vsel %vm3758_vm1, %v7643_v47, 0.0 }
 0xfa4   : > { %v8248_v5 = vpop.xlane.xlu1 %8247  ;;  %v9063_v34 = vperm.slane %v8251_v49, %v13736_v61 }
 0xfa5   : > { %v9061_v12 = vperm.slane %v8248_v5, %v13730_v11  ;;  %v8369_v5 = vsel %vm3758_vm1, %v7635_v29, 0.0  ;;  %v7393_v51 = vmax.f32 %v7137_v18, 0.0 }
 0xfa7   : > { %v9062_v3 = vsel %vm8699_vm7, %v9061_v12, %v9060_v27  ;;  %v7648_v27 = vmul.f32 %v7392_v7, %v16506_v43  ;;  %v7649_v41 = vmul.f32 %v7393_v51, %v16509_v62 }
 0xfa8   : > { %v9064_v0 = vsel %vm8703_vm8, %v9063_v34, %v9062_v3  ;;  %8382 = vadd.xlane.f32.xlu2 %v8381_v42  ;;  %v8290_v3 = vpop.xlane.xlu0 %8289 }
 0xfa9   : > { %8400 = vadd.xlane.f32.xlu1 %v8399_v45  ;;  %v8408_v34 = vsel %vm3758_vm1, %v7648_v27, 0.0  ;;  %v8411_v22 = vsel %vm3758_vm1, %v7649_v41, 0.0 }
 0xfab   : > { %v8260_v15 = vpop.xlane.xlu2 %8259 }
 0xfac   : > { %v8257_v57 = vpop.xlane.xlu1 %8256  ;;  %v9068_v37 = vperm.slane %v8260_v15, %v13739_v36 }
 0xfad   : > { %v9066_v30 = vperm.slane %v8257_v57, %v13713_v13  ;;  %v4801_v57 = vpop.f32.mrf.mxu3 }
 0xfaf   : > { %v9067_v16 = vsel %vm8679_vm2, %v9066_v30, %v9065_v63  ;;  %v7651_v30 = vmul.f32 %v7395_v53, %v4801_v57 }
 0xfb0   : > { %v9069_v58 = vsel %vm8683_vm3, %v9068_v37, %v9067_v16  ;;  %8406 = vadd.xlane.f32.xlu2 %v8405_v52  ;;  %v8299_v46 = vpop.xlane.xlu0 %8298 }
 0xfb1   : > { %8385 = vadd.xlane.f32.xlu1 %v8384_v14  ;;  %v9071_v55 = vsel %vm8687_vm4, %v9070_v9, %v9069_v58  ;;  %v9087_v9 = vperm.slane %v8290_v3, %v13733_v33 }
 0xfb3   : > { %v8269_v50 = vpop.xlane.xlu2 %8268 }
 0xfb4   : > { %v8266_v49 = vpop.xlane.xlu1 %8265  ;;  %v9074_v54 = vperm.slane %v8269_v50, %v13724_v31 }
 0xfb5   : > { %v9072_v28 = vperm.slane %v8266_v49, %v13733_v33 }
 0xfb7   : > { %v9073_v32 = vsel %vm8691_vm5, %v9072_v28, %v9071_v55  ;;  %v9093_v55 = vperm.slane %v8299_v46, %v13736_v61 }
 0xfb8   : > { %v9075_v12 = vsel %vm8695_vm6, %v9074_v54, %v9073_v32  ;;  %8370 = vadd.xlane.f32.xlu2 %v8369_v5  ;;  %v8308_v7 = vpop.xlane.xlu0 %8307 }
 0xfb9   : > { %8409 = vadd.xlane.f32.xlu1 %v8408_v34  ;;  %v9077_v8 = vsel %vm8699_vm7, %v9076_v38, %v9075_v12  ;;  %v9098_v49 = vperm.slane %v8308_v7, %v13739_v36 }
 0xfbb   : > { %v8278_v42 = vpop.xlane.xlu2 %8277 }
 0xfbc   : > { %v9080_v26 = vperm.slane %v8278_v42, %v16169_v19  ;;  %v8275_v45 = vpop.xlane.xlu1 %8274 }
 0xfbd   : > { %v9078_v23 = vperm.slane %v8275_v45, %v13736_v61 }
 0xfbe   : > { %v9082_v15 = vsel %vm8679_vm2, %v9081_v24, %v9080_v26 }
 0xfbf   : > { %v9079_v4 = vsel %vm8703_vm8, %v9078_v23, %v9077_v8 }
 0xfc0   : > { %v9198_v1 = vsel %vm9170_vm9, %v9079_v4, %v9064_v0  ;;  %8394 = vadd.xlane.f32.xlu2 %v8393_v39  ;;  %v8417_v0 = vsel %vm3758_vm1, %v7651_v30, 0.0  ;;  %v8317_v59 = vpop.xlane.xlu0 %8316 }
 0xfc1   : > { %8412 = vadd.xlane.f32.xlu1 %v8411_v22  ;;  %v9104_v51 = vperm.slane %v8317_v59, %v13724_v31 }
 0xfc3   : > { %v8287_v21 = vpop.xlane.xlu2 %8286 }
 0xfc4   : > { %v8284_v63 = vpop.xlane.xlu1 %8283  ;;  %v9085_v37 = vperm.slane %v8287_v21, %v13727_v40 }
 0xfc5   : > { %v9083_v20 = vperm.slane %v8284_v63, %v13739_v36 }
 0xfc7   : > { %v9084_v2 = vsel %vm8683_vm3, %v9083_v20, %v9082_v15 }
 0xfc8   : > { %v9086_v16 = vsel %vm8687_vm4, %v9085_v37, %v9084_v2  ;;  %v8326_v48 = vpop.xlane.xlu0 %8325 }
 0xfc9   : > { %8418 = vadd.xlane.f32.xlu1 %v8417_v0  ;;  %v9088_v52 = vsel %vm8691_vm5, %v9087_v9, %v9086_v16  ;;  %v9110_v23 = vperm.slane %v8326_v48, %v16169_v19 }
 0xfcb   : > { %v8296_v10 = vpop.xlane.xlu2 %8295 }
 0xfcc   : > { %v8293_v58 = vpop.xlane.xlu1 %8292  ;;  %v9091_v6 = vperm.slane %v8296_v10, %v13730_v11 }
 0xfcd   : > { %v9089_v14 = vperm.slane %v8293_v58, %v13724_v31 }
 0xfcf   : > { %v9090_v35 = vsel %vm8695_vm6, %v9089_v14, %v9088_v52 }
 0xfd0   : > { %v9092_v50 = vsel %vm8699_vm7, %v9091_v6, %v9090_v35  ;;  %v8335_v26 = vpop.xlane.xlu0 %8334 }
 0xfd1   : > { %v9094_v25 = vsel %vm8703_vm8, %v9093_v55, %v9092_v50  ;;  %v9115_v39 = vperm.slane %v8335_v26, %v13727_v40 }
 0xfd2   : > { %v9199_v29 = vsel %vm9172_vm10, %v9094_v25, %v9198_v1 }
 0xfd3   : > { %v8305_v43 = vpop.xlane.xlu2 %8304 }
 0xfd4   : > { %v9096_v27 = vperm.slane %v8305_v43, %v13713_v13  ;;  %v8302_v18 = vpop.xlane.xlu1 %8301 }
 0xfd5   : > { %v9095_v60 = vperm.slane %v8302_v18, %v16169_v19 }
 0xfd7   : > { %v9097_v28 = vsel %vm8679_vm2, %v9096_v27, %v9095_v60 }
 0xfd8   : > { %v9099_v54 = vsel %vm8683_vm3, %v9098_v49, %v9097_v28  ;;  %v8344_v22 = vpop.xlane.xlu0 %8343 }
 0xfd9   : > { %v9121_v16 = vperm.slane %v8344_v22, %v13730_v11 }
 0xfdb   : > { %v8314_v44 = vpop.xlane.xlu2 %8313 }
 0xfdc   : > { %v8311_v38 = vpop.xlane.xlu1 %8310  ;;  %v9102_v5 = vperm.slane %v8314_v44, %v13733_v33 }
 0xfdd   : > { %v9100_v32 = vperm.slane %v8311_v38, %v13727_v40 }
 0xfdf   : > { %v9101_v12 = vsel %vm8687_vm4, %v9100_v32, %v9099_v54 }
 0xfe0   : > { %v9103_v34 = vsel %vm8691_vm5, %v9102_v5, %v9101_v12  ;;  %v8353_v20 = vpop.xlane.xlu0 %8352 }
 0xfe1   : > { %v9105_v8 = vsel %vm8695_vm6, %v9104_v51, %v9103_v34  ;;  %v9126_v48 = vperm.slane %v8353_v20, %v13713_v13 }
 0xfe3   : > { %v8323_v56 = vpop.xlane.xlu2 %8322 }
 0xfe4   : > { %v8320_v47 = vpop.xlane.xlu1 %8319  ;;  %v9108_v42 = vperm.slane %v8323_v56, %v13736_v61 }
 0xfe5   : > { %v9106_v3 = vperm.slane %v8320_v47, %v13730_v11 }
 0xfe7   : > { %v9107_v24 = vsel %vm8699_vm7, %v9106_v3, %v9105_v8 }
 0xfe8   : > { %v9109_v17 = vsel %vm8703_vm8, %v9108_v42, %v9107_v24  ;;  %v8362_v14 = vpop.xlane.xlu0 %8361 }
 0xfe9   : > { %v9200_v45 = vsel %vm9174_vm11, %v9109_v17, %v9199_v29 }
 0xfeb   : > { %v8332_v62 = vpop.xlane.xlu2 %8331 }
 0xfec   : > { %v8329_v41 = vpop.xlane.xlu1 %8328  ;;  %v9113_v4 = vperm.slane %v8332_v62, %v13739_v36 }
 0xfed   : > { %v9111_v15 = vperm.slane %v8329_v41, %v13713_v13 }
 0xfef   : > { %v9112_v53 = vsel %vm8679_vm2, %v9111_v15, %v9110_v23  ;;  %v9132_v15 = vperm.slane %v8362_v14, %v13733_v33 }
 0xff0   : > { %v9114_v1 = vsel %vm8683_vm3, %v9113_v4, %v9112_v53  ;;  %v8374_v35 = vpop.xlane.xlu0 %8373 }
 0xff1   : > { %v9116_v57 = vsel %vm8687_vm4, %v9115_v39, %v9114_v1  ;;  %v9140_v12 = vperm.slane %v8374_v35, %v16169_v19 }
 0xff3   : > { %v8341_v46 = vpop.xlane.xlu2 %8340 }
 0xff4   : > { %v8338_v21 = vpop.xlane.xlu1 %8337  ;;  %v9119_v37 = vperm.slane %v8341_v46, %v13724_v31 }
 0xff5   : > { %v9117_v63 = vperm.slane %v8338_v21, %v13733_v33 }
 0xff7   : > { %v9118_v30 = vsel %vm8691_vm5, %v9117_v63, %v9116_v57 }
 0xff8   : > { %v9120_v9 = vsel %vm8695_vm6, %v9119_v37, %v9118_v30  ;;  %v8398_v29 = vpop.xlane.xlu0 %8397 }
 0xff9   : > { %v9122_v7 = vsel %vm8699_vm7, %v9121_v16, %v9120_v9 }
 0xffb   : > { %v8350_v2 = vpop.xlane.xlu2 %8349 }
 0xffc   : > { %v8347_v0 = vpop.xlane.xlu1 %8346  ;;  %v9125_v44 = vperm.slane %v8350_v2, %v16169_v19 }
 0xffd   : > { %v9123_v52 = vperm.slane %v8347_v0, %v13736_v61 }
 0xffe   : > { %v9127_v8 = vsel %vm8679_vm2, %v9126_v48, %v9125_v44 }
 0xfff   : > { %v9124_v10 = vsel %vm8703_vm8, %v9123_v52, %v9122_v7 }
0x1000   : > { %v15131_v58 = vsel %vm9176_vm12, %v9124_v10, %v9200_v45  ;;  %v8404_v18 = vpop.xlane.xlu0 %8403  ;;  %v9155_v45 = vperm.slane %v8398_v29, %v16169_v19 }
0x1001   : > { %v9158_v19 = vperm.slane %v8404_v18, %v13739_v36 }
0x1003   : > { %v8359_v6 = vpop.xlane.xlu2 %8358 }
0x1004   : > { %v8356_v55 = vpop.xlane.xlu1 %8355  ;;  %v9130_v42 = vperm.slane %v8359_v6, %v13727_v40 }
0x1005   : > { %v9128_v32 = vperm.slane %v8356_v55, %v13739_v36 }
0x1007   : > { %v9129_v56 = vsel %vm8683_vm3, %v9128_v32, %v9127_v8 }
0x1008   : > { %v8389_v54 = vpop.xlane.xlu0 %8388  ;;  %v9131_v62 = vsel %vm8687_vm4, %v9130_v42, %v9129_v56 }
0x1009   : > { %v9149_v57 = vperm.slane %v8389_v54, %v13724_v31  ;;  %v9133_v46 = vsel %vm8691_vm5, %v9132_v15, %v9131_v62 }
0x100b   : > { %v8368_v50 = vpop.xlane.xlu2 %8367 }
0x100c   : > { %v8365_v25 = vpop.xlane.xlu1 %8364 }
0x100d   : > { %v9134_v41 = vperm.slane %v8365_v25, %v13724_v31 }
0x100f   : > { %v9135_v63 = vsel %vm8695_vm6, %v9134_v41, %v9133_v46 }
0x1010   : > { %v8392_v34 = vpop.xlane.xlu0 %8391 }
0x1013   : > { %v8380_v43 = vpop.xlane.xlu2 %8379 }
0x1014   : > { %v8377_v27 = vpop.xlane.xlu1 %8376  ;;  %v9143_v24 = vperm.slane %v8380_v43, %v13739_v36 }
0x1015   : > { %v9141_v5 = vperm.slane %v8377_v27, %v13713_v13 }
0x1017   : > { %v9142_v47 = vsel %vm8679_vm2, %v9141_v5, %v9140_v12 }
0x1018   : > { %v9144_v23 = vsel %vm8683_vm3, %v9143_v24, %v9142_v47  ;;  %v8416_v2 = vpop.xlane.xlu0 %8415 }
0x1019   : > { %v9166_v14 = vperm.slane %v8416_v2, %v13730_v11 }
0x101b   : > { %v8383_v59 = vpop.xlane.xlu2 %8382 }
0x101c   : > { %v8401_v60 = vpop.xlane.xlu1 %8400  ;;  %v9145_v3 = vperm.slane %v8383_v59, %v13727_v40 }
0x101d   : > { %v9156_v17 = vperm.slane %v8401_v60, %v13713_v13 }
0x101e   : > { %v9146_v4 = vsel %vm8687_vm4, %v9145_v3, %v9144_v23 }
0x101f   : > { %v9157_v53 = vsel %vm8679_vm2, %v9156_v17, %v9155_v45 }
0x1020   : > { %v9159_v37 = vsel %vm8683_vm3, %v9158_v19, %v9157_v53 }
0x1023   : > { %v8407_v49 = vpop.xlane.xlu2 %8406 }
0x1024   : > { %v8386_v28 = vpop.xlane.xlu1 %8385  ;;  %v9160_v13 = vperm.slane %v8407_v49, %v13727_v40  ;;  %v9136_v40 = vperm.slane %v8368_v50, %v13730_v11 }
0x1025   : > { %v9147_v26 = vperm.slane %v8386_v28, %v13733_v33 }
0x1026   : > { %v9161_v16 = vsel %vm8687_vm4, %v9160_v13, %v9159_v37 }
0x1027   : > { %v9148_v1 = vsel %vm8691_vm5, %v9147_v26, %v9146_v4 }
0x1028   : > { %v9150_v9 = vsel %vm8695_vm6, %v9149_v57, %v9148_v1 }
0x102b   : > { %v8371_v38 = vpop.xlane.xlu2 %8370 }
0x102c   : > { %v8410_v51 = vpop.xlane.xlu1 %8409  ;;  %v9138_v30 = vperm.slane %v8371_v38, %v13736_v61 }
0x102d   : > { %v9162_v21 = vperm.slane %v8410_v51, %v13733_v33  ;;  %v9151_v33 = vperm.slane %v8392_v34, %v13730_v11 }
0x102f   : > { %v9163_v0 = vsel %vm8691_vm5, %v9162_v21, %v9161_v16  ;;  %v9152_v7 = vsel %vm8699_vm7, %v9151_v33, %v9150_v9 }
0x1033   : > { %v8395_v22 = vpop.xlane.xlu2 %8394 }
0x1034   : > { %v8413_v39 = vpop.xlane.xlu1 %8412  ;;  %v9153_v36 = vperm.slane %v8395_v22, %v13736_v61 }
0x1035   : > { %v9164_v20 = vperm.slane %v8413_v39, %v13724_v31  ;;  %v9137_v31 = vsel %vm8699_vm7, %v9136_v40, %v9135_v63 }
0x1036   : > { %v9139_v52 = vsel %vm8703_vm8, %v9138_v30, %v9137_v31  ;;  %v9154_v6 = vsel %vm8703_vm8, %v9153_v36, %v9152_v7 }
0x1037   : > { %v9165_v10 = vsel %vm8695_vm6, %v9164_v20, %v9163_v0  ;;  %v9202_v50 = vsel %vm9178_vm13, %v9139_v52, %v15131_v58 }
0x1038   : > { %v9167_v25 = vsel %vm8699_vm7, %v9166_v14, %v9165_v10  ;;  %v9203_v29 = vsel %vm9180_vm14, %v9154_v6, %v9202_v50 }
0x103c   : > { %v8419_v55 = vpop.xlane.xlu1 %8418 }
0x103d   : > { %v9168_v35 = vperm.slane %v8419_v55, %v13736_v61 }
0x103f   : > { %v9169_v43 = vsel %vm8703_vm8, %v9168_v35, %v9167_v25 }
0x1040   : > { %v9204_v27 = vsel %vm9182_vm15, %v9169_v43, %v9203_v29 }
0x1041   : > { %9212 = vst.msk [vmem:[%s14070_s21 + $0x18] sm:$0xff] %vm3758_vm1, %v9204_v27 }
0x1042   : > { %10031 = shalt.err (!%p10028_p7)
}
0x1043   : > { %s10081_s6 = smov 128   ;;  %s10082_s7 = smov 8  }
0x1044   : > { %9482 = dma.vmem_to_hbm [thread:$0]  (%p10136_p5), %s9227_s13, 512, %s9229_s25, %s9214_s26, %s10081_s6, %s10081_s6, %s10082_s7  }
0x1045 PF: > { %p9499_p8 = scmp.ge.s32.totalorder %s10074_s12, 2  ;;  %s9243_s8 = sand.u32 1, %s10062_s9  }
0x1046   : > { %s9244_s14 = scalar_lea.sflag [#allocation4], %s9243_s8 }
0x1047   : > { %p9492_p9 = pnand %p9499_p8, %p10140_p6 }
0x1049   : > { %p9493_p10 = pneg %p9492_p9 }
0x104b   : > { %10057 = dma.done.wait (%p9493_p10), %s9244_s14, 512  }
0x104c   : > { %10059 = vsyncadd (%p9493_p10), %s9244_s14, 4294966784  ;;  %p14_p11 = scmp.ge.s32.totalorder %s10123_s15, 4   ;;  %s16510_s9 = smov %s10066_s10 }
0x104d   : > { %s16511_s10 = smov %s10070_s11  ;;  %s16512_s11 = smov %s10134_s18 }
0x104e   : > { %s16513_s12 = smov %s10123_s15  ;;  %16 = sbr.rel (!%p14_p11) target bundleno = 5 (0x5), region = 70 }
0x1053   :  { %9250 = vsyncpa [#allocation3], 1 }
0x1054   :  { %9252 = vsyncpa [#allocation3 + $0x1], 1 }
0x1055   :  { %9253 = vsyncpa [#allocation4], 1 }
0x1056   :  { %9255 = vsyncpa [#allocation4 + $0x1], 1 }
0x1057   :  { %9256 = vsyncpa [#allocation5], 1 }
0x1058   :  { %9258 = vsyncpa [#allocation5 + $0x1], 1 }

</bundles_post_ra>
